<compile_context>
chip_gen: v7x
topology: tpu7x:2x2x1
jax: 0.10.0
libtpu: 0.0.40
codegen_flags: <defaults>
</compile_context>

<pallas_src>
import jax
import jax.numpy as jnp
from jax.experimental import pallas as pl
from jax.experimental.pallas import tpu as pltpu


_VMEM_LIMIT = 32 * 1024 * 1024  # well under v7x's 64 MiB physical VMEM; fine on v5e/v6e


def _pick_row_tile(m, target=256):
    """Largest row tile <= target that divides m and is sublane-friendly (multiple of 8)."""
    if m <= target:
        return m
    for t in range(target, 0, -1):
        if m % t == 0 and t % 8 == 0:
            return t
    return m


# ----------------------------------------------------------------------------
# Pallas kernels
# ----------------------------------------------------------------------------
def _conv_bn_relu_pool_kernel(x00_ref, x01_ref, x10_ref, x11_ref,
                              w_ref, scale_ref, shift_ref, o_ref):
    """Fused conv (im2col matmul, bf16 MXU) + BN affine + 2x2 max-pool + ReLU.

    Each x??_ref holds the im2col rows of one pool-tap parity. The four conv results
    share one weight tile, get the folded BN affine applied per tap (scale can be
    negative, so affine BEFORE max), are maxed (= the 2x2 pool), ReLU'd (monotone, so
    it commutes with max), and only the pooled tile is written back in f32.
    """
    w = w_ref[...]
    scale = scale_ref[...]
    shift = shift_ref[...]

    def tap(x_ref):
        acc = jnp.dot(x_ref[...], w, preferred_element_type=jnp.float32)
        return acc * scale + shift

    z = jnp.maximum(jnp.maximum(tap(x00_ref), tap(x01_ref)),
                    jnp.maximum(tap(x10_ref), tap(x11_ref)))
    o_ref[...] = jnp.maximum(z, 0.0)


def _mlp_kernel(x_ref, w1_ref, b1_ref, w2_ref, b2_ref, o_ref):
    """Fused classifier: fc1 + ReLU (+ eval-mode Dropout = identity) + fc2."""
    h = jnp.dot(x_ref[...], w1_ref[...], preferred_element_type=jnp.float32)
    h = jnp.maximum(h + b1_ref[...], 0.0)
    # TODO(synk): nn.Dropout() is identity in eval mode; training-mode random masking not implemented.
    o_ref[...] = jnp.dot(h.astype(jnp.bfloat16), w2_ref[...],
                         preferred_element_type=jnp.float32) + b2_ref[...]


# ----------------------------------------------------------------------------
# Pallas wrappers
# ----------------------------------------------------------------------------
def conv_bn_relu_pool(x_nhwc, w, b, gamma, beta, mean, var, eps=1e-5):
    """Conv2d(kxk, stride 1, pad k//2) + BatchNorm(eval) + ReLU + MaxPool 2x2 (stride 2).

    x_nhwc: (B, H, W, Cin) f32.  w: PyTorch layout (Cout, Cin, KH, KW).
    Returns (B, H//2, W//2, Cout) f32.  (H, W stay even -> ceil_mode is a no-op.)
    """
    B, H, W, Cin = x_nhwc.shape
    Cout, _, KH, KW = w.shape
    pad = KH // 2
    Ho, Wo = H // 2, W // 2
    K = KH * KW * Cin
    M = B * Ho * Wo

    # bf16 activations for the MXU; spatial zero-pad for the "same" convolution.
    xp = jnp.pad(x_nhwc.astype(jnp.bfloat16),
                 ((0, 0), (pad, pad), (pad, pad), (0, 0)))

    def parity_slab(p, q):
        # im2col rows for pooled output (b, i, j) covering conv position (2i+p, 2j+q);
        # patch feature order is (kh, kw, cin), matching wcol below.
        taps = [xp[:, p + di: p + di + H: 2, q + dj: q + dj + W: 2, :]
                for di in range(KH) for dj in range(KW)]
        return jnp.concatenate(taps, axis=-1).reshape(M, K)

    slabs = [parity_slab(p, q) for p in (0, 1) for q in (0, 1)]

    wcol = jnp.transpose(w, (2, 3, 1, 0)).reshape(K, Cout).astype(jnp.bfloat16)

    # fold conv bias + BatchNorm (eval) into a per-channel affine (kept in f32)
    scale = (gamma / jnp.sqrt(var + eps)).astype(jnp.float32)
    shift = (beta + (b - mean) * scale).astype(jnp.float32)
    scale2 = scale.reshape(1, Cout)
    shift2 = shift.reshape(1, Cout)

    tm = _pick_row_tile(M)          # <=256 rows: modest VMEM even on v7x, MXU-friendly
    grid = (M // tm,)

    row_spec = pl.BlockSpec((tm, K), lambda i: (i, 0))
    def full(shape):
        return pl.BlockSpec(shape, lambda i: (0, 0))

    out = pl.pallas_call(
        _conv_bn_relu_pool_kernel,
        grid=grid,
        in_specs=[row_spec, row_spec, row_spec, row_spec,
                  full((K, Cout)), full((1, Cout)), full((1, Cout))],
        out_specs=pl.BlockSpec((tm, Cout), lambda i: (i, 0)),
        out_shape=jax.ShapeDtypeStruct((M, Cout), jnp.float32),
        compiler_params=pltpu.CompilerParams(
            dimension_semantics=("parallel",),   # shards row tiles across v7x's 2 TCs
            vmem_limit_bytes=_VMEM_LIMIT,
        ),
    )(*slabs, wcol, scale2, shift2)
    return out.reshape(B, Ho, Wo, Cout)


def classifier(x_flat, w1_hwc, b1, w2, b2):
    """Fused fc1 + ReLU + fc2 in a single pallas_call.

    x_flat: (B, K1) f32 with features in (h, w, c) order.
    w1_hwc: (N1, K1) with columns already permuted to (h, w, c) order.
    w2:     (N2, N1).
    """
    B, K1 = x_flat.shape
    N1 = w1_hwc.shape[0]
    N2 = w2.shape[0]

    xb = x_flat.astype(jnp.bfloat16)
    w1t = jnp.transpose(w1_hwc).astype(jnp.bfloat16)   # (K1, N1)
    w2t = jnp.transpose(w2).astype(jnp.bfloat16)       # (N1, N2)
    b1r = b1.reshape(1, N1).astype(jnp.float32)
    b2r = b2.reshape(1, N2).astype(jnp.float32)

    tm = _pick_row_tile(B)   # B=2 today -> single step; multiples of 8/256 at larger batch
    grid = (B // tm,)

    out = pl.pallas_call(
        _mlp_kernel,
        grid=grid,
        in_specs=[
            pl.BlockSpec((tm, K1), lambda i: (i, 0)),
            pl.BlockSpec((K1, N1), lambda i: (0, 0)),
            pl.BlockSpec((1, N1), lambda i: (0, 0)),
            pl.BlockSpec((N1, N2), lambda i: (0, 0)),
            pl.BlockSpec((1, N2), lambda i: (0, 0)),
        ],
        out_specs=pl.BlockSpec((tm, N2), lambda i: (i, 0)),
        out_shape=jax.ShapeDtypeStruct((B, N2), jnp.float32),
        compiler_params=pltpu.CompilerParams(
            dimension_semantics=("parallel",),
            vmem_limit_bytes=_VMEM_LIMIT,
        ),
    )(xb, w1t, b1r, w2t, b2r)
    return out


# ----------------------------------------------------------------------------
# Parameter init (deterministic, synthetic; PyTorch layouts)
# ----------------------------------------------------------------------------
def init_params(key):
    ks = list(jax.random.split(key, 22))
    it = iter(ks)

    def conv_block(cin, cout, ksz=5):
        w = jax.random.normal(next(it), (cout, cin, ksz, ksz), jnp.float32) * 0.05
        b = jax.random.normal(next(it), (cout,), jnp.float32) * 0.05
        gamma = 1.0 + 0.1 * jax.random.normal(next(it), (cout,), jnp.float32)
        beta = 0.1 * jax.random.normal(next(it), (cout,), jnp.float32)
        mean = 0.1 * jax.random.normal(next(it), (cout,), jnp.float32)
        var = jax.random.uniform(next(it), (cout,), jnp.float32, minval=0.5, maxval=1.5)
        return (w, b, gamma, beta, mean, var)

    p = {}
    p["block1"] = conv_block(3, 32)
    p["block2"] = conv_block(32, 64)
    p["block3"] = conv_block(64, 64)
    p["fc1"] = (jax.random.normal(next(it), (1000, 64 * 4 * 4), jnp.float32) * 0.02,
                jax.random.normal(next(it), (1000,), jnp.float32) * 0.02)
    p["fc2"] = (jax.random.normal(next(it), (4, 1000), jnp.float32) * 0.02,
                jax.random.normal(next(it), (4,), jnp.float32) * 0.02)
    return p


# ----------------------------------------------------------------------------
# Full forward pass (matches ConvNet.forward, eval mode)
# ----------------------------------------------------------------------------
def convnet_forward(x_nchw, params):
    # NCHW (PyTorch) -> NHWC (TPU-friendly: channels on lanes)
    x = jnp.transpose(x_nchw, (0, 2, 3, 1)).astype(jnp.float32)

    x = conv_bn_relu_pool(x, *params["block1"])   # (B, 16, 16, 32)
    x = conv_bn_relu_pool(x, *params["block2"])   # (B,  8,  8, 64)
    x = conv_bn_relu_pool(x, *params["block3"])   # (B,  4,  4, 64)  ceil_mode no-op (even dims)

    B, Hh, Ww, C = x.shape
    x_flat = x.reshape(B, Hh * Ww * C)            # feature order (h, w, c)

    # Fold PyTorch's `output.view(bsize, -1)` on NCHW (feature order (c, h, w)) into a
    # column permutation of fc1's weight, instead of transposing the activation at runtime.
    w1, b1 = params["fc1"]
    w2, b2 = params["fc2"]
    N1 = w1.shape[0]
    w1_hwc = jnp.transpose(w1.reshape(N1, C, Hh, Ww), (0, 2, 3, 1)).reshape(N1, Hh * Ww * C)

    return classifier(x_flat, w1_hwc, b1, w2, b2)


if __name__ == "__main__":
    key = jax.random.PRNGKey(0)
    k_in, k_par = jax.random.split(key)

    # spatial size 32 is implied by the classifier (64 * 4 * 4 after three /2 pools)
    x = jax.random.normal(k_in, (2, 3, 32, 32), jnp.float32)   # NCHW like PyTorch
    params = init_params(k_par)

    fwd = jax.jit(convnet_forward)
    out = fwd(x, params)
    jax.block_until_ready(out)

    assert out.shape == (2, 4), out.shape
    assert out.dtype == jnp.float32
    assert bool(jnp.all(jnp.isfinite(out)))
    print("KERNEL_OK")
</pallas_src>

<mosaic_0001>
module attributes {stable_mosaic.version = 11 : i64} {
  func.func @_conv_bn_relu_pool_kernel(%arg0: i32, %arg1: memref<256x75xbf16, #tpu.memory_space<vmem>>, %arg2: memref<256x75xbf16, #tpu.memory_space<vmem>>, %arg3: memref<256x75xbf16, #tpu.memory_space<vmem>>, %arg4: memref<256x75xbf16, #tpu.memory_space<vmem>>, %arg5: memref<75x32xbf16, #tpu.memory_space<vmem>>, %arg6: memref<1x32xf32, #tpu.memory_space<vmem>>, %arg7: memref<1x32xf32, #tpu.memory_space<vmem>>, %arg8: memref<256x32xf32, #tpu.memory_space<vmem>>) attributes {dimension_semantics = [#tpu.dimension_semantics<parallel>], iteration_bounds = array<i64: 2>, scalar_prefetch = 0 : i64, scratch_operands = 0 : i64, tpu.core_type = #tpu.core_type<tc>, window_params = [{transform_indices = @transform_0, window_bounds = array<i64: 256, 75>}, {transform_indices = @transform_1, window_bounds = array<i64: 256, 75>}, {transform_indices = @transform_2, window_bounds = array<i64: 256, 75>}, {transform_indices = @transform_3, window_bounds = array<i64: 256, 75>}, {pipeline_mode = #tpu.pipeline_mode<synchronous>, transform_indices = @transform_4, window_bounds = array<i64: 75, 32>}, {pipeline_mode = #tpu.pipeline_mode<synchronous>, transform_indices = @transform_5, window_bounds = array<i64: 1, 32>}, {pipeline_mode = #tpu.pipeline_mode<synchronous>, transform_indices = @transform_6, window_bounds = array<i64: 1, 32>}, {transform_indices = @transform_7, window_bounds = array<i64: 256, 32>}]} {
    %c0 = arith.constant 0 : index
    %c0_0 = arith.constant 0 : index
    %0 = vector.load %arg5[%c0, %c0_0] : memref<75x32xbf16, #tpu.memory_space<vmem>>, vector<75x32xbf16>
    %c0_1 = arith.constant 0 : index
    %c0_2 = arith.constant 0 : index
    %1 = vector.load %arg6[%c0_1, %c0_2] : memref<1x32xf32, #tpu.memory_space<vmem>>, vector<1x32xf32>
    %c0_3 = arith.constant 0 : index
    %c0_4 = arith.constant 0 : index
    %2 = vector.load %arg7[%c0_3, %c0_4] : memref<1x32xf32, #tpu.memory_space<vmem>>, vector<1x32xf32>
    %c0_5 = arith.constant 0 : index
    %c0_6 = arith.constant 0 : index
    %3 = vector.load %arg1[%c0_5, %c0_6] : memref<256x75xbf16, #tpu.memory_space<vmem>>, vector<256x75xbf16>
    %cst = arith.constant dense<0.000000e+00> : vector<256x32xf32>
    %4 = tpu.matmul %3, %0, %cst {dimension_numbers = #tpu.dot_dimension_numbers<[1], [0], [0], [1], [0, 0, 1, 1], [], []>} : vector<256x75xbf16>, vector<75x32xbf16>, vector<256x32xf32> -> vector<256x32xf32>
    %5 = vector.broadcast %1 : vector<1x32xf32> to vector<256x32xf32>
    %6 = arith.mulf %4, %5 : vector<256x32xf32>
    %7 = vector.broadcast %2 : vector<1x32xf32> to vector<256x32xf32>
    %8 = arith.addf %6, %7 : vector<256x32xf32>
    %c0_7 = arith.constant 0 : index
    %c0_8 = arith.constant 0 : index
    %9 = vector.load %arg2[%c0_7, %c0_8] : memref<256x75xbf16, #tpu.memory_space<vmem>>, vector<256x75xbf16>
    %cst_9 = arith.constant dense<0.000000e+00> : vector<256x32xf32>
    %10 = tpu.matmul %9, %0, %cst_9 {dimension_numbers = #tpu.dot_dimension_numbers<[1], [0], [0], [1], [0, 0, 1, 1], [], []>} : vector<256x75xbf16>, vector<75x32xbf16>, vector<256x32xf32> -> vector<256x32xf32>
    %11 = vector.broadcast %1 : vector<1x32xf32> to vector<256x32xf32>
    %12 = arith.mulf %10, %11 : vector<256x32xf32>
    %13 = vector.broadcast %2 : vector<1x32xf32> to vector<256x32xf32>
    %14 = arith.addf %12, %13 : vector<256x32xf32>
    %15 = arith.maximumf %8, %14 : vector<256x32xf32>
    %c0_10 = arith.constant 0 : index
    %c0_11 = arith.constant 0 : index
    %16 = vector.load %arg3[%c0_10, %c0_11] : memref<256x75xbf16, #tpu.memory_space<vmem>>, vector<256x75xbf16>
    %cst_12 = arith.constant dense<0.000000e+00> : vector<256x32xf32>
    %17 = tpu.matmul %16, %0, %cst_12 {dimension_numbers = #tpu.dot_dimension_numbers<[1], [0], [0], [1], [0, 0, 1, 1], [], []>} : vector<256x75xbf16>, vector<75x32xbf16>, vector<256x32xf32> -> vector<256x32xf32>
    %18 = vector.broadcast %1 : vector<1x32xf32> to vector<256x32xf32>
    %19 = arith.mulf %17, %18 : vector<256x32xf32>
    %20 = vector.broadcast %2 : vector<1x32xf32> to vector<256x32xf32>
    %21 = arith.addf %19, %20 : vector<256x32xf32>
    %c0_13 = arith.constant 0 : index
    %c0_14 = arith.constant 0 : index
    %22 = vector.load %arg4[%c0_13, %c0_14] : memref<256x75xbf16, #tpu.memory_space<vmem>>, vector<256x75xbf16>
    %cst_15 = arith.constant dense<0.000000e+00> : vector<256x32xf32>
    %23 = tpu.matmul %22, %0, %cst_15 {dimension_numbers = #tpu.dot_dimension_numbers<[1], [0], [0], [1], [0, 0, 1, 1], [], []>} : vector<256x75xbf16>, vector<75x32xbf16>, vector<256x32xf32> -> vector<256x32xf32>
    %24 = vector.broadcast %1 : vector<1x32xf32> to vector<256x32xf32>
    %25 = arith.mulf %23, %24 : vector<256x32xf32>
    %26 = vector.broadcast %2 : vector<1x32xf32> to vector<256x32xf32>
    %27 = arith.addf %25, %26 : vector<256x32xf32>
    %28 = arith.maximumf %21, %27 : vector<256x32xf32>
    %29 = arith.maximumf %15, %28 : vector<256x32xf32>
    %cst_16 = arith.constant 0.000000e+00 : f32
    %30 = vector.broadcast %cst_16 : f32 to vector<256x32xf32>
    %31 = arith.maximumf %29, %30 : vector<256x32xf32>
    %c0_17 = arith.constant 0 : index
    %c0_18 = arith.constant 0 : index
    %32 = vector.load %arg8[%c0_17, %c0_18] : memref<256x32xf32, #tpu.memory_space<vmem>>, vector<256x32xf32>
    tpu.vector_store %arg8[%c0_17, %c0_18], %31 {strides = array<i32>} : memref<256x32xf32, #tpu.memory_space<vmem>>, vector<256x32xf32>,
    return
  }
  func.func @transform_0(%arg0: i32) -> (i32, i32) {
    %c0_i32 = arith.constant 0 : i32
    %c0_i32_0 = arith.constant 0 : i32
    return %arg0, %c0_i32 : i32, i32
  }
  func.func @transform_1(%arg0: i32) -> (i32, i32) {
    %c0_i32 = arith.constant 0 : i32
    %c0_i32_0 = arith.constant 0 : i32
    return %arg0, %c0_i32 : i32, i32
  }
  func.func @transform_2(%arg0: i32) -> (i32, i32) {
    %c0_i32 = arith.constant 0 : i32
    %c0_i32_0 = arith.constant 0 : i32
    return %arg0, %c0_i32 : i32, i32
  }
  func.func @transform_3(%arg0: i32) -> (i32, i32) {
    %c0_i32 = arith.constant 0 : i32
    %c0_i32_0 = arith.constant 0 : i32
    return %arg0, %c0_i32 : i32, i32
  }
  func.func @transform_4(%arg0: i32) -> (i32, i32) {
    %c0_i32 = arith.constant 0 : i32
    %c0_i32_0 = arith.constant 0 : i32
    %c0_i32_1 = arith.constant 0 : i32
    return %c0_i32, %c0_i32_0 : i32, i32
  }
  func.func @transform_5(%arg0: i32) -> (i32, i32) {
    %c0_i32 = arith.constant 0 : i32
    %c0_i32_0 = arith.constant 0 : i32
    %c0_i32_1 = arith.constant 0 : i32
    return %c0_i32, %c0_i32_0 : i32, i32
  }
  func.func @transform_6(%arg0: i32) -> (i32, i32) {
    %c0_i32 = arith.constant 0 : i32
    %c0_i32_0 = arith.constant 0 : i32
    %c0_i32_1 = arith.constant 0 : i32
    return %c0_i32, %c0_i32_0 : i32, i32
  }
  func.func @transform_7(%arg0: i32) -> (i32, i32) {
    %c0_i32 = arith.constant 0 : i32
    %c0_i32_0 = arith.constant 0 : i32
    return %arg0, %c0_i32 : i32, i32
  }
}

module attributes {stable_mosaic.version = 11 : i64} {
  func.func @_conv_bn_relu_pool_kernel(%arg0: i32, %arg1: memref<128x800xbf16, #tpu.memory_space<vmem>>, %arg2: memref<128x800xbf16, #tpu.memory_space<vmem>>, %arg3: memref<128x800xbf16, #tpu.memory_space<vmem>>, %arg4: memref<128x800xbf16, #tpu.memory_space<vmem>>, %arg5: memref<800x64xbf16, #tpu.memory_space<vmem>>, %arg6: memref<1x64xf32, #tpu.memory_space<vmem>>, %arg7: memref<1x64xf32, #tpu.memory_space<vmem>>, %arg8: memref<128x64xf32, #tpu.memory_space<vmem>>) attributes {dimension_semantics = [#tpu.dimension_semantics<parallel>], iteration_bounds = array<i64: 1>, scalar_prefetch = 0 : i64, scratch_operands = 0 : i64, tpu.core_type = #tpu.core_type<tc>, window_params = [{transform_indices = @transform_0, window_bounds = array<i64: 128, 800>}, {transform_indices = @transform_1, window_bounds = array<i64: 128, 800>}, {transform_indices = @transform_2, window_bounds = array<i64: 128, 800>}, {transform_indices = @transform_3, window_bounds = array<i64: 128, 800>}, {pipeline_mode = #tpu.pipeline_mode<synchronous>, transform_indices = @transform_4, window_bounds = array<i64: 800, 64>}, {pipeline_mode = #tpu.pipeline_mode<synchronous>, transform_indices = @transform_5, window_bounds = array<i64: 1, 64>}, {pipeline_mode = #tpu.pipeline_mode<synchronous>, transform_indices = @transform_6, window_bounds = array<i64: 1, 64>}, {transform_indices = @transform_7, window_bounds = array<i64: 128, 64>}]} {
    %c0 = arith.constant 0 : index
    %c0_0 = arith.constant 0 : index
    %0 = vector.load %arg5[%c0, %c0_0] : memref<800x64xbf16, #tpu.memory_space<vmem>>, vector<800x64xbf16>
    %c0_1 = arith.constant 0 : index
    %c0_2 = arith.constant 0 : index
    %1 = vector.load %arg6[%c0_1, %c0_2] : memref<1x64xf32, #tpu.memory_space<vmem>>, vector<1x64xf32>
    %c0_3 = arith.constant 0 : index
    %c0_4 = arith.constant 0 : index
    %2 = vector.load %arg7[%c0_3, %c0_4] : memref<1x64xf32, #tpu.memory_space<vmem>>, vector<1x64xf32>
    %c0_5 = arith.constant 0 : index
    %c0_6 = arith.constant 0 : index
    %3 = vector.load %arg1[%c0_5, %c0_6] : memref<128x800xbf16, #tpu.memory_space<vmem>>, vector<128x800xbf16>
    %cst = arith.constant dense<0.000000e+00> : vector<128x64xf32>
    %4 = tpu.matmul %3, %0, %cst {dimension_numbers = #tpu.dot_dimension_numbers<[1], [0], [0], [1], [0, 0, 1, 1], [], []>} : vector<128x800xbf16>, vector<800x64xbf16>, vector<128x64xf32> -> vector<128x64xf32>
    %5 = vector.broadcast %1 : vector<1x64xf32> to vector<128x64xf32>
    %6 = arith.mulf %4, %5 : vector<128x64xf32>
    %7 = vector.broadcast %2 : vector<1x64xf32> to vector<128x64xf32>
    %8 = arith.addf %6, %7 : vector<128x64xf32>
    %c0_7 = arith.constant 0 : index
    %c0_8 = arith.constant 0 : index
    %9 = vector.load %arg2[%c0_7, %c0_8] : memref<128x800xbf16, #tpu.memory_space<vmem>>, vector<128x800xbf16>
    %cst_9 = arith.constant dense<0.000000e+00> : vector<128x64xf32>
    %10 = tpu.matmul %9, %0, %cst_9 {dimension_numbers = #tpu.dot_dimension_numbers<[1], [0], [0], [1], [0, 0, 1, 1], [], []>} : vector<128x800xbf16>, vector<800x64xbf16>, vector<128x64xf32> -> vector<128x64xf32>
    %11 = vector.broadcast %1 : vector<1x64xf32> to vector<128x64xf32>
    %12 = arith.mulf %10, %11 : vector<128x64xf32>
    %13 = vector.broadcast %2 : vector<1x64xf32> to vector<128x64xf32>
    %14 = arith.addf %12, %13 : vector<128x64xf32>
    %15 = arith.maximumf %8, %14 : vector<128x64xf32>
    %c0_10 = arith.constant 0 : index
    %c0_11 = arith.constant 0 : index
    %16 = vector.load %arg3[%c0_10, %c0_11] : memref<128x800xbf16, #tpu.memory_space<vmem>>, vector<128x800xbf16>
    %cst_12 = arith.constant dense<0.000000e+00> : vector<128x64xf32>
    %17 = tpu.matmul %16, %0, %cst_12 {dimension_numbers = #tpu.dot_dimension_numbers<[1], [0], [0], [1], [0, 0, 1, 1], [], []>} : vector<128x800xbf16>, vector<800x64xbf16>, vector<128x64xf32> -> vector<128x64xf32>
    %18 = vector.broadcast %1 : vector<1x64xf32> to vector<128x64xf32>
    %19 = arith.mulf %17, %18 : vector<128x64xf32>
    %20 = vector.broadcast %2 : vector<1x64xf32> to vector<128x64xf32>
    %21 = arith.addf %19, %20 : vector<128x64xf32>
    %c0_13 = arith.constant 0 : index
    %c0_14 = arith.constant 0 : index
    %22 = vector.load %arg4[%c0_13, %c0_14] : memref<128x800xbf16, #tpu.memory_space<vmem>>, vector<128x800xbf16>
    %cst_15 = arith.constant dense<0.000000e+00> : vector<128x64xf32>
    %23 = tpu.matmul %22, %0, %cst_15 {dimension_numbers = #tpu.dot_dimension_numbers<[1], [0], [0], [1], [0, 0, 1, 1], [], []>} : vector<128x800xbf16>, vector<800x64xbf16>, vector<128x64xf32> -> vector<128x64xf32>
    %24 = vector.broadcast %1 : vector<1x64xf32> to vector<128x64xf32>
    %25 = arith.mulf %23, %24 : vector<128x64xf32>
    %26 = vector.broadcast %2 : vector<1x64xf32> to vector<128x64xf32>
    %27 = arith.addf %25, %26 : vector<128x64xf32>
    %28 = arith.maximumf %21, %27 : vector<128x64xf32>
    %29 = arith.maximumf %15, %28 : vector<128x64xf32>
    %cst_16 = arith.constant 0.000000e+00 : f32
    %30 = vector.broadcast %cst_16 : f32 to vector<128x64xf32>
    %31 = arith.maximumf %29, %30 : vector<128x64xf32>
    %c0_17 = arith.constant 0 : index
    %c0_18 = arith.constant 0 : index
    %32 = vector.load %arg8[%c0_17, %c0_18] : memref<128x64xf32, #tpu.memory_space<vmem>>, vector<128x64xf32>
    tpu.vector_store %arg8[%c0_17, %c0_18], %31 {strides = array<i32>} : memref<128x64xf32, #tpu.memory_space<vmem>>, vector<128x64xf32>,
    return
  }
  func.func @transform_0(%arg0: i32) -> (i32, i32) {
    %c0_i32 = arith.constant 0 : i32
    %c0_i32_0 = arith.constant 0 : i32
    return %arg0, %c0_i32 : i32, i32
  }
  func.func @transform_1(%arg0: i32) -> (i32, i32) {
    %c0_i32 = arith.constant 0 : i32
    %c0_i32_0 = arith.constant 0 : i32
    return %arg0, %c0_i32 : i32, i32
  }
  func.func @transform_2(%arg0: i32) -> (i32, i32) {
    %c0_i32 = arith.constant 0 : i32
    %c0_i32_0 = arith.constant 0 : i32
    return %arg0, %c0_i32 : i32, i32
  }
  func.func @transform_3(%arg0: i32) -> (i32, i32) {
    %c0_i32 = arith.constant 0 : i32
    %c0_i32_0 = arith.constant 0 : i32
    return %arg0, %c0_i32 : i32, i32
  }
  func.func @transform_4(%arg0: i32) -> (i32, i32) {
    %c0_i32 = arith.constant 0 : i32
    %c0_i32_0 = arith.constant 0 : i32
    %c0_i32_1 = arith.constant 0 : i32
    return %c0_i32, %c0_i32_0 : i32, i32
  }
  func.func @transform_5(%arg0: i32) -> (i32, i32) {
    %c0_i32 = arith.constant 0 : i32
    %c0_i32_0 = arith.constant 0 : i32
    %c0_i32_1 = arith.constant 0 : i32
    return %c0_i32, %c0_i32_0 : i32, i32
  }
  func.func @transform_6(%arg0: i32) -> (i32, i32) {
    %c0_i32 = arith.constant 0 : i32
    %c0_i32_0 = arith.constant 0 : i32
    %c0_i32_1 = arith.constant 0 : i32
    return %c0_i32, %c0_i32_0 : i32, i32
  }
  func.func @transform_7(%arg0: i32) -> (i32, i32) {
    %c0_i32 = arith.constant 0 : i32
    %c0_i32_0 = arith.constant 0 : i32
    return %arg0, %c0_i32 : i32, i32
  }
}

module attributes {stable_mosaic.version = 11 : i64} {
  func.func @_conv_bn_relu_pool_kernel(%arg0: i32, %arg1: memref<32x1600xbf16, #tpu.memory_space<vmem>>, %arg2: memref<32x1600xbf16, #tpu.memory_space<vmem>>, %arg3: memref<32x1600xbf16, #tpu.memory_space<vmem>>, %arg4: memref<32x1600xbf16, #tpu.memory_space<vmem>>, %arg5: memref<1600x64xbf16, #tpu.memory_space<vmem>>, %arg6: memref<1x64xf32, #tpu.memory_space<vmem>>, %arg7: memref<1x64xf32, #tpu.memory_space<vmem>>, %arg8: memref<32x64xf32, #tpu.memory_space<vmem>>) attributes {dimension_semantics = [#tpu.dimension_semantics<parallel>], iteration_bounds = array<i64: 1>, scalar_prefetch = 0 : i64, scratch_operands = 0 : i64, tpu.core_type = #tpu.core_type<tc>, window_params = [{transform_indices = @transform_0, window_bounds = array<i64: 32, 1600>}, {transform_indices = @transform_1, window_bounds = array<i64: 32, 1600>}, {transform_indices = @transform_2, window_bounds = array<i64: 32, 1600>}, {transform_indices = @transform_3, window_bounds = array<i64: 32, 1600>}, {pipeline_mode = #tpu.pipeline_mode<synchronous>, transform_indices = @transform_4, window_bounds = array<i64: 1600, 64>}, {pipeline_mode = #tpu.pipeline_mode<synchronous>, transform_indices = @transform_5, window_bounds = array<i64: 1, 64>}, {pipeline_mode = #tpu.pipeline_mode<synchronous>, transform_indices = @transform_6, window_bounds = array<i64: 1, 64>}, {transform_indices = @transform_7, window_bounds = array<i64: 32, 64>}]} {
    %c0 = arith.constant 0 : index
    %c0_0 = arith.constant 0 : index
    %0 = vector.load %arg5[%c0, %c0_0] : memref<1600x64xbf16, #tpu.memory_space<vmem>>, vector<1600x64xbf16>
    %c0_1 = arith.constant 0 : index
    %c0_2 = arith.constant 0 : index
    %1 = vector.load %arg6[%c0_1, %c0_2] : memref<1x64xf32, #tpu.memory_space<vmem>>, vector<1x64xf32>
    %c0_3 = arith.constant 0 : index
    %c0_4 = arith.constant 0 : index
    %2 = vector.load %arg7[%c0_3, %c0_4] : memref<1x64xf32, #tpu.memory_space<vmem>>, vector<1x64xf32>
    %c0_5 = arith.constant 0 : index
    %c0_6 = arith.constant 0 : index
    %3 = vector.load %arg1[%c0_5, %c0_6] : memref<32x1600xbf16, #tpu.memory_space<vmem>>, vector<32x1600xbf16>
    %cst = arith.constant dense<0.000000e+00> : vector<32x64xf32>
    %4 = tpu.matmul %3, %0, %cst {dimension_numbers = #tpu.dot_dimension_numbers<[1], [0], [0], [1], [0, 0, 1, 1], [], []>} : vector<32x1600xbf16>, vector<1600x64xbf16>, vector<32x64xf32> -> vector<32x64xf32>
    %5 = vector.broadcast %1 : vector<1x64xf32> to vector<32x64xf32>
    %6 = arith.mulf %4, %5 : vector<32x64xf32>
    %7 = vector.broadcast %2 : vector<1x64xf32> to vector<32x64xf32>
    %8 = arith.addf %6, %7 : vector<32x64xf32>
    %c0_7 = arith.constant 0 : index
    %c0_8 = arith.constant 0 : index
    %9 = vector.load %arg2[%c0_7, %c0_8] : memref<32x1600xbf16, #tpu.memory_space<vmem>>, vector<32x1600xbf16>
    %cst_9 = arith.constant dense<0.000000e+00> : vector<32x64xf32>
    %10 = tpu.matmul %9, %0, %cst_9 {dimension_numbers = #tpu.dot_dimension_numbers<[1], [0], [0], [1], [0, 0, 1, 1], [], []>} : vector<32x1600xbf16>, vector<1600x64xbf16>, vector<32x64xf32> -> vector<32x64xf32>
    %11 = vector.broadcast %1 : vector<1x64xf32> to vector<32x64xf32>
    %12 = arith.mulf %10, %11 : vector<32x64xf32>
    %13 = vector.broadcast %2 : vector<1x64xf32> to vector<32x64xf32>
    %14 = arith.addf %12, %13 : vector<32x64xf32>
    %15 = arith.maximumf %8, %14 : vector<32x64xf32>
    %c0_10 = arith.constant 0 : index
    %c0_11 = arith.constant 0 : index
    %16 = vector.load %arg3[%c0_10, %c0_11] : memref<32x1600xbf16, #tpu.memory_space<vmem>>, vector<32x1600xbf16>
    %cst_12 = arith.constant dense<0.000000e+00> : vector<32x64xf32>
    %17 = tpu.matmul %16, %0, %cst_12 {dimension_numbers = #tpu.dot_dimension_numbers<[1], [0], [0], [1], [0, 0, 1, 1], [], []>} : vector<32x1600xbf16>, vector<1600x64xbf16>, vector<32x64xf32> -> vector<32x64xf32>
    %18 = vector.broadcast %1 : vector<1x64xf32> to vector<32x64xf32>
    %19 = arith.mulf %17, %18 : vector<32x64xf32>
    %20 = vector.broadcast %2 : vector<1x64xf32> to vector<32x64xf32>
    %21 = arith.addf %19, %20 : vector<32x64xf32>
    %c0_13 = arith.constant 0 : index
    %c0_14 = arith.constant 0 : index
    %22 = vector.load %arg4[%c0_13, %c0_14] : memref<32x1600xbf16, #tpu.memory_space<vmem>>, vector<32x1600xbf16>
    %cst_15 = arith.constant dense<0.000000e+00> : vector<32x64xf32>
    %23 = tpu.matmul %22, %0, %cst_15 {dimension_numbers = #tpu.dot_dimension_numbers<[1], [0], [0], [1], [0, 0, 1, 1], [], []>} : vector<32x1600xbf16>, vector<1600x64xbf16>, vector<32x64xf32> -> vector<32x64xf32>
    %24 = vector.broadcast %1 : vector<1x64xf32> to vector<32x64xf32>
    %25 = arith.mulf %23, %24 : vector<32x64xf32>
    %26 = vector.broadcast %2 : vector<1x64xf32> to vector<32x64xf32>
    %27 = arith.addf %25, %26 : vector<32x64xf32>
    %28 = arith.maximumf %21, %27 : vector<32x64xf32>
    %29 = arith.maximumf %15, %28 : vector<32x64xf32>
    %cst_16 = arith.constant 0.000000e+00 : f32
    %30 = vector.broadcast %cst_16 : f32 to vector<32x64xf32>
    %31 = arith.maximumf %29, %30 : vector<32x64xf32>
    %c0_17 = arith.constant 0 : index
    %c0_18 = arith.constant 0 : index
    %32 = vector.load %arg8[%c0_17, %c0_18] : memref<32x64xf32, #tpu.memory_space<vmem>>, vector<32x64xf32>
    tpu.vector_store %arg8[%c0_17, %c0_18], %31 {strides = array<i32>} : memref<32x64xf32, #tpu.memory_space<vmem>>, vector<32x64xf32>,
    return
  }
  func.func @transform_0(%arg0: i32) -> (i32, i32) {
    %c0_i32 = arith.constant 0 : i32
    %c0_i32_0 = arith.constant 0 : i32
    return %arg0, %c0_i32 : i32, i32
  }
  func.func @transform_1(%arg0: i32) -> (i32, i32) {
    %c0_i32 = arith.constant 0 : i32
    %c0_i32_0 = arith.constant 0 : i32
    return %arg0, %c0_i32 : i32, i32
  }
  func.func @transform_2(%arg0: i32) -> (i32, i32) {
    %c0_i32 = arith.constant 0 : i32
    %c0_i32_0 = arith.constant 0 : i32
    return %arg0, %c0_i32 : i32, i32
  }
  func.func @transform_3(%arg0: i32) -> (i32, i32) {
    %c0_i32 = arith.constant 0 : i32
    %c0_i32_0 = arith.constant 0 : i32
    return %arg0, %c0_i32 : i32, i32
  }
  func.func @transform_4(%arg0: i32) -> (i32, i32) {
    %c0_i32 = arith.constant 0 : i32
    %c0_i32_0 = arith.constant 0 : i32
    %c0_i32_1 = arith.constant 0 : i32
    return %c0_i32, %c0_i32_0 : i32, i32
  }
  func.func @transform_5(%arg0: i32) -> (i32, i32) {
    %c0_i32 = arith.constant 0 : i32
    %c0_i32_0 = arith.constant 0 : i32
    %c0_i32_1 = arith.constant 0 : i32
    return %c0_i32, %c0_i32_0 : i32, i32
  }
  func.func @transform_6(%arg0: i32) -> (i32, i32) {
    %c0_i32 = arith.constant 0 : i32
    %c0_i32_0 = arith.constant 0 : i32
    %c0_i32_1 = arith.constant 0 : i32
    return %c0_i32, %c0_i32_0 : i32, i32
  }
  func.func @transform_7(%arg0: i32) -> (i32, i32) {
    %c0_i32 = arith.constant 0 : i32
    %c0_i32_0 = arith.constant 0 : i32
    return %arg0, %c0_i32 : i32, i32
  }
}

module attributes {stable_mosaic.version = 11 : i64} {
  func.func @_mlp_kernel(%arg0: i32, %arg1: memref<2x1024xbf16, #tpu.memory_space<vmem>>, %arg2: memref<1024x1000xbf16, #tpu.memory_space<vmem>>, %arg3: memref<1x1000xf32, #tpu.memory_space<vmem>>, %arg4: memref<1000x4xbf16, #tpu.memory_space<vmem>>, %arg5: memref<1x4xf32, #tpu.memory_space<vmem>>, %arg6: memref<2x4xf32, #tpu.memory_space<vmem>>) attributes {dimension_semantics = [#tpu.dimension_semantics<parallel>], iteration_bounds = array<i64: 1>, scalar_prefetch = 0 : i64, scratch_operands = 0 : i64, tpu.core_type = #tpu.core_type<tc>, window_params = [{transform_indices = @transform_0, window_bounds = array<i64: 2, 1024>}, {pipeline_mode = #tpu.pipeline_mode<synchronous>, transform_indices = @transform_1, window_bounds = array<i64: 1024, 1000>}, {pipeline_mode = #tpu.pipeline_mode<synchronous>, transform_indices = @transform_2, window_bounds = array<i64: 1, 1000>}, {pipeline_mode = #tpu.pipeline_mode<synchronous>, transform_indices = @transform_3, window_bounds = array<i64: 1000, 4>}, {pipeline_mode = #tpu.pipeline_mode<synchronous>, transform_indices = @transform_4, window_bounds = array<i64: 1, 4>}, {transform_indices = @transform_5, window_bounds = array<i64: 2, 4>}]} {
    %c0 = arith.constant 0 : index
    %c0_0 = arith.constant 0 : index
    %0 = vector.load %arg1[%c0, %c0_0] : memref<2x1024xbf16, #tpu.memory_space<vmem>>, vector<2x1024xbf16>
    %c0_1 = arith.constant 0 : index
    %c0_2 = arith.constant 0 : index
    %1 = vector.load %arg2[%c0_1, %c0_2] : memref<1024x1000xbf16, #tpu.memory_space<vmem>>, vector<1024x1000xbf16>
    %cst = arith.constant dense<0.000000e+00> : vector<2x1000xf32>
    %2 = tpu.matmul %0, %1, %cst {dimension_numbers = #tpu.dot_dimension_numbers<[1], [0], [0], [1], [0, 0, 1, 1], [], []>} : vector<2x1024xbf16>, vector<1024x1000xbf16>, vector<2x1000xf32> -> vector<2x1000xf32>
    %c0_3 = arith.constant 0 : index
    %c0_4 = arith.constant 0 : index
    %3 = vector.load %arg3[%c0_3, %c0_4] : memref<1x1000xf32, #tpu.memory_space<vmem>>, vector<1x1000xf32>
    %4 = vector.broadcast %3 : vector<1x1000xf32> to vector<2x1000xf32>
    %5 = arith.addf %2, %4 : vector<2x1000xf32>
    %cst_5 = arith.constant 0.000000e+00 : f32
    %6 = vector.broadcast %cst_5 : f32 to vector<2x1000xf32>
    %7 = arith.maximumf %5, %6 : vector<2x1000xf32>
    %8 = arith.truncf %7 : vector<2x1000xf32> to vector<2x1000xbf16>
    %c0_6 = arith.constant 0 : index
    %c0_7 = arith.constant 0 : index
    %9 = vector.load %arg4[%c0_6, %c0_7] : memref<1000x4xbf16, #tpu.memory_space<vmem>>, vector<1000x4xbf16>
    %cst_8 = arith.constant dense<0.000000e+00> : vector<2x4xf32>
    %10 = tpu.matmul %8, %9, %cst_8 {dimension_numbers = #tpu.dot_dimension_numbers<[1], [0], [0], [1], [0, 0, 1, 1], [], []>} : vector<2x1000xbf16>, vector<1000x4xbf16>, vector<2x4xf32> -> vector<2x4xf32>
    %c0_9 = arith.constant 0 : index
    %c0_10 = arith.constant 0 : index
    %11 = vector.load %arg5[%c0_9, %c0_10] : memref<1x4xf32, #tpu.memory_space<vmem>>, vector<1x4xf32>
    %12 = vector.broadcast %11 : vector<1x4xf32> to vector<2x4xf32>
    %13 = arith.addf %10, %12 : vector<2x4xf32>
    %c0_11 = arith.constant 0 : index
    %c0_12 = arith.constant 0 : index
    %14 = vector.load %arg6[%c0_11, %c0_12] : memref<2x4xf32, #tpu.memory_space<vmem>>, vector<2x4xf32>
    tpu.vector_store %arg6[%c0_11, %c0_12], %13 {strides = array<i32>} : memref<2x4xf32, #tpu.memory_space<vmem>>, vector<2x4xf32>,
    return
  }
  func.func @transform_0(%arg0: i32) -> (i32, i32) {
    %c0_i32 = arith.constant 0 : i32
    %c0_i32_0 = arith.constant 0 : i32
    return %arg0, %c0_i32 : i32, i32
  }
  func.func @transform_1(%arg0: i32) -> (i32, i32) {
    %c0_i32 = arith.constant 0 : i32
    %c0_i32_0 = arith.constant 0 : i32
    %c0_i32_1 = arith.constant 0 : i32
    return %c0_i32, %c0_i32_0 : i32, i32
  }
  func.func @transform_2(%arg0: i32) -> (i32, i32) {
    %c0_i32 = arith.constant 0 : i32
    %c0_i32_0 = arith.constant 0 : i32
    %c0_i32_1 = arith.constant 0 : i32
    return %c0_i32, %c0_i32_0 : i32, i32
  }
  func.func @transform_3(%arg0: i32) -> (i32, i32) {
    %c0_i32 = arith.constant 0 : i32
    %c0_i32_0 = arith.constant 0 : i32
    %c0_i32_1 = arith.constant 0 : i32
    return %c0_i32, %c0_i32_0 : i32, i32
  }
  func.func @transform_4(%arg0: i32) -> (i32, i32) {
    %c0_i32 = arith.constant 0 : i32
    %c0_i32_0 = arith.constant 0 : i32
    %c0_i32_1 = arith.constant 0 : i32
    return %c0_i32, %c0_i32_0 : i32, i32
  }
  func.func @transform_5(%arg0: i32) -> (i32, i32) {
    %c0_i32 = arith.constant 0 : i32
    %c0_i32_0 = arith.constant 0 : i32
    return %arg0, %c0_i32 : i32, i32
  }
}

</mosaic_0001>

<bundles_post_ra>
// kernel: convnet_forward.4
= control target key start
LH: loop header
LB: loop body
LE: loop exit
PB: predicated region body
PF: predicated region fallthrough
CT: control target
= control target key end

     0   :  { %s2736_s24 = smov 0   ;;  %s3537_s0 = inlined_call_operand.vmem [shape: bf16[512,75], index: 0, kind: input, shape index: {}]   ;;  %s3538_s1 = inlined_call_operand.vmem [shape: bf16[512,75], index: 1, kind: input, shape index: {}]   ;;  %s3539_s2 = inlined_call_operand.vmem [shape: bf16[512,75], index: 2, kind: input, shape index: {}]   ;;  %s3540_s3 = inlined_call_operand.vmem [shape: bf16[512,75], index: 3, kind: input, shape index: {}]   ;;  %s3541_s4 = inlined_call_operand.vmem [shape: bf16[75,32], index: 4, kind: input, shape index: {}]   ;;  %s3542_s5 = inlined_call_operand.vmem [shape: f32[1,32], index: 5, kind: input, shape index: {}]   ;;  %s3543_s6 = inlined_call_operand.vmem [shape: f32[1,32], index: 6, kind: input, shape index: {}]   ;;  %s3544_s7 = inlined_call_operand.vmem [shape: f32[512,32], index: 7, kind: output, shape index: {}]  }
   0x1 LB: > { %s2203_s25 = sadd.s32 4294967295, %s2693_s24   ;;  %p2207_p0 = scmp.ge.s32.totalorder %s2693_s24, 1  ;;  %s2693_s24 = sphi %s2736_s24, %s17_s24  }
   0x2   : > { %p271_p1 = scmp.lt.s32.totalorder %s2693_s24, 3 }
   0x4   : > { %p272_p2 = pnand %p2207_p0, %p271_p1 }
   0x6   : > { %275 = sbr.rel (%p272_p2) target bundleno = 382 (0x17e), region = 48 }
   0xd   : > { %v2616_v0 = vld [vmem:[%s3541_s4] sm:$0xff]   ;;  %v2617_v1 = vld [vmem:[%s3541_s4 + $0x8] sm:$0xff]   ;;  %vm551_vm0 = vcmask 1044480   ;;  %v2618_v2 = vld [vmem:[%s3541_s4 + $0x10] sm:$0xff]   ;;  %s2208_s9 = sshll.u32 %s2203_s25, 5  ;;  %vm552_vm1 = vcmask 1045504  }
   0xe   : > { %2439 = vmatprep.subr.bf16.mxu0 %v2616_v0  ;;  %2481 = vmatprep.subr.bf16.mxu1 %v2616_v0  ;;  %v2695_v3 = vmov 65535   ;;  %p319_p3 = scmp.lt.s32.totalorder %s2208_s9, 63  ;;  %v2619_v5 = vld [vmem:[%s3541_s4 + $0x18] sm:$0xff]   ;;  %v2620_v6 = vld [vmem:[%s3541_s4 + $0x20] sm:$0x3f]   ;;  %vm502_vm2 = vcmask 613376  }
   0xf   : > { %2440 = vmatpush3.bf16.msra.mxu0 %v2616_v0  ;;  %2482 = vmatpush3.bf16.msra.mxu1 %v2616_v0  ;;  %v553_v4 = vsel %vm551_vm0, 4294967295, %v2695_v3  ;;  %vm2078_vm3 = vcmask 261120  }
  0x10   : > { %2441 = vmatprep.subr.bf16.mxu0 %v2617_v1  ;;  %2483 = vmatprep.subr.bf16.mxu1 %v2617_v1  ;;  %s3641_s9 = smov (!%p319_p3, %s2208_s9), 63  ;;  %v554_v7 = vsel %vm552_vm1, %v553_v4, 0 }
  0x11   : > { %s2762_s14 = sshll.u32 %s3641_s9, 2  ;;  %v556_v8 = vand.u32 %v2620_v6, %v554_v7  ;;  %s2217_s10 = sshll.u32 %s3641_s9, 3 }
  0x12   : > { %s2768_s17 = scalar_lea.vmem %s3537_s0, %s2762_s14  ;;  %s2775_s20 = scalar_lea.vmem %s3538_s1, %s2762_s14 }
  0x13   : > { %2442 = vmatpush3.bf16.msra.mxu0 %v2617_v1  ;;  %2484 = vmatpush3.bf16.msra.mxu1 %v2617_v1  ;;  %v2621_v9 = vld [vmem:[%s2768_s17] sm:$0xff]   ;;  %v2623_v11 = vld [vmem:[%s2768_s17 + $0x8] sm:$0xff]   ;;  %v2625_v13 = vld [vmem:[%s2768_s17 + $0x10] sm:$0xff]   ;;  %s2812_s23 = scalar_lea.vmem %s3539_s2, %s2762_s14  ;;  %s2818_s27 = scalar_lea.vmem %s3540_s3, %s2762_s14 }
  0x14   : > { %2443 = vmatprep.subr.bf16.mxu0 %v2618_v2  ;;  %2485 = vmatprep.subr.bf16.mxu1 %v2618_v2  ;;  %v2622_v10 = vld [vmem:[%s2775_s20] sm:$0xff]   ;;  %v2624_v12 = vld [vmem:[%s2775_s20 + $0x8] sm:$0xff]   ;;  %v2626_v14 = vld [vmem:[%s2775_s20 + $0x10] sm:$0xff]   ;;  %s3269_s13 = scalar_lea.vmem %s3544_s7, %s2217_s10 }
  0x15   : > { %2449 = vmatprep.mubr.msk.bf16.mxu0 %vm502_vm2, %v2621_v9  ;;  %2491 = vmatprep.mubr.msk.bf16.mxu1 %vm502_vm2, %v2622_v10  ;;  %v2627_v15 = vld [vmem:[%s2768_s17 + $0x18] sm:$0xff]   ;;  %v2629_v17 = vld [vmem:[%s2768_s17 + $0x20] sm:$0xff]   ;;  %v2631_v19 = vld [vmem:[%s2768_s17 + $0x28] sm:$0xff]  }
  0x16   : > { %v2628_v16 = vld [vmem:[%s2775_s20 + $0x18] sm:$0xff]   ;;  %v2630_v18 = vld [vmem:[%s2775_s20 + $0x20] sm:$0xff]   ;;  %v2632_v20 = vld [vmem:[%s2775_s20 + $0x28] sm:$0xff]  }
  0x17   : > { %2444 = vmatpush3.bf16.msra.mxu0 %v2618_v2  ;;  %2486 = vmatpush3.bf16.msra.mxu1 %v2618_v2  ;;  %v2633_v21 = vld [vmem:[%s2768_s17 + $0x30] sm:$0xff]   ;;  %v2635_v23 = vld [vmem:[%s2768_s17 + $0x38] sm:$0xff]   ;;  %v2637_v25 = vld [vmem:[%s2768_s17 + $0x40] sm:$0xff]  }
  0x18   : > { %2445 = vmatprep.subr.bf16.mxu0 %v2619_v5  ;;  %2487 = vmatprep.subr.bf16.mxu1 %v2619_v5  ;;  %v2634_v22 = vld [vmem:[%s2775_s20 + $0x30] sm:$0xff]   ;;  %v2636_v24 = vld [vmem:[%s2775_s20 + $0x38] sm:$0xff]   ;;  %v2638_v26 = vld [vmem:[%s2775_s20 + $0x40] sm:$0xff]  }
  0x19   : > { %v2639_v27 = vld [vmem:[%s2768_s17 + $0x48] sm:$0xff]   ;;  %v2641_v29 = vld [vmem:[%s2768_s17 + $0x50] sm:$0xff]   ;;  %v2643_v31 = vld [vmem:[%s2768_s17 + $0x58] sm:$0xff]  }
  0x1a   : > { %v2640_v28 = vld [vmem:[%s2775_s20 + $0x48] sm:$0xff]   ;;  %v2642_v30 = vld [vmem:[%s2775_s20 + $0x50] sm:$0xff]   ;;  %v2644_v32 = vld [vmem:[%s2775_s20 + $0x58] sm:$0xff]  }
  0x1b   : > { %2446 = vmatpush3.bf16.msra.mxu0 %v2619_v5  ;;  %2488 = vmatpush3.bf16.msra.mxu1 %v2619_v5  ;;  %v2645_v33 = vld [vmem:[%s2768_s17 + $0x60] sm:$0xff]   ;;  %v2647_v35 = vld [vmem:[%s2768_s17 + $0x68] sm:$0xff]   ;;  %v2649_v37 = vld [vmem:[%s2768_s17 + $0x70] sm:$0xff]  }
  0x1c   : > { %2447 = vmatprep.subr.bf16.mxu0 %v556_v8  ;;  %2489 = vmatprep.subr.bf16.mxu1 %v556_v8  ;;  %v2646_v34 = vld [vmem:[%s2775_s20 + $0x60] sm:$0xff]   ;;  %v2648_v36 = vld [vmem:[%s2775_s20 + $0x68] sm:$0xff]   ;;  %v2650_v38 = vld [vmem:[%s2775_s20 + $0x70] sm:$0xff]  }
  0x1d   : > { %v2651_v39 = vld [vmem:[%s2768_s17 + $0x78] sm:$0xff]   ;;  %v2653_v41 = vld [vmem:[%s2812_s23] sm:$0xff]   ;;  %v2655_v43 = vld [vmem:[%s2812_s23 + $0x8] sm:$0xff]  }
  0x1e   : > { %v2652_v40 = vld [vmem:[%s2775_s20 + $0x78] sm:$0xff]   ;;  %v2654_v42 = vld [vmem:[%s2818_s27] sm:$0xff]   ;;  %v2656_v44 = vld [vmem:[%s2818_s27 + $0x8] sm:$0xff]  }
  0x1f   : > { %2448 = vmatpush3.bf16.msra.mxu0 %v556_v8  ;;  %2490 = vmatpush3.bf16.msra.mxu1 %v556_v8  ;;  %v2657_v45 = vld [vmem:[%s2812_s23 + $0x10] sm:$0xff]   ;;  %v2659_v47 = vld [vmem:[%s2812_s23 + $0x18] sm:$0xff]   ;;  %v2661_v49 = vld [vmem:[%s2812_s23 + $0x20] sm:$0xff]  }
  0x20   : > { %2523 = vmatprep.subr.bf16.mxu0 %v2616_v0  ;;  %2565 = vmatprep.subr.bf16.mxu1 %v2616_v0  ;;  %v2658_v46 = vld [vmem:[%s2818_s27 + $0x10] sm:$0xff]   ;;  %v2660_v48 = vld [vmem:[%s2818_s27 + $0x18] sm:$0xff]   ;;  %v2662_v50 = vld [vmem:[%s2818_s27 + $0x20] sm:$0xff]  }
  0x21   : > { %v2663_v51 = vld [vmem:[%s2812_s23 + $0x28] sm:$0xff]   ;;  %v2665_v53 = vld [vmem:[%s2812_s23 + $0x30] sm:$0xff]   ;;  %v2667_v55 = vld [vmem:[%s2812_s23 + $0x38] sm:$0xff]  }
  0x22   : > { %2450 = vmatmul.mubr.msk.bf16.vlgmr.msra.gmra.mrb[0].mxu0 %vm502_vm2, %v2623_v11  ;;  %2492 = vmatmul.mubr.msk.bf16.vlgmr.msra.gmra.mrb[0].mxu1 %vm502_vm2, %v2624_v12  ;;  %v2664_v52 = vld [vmem:[%s2818_s27 + $0x28] sm:$0xff]   ;;  %v2666_v54 = vld [vmem:[%s2818_s27 + $0x30] sm:$0xff]   ;;  %v2668_v56 = vld [vmem:[%s2818_s27 + $0x38] sm:$0xff]  }
  0x23   : > { %2524 = vmatpush3.bf16.msra.mxu0 %v2616_v0  ;;  %2566 = vmatpush3.bf16.msra.mxu1 %v2616_v0  ;;  %v2669_v57 = vld [vmem:[%s2812_s23 + $0x40] sm:$0xff]   ;;  %v2671_v59 = vld [vmem:[%s2812_s23 + $0x48] sm:$0xff]   ;;  %v2673_v61 = vld [vmem:[%s2812_s23 + $0x50] sm:$0xff]  }
  0x24   : > { %2453 = vmatprep.mubr.msk.bf16.mxu0 %vm502_vm2, %v2625_v13  ;;  %2495 = vmatprep.mubr.msk.bf16.mxu1 %vm502_vm2, %v2626_v14  ;;  %v2670_v58 = vld [vmem:[%s2818_s27 + $0x40] sm:$0xff]   ;;  %v2672_v60 = vld [vmem:[%s2818_s27 + $0x48] sm:$0xff]   ;;  %v2674_v62 = vld [vmem:[%s2818_s27 + $0x50] sm:$0xff]  }
  0x25   : > { %2525 = vmatprep.subr.bf16.mxu0 %v2617_v1  ;;  %2567 = vmatprep.subr.bf16.mxu1 %v2617_v1  ;;  %v2675_v63 = vld [vmem:[%s2812_s23 + $0x58] sm:$0xff]   ;;  %v2679_v3 = vld [vmem:[%s2812_s23 + $0x68] sm:$0xff]   ;;  %v2682_v6 = vld [vmem:[%s2818_s27 + $0x70] sm:$0xff]  }
  0x26   : > { %v2676_v0 = vld [vmem:[%s2818_s27 + $0x58] sm:$0xff]   ;;  %v2680_v4 = vld [vmem:[%s2818_s27 + $0x68] sm:$0xff]   ;;  %v2919_v9 = vld [vmem:[%s3542_s5] ss:$0 sm:$0xff] }
  0x27   : > { %2526 = vmatpush3.bf16.msra.mxu0 %v2617_v1  ;;  %2568 = vmatpush3.bf16.msra.mxu1 %v2617_v1  ;;  %v2677_v1 = vld [vmem:[%s2812_s23 + $0x60] sm:$0xff]   ;;  %v2683_v7 = vld [vmem:[%s2812_s23 + $0x78] sm:$0xff]  }
  0x28   : > { %2527 = vmatprep.subr.bf16.mxu0 %v2618_v2  ;;  %2569 = vmatprep.subr.bf16.mxu1 %v2618_v2  ;;  %v2924_v10 = vld [vmem:[%s3543_s6] ss:$0 sm:$0xff] }
  0x2a   : > { %2454 = vmatmul.mubr.msk.bf16.gmra.mrb[4].mxu0 %vm502_vm2, %v2627_v15  ;;  %2496 = vmatmul.mubr.msk.bf16.gmra.mrb[4].mxu1 %vm502_vm2, %v2628_v16 }
  0x2b   : > { %2457 = vmatprep.mubr.msk.bf16.mxu0 %vm502_vm2, %v2629_v17  ;;  %2499 = vmatprep.mubr.msk.bf16.mxu1 %vm502_vm2, %v2630_v18 }
  0x2c   : > { %2528 = vmatpush3.bf16.msra.mxu0 %v2618_v2  ;;  %2570 = vmatpush3.bf16.msra.mxu1 %v2618_v2  ;;  %v2678_v2 = vld [vmem:[%s2818_s27 + $0x60] sm:$0xff]  }
  0x2d   : > { %2529 = vmatprep.subr.bf16.mxu0 %v2619_v5  ;;  %2571 = vmatprep.subr.bf16.mxu1 %v2619_v5 }
  0x30   : > { %2530 = vmatpush3.bf16.msra.mxu0 %v2619_v5  ;;  %2572 = vmatpush3.bf16.msra.mxu1 %v2619_v5  ;;  %v2681_v5 = vld [vmem:[%s2812_s23 + $0x70] sm:$0xff]  }
  0x31   : > { %2531 = vmatprep.subr.bf16.mxu0 %v556_v8  ;;  %2573 = vmatprep.subr.bf16.mxu1 %v556_v8 }
  0x32   : > { %2458 = vmatmul.mubr.msk.bf16.gmra.mrb[8].mxu0 %vm502_vm2, %v2631_v19  ;;  %2500 = vmatmul.mubr.msk.bf16.gmra.mrb[8].mxu1 %vm502_vm2, %v2632_v20 }
  0x33   : > { %2461 = vmatprep.mubr.msk.bf16.mxu0 %vm502_vm2, %v2633_v21  ;;  %2503 = vmatprep.mubr.msk.bf16.mxu1 %vm502_vm2, %v2634_v22 }
  0x34   : > { %2532 = vmatpush3.bf16.msra.mxu0 %v556_v8  ;;  %2574 = vmatpush3.bf16.msra.mxu1 %v556_v8  ;;  %v2684_v8 = vld [vmem:[%s2818_s27 + $0x78] sm:$0xff]  }
  0x3a   : > { %2462 = vmatmul.mubr.msk.bf16.gmra.mrb[12].mxu0 %vm502_vm2, %v2635_v23  ;;  %2504 = vmatmul.mubr.msk.bf16.gmra.mrb[12].mxu1 %vm502_vm2, %v2636_v24 }
  0x3b   : > { %2465 = vmatprep.mubr.msk.bf16.mxu0 %vm502_vm2, %v2637_v25  ;;  %2507 = vmatprep.mubr.msk.bf16.mxu1 %vm502_vm2, %v2638_v26 }
  0x42   : > { %2466 = vmatmul.mubr.msk.bf16.gmra.mrb[16].mxu0 %vm502_vm2, %v2639_v27  ;;  %2508 = vmatmul.mubr.msk.bf16.gmra.mrb[16].mxu1 %vm502_vm2, %v2640_v28 }
  0x43   : > { %2469 = vmatprep.mubr.msk.bf16.mxu0 %vm502_vm2, %v2641_v29  ;;  %2511 = vmatprep.mubr.msk.bf16.mxu1 %vm502_vm2, %v2642_v30 }
  0x4a   : > { %2470 = vmatmul.mubr.msk.bf16.gmra.mrb[20].mxu0 %vm502_vm2, %v2643_v31  ;;  %2512 = vmatmul.mubr.msk.bf16.gmra.mrb[20].mxu1 %vm502_vm2, %v2644_v32 }
  0x4b   : > { %2473 = vmatprep.mubr.msk.bf16.mxu0 %vm502_vm2, %v2645_v33  ;;  %2515 = vmatprep.mubr.msk.bf16.mxu1 %vm502_vm2, %v2646_v34 }
  0x52   : > { %2474 = vmatmul.mubr.msk.bf16.gmra.mrb[24].mxu0 %vm502_vm2, %v2647_v35  ;;  %2516 = vmatmul.mubr.msk.bf16.gmra.mrb[24].mxu1 %vm502_vm2, %v2648_v36 }
  0x53   : > { %2477 = vmatprep.mubr.msk.bf16.mxu0 %vm502_vm2, %v2649_v37  ;;  %2519 = vmatprep.mubr.msk.bf16.mxu1 %vm502_vm2, %v2650_v38 }
  0x5a   : > { %2478 = vmatmul.mubr.msk.bf16.gmra.mrb[28].mxu0 %vm502_vm2, %v2651_v39  ;;  %2520 = vmatmul.mubr.msk.bf16.gmra.mrb[28].mxu1 %vm502_vm2, %v2652_v40 }
  0x5b   : > { %2533 = vmatprep.mubr.msk.bf16.mxu0 %vm502_vm2, %v2653_v41  ;;  %2575 = vmatprep.mubr.msk.bf16.mxu1 %vm502_vm2, %v2654_v42 }
  0x62   : > { %2534 = vmatmul.mubr.msk.bf16.vlgmr.msra.gmra.mrb[32].mxu0 %vm502_vm2, %v2655_v43  ;;  %2576 = vmatmul.mubr.msk.bf16.vlgmr.msra.gmra.mrb[32].mxu1 %vm502_vm2, %v2656_v44 }
  0x63   : > { %2537 = vmatprep.mubr.msk.bf16.mxu0 %vm502_vm2, %v2657_v45  ;;  %2579 = vmatprep.mubr.msk.bf16.mxu1 %vm502_vm2, %v2658_v46 }
  0x6a   : > { %2538 = vmatmul.mubr.msk.bf16.gmra.mrb[36].mxu0 %vm502_vm2, %v2659_v47  ;;  %2580 = vmatmul.mubr.msk.bf16.gmra.mrb[36].mxu1 %vm502_vm2, %v2660_v48 }
  0x6b   : > { %2541 = vmatprep.mubr.msk.bf16.mxu0 %vm502_vm2, %v2661_v49  ;;  %2583 = vmatprep.mubr.msk.bf16.mxu1 %vm502_vm2, %v2662_v50 }
  0x72   : > { %2542 = vmatmul.mubr.msk.bf16.gmra.mrb[40].mxu0 %vm502_vm2, %v2663_v51  ;;  %2584 = vmatmul.mubr.msk.bf16.gmra.mrb[40].mxu1 %vm502_vm2, %v2664_v52 }
  0x73   : > { %2545 = vmatprep.mubr.msk.bf16.mxu0 %vm502_vm2, %v2665_v53  ;;  %2587 = vmatprep.mubr.msk.bf16.mxu1 %vm502_vm2, %v2666_v54 }
  0x7a   : > { %2546 = vmatmul.mubr.msk.bf16.gmra.mrb[44].mxu0 %vm502_vm2, %v2667_v55  ;;  %2588 = vmatmul.mubr.msk.bf16.gmra.mrb[44].mxu1 %vm502_vm2, %v2668_v56 }
  0x7b   : > { %2549 = vmatprep.mubr.msk.bf16.mxu0 %vm502_vm2, %v2669_v57  ;;  %2591 = vmatprep.mubr.msk.bf16.mxu1 %vm502_vm2, %v2670_v58 }
  0x82   : > { %2550 = vmatmul.mubr.msk.bf16.gmra.mrb[48].mxu0 %vm502_vm2, %v2671_v59  ;;  %2592 = vmatmul.mubr.msk.bf16.gmra.mrb[48].mxu1 %vm502_vm2, %v2672_v60 }
  0x83   : > { %2553 = vmatprep.mubr.msk.bf16.mxu0 %vm502_vm2, %v2673_v61  ;;  %2595 = vmatprep.mubr.msk.bf16.mxu1 %vm502_vm2, %v2674_v62 }
  0x8a   : > { %2554 = vmatmul.mubr.msk.bf16.gmra.mrb[52].mxu0 %vm502_vm2, %v2675_v63  ;;  %2596 = vmatmul.mubr.msk.bf16.gmra.mrb[52].mxu1 %vm502_vm2, %v2676_v0 }
  0x8b   : > { %2557 = vmatprep.mubr.msk.bf16.mxu0 %vm502_vm2, %v2677_v1  ;;  %2599 = vmatprep.mubr.msk.bf16.mxu1 %vm502_vm2, %v2678_v2 }
  0x92   : > { %2558 = vmatmul.mubr.msk.bf16.gmra.mrb[56].mxu0 %vm502_vm2, %v2679_v3  ;;  %2600 = vmatmul.mubr.msk.bf16.gmra.mrb[56].mxu1 %vm502_vm2, %v2680_v4 }
  0x93   : > { %2561 = vmatprep.mubr.msk.bf16.mxu0 %vm502_vm2, %v2681_v5  ;;  %2603 = vmatprep.mubr.msk.bf16.mxu1 %vm502_vm2, %v2682_v6 }
  0x9a   : > { %2562 = vmatmul.mubr.msk.bf16.gmra.mrb[60].mxu0 %vm502_vm2, %v2683_v7  ;;  %2604 = vmatmul.mubr.msk.bf16.gmra.mrb[60].mxu1 %vm502_vm2, %v2684_v8 }
  0xf5   : > { %v2451_v11 = vpop.f32.mrb[0].mxu0  ;;  %v2493_v12 = vpop.f32.mrb[0].mxu1 }
  0xf6   : > { %v727_v13 = vmul.f32 %v2451_v11, %v2919_v9  ;;  %v1118_v14 = vmul.f32 %v2493_v12, %v2919_v9  ;;  %v592_v15 = vpop.f32.mrb[1].mxu0  ;;  %v989_v16 = vpop.f32.mrb[1].mxu1 }
  0xf7   : > { %v725_v17 = vmul.f32 %v2919_v9, %v592_v15  ;;  %v1116_v18 = vmul.f32 %v2919_v9, %v989_v16  ;;  %v2452_v19 = vpop.f32.mrb[2].mxu0  ;;  %v2494_v20 = vpop.f32.mrb[2].mxu1 }
  0xf8   : > { %v2931_v21 = vadd.f32 %v2924_v10, %v727_v13  ;;  %v2934_v22 = vadd.f32 %v2924_v10, %v1118_v14  ;;  %v728_v23 = vmul.f32 %v2452_v19, %v2919_v9  ;;  %v1119_v24 = vmul.f32 %v2494_v20, %v2919_v9  ;;  %v595_v25 = vpop.f32.mrb[3].mxu0  ;;  %v992_v26 = vpop.f32.mrb[3].mxu1 }
  0xf9   : > { %v2939_v27 = vadd.f32 %v2924_v10, %v725_v17  ;;  %v2942_v28 = vadd.f32 %v2924_v10, %v1116_v18  ;;  %v726_v29 = vmul.f32 %v2919_v9, %v595_v25  ;;  %v1117_v30 = vmul.f32 %v2919_v9, %v992_v26 }
  0xfa   : > { %v2949_v32 = vadd.f32 %v2924_v10, %v728_v23  ;;  %v2952_v33 = vadd.f32 %v2924_v10, %v1119_v24 }
  0xfb   : > { %v2957_v35 = vadd.f32 %v2924_v10, %v726_v29  ;;  %v2960_v36 = vadd.f32 %v2924_v10, %v1117_v30 }
  0xfd   : > { %v2455_v39 = vpop.f32.mrb[4].mxu0  ;;  %v2497_v40 = vpop.f32.mrb[4].mxu1 }
  0xfe   : > { %v731_v41 = vmul.f32 %v2455_v39, %v2919_v9  ;;  %v1122_v42 = vmul.f32 %v2497_v40, %v2919_v9  ;;  %v608_v43 = vpop.f32.mrb[5].mxu0  ;;  %v1005_v44 = vpop.f32.mrb[5].mxu1 }
  0xff   : > { %v729_v45 = vmul.f32 %v2919_v9, %v608_v43  ;;  %v1120_v46 = vmul.f32 %v2919_v9, %v1005_v44  ;;  %v2456_v47 = vpop.f32.mrb[6].mxu0  ;;  %v2498_v48 = vpop.f32.mrb[6].mxu1 }
 0x100   : > { %v2971_v49 = vadd.f32 %v2924_v10, %v731_v41  ;;  %v2974_v50 = vadd.f32 %v2924_v10, %v1122_v42  ;;  %v732_v51 = vmul.f32 %v2456_v47, %v2919_v9  ;;  %v1123_v52 = vmul.f32 %v2498_v48, %v2919_v9  ;;  %v611_v53 = vpop.f32.mrb[7].mxu0  ;;  %v1008_v54 = vpop.f32.mrb[7].mxu1 }
 0x101   : > { %v2979_v55 = vadd.f32 %v2924_v10, %v729_v45  ;;  %v2982_v56 = vadd.f32 %v2924_v10, %v1120_v46  ;;  %v730_v57 = vmul.f32 %v2919_v9, %v611_v53  ;;  %v1121_v58 = vmul.f32 %v2919_v9, %v1008_v54 }
 0x102   : > { %v2989_v60 = vadd.f32 %v2924_v10, %v732_v51  ;;  %v2992_v61 = vadd.f32 %v2924_v10, %v1123_v52 }
 0x103   : > { %v2997_v63 = vadd.f32 %v2924_v10, %v730_v57  ;;  %v3000_v0 = vadd.f32 %v2924_v10, %v1121_v58 }
 0x105   : > { %v2459_v3 = vpop.f32.mrb[8].mxu0  ;;  %v2501_v4 = vpop.f32.mrb[8].mxu1 }
 0x106   : > { %v735_v5 = vmul.f32 %v2459_v3, %v2919_v9  ;;  %v1126_v6 = vmul.f32 %v2501_v4, %v2919_v9  ;;  %v624_v7 = vpop.f32.mrb[9].mxu0  ;;  %v1021_v8 = vpop.f32.mrb[9].mxu1 }
 0x107   : > { %v733_v11 = vmul.f32 %v2919_v9, %v624_v7  ;;  %v1124_v12 = vmul.f32 %v2919_v9, %v1021_v8  ;;  %v2460_v13 = vpop.f32.mrb[10].mxu0  ;;  %v2502_v14 = vpop.f32.mrb[10].mxu1 }
 0x108   : > { %v3011_v15 = vadd.f32 %v2924_v10, %v735_v5  ;;  %v3014_v16 = vadd.f32 %v2924_v10, %v1126_v6  ;;  %v736_v17 = vmul.f32 %v2460_v13, %v2919_v9  ;;  %v1127_v18 = vmul.f32 %v2502_v14, %v2919_v9  ;;  %v627_v19 = vpop.f32.mrb[11].mxu0  ;;  %v1024_v20 = vpop.f32.mrb[11].mxu1 }
 0x109   : > { %v3019_v23 = vadd.f32 %v2924_v10, %v733_v11  ;;  %v3022_v24 = vadd.f32 %v2924_v10, %v1124_v12  ;;  %v734_v25 = vmul.f32 %v2919_v9, %v627_v19  ;;  %v1125_v26 = vmul.f32 %v2919_v9, %v1024_v20 }
 0x10a   : > { %v3029_v30 = vadd.f32 %v2924_v10, %v736_v17  ;;  %v3032_v39 = vadd.f32 %v2924_v10, %v1127_v18 }
 0x10b   : > { %v3037_v41 = vadd.f32 %v2924_v10, %v734_v25  ;;  %v3040_v42 = vadd.f32 %v2924_v10, %v1125_v26 }
 0x10d   : > { %v2463_v45 = vpop.f32.mrb[12].mxu0  ;;  %v2505_v46 = vpop.f32.mrb[12].mxu1 }
 0x10e   : > { %v739_v47 = vmul.f32 %v2463_v45, %v2919_v9  ;;  %v1130_v48 = vmul.f32 %v2505_v46, %v2919_v9  ;;  %v640_v51 = vpop.f32.mrb[13].mxu0  ;;  %v1037_v52 = vpop.f32.mrb[13].mxu1 }
 0x10f   : > { %v737_v53 = vmul.f32 %v2919_v9, %v640_v51  ;;  %v1128_v54 = vmul.f32 %v2919_v9, %v1037_v52  ;;  %v2464_v57 = vpop.f32.mrb[14].mxu0  ;;  %v2506_v58 = vpop.f32.mrb[14].mxu1 }
 0x110   : > { %v3051_v3 = vadd.f32 %v2924_v10, %v739_v47  ;;  %v3054_v4 = vadd.f32 %v2924_v10, %v1130_v48  ;;  %v740_v5 = vmul.f32 %v2464_v57, %v2919_v9  ;;  %v1131_v6 = vmul.f32 %v2506_v58, %v2919_v9  ;;  %v643_v7 = vpop.f32.mrb[15].mxu0  ;;  %v1040_v8 = vpop.f32.mrb[15].mxu1 }
 0x111   : > { %v3059_v11 = vadd.f32 %v2924_v10, %v737_v53  ;;  %v3062_v12 = vadd.f32 %v2924_v10, %v1128_v54  ;;  %v738_v13 = vmul.f32 %v2919_v9, %v643_v7  ;;  %v1129_v14 = vmul.f32 %v2919_v9, %v1040_v8 }
 0x112   : > { %v3069_v18 = vadd.f32 %v2924_v10, %v740_v5  ;;  %v3072_v19 = vadd.f32 %v2924_v10, %v1131_v6 }
 0x113   : > { %v3077_v25 = vadd.f32 %v2924_v10, %v738_v13  ;;  %v3080_v26 = vadd.f32 %v2924_v10, %v1129_v14 }
 0x115   : > { %v2467_v47 = vpop.f32.mrb[16].mxu0  ;;  %v2509_v48 = vpop.f32.mrb[16].mxu1 }
 0x116   : > { %v743_v51 = vmul.f32 %v2467_v47, %v2919_v9  ;;  %v1134_v52 = vmul.f32 %v2509_v48, %v2919_v9  ;;  %v656_v53 = vpop.f32.mrb[17].mxu0  ;;  %v1053_v54 = vpop.f32.mrb[17].mxu1 }
 0x117   : > { %v741_v57 = vmul.f32 %v2919_v9, %v656_v53  ;;  %v1132_v58 = vmul.f32 %v2919_v9, %v1053_v54  ;;  %v2468_v5 = vpop.f32.mrb[18].mxu0  ;;  %v2510_v6 = vpop.f32.mrb[18].mxu1 }
 0x118   : > { %v3091_v7 = vadd.f32 %v2924_v10, %v743_v51  ;;  %v3094_v8 = vadd.f32 %v2924_v10, %v1134_v52  ;;  %v744_v13 = vmul.f32 %v2468_v5, %v2919_v9  ;;  %v1135_v14 = vmul.f32 %v2510_v6, %v2919_v9  ;;  %v659_v47 = vpop.f32.mrb[19].mxu0  ;;  %v1056_v48 = vpop.f32.mrb[19].mxu1 }
 0x119   : > { %v3099_v46 = vadd.f32 %v2924_v10, %v741_v57  ;;  %v3102_v53 = vadd.f32 %v2924_v10, %v1132_v58  ;;  %v742_v54 = vmul.f32 %v2919_v9, %v659_v47  ;;  %v1133_v51 = vmul.f32 %v2919_v9, %v1056_v48 }
 0x11a   : > { %v3109_v45 = vadd.f32 %v2924_v10, %v744_v13  ;;  %v3112_v5 = vadd.f32 %v2924_v10, %v1135_v14 }
 0x11b   : > { %v3117_v6 = vadd.f32 %v2924_v10, %v742_v54  ;;  %v3120_v58 = vadd.f32 %v2924_v10, %v1133_v51 }
 0x11d   : > { %v2471_v13 = vpop.f32.mrb[20].mxu0  ;;  %v2513_v52 = vpop.f32.mrb[20].mxu1 }
 0x11e   : > { %v747_v14 = vmul.f32 %v2471_v13, %v2919_v9  ;;  %v1138_v20 = vmul.f32 %v2513_v52, %v2919_v9  ;;  %v672_v17 = vpop.f32.mrb[21].mxu0  ;;  %v1069_v57 = vpop.f32.mrb[21].mxu1 }
 0x11f   : > { %v745_v54 = vmul.f32 %v2919_v9, %v672_v17  ;;  %v1136_v44 = vmul.f32 %v2919_v9, %v1069_v57  ;;  %v2472_v51 = vpop.f32.mrb[22].mxu0  ;;  %v2514_v43 = vpop.f32.mrb[22].mxu1 }
 0x120   : > { %v3131_v40 = vadd.f32 %v2924_v10, %v747_v14  ;;  %v3134_v47 = vadd.f32 %v2924_v10, %v1138_v20  ;;  %v748_v48 = vmul.f32 %v2472_v51, %v2919_v9  ;;  %v1139_v13 = vmul.f32 %v2514_v43, %v2919_v9  ;;  %v675_v29 = vpop.f32.mrb[23].mxu0  ;;  %v1072_v52 = vpop.f32.mrb[23].mxu1 }
 0x121   : > { %v3139_v2 = vadd.f32 %v2924_v10, %v745_v54  ;;  %v3142_v17 = vadd.f32 %v2924_v10, %v1136_v44  ;;  %v746_v57 = vmul.f32 %v2919_v9, %v675_v29  ;;  %v1137_v14 = vmul.f32 %v2919_v9, %v1072_v52 }
 0x122   : > { %v3149_v1 = vadd.f32 %v2924_v10, %v748_v48  ;;  %v3152_v43 = vadd.f32 %v2924_v10, %v1139_v13 }
 0x123   : > { %3566 = vst [vmem:[#allocation2_spill] sm:$0xff] %v3142_v17  ;;  %v3157_v51 = vadd.f32 %v2924_v10, %v746_v57  ;;  %v3160_v44 = vadd.f32 %v2924_v10, %v1137_v14 }
 0x124   : > { %3567 = vst [vmem:[#allocation3_spill] sm:$0xff] %v3149_v1  ;;  %3568 = vst [vmem:[#allocation4_spill] sm:$0xff] %v3152_v43 }
 0x125   : > { %3569 = vst [vmem:[#allocation5_spill] sm:$0xff] %v3157_v51  ;;  %3570 = vst [vmem:[#allocation6_spill] sm:$0xff] %v3160_v44  ;;  %v2475_v48 = vpop.f32.mrb[24].mxu0  ;;  %v2517_v20 = vpop.f32.mrb[24].mxu1 }
 0x126   : > { %v751_v13 = vmul.f32 %v2475_v48, %v2919_v9  ;;  %v1142_v62 = vmul.f32 %v2517_v20, %v2919_v9  ;;  %v688_v59 = vpop.f32.mrb[25].mxu0  ;;  %v1085_v54 = vpop.f32.mrb[25].mxu1 }
 0x127   : > { %v749_v57 = vmul.f32 %v2919_v9, %v688_v59  ;;  %v1140_v38 = vmul.f32 %v2919_v9, %v1085_v54  ;;  %v2476_v14 = vpop.f32.mrb[26].mxu0  ;;  %v2518_v37 = vpop.f32.mrb[26].mxu1 }
 0x128   : > { %v3171_v34 = vadd.f32 %v2924_v10, %v751_v13  ;;  %v3174_v29 = vadd.f32 %v2924_v10, %v1142_v62  ;;  %v752_v52 = vmul.f32 %v2476_v14, %v2919_v9  ;;  %v1143_v48 = vmul.f32 %v2518_v37, %v2919_v9  ;;  %v691_v31 = vpop.f32.mrb[27].mxu0  ;;  %v1088_v20 = vpop.f32.mrb[27].mxu1 }
 0x129   : > { %v3179_v44 = vadd.f32 %v2924_v10, %v749_v57  ;;  %v3182_v59 = vadd.f32 %v2924_v10, %v1140_v38  ;;  %v750_v54 = vmul.f32 %v2919_v9, %v691_v31  ;;  %v1141_v13 = vmul.f32 %v2919_v9, %v1088_v20 }
 0x12a   : > { %3571 = vst [vmem:[#allocation7_spill] sm:$0xff] %v3171_v34  ;;  %3572 = vst [vmem:[#allocation8_spill] sm:$0xff] %v3174_v29  ;;  %v3189_v51 = vadd.f32 %v2924_v10, %v752_v52  ;;  %v3192_v37 = vadd.f32 %v2924_v10, %v1143_v48 }
 0x12b   : > { %3573 = vst [vmem:[#allocation9_spill] sm:$0xff] %v3179_v44  ;;  %3574 = vst [vmem:[#allocation10_spill] sm:$0xff] %v3182_v59  ;;  %v3197_v14 = vadd.f32 %v2924_v10, %v750_v54  ;;  %v3200_v38 = vadd.f32 %v2924_v10, %v1141_v13 }
 0x12c   : > { %3575 = vst [vmem:[#allocation11_spill] sm:$0xff] %v3189_v51  ;;  %3576 = vst [vmem:[#allocation12_spill] sm:$0xff] %v3192_v37 }
 0x12d   : > { %3577 = vst [vmem:[#allocation13_spill] sm:$0xff] %v3197_v14  ;;  %3578 = vst [vmem:[#allocation14_spill] sm:$0xff] %v3200_v38  ;;  %v2479_v52 = vpop.f32.mrb[28].mxu0  ;;  %v2521_v62 = vpop.f32.mrb[28].mxu1 }
 0x12e   : > { %v755_v48 = vmul.f32 %v2479_v52, %v2919_v9  ;;  %v1146_v29 = vmul.f32 %v2521_v62, %v2919_v9  ;;  %v704_v34 = vpop.f32.mrb[29].mxu0  ;;  %v1101_v57 = vpop.f32.mrb[29].mxu1 }
 0x12f   : > { %v753_v54 = vmul.f32 %v2919_v9, %v704_v34  ;;  %v1144_v59 = vmul.f32 %v2919_v9, %v1101_v57  ;;  %v2480_v13 = vpop.f32.mrb[30].mxu0  ;;  %v2522_v44 = vpop.f32.mrb[30].mxu1 }
 0x130   : > { %v3211_v43 = vadd.f32 %v2924_v10, %v755_v48  ;;  %v3214_v31 = vadd.f32 %v2924_v10, %v1146_v29  ;;  %v756_v20 = vmul.f32 %v2480_v13, %v2919_v9  ;;  %v1147_v52 = vmul.f32 %v2522_v44, %v2919_v9  ;;  %v707_v38 = vpop.f32.mrb[31].mxu0  ;;  %v1104_v62 = vpop.f32.mrb[31].mxu1 }
 0x131   : > { %v3219_v14 = vadd.f32 %v2924_v10, %v753_v54  ;;  %v3222_v34 = vadd.f32 %v2924_v10, %v1144_v59  ;;  %v754_v57 = vmul.f32 %v2919_v9, %v707_v38  ;;  %v1145_v48 = vmul.f32 %v2919_v9, %v1104_v62 }
 0x132   : > { %3579 = vst [vmem:[#allocation15_spill] sm:$0xff] %v3211_v43  ;;  %3580 = vst [vmem:[#allocation16_spill] sm:$0xff] %v3214_v31  ;;  %v3229_v37 = vadd.f32 %v2924_v10, %v756_v20  ;;  %v3232_v44 = vadd.f32 %v2924_v10, %v1147_v52 }
 0x133   : > { %3581 = vst [vmem:[#allocation17_spill] sm:$0xff] %v3219_v14  ;;  %3582 = vst [vmem:[#allocation18_spill] sm:$0xff] %v3222_v34  ;;  %v3237_v13 = vadd.f32 %v2924_v10, %v754_v57  ;;  %v3240_v59 = vadd.f32 %v2924_v10, %v1145_v48 }
 0x134   : > { %3583 = vst [vmem:[#allocation19_spill] sm:$0xff] %v3229_v37  ;;  %3584 = vst [vmem:[#allocation20_spill] sm:$0xff] %v3232_v44 }
 0x135   : > { %3585 = vst [vmem:[#allocation21_spill] sm:$0xff] %v3237_v13  ;;  %3586 = vst [vmem:[#allocation22_spill] sm:$0xff] %v3240_v59  ;;  %v2535_v20 = vpop.f32.mrb[32].mxu0  ;;  %v2577_v29 = vpop.f32.mrb[32].mxu1 }
 0x136   : > { %v1535_v52 = vmul.f32 %v2535_v20, %v2919_v9  ;;  %v1920_v31 = vmul.f32 %v2577_v29, %v2919_v9  ;;  %v1406_v43 = vpop.f32.mrb[33].mxu0  ;;  %v1791_v54 = vpop.f32.mrb[33].mxu1 }
 0x137   : > { %v1533_v57 = vmul.f32 %v2919_v9, %v1406_v43  ;;  %v1918_v48 = vmul.f32 %v2919_v9, %v1791_v54  ;;  %v2536_v34 = vpop.f32.mrb[34].mxu0  ;;  %v2578_v14 = vpop.f32.mrb[34].mxu1 }
 0x138   : > { %v1567_v38 = vadd.f32 %v2924_v10, %v1535_v52  ;;  %v1952_v44 = vadd.f32 %v2924_v10, %v1920_v31  ;;  %v1536_v62 = vmul.f32 %v2536_v34, %v2919_v9  ;;  %v1921_v59 = vmul.f32 %v2578_v14, %v2919_v9  ;;  %v1409_v20 = vpop.f32.mrb[35].mxu0  ;;  %v1794_v13 = vpop.f32.mrb[35].mxu1 }
 0x139   : > { %v1565_v29 = vadd.f32 %v2924_v10, %v1533_v57  ;;  %v1950_v37 = vadd.f32 %v2924_v10, %v1918_v48  ;;  %v1534_v43 = vmul.f32 %v2919_v9, %v1409_v20  ;;  %v1919_v54 = vmul.f32 %v2919_v9, %v1794_v13 }
 0x13a   : > { %v1984_v51 = vmax.f32 %v1567_v38, %v1952_v44  ;;  %v1568_v52 = vadd.f32 %v2924_v10, %v1536_v62  ;;  %v1953_v31 = vadd.f32 %v2924_v10, %v1921_v59  ;;  %v3587_v57 = vmax.f32 %v2931_v21, %v2934_v22 }
 0x13b   : > { %v1982_v1 = vmax.f32 %v1565_v29, %v1950_v37  ;;  %v1566_v34 = vadd.f32 %v2924_v10, %v1534_v43  ;;  %v1951_v14 = vadd.f32 %v2924_v10, %v1919_v54  ;;  %v3588_v44 = vmax.f32 %v2939_v27, %v2942_v28 }
 0x13c   : > { %v2016_v17 = vmax.f32 %v3587_v57, %v1984_v51  ;;  %v1985_v48 = vmax.f32 %v1568_v52, %v1953_v31  ;;  %v3589_v21 = vmax.f32 %v2949_v32, %v2952_v33  ;;  %v3590_v27 = vmax.f32 %v2957_v35, %v2960_v36 }
 0x13d   : > { %v2014_v13 = vmax.f32 %v3588_v44, %v1982_v1  ;;  %v1983_v37 = vmax.f32 %v1566_v34, %v1951_v14  ;;  %v2539_v59 = vpop.f32.mrb[36].mxu0  ;;  %v2581_v38 = vpop.f32.mrb[36].mxu1 }
 0x13e   : > { %v2048_v62 = vmax.f32 %v2016_v17, 0.0  ;;  %v2017_v22 = vmax.f32 %v3589_v21, %v1985_v48  ;;  %v1539_v51 = vmul.f32 %v2539_v59, %v2919_v9  ;;  %v1924_v20 = vmul.f32 %v2581_v38, %v2919_v9  ;;  %v1422_v29 = vpop.f32.mrb[37].mxu0  ;;  %v1807_v43 = vpop.f32.mrb[37].mxu1 }
 0x13f   : > { %v2046_v54 = vmax.f32 %v2014_v13, 0.0  ;;  %v2015_v28 = vmax.f32 %v3590_v27, %v1983_v37  ;;  %v1537_v1 = vmul.f32 %v2919_v9, %v1422_v29  ;;  %v1922_v17 = vmul.f32 %v2919_v9, %v1807_v43  ;;  %v2540_v52 = vpop.f32.mrb[38].mxu0  ;;  %v2582_v32 = vpop.f32.mrb[38].mxu1 }
 0x140   : > { %2081 = vst.msk [vmem:[%s3269_s13 + $0x10] sm:$0xff] %vm2078_vm3, %v2048_v62  ;;  %v2049_v33 = vmax.f32 %v2017_v22, 0.0  ;;  %v1571_v31 = vadd.f32 %v2924_v10, %v1539_v51  ;;  %v1956_v34 = vadd.f32 %v2924_v10, %v1924_v20  ;;  %v1540_v14 = vmul.f32 %v2540_v52, %v2919_v9  ;;  %v1425_v57 = vpop.f32.mrb[39].mxu0  ;;  %v1810_v35 = vpop.f32.mrb[39].mxu1 }
 0x141   : > { %2079 = vst.msk [vmem:[%s3269_s13] sm:$0xff] %vm2078_vm3, %v2046_v54  ;;  %v2047_v36 = vmax.f32 %v2015_v28, 0.0  ;;  %v1569_v48 = vadd.f32 %v2924_v10, %v1537_v1  ;;  %v1954_v44 = vadd.f32 %v2924_v10, %v1922_v17  ;;  %v1925_v13 = vmul.f32 %v2582_v32, %v2919_v9 }
 0x142   : > { %2082 = vst.msk [vmem:[%s3269_s13 + $0x18] sm:$0xff] %vm2078_vm3, %v2049_v33  ;;  %v1988_v37 = vmax.f32 %v1571_v31, %v1956_v34  ;;  %v1572_v59 = vadd.f32 %v2924_v10, %v1540_v14  ;;  %v1538_v38 = vmul.f32 %v2919_v9, %v1425_v57  ;;  %v1923_v62 = vmul.f32 %v2919_v9, %v1810_v35 }
 0x143   : > { %2080 = vst.msk [vmem:[%s3269_s13 + $0x8] sm:$0xff] %vm2078_vm3, %v2047_v36  ;;  %v1986_v21 = vmax.f32 %v1569_v48, %v1954_v44  ;;  %v1957_v22 = vadd.f32 %v2924_v10, %v1925_v13  ;;  %v3591_v51 = vmax.f32 %v2971_v49, %v2974_v50  ;;  %v3592_v54 = vmax.f32 %v2979_v55, %v2982_v56 }
 0x144   : > { %v1570_v29 = vadd.f32 %v2924_v10, %v1538_v38  ;;  %v1955_v43 = vadd.f32 %v2924_v10, %v1923_v62  ;;  %v3593_v14 = vmax.f32 %v2989_v60, %v2992_v61  ;;  %v3594_v48 = vmax.f32 %v2997_v63, %v3000_v0 }
 0x145   : > { %v2020_v20 = vmax.f32 %v3591_v51, %v1988_v37  ;;  %v2018_v27 = vmax.f32 %v3592_v54, %v1986_v21  ;;  %v1989_v28 = vmax.f32 %v1572_v59, %v1957_v22  ;;  %v2543_v1 = vpop.f32.mrb[40].mxu0  ;;  %v2585_v17 = vpop.f32.mrb[40].mxu1 }
 0x146   : > { %v1987_v32 = vmax.f32 %v1570_v29, %v1955_v43  ;;  %v1543_v33 = vmul.f32 %v2543_v1, %v2919_v9  ;;  %v1928_v31 = vmul.f32 %v2585_v17, %v2919_v9  ;;  %v1438_v49 = vpop.f32.mrb[41].mxu0  ;;  %v1823_v50 = vpop.f32.mrb[41].mxu1  ;;  %v3596_v17 = vmax.f32 %v3019_v23, %v3022_v24 }
 0x147   : > { %v2052_v52 = vmax.f32 %v2020_v20, 0.0  ;;  %v2050_v34 = vmax.f32 %v2018_v27, 0.0  ;;  %v2021_v57 = vmax.f32 %v3593_v14, %v1989_v28  ;;  %v1541_v55 = vmul.f32 %v2919_v9, %v1438_v49  ;;  %v2544_v35 = vpop.f32.mrb[42].mxu0  ;;  %v2586_v36 = vpop.f32.mrb[42].mxu1 }
 0x148   : > { %v1926_v56 = vmul.f32 %v2919_v9, %v1823_v50  ;;  %v2019_v44 = vmax.f32 %v3594_v48, %v1987_v32  ;;  %v1575_v13 = vadd.f32 %v2924_v10, %v1543_v33  ;;  %v1960_v37 = vadd.f32 %v2924_v10, %v1928_v31  ;;  %v1441_v61 = vpop.f32.mrb[43].mxu0  ;;  %v1826_v59 = vpop.f32.mrb[43].mxu1 }
 0x149   : > { %2085 = vst.msk [vmem:[%s3269_s13 + $0x30] sm:$0xff] %vm2078_vm3, %v2052_v52  ;;  %v1544_v60 = vmul.f32 %v2544_v35, %v2919_v9  ;;  %2083 = vst.msk [vmem:[%s3269_s13 + $0x20] sm:$0xff] %vm2078_vm3, %v2050_v34  ;;  %v2053_v38 = vmax.f32 %v2021_v57, 0.0  ;;  %v1573_v62 = vadd.f32 %v2924_v10, %v1541_v55  ;;  %v1929_v63 = vmul.f32 %v2586_v36, %v2919_v9 }
 0x14a   : > { %v1958_v21 = vadd.f32 %v2924_v10, %v1926_v56  ;;  %v2051_v0 = vmax.f32 %v2019_v44, 0.0  ;;  %v1992_v22 = vmax.f32 %v1575_v13, %v1960_v37  ;;  %v1542_v20 = vmul.f32 %v2919_v9, %v1441_v61 }
 0x14b   : > { %v1576_v51 = vadd.f32 %v2924_v10, %v1544_v60  ;;  %2086 = vst.msk [vmem:[%s3269_s13 + $0x38] sm:$0xff] %vm2078_vm3, %v2053_v38  ;;  %v1961_v43 = vadd.f32 %v2924_v10, %v1929_v63  ;;  %v1927_v54 = vmul.f32 %v2919_v9, %v1826_v59  ;;  %v3595_v27 = vmax.f32 %v3011_v15, %v3014_v16 }
 0x14c   : > { %v1990_v29 = vmax.f32 %v1573_v62, %v1958_v21  ;;  %2084 = vst.msk [vmem:[%s3269_s13 + $0x28] sm:$0xff] %vm2078_vm3, %v2051_v0  ;;  %v1574_v1 = vadd.f32 %v2924_v10, %v1542_v20  ;;  %v3597_v55 = vmax.f32 %v3029_v30, %v3032_v39  ;;  %v3598_v39 = vmax.f32 %v3037_v41, %v3040_v42 }
 0x14d   : > { %v2024_v28 = vmax.f32 %v3595_v27, %v1992_v22  ;;  %v1993_v32 = vmax.f32 %v1576_v51, %v1961_v43  ;;  %v1959_v33 = vadd.f32 %v2924_v10, %v1927_v54  ;;  %v2547_v31 = vpop.f32.mrb[44].mxu0  ;;  %v2589_v49 = vpop.f32.mrb[44].mxu1  ;;  %v3599_v41 = vmax.f32 %v3051_v3, %v3054_v4 }
 0x14e   : > { %v2022_v52 = vmax.f32 %v3596_v17, %v1990_v29  ;;  %v1547_v34 = vmul.f32 %v2547_v31, %v2919_v9  ;;  %v1932_v14 = vmul.f32 %v2589_v49, %v2919_v9  ;;  %v1454_v15 = vpop.f32.mrb[45].mxu0  ;;  %v1839_v16 = vpop.f32.mrb[45].mxu1 }
 0x14f   : > { %v2056_v50 = vmax.f32 %v2024_v28, 0.0  ;;  %v2025_v23 = vmax.f32 %v3597_v55, %v1993_v32  ;;  %v1991_v24 = vmax.f32 %v1574_v1, %v1959_v33  ;;  %v1545_v56 = vmul.f32 %v2919_v9, %v1454_v15  ;;  %v2548_v35 = vpop.f32.mrb[46].mxu0  ;;  %v2590_v36 = vpop.f32.mrb[46].mxu1 }
 0x150   : > { %v2054_v57 = vmax.f32 %v2022_v52, 0.0  ;;  %v1579_v48 = vadd.f32 %v2924_v10, %v1547_v34  ;;  %v1964_v44 = vadd.f32 %v2924_v10, %v1932_v14  ;;  %v1930_v13 = vmul.f32 %v2919_v9, %v1839_v16  ;;  %v1457_v60 = vpop.f32.mrb[47].mxu0  ;;  %v1842_v61 = vpop.f32.mrb[47].mxu1 }
 0x151   : > { %2089 = vst.msk [vmem:[%s3269_s13 + $0x50] sm:$0xff] %vm2078_vm3, %v2056_v50  ;;  %v1548_v37 = vmul.f32 %v2548_v35, %v2919_v9  ;;  %v2057_v30 = vmax.f32 %v2025_v23, 0.0  ;;  %v2023_v59 = vmax.f32 %v3598_v39, %v1991_v24  ;;  %v1577_v38 = vadd.f32 %v2924_v10, %v1545_v56 }
 0x152   : > { %2087 = vst.msk [vmem:[%s3269_s13 + $0x40] sm:$0xff] %vm2078_vm3, %v2054_v57  ;;  %v1933_v62 = vmul.f32 %v2590_v36, %v2919_v9  ;;  %v1996_v21 = vmax.f32 %v1579_v48, %v1964_v44  ;;  %v1962_v63 = vadd.f32 %v2924_v10, %v1930_v13  ;;  %v1546_v22 = vmul.f32 %v2919_v9, %v1457_v60 }
 0x153   : > { %v1580_v0 = vadd.f32 %v2924_v10, %v1548_v37  ;;  %2090 = vst.msk [vmem:[%s3269_s13 + $0x58] sm:$0xff] %vm2078_vm3, %v2057_v30  ;;  %v2055_v51 = vmax.f32 %v2023_v59, 0.0  ;;  %v1931_v29 = vmul.f32 %v2919_v9, %v1842_v61  ;;  %v3600_v32 = vmax.f32 %v3059_v11, %v3062_v12 }
 0x154   : > { %v1965_v20 = vadd.f32 %v2924_v10, %v1933_v62  ;;  %v2028_v42 = vmax.f32 %v3599_v41, %v1996_v21  ;;  %v1994_v43 = vmax.f32 %v1577_v38, %v1962_v63  ;;  %v1578_v54 = vadd.f32 %v2924_v10, %v1546_v22 }
 0x155   : > { %2088 = vst.msk [vmem:[%s3269_s13 + $0x48] sm:$0xff] %vm2078_vm3, %v2055_v51  ;;  %v1963_v28 = vadd.f32 %v2924_v10, %v1931_v29  ;;  %v2551_v1 = vpop.f32.mrb[48].mxu0  ;;  %v2593_v17 = vpop.f32.mrb[48].mxu1  ;;  %v3601_v50 = vmax.f32 %v3069_v18, %v3072_v19  ;;  %v3602_v35 = vmax.f32 %v3077_v25, %v3080_v26  ;;  %v3603_v26 = vmax.f32 %v3091_v7, %v3094_v8 }
 0x156   : > { %v1997_v27 = vmax.f32 %v1580_v0, %v1965_v20  ;;  %v2060_v52 = vmax.f32 %v2028_v42, 0.0  ;;  %v2026_v33 = vmax.f32 %v3600_v32, %v1994_v43  ;;  %v1551_v31 = vmul.f32 %v2551_v1, %v2919_v9  ;;  %v1470_v4 = vpop.f32.mrb[49].mxu0  ;;  %v1855_v49 = vpop.f32.mrb[49].mxu1 }
 0x157   : > { %v1936_v3 = vmul.f32 %v2593_v17, %v2919_v9  ;;  %v1995_v14 = vmax.f32 %v1578_v54, %v1963_v28  ;;  %v1549_v15 = vmul.f32 %v2919_v9, %v1470_v4  ;;  %v1934_v16 = vmul.f32 %v2919_v9, %v1855_v49  ;;  %v2552_v57 = vpop.f32.mrb[50].mxu0  ;;  %v2594_v55 = vpop.f32.mrb[50].mxu1 }
 0x158   : > { %v2029_v34 = vmax.f32 %v3601_v50, %v1997_v27  ;;  %2093 = vst.msk [vmem:[%s3269_s13 + $0x70] sm:$0xff] %vm2078_vm3, %v2060_v52  ;;  %v2058_v11 = vmax.f32 %v2026_v33, 0.0  ;;  %v1583_v12 = vadd.f32 %v2924_v10, %v1551_v31  ;;  %v1552_v24 = vmul.f32 %v2552_v57, %v2919_v9  ;;  %v1473_v18 = vpop.f32.mrb[51].mxu0  ;;  %v1858_v19 = vpop.f32.mrb[51].mxu1 }
 0x159   : > { %v1968_v23 = vadd.f32 %v2924_v10, %v1936_v3  ;;  %v2027_v36 = vmax.f32 %v3602_v35, %v1995_v14  ;;  %v1581_v48 = vadd.f32 %v2924_v10, %v1549_v15  ;;  %v1966_v44 = vadd.f32 %v2924_v10, %v1934_v16 }
 0x15a   : > { %v2061_v56 = vmax.f32 %v2029_v34, 0.0  ;;  %2091 = vst.msk [vmem:[%s3269_s13 + $0x60] sm:$0xff] %vm2078_vm3, %v2058_v11  ;;  %v1584_v37 = vadd.f32 %v2924_v10, %v1552_v24  ;;  %v1937_v60 = vmul.f32 %v2594_v55, %v2919_v9  ;;  %v1550_v61 = vmul.f32 %v2919_v9, %v1473_v18  ;;  %v3608_v24 = vld [vmem:[#allocation2_spill] sm:$0xff] }
 0x15b   : > { %v2000_v13 = vmax.f32 %v1583_v12, %v1968_v23  ;;  %v2059_v30 = vmax.f32 %v2027_v36, 0.0  ;;  %v1998_v39 = vmax.f32 %v1581_v48, %v1966_v44  ;;  %v1935_v25 = vmul.f32 %v2919_v9, %v1858_v19 }
 0x15c   : > { %2094 = vst.msk [vmem:[%s3269_s13 + $0x78] sm:$0xff] %vm2078_vm3, %v2061_v56  ;;  %v1969_v38 = vadd.f32 %v2924_v10, %v1937_v60  ;;  %v1582_v62 = vadd.f32 %v2924_v10, %v1550_v61  ;;  %v3604_v21 = vmax.f32 %v3099_v46, %v3102_v53  ;;  %v3605_v1 = vmax.f32 %v3109_v45, %v3112_v5  ;;  %v3610_v61 = vld [vmem:[#allocation3_spill] sm:$0xff] }
 0x15d   : > { %v2032_v59 = vmax.f32 %v3603_v26, %v2000_v13  ;;  %2092 = vst.msk [vmem:[%s3269_s13 + $0x68] sm:$0xff] %vm2078_vm3, %v2059_v30  ;;  %v1967_v0 = vadd.f32 %v2924_v10, %v1935_v25  ;;  %v2555_v22 = vpop.f32.mrb[52].mxu0  ;;  %v2597_v51 = vpop.f32.mrb[52].mxu1  ;;  %v3606_v4 = vmax.f32 %v3117_v6, %v3120_v58  ;;  %v3607_v58 = vmax.f32 %v3131_v40, %v3134_v47  ;;  %v3611_v30 = vld [vmem:[#allocation4_spill] sm:$0xff] }
 0x15e   : > { %v2030_v63 = vmax.f32 %v3604_v21, %v1998_v39  ;;  %v2001_v29 = vmax.f32 %v1584_v37, %v1969_v38  ;;  %v1555_v7 = vmul.f32 %v2555_v22, %v2919_v9  ;;  %v1940_v8 = vmul.f32 %v2597_v51, %v2919_v9  ;;  %v1486_v41 = vpop.f32.mrb[53].mxu0  ;;  %v1871_v42 = vpop.f32.mrb[53].mxu1 }
 0x15f   : > { %v2064_v20 = vmax.f32 %v2032_v59, 0.0  ;;  %v1999_v54 = vmax.f32 %v1582_v62, %v1967_v0  ;;  %v1553_v27 = vmul.f32 %v2919_v9, %v1486_v41  ;;  %v1938_v46 = vmul.f32 %v2919_v9, %v1871_v42  ;;  %v2556_v53 = vpop.f32.mrb[54].mxu0  ;;  %v2598_v28 = vpop.f32.mrb[54].mxu1 }
 0x160   : > { %v2062_v43 = vmax.f32 %v2030_v63, 0.0  ;;  %v2033_v17 = vmax.f32 %v3605_v1, %v2001_v29  ;;  %v1587_v52 = vadd.f32 %v2924_v10, %v1555_v7  ;;  %v1972_v32 = vadd.f32 %v2924_v10, %v1940_v8  ;;  %v1489_v31 = vpop.f32.mrb[55].mxu0  ;;  %v1874_v3 = vpop.f32.mrb[55].mxu1  ;;  %v3613_v29 = vld [vmem:[#allocation5_spill] sm:$0xff]  ;;  %v3614_v7 = vld [vmem:[#allocation6_spill] sm:$0xff] }
 0x161   : > { %2097 = vst.msk [vmem:[%s3269_s13 + $0x90] sm:$0xff] %vm2078_vm3, %v2064_v20  ;;  %v1556_v33 = vmul.f32 %v2556_v53, %v2919_v9  ;;  %v2031_v49 = vmax.f32 %v3606_v4, %v1999_v54  ;;  %v1585_v50 = vadd.f32 %v2924_v10, %v1553_v27  ;;  %v1970_v45 = vadd.f32 %v2924_v10, %v1938_v46 }
 0x162   : > { %2095 = vst.msk [vmem:[%s3269_s13 + $0x80] sm:$0xff] %vm2078_vm3, %v2062_v43  ;;  %v1941_v5 = vmul.f32 %v2598_v28, %v2919_v9  ;;  %v2065_v34 = vmax.f32 %v2033_v17, 0.0  ;;  %v2004_v14 = vmax.f32 %v1587_v52, %v1972_v32  ;;  %v1554_v16 = vmul.f32 %v2919_v9, %v1489_v31  ;;  %v3616_v52 = vld [vmem:[#allocation7_spill] sm:$0xff]  ;;  %v3617_v32 = vld [vmem:[#allocation8_spill] sm:$0xff] }
 0x163   : > { %v1588_v15 = vadd.f32 %v2924_v10, %v1556_v33  ;;  %v2063_v57 = vmax.f32 %v2031_v49, 0.0  ;;  %v2002_v55 = vmax.f32 %v1585_v50, %v1970_v45  ;;  %v1939_v6 = vmul.f32 %v2919_v9, %v1874_v3 }
 0x164   : > { %v1973_v11 = vadd.f32 %v2924_v10, %v1941_v5  ;;  %2098 = vst.msk [vmem:[%s3269_s13 + $0x98] sm:$0xff] %vm2078_vm3, %v2065_v34  ;;  %v2036_v12 = vmax.f32 %v3607_v58, %v2004_v14  ;;  %v1586_v23 = vadd.f32 %v2924_v10, %v1554_v16  ;;  %v3609_v18 = vmax.f32 %v3139_v2, %v3608_v24  ;;  %v3619_v14 = vld [vmem:[#allocation9_spill] sm:$0xff] }
 0x165   : > { %2096 = vst.msk [vmem:[%s3269_s13 + $0x88] sm:$0xff] %vm2078_vm3, %v2063_v57  ;;  %v1971_v35 = vadd.f32 %v2924_v10, %v1939_v6  ;;  %v2559_v36 = vpop.f32.mrb[56].mxu0  ;;  %v2601_v48 = vpop.f32.mrb[56].mxu1  ;;  %v3612_v39 = vmax.f32 %v3610_v61, %v3611_v30  ;;  %v3615_v8 = vmax.f32 %v3613_v29, %v3614_v7  ;;  %v3618_v33 = vmax.f32 %v3616_v52, %v3617_v32  ;;  %v3625_v30 = vld [vmem:[#allocation13_spill] sm:$0xff]  ;;  %v3629_v29 = vld [vmem:[#allocation16_spill] sm:$0xff]  ;;  %v3634_v32 = vld [vmem:[#allocation19_spill] sm:$0xff] }
 0x166   : > { %v2034_v19 = vmax.f32 %v3609_v18, %v2002_v55  ;;  %v2005_v56 = vmax.f32 %v1588_v15, %v1973_v11  ;;  %v2068_v44 = vmax.f32 %v2036_v12, 0.0  ;;  %v1559_v13 = vmul.f32 %v2559_v36, %v2919_v9  ;;  %v1502_v47 = vpop.f32.mrb[57].mxu0  ;;  %v1887_v37 = vpop.f32.mrb[57].mxu1  ;;  %v3620_v15 = vld [vmem:[#allocation10_spill] sm:$0xff]  ;;  %v3622_v12 = vld [vmem:[#allocation11_spill] sm:$0xff] }
 0x167   : > { %v1944_v40 = vmul.f32 %v2601_v48, %v2919_v9  ;;  %v2003_v25 = vmax.f32 %v1586_v23, %v1971_v35  ;;  %v1557_v26 = vmul.f32 %v2919_v9, %v1502_v47  ;;  %v2560_v59 = vpop.f32.mrb[58].mxu0  ;;  %v2602_v38 = vpop.f32.mrb[58].mxu1  ;;  %v1942_v63 = vmul.f32 %v2919_v9, %v1887_v37  ;;  %v3623_v23 = vld [vmem:[#allocation12_spill] sm:$0xff]  ;;  %v2686_v47 = vld [vmem:[%s3542_s5] ss:$0 sm:$0xff] }
 0x168   : > { %v2066_v60 = vmax.f32 %v2034_v19, 0.0  ;;  %v2037_v2 = vmax.f32 %v3612_v39, %v2005_v56  ;;  %2101 = vst.msk [vmem:[%s3269_s13 + $0xb0] sm:$0xff] %vm2078_vm3, %v2068_v44  ;;  %v1591_v62 = vadd.f32 %v2924_v10, %v1559_v13  ;;  %v1560_v0 = vmul.f32 %v2560_v59, %v2919_v9  ;;  %v1505_v22 = vpop.f32.mrb[59].mxu0  ;;  %v1890_v51 = vpop.f32.mrb[59].mxu1  ;;  %v2685_v44 = vld [vmem:[%s3543_s6] ss:$0 sm:$0xff] }
 0x169   : > { %v1976_v21 = vadd.f32 %v2924_v10, %v1944_v40  ;;  %v2035_v41 = vmax.f32 %v3615_v8, %v2003_v25  ;;  %v1589_v42 = vadd.f32 %v2924_v10, %v1557_v26  ;;  %v1945_v43 = vmul.f32 %v2602_v38, %v2919_v9  ;;  %v3626_v39 = vld [vmem:[#allocation14_spill] sm:$0xff] }
 0x16a   : > { %2099 = vst.msk [vmem:[%s3269_s13 + $0xa0] sm:$0xff] %vm2078_vm3, %v2066_v60  ;;  %v2069_v20 = vmax.f32 %v2037_v2, 0.0  ;;  %v1974_v27 = vadd.f32 %v2924_v10, %v1942_v63  ;;  %v1592_v46 = vadd.f32 %v2924_v10, %v1560_v0  ;;  %v1558_v53 = vmul.f32 %v2919_v9, %v1505_v22 }
 0x16b   : > { %v2008_v54 = vmax.f32 %v1591_v62, %v1976_v21  ;;  %v2067_v28 = vmax.f32 %v2035_v41, 0.0  ;;  %v1977_v1 = vadd.f32 %v2924_v10, %v1945_v43  ;;  %v1943_v17 = vmul.f32 %v2919_v9, %v1890_v51  ;;  %v3631_v43 = vld [vmem:[#allocation17_spill] sm:$0xff] }
 0x16c   : > { %2102 = vst.msk [vmem:[%s3269_s13 + $0xb8] sm:$0xff] %vm2078_vm3, %v2069_v20  ;;  %v2006_v3 = vmax.f32 %v1589_v42, %v1974_v27  ;;  %v1590_v4 = vadd.f32 %v2924_v10, %v1558_v53  ;;  %v3621_v16 = vmax.f32 %v3619_v14, %v3620_v15  ;;  %v3624_v24 = vmax.f32 %v3622_v12, %v3623_v23  ;;  %v3628_v20 = vld [vmem:[#allocation15_spill] sm:$0xff] }
 0x16d   : > { %v2040_v31 = vmax.f32 %v3618_v33, %v2008_v54  ;;  %2100 = vst.msk [vmem:[%s3269_s13 + $0xa8] sm:$0xff] %vm2078_vm3, %v2067_v28  ;;  %v2009_v49 = vmax.f32 %v1592_v46, %v1977_v1  ;;  %v1975_v50 = vadd.f32 %v2924_v10, %v1943_v17  ;;  %v2563_v45 = vpop.f32.mrb[60].mxu0  ;;  %v2605_v5 = vpop.f32.mrb[60].mxu1  ;;  %v3627_v2 = vmax.f32 %v3625_v30, %v3626_v39  ;;  %v3632_v54 = vld [vmem:[#allocation18_spill] sm:$0xff]  ;;  %v3635_v33 = vld [vmem:[#allocation20_spill] sm:$0xff] }
 0x16e   : > { %v2038_v57 = vmax.f32 %v3621_v16, %v2006_v3  ;;  %v1563_v55 = vmul.f32 %v2563_v45, %v2919_v9  ;;  %v1948_v11 = vmul.f32 %v2605_v5, %v2919_v9  ;;  %v1518_v6 = vpop.f32.mrb[61].mxu0  ;;  %v1903_v58 = vpop.f32.mrb[61].mxu1  ;;  %v3630_v7 = vmax.f32 %v3628_v20, %v3629_v29 }
 0x16f   : > { %v2072_v34 = vmax.f32 %v2040_v31, 0.0  ;;  %v2041_v18 = vmax.f32 %v3624_v24, %v2009_v49  ;;  %v2007_v19 = vmax.f32 %v1590_v4, %v1975_v50  ;;  %v1561_v10 = vmul.f32 %v2919_v9, %v1518_v6  ;;  %v2564_v35 = vpop.f32.mrb[62].mxu0  ;;  %v2606_v36 = vpop.f32.mrb[62].mxu1  ;;  %v3637_v4 = vld [vmem:[#allocation21_spill] sm:$0xff]  ;;  %v3638_v49 = vld [vmem:[#allocation22_spill] sm:$0xff] }
 0x170   : > { %v1946_v56 = vmul.f32 %v2919_v9, %v1903_v58  ;;  %v2070_v48 = vmax.f32 %v2038_v57, 0.0  ;;  %v1595_v13 = vadd.f32 %v2685_v44, %v1563_v55  ;;  %v1980_v40 = vadd.f32 %v2685_v44, %v1948_v11  ;;  %v1521_v60 = vpop.f32.mrb[63].mxu0  ;;  %v1906_v9 = vpop.f32.mrb[63].mxu1 }
 0x171   : > { %2105 = vst.msk [vmem:[%s3269_s13 + $0xd0] sm:$0xff] %vm2078_vm3, %v2072_v34  ;;  %v1564_v37 = vmul.f32 %v2686_v47, %v2564_v35  ;;  %v2073_v61 = vmax.f32 %v2041_v18, 0.0  ;;  %v2039_v25 = vmax.f32 %v3627_v2, %v2007_v19  ;;  %v1593_v26 = vadd.f32 %v2685_v44, %v1561_v10 }
 0x172   : > { %v1978_v59 = vadd.f32 %v2685_v44, %v1946_v56  ;;  %2103 = vst.msk [vmem:[%s3269_s13 + $0xc0] sm:$0xff] %vm2078_vm3, %v2070_v48  ;;  %v2012_v38 = vmax.f32 %v1595_v13, %v1980_v40  ;;  %v1949_v21 = vmul.f32 %v2686_v47, %v2606_v36  ;;  %v1562_v63 = vmul.f32 %v2686_v47, %v1521_v60 }
 0x173   : > { %v1596_v62 = vadd.f32 %v2685_v44, %v1564_v37  ;;  %2106 = vst.msk [vmem:[%s3269_s13 + $0xd8] sm:$0xff] %vm2078_vm3, %v2073_v61  ;;  %v2071_v0 = vmax.f32 %v2039_v25, 0.0  ;;  %v1947_v51 = vmul.f32 %v2686_v47, %v1906_v9  ;;  %v3633_v27 = vmax.f32 %v3631_v43, %v3632_v54 }
 0x174   : > { %v2010_v22 = vmax.f32 %v1593_v26, %v1978_v59  ;;  %v2044_v8 = vmax.f32 %v3630_v7, %v2012_v38  ;;  %v1981_v41 = vadd.f32 %v2685_v44, %v1949_v21  ;;  %v1594_v42 = vadd.f32 %v2685_v44, %v1562_v63 }
 0x175   : > { %2104 = vst.msk [vmem:[%s3269_s13 + $0xc8] sm:$0xff] %vm2078_vm3, %v2071_v0  ;;  %v1979_v53 = vadd.f32 %v2685_v44, %v1947_v51  ;;  %v3636_v31 = vmax.f32 %v3634_v32, %v3635_v33  ;;  %v3639_v50 = vmax.f32 %v3637_v4, %v3638_v49 }
 0x176   : > { %v2042_v46 = vmax.f32 %v3633_v27, %v2010_v22  ;;  %v2076_v28 = vmax.f32 %v2044_v8, 0.0  ;;  %v2013_v1 = vmax.f32 %v1596_v62, %v1981_v41 }
 0x177   : > { %v2011_v52 = vmax.f32 %v1594_v42, %v1979_v53 }
 0x178   : > { %v2074_v17 = vmax.f32 %v2042_v46, 0.0  ;;  %2109 = vst.msk [vmem:[%s3269_s13 + $0xf0] sm:$0xff] %vm2078_vm3, %v2076_v28  ;;  %v2045_v3 = vmax.f32 %v3636_v31, %v2013_v1 }
 0x179   : > { %v2043_v45 = vmax.f32 %v3639_v50, %v2011_v52 }
 0x17a   : > { %2107 = vst.msk [vmem:[%s3269_s13 + $0xe0] sm:$0xff] %vm2078_vm3, %v2074_v17  ;;  %v2077_v5 = vmax.f32 %v2045_v3, 0.0 }
 0x17b   : > { %v2075_v34 = vmax.f32 %v2043_v45, 0.0 }
 0x17c   : > { %2110 = vst.msk [vmem:[%s3269_s13 + $0xf8] sm:$0xff] %vm2078_vm3, %v2077_v5 }
 0x17d   : > { %2108 = vst.msk [vmem:[%s3269_s13 + $0xe8] sm:$0xff] %vm2078_vm3, %v2075_v34 }
 0x17e PF: > { %s17_s24 = sadd.s32 1, %s2693_s24  }
 0x17f   : > { %p14_p4 = scmp.ge.s32.totalorder %s17_s24, 4  }
 0x181   :  { %16 = sbr.rel (!%p14_p4) target bundleno = 1 (0x1), region = 87 }

// kernel: convnet_forward.5
= control target key start
LH: loop header
LB: loop body
LE: loop exit
PB: predicated region body
PF: predicated region fallthrough
CT: control target
= control target key end

     0   :  { %vm773_vm0 = vcmask 261120   ;;  %vm3658_vm1 = vcmask 523264   ;;  %s7537_s4 = inlined_call_operand.vmem [shape: bf16[800,64], index: 4, kind: input, shape index: {}]   ;;  %s7538_s0 = inlined_call_operand.vmem [shape: bf16[128,800], index: 0, kind: input, shape index: {}]   ;;  %s7539_s1 = inlined_call_operand.vmem [shape: bf16[128,800], index: 1, kind: input, shape index: {}]   ;;  %s7540_s2 = inlined_call_operand.vmem [shape: bf16[128,800], index: 2, kind: input, shape index: {}]   ;;  %s7541_s3 = inlined_call_operand.vmem [shape: bf16[128,800], index: 3, kind: input, shape index: {}]   ;;  %s7542_s5 = inlined_call_operand.vmem [shape: f32[1,64], index: 5, kind: input, shape index: {}]   ;;  %s7543_s6 = inlined_call_operand.vmem [shape: f32[1,64], index: 6, kind: input, shape index: {}]   ;;  %s7544_s7 = inlined_call_operand.vmem [shape: f32[128,64], index: 7, kind: output, shape index: {}]  }
   0x1   :  { %v5341_v0 = vld [vmem:[%s7537_s4 + $0x40] sm:$0xff]   ;;  %v5364_v4 = vld [vmem:[%s7537_s4 + $0x48] sm:$0xff]   ;;  %v5388_v8 = vld [vmem:[%s7537_s4 + $0x50] sm:$0xff]  }
   0x2   :  { %v5346_v1 = vld [vmem:[%s7537_s4 + $0xc0] sm:$0xff]   ;;  %3987 = vmatprep.subr.bf16.mxu0 %v5341_v0  ;;  %v5370_v5 = vld [vmem:[%s7537_s4 + $0xc8] sm:$0xff]   ;;  %v5394_v9 = vld [vmem:[%s7537_s4 + $0xd0] sm:$0xff]  }
   0x3   :  { %v5352_v2 = vld [vmem:[%s7537_s4] sm:$0xff]   ;;  %4051 = vmatprep.subr.bf16.mxu1 %v5346_v1  ;;  %v5376_v6 = vld [vmem:[%s7537_s4 + $0x8] sm:$0xff]   ;;  %v5400_v10 = vld [vmem:[%s7537_s4 + $0x10] sm:$0xff]  }
   0x4   :  { %v5358_v3 = vld [vmem:[%s7537_s4 + $0x80] sm:$0xff]   ;;  %3988 = vmatpush3.bf16.msra.mxu0 %v5352_v2  ;;  %v5382_v7 = vld [vmem:[%s7537_s4 + $0x88] sm:$0xff]   ;;  %v5406_v11 = vld [vmem:[%s7537_s4 + $0x90] sm:$0xff]  }
   0x5   :  { %4052 = vmatpush3.bf16.msra.mxu1 %v5358_v3  ;;  %3989 = vmatprep.subr.bf16.mxu0 %v5364_v4  ;;  %v5412_v12 = vld [vmem:[%s7537_s4 + $0x58] sm:$0xff]   ;;  %v5436_v16 = vld [vmem:[%s7537_s4 + $0x60] sm:$0xff]   ;;  %v5460_v20 = vld [vmem:[%s7537_s4 + $0x68] sm:$0xff]  }
   0x6   :  { %4053 = vmatprep.subr.bf16.mxu1 %v5370_v5  ;;  %v5418_v13 = vld [vmem:[%s7537_s4 + $0xd8] sm:$0xff]   ;;  %v5442_v17 = vld [vmem:[%s7537_s4 + $0xe0] sm:$0xff]   ;;  %v5466_v21 = vld [vmem:[%s7537_s4 + $0xe8] sm:$0xff]  }
   0x7   :  { %v5424_v14 = vld [vmem:[%s7537_s4 + $0x18] sm:$0xff]   ;;  %v5448_v18 = vld [vmem:[%s7537_s4 + $0x20] sm:$0xff]   ;;  %v5472_v22 = vld [vmem:[%s7537_s4 + $0x28] sm:$0xff]  }
   0x8   :  { %3990 = vmatpush3.bf16.msra.mxu0 %v5376_v6  ;;  %v5430_v15 = vld [vmem:[%s7537_s4 + $0x98] sm:$0xff]   ;;  %v5454_v19 = vld [vmem:[%s7537_s4 + $0xa0] sm:$0xff]   ;;  %v5478_v23 = vld [vmem:[%s7537_s4 + $0xa8] sm:$0xff]  }
   0x9   :  { %4054 = vmatpush3.bf16.msra.mxu1 %v5382_v7  ;;  %3991 = vmatprep.subr.bf16.mxu0 %v5388_v8  ;;  %v5484_v24 = vld [vmem:[%s7537_s4 + $0x70] sm:$0xff]   ;;  %v5508_v28 = vld [vmem:[%s7537_s4 + $0x78] sm:$0xff]   ;;  %v4909_v33 = vld [vmem:[%s7538_s0 + $0x4] ss:$28 sps:$4 sm:$0xff]  }
   0xa   :  { %4055 = vmatprep.subr.bf16.mxu1 %v5394_v9  ;;  %v5490_v25 = vld [vmem:[%s7537_s4 + $0xf0] sm:$0xff]   ;;  %v5514_v29 = vld [vmem:[%s7537_s4 + $0xf8] sm:$0xff]   ;;  %v4910_v34 = vld [vmem:[%s7538_s0 + $0x8] ss:$28 sps:$4 sm:$0xff]   ;;  %830 = vmatprep.mubr.bf16.mxu0 %v4909_v33 }
   0xb   :  { %v5496_v26 = vld [vmem:[%s7537_s4 + $0x30] sm:$0xff]   ;;  %v5520_v30 = vld [vmem:[%s7537_s4 + $0x38] sm:$0xff]   ;;  %v4912_v35 = vld [vmem:[%s7538_s0 + $0xc] ss:$28 sps:$4 sm:$0xff]  }
   0xc   :  { %3992 = vmatpush3.bf16.msra.mxu0 %v5400_v10  ;;  %v5502_v27 = vld [vmem:[%s7537_s4 + $0xb0] sm:$0xff]   ;;  %v5526_v31 = vld [vmem:[%s7537_s4 + $0xb8] sm:$0xff]   ;;  %v5545_v36 = vld [vmem:[%s7537_s4 + $0x180] sm:$0xff]   ;;  %927 = vmatprep.mubr.bf16.mxu1 %v4912_v35 }
   0xd   :  { %4056 = vmatpush3.bf16.msra.mxu1 %v5406_v11  ;;  %3993 = vmatprep.subr.bf16.mxu0 %v5412_v12  ;;  %v4907_v32 = vld [vmem:[%s7538_s0] ss:$28 sps:$4 sm:$0xff]   ;;  %v4920_v41 = vld [vmem:[%s7538_s0 + $0x38] ss:$28 sps:$4 sm:$0xff]   ;;  %v5576_v43 = vld [vmem:[%s7537_s4 + $0x148] sm:$0xff]  }
   0xe   :  { %4057 = vmatprep.subr.bf16.mxu1 %v5418_v13  ;;  %v5550_v37 = vld [vmem:[%s7537_s4 + $0x140] sm:$0xff]   ;;  %v4916_v39 = vld [vmem:[%s7538_s0 + $0x3c] ss:$28 sps:$4 sm:$0xff]   ;;  %v5581_v44 = vld [vmem:[%s7537_s4 + $0x108] sm:$0xff]  }
   0xf   :  { %v5556_v38 = vld [vmem:[%s7537_s4 + $0x100] sm:$0xff]   ;;  %v4924_v45 = vld [vmem:[%s7538_s0 + $0x74] ss:$28 sps:$4 sm:$0xff]   ;;  %v4926_v46 = vld [vmem:[%s7538_s0 + $0x7c] ss:$28 sps:$4 sm:$0xff]  }
  0x10   :  { %3994 = vmatpush3.bf16.msra.mxu0 %v5424_v14  ;;  %v4918_v40 = vld [vmem:[%s7538_s0 + $0x44] ss:$28 sps:$4 sm:$0xff]   ;;  %v5594_v47 = vld [vmem:[%s7537_s4 + $0x150] sm:$0xff]   ;;  %v4932_v51 = vld [vmem:[%s7538_s0 + $0xac] ss:$28 sps:$4 sm:$0xff]  }
  0x11   :  { %4058 = vmatpush3.bf16.msra.mxu1 %v5430_v15  ;;  %3995 = vmatprep.subr.bf16.mxu0 %v5436_v16  ;;  %v4921_v42 = vld [vmem:[%s7538_s0 + $0x40] ss:$28 sps:$4 sm:$0xff]   ;;  %v5599_v48 = vld [vmem:[%s7537_s4 + $0x110] sm:$0xff]   ;;  %v4936_v55 = vld [vmem:[%s7538_s0 + $0xa8] ss:$28 sps:$4 sm:$0xff]  }
  0x12   :  { %4059 = vmatprep.subr.bf16.mxu1 %v5442_v17  ;;  %v4928_v49 = vld [vmem:[%s7538_s0 + $0x70] ss:$28 sps:$4 sm:$0xff]   ;;  %v4929_v50 = vld [vmem:[%s7538_s0 + $0x78] ss:$28 sps:$4 sm:$0xff]   ;;  %v4940_v57 = vld [vmem:[%s7538_s0 + $0xe4] ss:$28 sps:$4 sm:$0xff]  }
  0x13   :  { %v4934_v52 = vld [vmem:[%s7538_s0 + $0xb4] ss:$28 sps:$4 sm:$0xff]   ;;  %v5618_v53 = vld [vmem:[%s7537_s4 + $0x158] sm:$0xff]   ;;  %v5639_v58 = vld [vmem:[%s7537_s4 + $0x188] sm:$0xff]  }
  0x14   :  { %3996 = vmatpush3.bf16.msra.mxu0 %v5448_v18  ;;  %v5623_v54 = vld [vmem:[%s7537_s4 + $0x118] sm:$0xff]   ;;  %v4937_v56 = vld [vmem:[%s7538_s0 + $0xb0] ss:$28 sps:$4 sm:$0xff]   ;;  %v5644_v59 = vld [vmem:[%s7537_s4 + $0x160] sm:$0xff]  }
  0x15   :  { %4060 = vmatpush3.bf16.msra.mxu1 %v5454_v19  ;;  %3997 = vmatprep.subr.bf16.mxu0 %v5460_v20  ;;  %v5650_v60 = vld [vmem:[%s7537_s4 + $0x120] sm:$0xff]   ;;  %v4942_v61 = vld [vmem:[%s7538_s0 + $0xec] ss:$28 sps:$4 sm:$0xff]   ;;  %v4949_v33 = vld [vmem:[%s7538_s0 + $0x11c] ss:$28 sps:$4 sm:$0xff]  }
  0x16   :  { %4061 = vmatprep.subr.bf16.mxu1 %v5466_v21  ;;  %v5662_v62 = vld [vmem:[%s7537_s4 + $0x168] sm:$0xff]   ;;  %v5686_v35 = vld [vmem:[%s7537_s4 + $0x170] sm:$0xff]  }
  0x17   :  { %v5667_v63 = vld [vmem:[%s7537_s4 + $0x128] sm:$0xff]  }
  0x18   :  { %3998 = vmatpush3.bf16.msra.mxu0 %v5472_v22 }
  0x19   :  { %4062 = vmatpush3.bf16.msra.mxu1 %v5478_v23  ;;  %3999 = vmatprep.subr.bf16.mxu0 %v5484_v24 }
  0x1a   :  { %4063 = vmatprep.subr.bf16.mxu1 %v5490_v25 }
  0x1c   :  { %4000 = vmatpush3.bf16.msra.mxu0 %v5496_v26 }
  0x1d   :  { %4064 = vmatpush3.bf16.msra.mxu1 %v5502_v27  ;;  %4001 = vmatprep.subr.bf16.mxu0 %v5508_v28 }
  0x1e   :  { %4065 = vmatprep.subr.bf16.mxu1 %v5514_v29 }
  0x20   :  { %4002 = vmatpush3.bf16.msra.mxu0 %v5520_v30 }
  0x21   :  { %4066 = vmatpush3.bf16.msra.mxu1 %v5526_v31  ;;  %4115 = vmatprep.subr.bf16.mxu0 %v5550_v37 }
  0x22   :  { %4795 = vmatprep.subr.bf16.mxu1 %v5545_v36 }
  0x23   :  { %831 = vmatmul.mubr.bf16.vlgmr.msra.gmra.mrb[0].mxu0 %v4907_v32  ;;  %v4944_v32 = vld [vmem:[%s7538_s0 + $0xe0] ss:$28 sps:$4 sm:$0xff]  }
  0x24   :  { %928 = vmatmul.mubr.bf16.vlgmr.msra.gmra.mrb[0].mxu1 %v4910_v34  ;;  %4116 = vmatpush3.bf16.msra.mxu0 %v5556_v38  ;;  %v4951_v34 = vld [vmem:[%s7538_s0 + $0x124] ss:$28 sps:$4 sm:$0xff]  }
  0x25   :  { %4796 = vmatpush3.bf16.msra.mxu1 %v5545_v36  ;;  %838 = vmatprep.mubr.bf16.mxu0 %v4916_v39  ;;  %v5691_v39 = vld [vmem:[%s7537_s4 + $0x130] sm:$0xff]  }
  0x26   :  { %935 = vmatprep.mubr.bf16.mxu1 %v4918_v40  ;;  %4117 = vmatprep.subr.bf16.mxu0 %v5576_v43  ;;  %v5698_v40 = vld [vmem:[%s7537_s4 + $0x178] sm:$0xff]  }
  0x27   :  { %4797 = vmatprep.subr.bf16.mxu1 %v5639_v58 }
  0x28   :  { %4118 = vmatpush3.bf16.msra.mxu0 %v5581_v44 }
  0x29   :  { %4119 = vmatprep.subr.bf16.mxu0 %v5594_v47  ;;  %4798 = vmatpush3.bf16.msra.mxu1 %v5639_v58 }
  0x2a   :  { %4189 = vmatprep.subr.bf16.mxu1 %v5341_v0  ;;  %v4945_v0 = vld [vmem:[%s7538_s0 + $0xe8] ss:$28 sps:$4 sm:$0xff]  }
  0x2b   :  { %839 = vmatmul.mubr.bf16.gmra.mrb[4].mxu0 %v4920_v41  ;;  %v5703_v41 = vld [vmem:[%s7537_s4 + $0x138] sm:$0xff]  }
  0x2c   :  { %936 = vmatmul.mubr.bf16.gmra.mrb[4].mxu1 %v4921_v42  ;;  %846 = vmatprep.mubr.bf16.mxu0 %v4924_v45  ;;  %v4953_v42 = vld [vmem:[%s7538_s0 + $0x118] ss:$28 sps:$4 sm:$0xff]   ;;  %v4954_v45 = vld [vmem:[%s7538_s0 + $0x120] ss:$28 sps:$4 sm:$0xff]  }
  0x2d   :  { %943 = vmatprep.mubr.bf16.mxu1 %v4926_v46  ;;  %4120 = vmatpush3.bf16.msra.mxu0 %v5599_v48  ;;  %v4957_v46 = vld [vmem:[%s7538_s0 + $0x154] ss:$28 sps:$4 sm:$0xff]  }
  0x2e   :  { %4121 = vmatprep.subr.bf16.mxu0 %v5618_v53 }
  0x31   :  { %4122 = vmatpush3.bf16.msra.mxu0 %v5623_v54 }
  0x32   :  { %4123 = vmatprep.subr.bf16.mxu0 %v5644_v59 }
  0x33   :  { %847 = vmatmul.mubr.bf16.gmra.mrb[8].mxu0 %v4928_v49  ;;  %v4959_v49 = vld [vmem:[%s7538_s0 + $0x15c] ss:$28 sps:$4 sm:$0xff]  }
  0x34   :  { %944 = vmatmul.mubr.bf16.gmra.mrb[8].mxu1 %v4929_v50  ;;  %854 = vmatprep.mubr.bf16.mxu0 %v4932_v51  ;;  %v4961_v50 = vld [vmem:[%s7538_s0 + $0x150] ss:$28 sps:$4 sm:$0xff]   ;;  %v4962_v51 = vld [vmem:[%s7538_s0 + $0x158] ss:$28 sps:$4 sm:$0xff]  }
  0x35   :  { %951 = vmatprep.mubr.bf16.mxu1 %v4934_v52  ;;  %4124 = vmatpush3.bf16.msra.mxu0 %v5650_v60  ;;  %v4965_v52 = vld [vmem:[%s7538_s0 + $0x18c] ss:$28 sps:$4 sm:$0xff]  }
  0x36   :  { %4125 = vmatprep.subr.bf16.mxu0 %v5662_v62 }
  0x39   :  { %4126 = vmatpush3.bf16.msra.mxu0 %v5667_v63 }
  0x3a   :  { %4127 = vmatprep.subr.bf16.mxu0 %v5686_v35 }
  0x3b   :  { %855 = vmatmul.mubr.bf16.gmra.mrb[12].mxu0 %v4936_v55  ;;  %v4969_v55 = vld [vmem:[%s7538_s0 + $0x188] ss:$28 sps:$4 sm:$0xff]  }
  0x3c   :  { %952 = vmatmul.mubr.bf16.gmra.mrb[12].mxu1 %v4937_v56  ;;  %862 = vmatprep.mubr.bf16.mxu0 %v4940_v57  ;;  %v4970_v56 = vld [vmem:[%s7538_s0 + $0x190] ss:$28 sps:$4 sm:$0xff]  }
  0x3d   :  { %959 = vmatprep.mubr.bf16.mxu1 %v4942_v61  ;;  %4128 = vmatpush3.bf16.msra.mxu0 %v5691_v39  ;;  %v4975_v57 = vld [vmem:[%s7538_s0 + $0x14] ss:$28 sps:$4 sm:$0xff]  }
  0x3e   :  { %4129 = vmatprep.subr.bf16.mxu0 %v5698_v40  ;;  %v4976_v61 = vld [vmem:[%s7538_s0 + $0x18] ss:$28 sps:$4 sm:$0xff]  }
  0x41   :  { %4130 = vmatpush3.bf16.msra.mxu0 %v5703_v41 }
  0x42   :  { %4253 = vmatprep.subr.bf16.mxu0 %v5346_v1  ;;  %v4967_v1 = vld [vmem:[%s7538_s0 + $0x194] ss:$28 sps:$4 sm:$0xff]  }
  0x43   :  { %863 = vmatmul.mubr.bf16.gmra.mrb[16].mxu0 %v4944_v32  ;;  %v4973_v32 = vld [vmem:[%s7538_s0 + $0x10] ss:$28 sps:$4 sm:$0xff]  }
  0x44   :  { %960 = vmatmul.mubr.bf16.gmra.mrb[16].mxu1 %v4945_v0  ;;  %870 = vmatprep.mubr.bf16.mxu0 %v4949_v33  ;;  %v4977_v0 = vld [vmem:[%s7538_s0 + $0x50] ss:$28 sps:$4 sm:$0xff]  }
  0x45   :  { %967 = vmatprep.mubr.bf16.mxu1 %v4951_v34  ;;  %v4978_v33 = vld [vmem:[%s7538_s0 + $0x4c] ss:$28 sps:$4 sm:$0xff]  }
  0x46   :  { %v4980_v34 = vld [vmem:[%s7538_s0 + $0x88] ss:$28 sps:$4 sm:$0xff]  }
  0x4b   :  { %871 = vmatmul.mubr.bf16.gmra.mrb[20].mxu0 %v4953_v42  ;;  %v4981_v42 = vld [vmem:[%s7538_s0 + $0x48] ss:$28 sps:$4 sm:$0xff]  }
  0x4c   :  { %968 = vmatmul.mubr.bf16.gmra.mrb[20].mxu1 %v4954_v45  ;;  %878 = vmatprep.mubr.bf16.mxu0 %v4957_v46  ;;  %v4982_v45 = vld [vmem:[%s7538_s0 + $0xc0] ss:$28 sps:$4 sm:$0xff]  }
  0x4d   :  { %975 = vmatprep.mubr.bf16.mxu1 %v4959_v49  ;;  %v5973_v46 = vld [vmem:[%s7537_s4 + $0x80] sm:$0xff]   ;;  %v5979_v49 = vld [vmem:[%s7537_s4 + $0xc8] sm:$0xff]  }
  0x53   :  { %879 = vmatmul.mubr.bf16.gmra.mrb[24].mxu0 %v4961_v50  ;;  %v5051_v50 = vld [vmem:[%s7539_s1 + $0x120] ss:$28 sps:$4 sm:$0xff]  }
  0x54   :  { %976 = vmatmul.mubr.bf16.gmra.mrb[24].mxu1 %v4962_v51  ;;  %886 = vmatprep.mubr.bf16.mxu0 %v4965_v52  ;;  %v5052_v51 = vld [vmem:[%s7539_s1 + $0x48] ss:$28 sps:$4 sm:$0xff]   ;;  %v5053_v52 = vld [vmem:[%s7539_s1 + $0x15c] ss:$28 sps:$4 sm:$0xff]  }
  0x55   :  { %983 = vmatprep.mubr.bf16.mxu1 %v4967_v1  ;;  %v5994_v1 = vld [vmem:[%s7537_s4 + $0x88] sm:$0xff]  }
  0x5b   :  { %887 = vmatmul.mubr.bf16.gmra.mrb[28].mxu0 %v4969_v55  ;;  %v5055_v55 = vld [vmem:[%s7539_s1 + $0x84] ss:$28 sps:$4 sm:$0xff]  }
  0x5c   :  { %984 = vmatmul.mubr.bf16.gmra.mrb[28].mxu1 %v4970_v56  ;;  %1024 = vmatprep.mubr.bf16.mxu0 %v4975_v57  ;;  %v6003_v56 = vld [vmem:[%s7537_s4 + $0xd0] sm:$0xff]  }
  0x5d   :  { %4799 = vmatprep.mubr.msk.bf16.mxu1 %vm773_vm0, %v4976_v61  ;;  %v6009_v57 = vld [vmem:[%s7537_s4 + $0x90] sm:$0xff]   ;;  %v6015_v61 = vld [vmem:[%s7537_s4 + $0xd8] sm:$0xff]  }
  0x63   :  { %1025 = vmatmul.mubr.bf16.vlgmr.msra.gmra.mrb[32].mxu0 %v4973_v32  ;;  %v5057_v32 = vld [vmem:[%s7539_s1 + $0x158] ss:$28 sps:$4 sm:$0xff]  }
  0x64   :  { %4800 = vmatmul.mubr.msk.bf16.vlgmr.msra.gmra.mrb[32].mxu1 %vm773_vm0, %v4977_v0  ;;  %4254 = vmatpush3.bf16.msra.mxu0 %v5358_v3  ;;  %v4985_v3 = vld [vmem:[%s7538_s0 + $0xf8] ss:$28 sps:$4 sm:$0xff]   ;;  %v5058_v0 = vld [vmem:[%s7539_s1 + $0x80] ss:$28 sps:$4 sm:$0xff]  }
  0x65   :  { %4190 = vmatpush3.bf16.msra.mxu1 %v5352_v2  ;;  %1032 = vmatprep.mubr.bf16.mxu0 %v4978_v33  ;;  %v4983_v2 = vld [vmem:[%s7538_s0 + $0x84] ss:$28 sps:$4 sm:$0xff]   ;;  %v5059_v33 = vld [vmem:[%s7539_s1 + $0x194] ss:$28 sps:$4 sm:$0xff]  }
  0x66   :  { %4191 = vmatprep.subr.bf16.mxu1 %v5364_v4  ;;  %4803 = vmatprep.mubr.msk.bf16.mxu1 %vm773_vm0, %v4980_v34  ;;  %v4986_v4 = vld [vmem:[%s7538_s0 + $0x80] ss:$28 sps:$4 sm:$0xff]  }
  0x67   :  { %4255 = vmatprep.subr.bf16.mxu0 %v5370_v5  ;;  %v4987_v5 = vld [vmem:[%s7538_s0 + $0x130] ss:$28 sps:$4 sm:$0xff]   ;;  %v5061_v34 = vld [vmem:[%s7539_s1 + $0xbc] ss:$28 sps:$4 sm:$0xff]  }
  0x68   :  { %4256 = vmatpush3.bf16.msra.mxu0 %v5382_v7  ;;  %v4990_v7 = vld [vmem:[%s7538_s0 + $0x168] ss:$28 sps:$4 sm:$0xff]  }
  0x69   :  { %4192 = vmatpush3.bf16.msra.mxu1 %v5376_v6  ;;  %4257 = vmatprep.subr.bf16.mxu0 %v5394_v9  ;;  %v4988_v6 = vld [vmem:[%s7538_s0 + $0xbc] ss:$28 sps:$4 sm:$0xff]  }
  0x6a   :  { %4193 = vmatprep.subr.bf16.mxu1 %v5388_v8  ;;  %v4991_v8 = vld [vmem:[%s7538_s0 + $0xb8] ss:$28 sps:$4 sm:$0xff]   ;;  %v4992_v9 = vld [vmem:[%s7538_s0 + $0x1a0] ss:$28 sps:$4 sm:$0xff]  }
  0x6b   :  { %1033 = vmatmul.mubr.bf16.gmra.mrb[36].mxu0 %v4981_v42  ;;  %v6033_v42 = vld [vmem:[%s7537_s4 + $0x98] sm:$0xff]  }
  0x6c   :  { %4804 = vmatmul.mubr.msk.bf16.gmra.mrb[36].mxu1 %vm773_vm0, %v4982_v45  ;;  %1040 = vmatprep.mubr.bf16.mxu0 %v4983_v2  ;;  %v6039_v45 = vld [vmem:[%s7537_s4 + $0xe0] sm:$0xff]  }
  0x6d   :  { %4194 = vmatpush3.bf16.msra.mxu1 %v5400_v10  ;;  %4807 = vmatprep.mubr.msk.bf16.mxu1 %vm773_vm0, %v4985_v3  ;;  %v4993_v10 = vld [vmem:[%s7538_s0 + $0xf4] ss:$28 sps:$4 sm:$0xff]   ;;  %v6045_v2 = vld [vmem:[%s7537_s4 + $0xa0] sm:$0xff]   ;;  %v6051_v3 = vld [vmem:[%s7537_s4 + $0xe8] sm:$0xff]  }
  0x6e   :  { %4195 = vmatprep.subr.bf16.mxu1 %v5412_v12  ;;  %4258 = vmatpush3.bf16.msra.mxu0 %v5406_v11  ;;  %v4997_v11 = vld [vmem:[%s7539_s1 + $0x4] ss:$28 sps:$4 sm:$0xff]  }
  0x6f   :  { %4259 = vmatprep.subr.bf16.mxu0 %v5418_v13  ;;  %v4995_v12 = vld [vmem:[%s7539_s1] ss:$28 sps:$4 sm:$0xff]   ;;  %v4998_v13 = vld [vmem:[%s7538_s0 + $0xf0] ss:$28 sps:$4 sm:$0xff]  }
  0x71   :  { %4196 = vmatpush3.bf16.msra.mxu1 %v5424_v14  ;;  %v4999_v14 = vld [vmem:[%s7538_s0 + $0x12c] ss:$28 sps:$4 sm:$0xff]  }
  0x72   :  { %4197 = vmatprep.subr.bf16.mxu1 %v5436_v16  ;;  %4260 = vmatpush3.bf16.msra.mxu0 %v5430_v15  ;;  %v5001_v15 = vld [vmem:[%s7539_s1 + $0x3c] ss:$28 sps:$4 sm:$0xff]   ;;  %v5003_v16 = vld [vmem:[%s7538_s0 + $0x128] ss:$28 sps:$4 sm:$0xff]  }
  0x73   :  { %1041 = vmatmul.mubr.bf16.gmra.mrb[40].mxu0 %v4986_v4  ;;  %4261 = vmatprep.subr.bf16.mxu0 %v5442_v17  ;;  %v5004_v17 = vld [vmem:[%s7539_s1 + $0x38] ss:$28 sps:$4 sm:$0xff]   ;;  %v5063_v4 = vld [vmem:[%s7539_s1 + $0x190] ss:$28 sps:$4 sm:$0xff]  }
  0x74   :  { %4808 = vmatmul.mubr.msk.bf16.gmra.mrb[40].mxu1 %vm773_vm0, %v4987_v5  ;;  %1048 = vmatprep.mubr.bf16.mxu0 %v4988_v6  ;;  %v5064_v5 = vld [vmem:[%s7539_s1 + $0xb8] ss:$28 sps:$4 sm:$0xff]  }
  0x75   :  { %4198 = vmatpush3.bf16.msra.mxu1 %v5448_v18  ;;  %4811 = vmatprep.mubr.msk.bf16.mxu1 %vm773_vm0, %v4990_v7  ;;  %v5005_v18 = vld [vmem:[%s7538_s0 + $0x164] ss:$28 sps:$4 sm:$0xff]   ;;  %v5067_v6 = vld [vmem:[%s7539_s1 + $0x18] ss:$28 sps:$4 sm:$0xff]  }
  0x76   :  { %4199 = vmatprep.subr.bf16.mxu1 %v5460_v20  ;;  %4262 = vmatpush3.bf16.msra.mxu0 %v5454_v19  ;;  %v5007_v19 = vld [vmem:[%s7539_s1 + $0x74] ss:$28 sps:$4 sm:$0xff]   ;;  %v5009_v20 = vld [vmem:[%s7538_s0 + $0x160] ss:$28 sps:$4 sm:$0xff]  }
  0x77   :  { %4263 = vmatprep.subr.bf16.mxu0 %v5466_v21  ;;  %v5010_v21 = vld [vmem:[%s7539_s1 + $0x70] ss:$28 sps:$4 sm:$0xff]  }
  0x78   :  { %v5065_v7 = vld [vmem:[%s7539_s1 + $0xf4] ss:$28 sps:$4 sm:$0xff]  }
  0x79   :  { %4200 = vmatpush3.bf16.msra.mxu1 %v5472_v22  ;;  %v5011_v22 = vld [vmem:[%s7538_s0 + $0x19c] ss:$28 sps:$4 sm:$0xff]  }
  0x7a   :  { %4201 = vmatprep.subr.bf16.mxu1 %v5484_v24  ;;  %4264 = vmatpush3.bf16.msra.mxu0 %v5478_v23  ;;  %v5013_v23 = vld [vmem:[%s7539_s1 + $0xac] ss:$28 sps:$4 sm:$0xff]   ;;  %v5015_v24 = vld [vmem:[%s7538_s0 + $0x198] ss:$28 sps:$4 sm:$0xff]  }
  0x7b   :  { %1049 = vmatmul.mubr.bf16.gmra.mrb[44].mxu0 %v4991_v8  ;;  %4265 = vmatprep.subr.bf16.mxu0 %v5490_v25  ;;  %v5016_v25 = vld [vmem:[%s7539_s1 + $0xa8] ss:$28 sps:$4 sm:$0xff]  }
  0x7c   :  { %4812 = vmatmul.mubr.msk.bf16.gmra.mrb[44].mxu1 %vm773_vm0, %v4992_v9  ;;  %1056 = vmatprep.mubr.bf16.mxu0 %v4993_v10  ;;  %v6069_v8 = vld [vmem:[%s7537_s4 + $0xa8] sm:$0xff]   ;;  %v6075_v9 = vld [vmem:[%s7537_s4 + $0xf0] sm:$0xff]  }
  0x7d   :  { %4202 = vmatpush3.bf16.msra.mxu1 %v5496_v26  ;;  %1630 = vmatprep.mubr.bf16.mxu1 %v4997_v11  ;;  %v5021_v26 = vld [vmem:[%s7539_s1 + $0xc] ss:$28 sps:$4 sm:$0xff]   ;;  %v6082_v10 = vld [vmem:[%s7537_s4 + $0xb0] sm:$0xff]   ;;  %v6088_v11 = vld [vmem:[%s7537_s4 + $0xf8] sm:$0xff]  }
  0x7e   :  { %4203 = vmatprep.subr.bf16.mxu1 %v5508_v28  ;;  %4266 = vmatpush3.bf16.msra.mxu0 %v5502_v27  ;;  %v5017_v27 = vld [vmem:[%s7539_s1 + $0xe4] ss:$28 sps:$4 sm:$0xff]  }
  0x7f   :  { %4267 = vmatprep.subr.bf16.mxu0 %v5514_v29  ;;  %v5019_v28 = vld [vmem:[%s7539_s1 + $0x8] ss:$28 sps:$4 sm:$0xff]   ;;  %v5022_v29 = vld [vmem:[%s7539_s1 + $0xe0] ss:$28 sps:$4 sm:$0xff]  }
  0x81   :  { %4204 = vmatpush3.bf16.msra.mxu1 %v5520_v30  ;;  %v5023_v30 = vld [vmem:[%s7539_s1 + $0x11c] ss:$28 sps:$4 sm:$0xff]  }
  0x82   :  { %4317 = vmatprep.subr.bf16.mxu1 %v5550_v37  ;;  %4268 = vmatpush3.bf16.msra.mxu0 %v5526_v31  ;;  %v5025_v31 = vld [vmem:[%s7539_s1 + $0x44] ss:$28 sps:$4 sm:$0xff]  }
  0x83   :  { %1057 = vmatmul.mubr.bf16.gmra.mrb[48].mxu0 %v4998_v13  ;;  %4815 = vmatprep.subr.bf16.mxu0 %v5545_v36  ;;  %v5910_v37 = vld [vmem:[%s7537_s4 + $0xc0] sm:$0xff]   ;;  %v5068_v13 = vld [vmem:[%s7539_s1 + $0xf0] ss:$28 sps:$4 sm:$0xff]  }
  0x84   :  { %1631 = vmatmul.mubr.bf16.vlgmr.msra.gmra.mrb[48].mxu1 %v4995_v12  ;;  %1064 = vmatprep.mubr.bf16.mxu0 %v4999_v14  ;;  %v5069_v12 = vld [vmem:[%s7539_s1 + $0x50] ss:$28 sps:$4 sm:$0xff]  }
  0x85   :  { %4318 = vmatpush3.bf16.msra.mxu1 %v5556_v38  ;;  %1638 = vmatprep.mubr.bf16.mxu1 %v5001_v15  ;;  %v5028_v38 = vld [vmem:[%s7539_s1 + $0x40] ss:$28 sps:$4 sm:$0xff]   ;;  %v5070_v14 = vld [vmem:[%s7539_s1 + $0x12c] ss:$28 sps:$4 sm:$0xff]  }
  0x86   :  { %4319 = vmatprep.subr.bf16.mxu1 %v5576_v43  ;;  %v5027_v43 = vld [vmem:[%s7539_s1 + $0x118] ss:$28 sps:$4 sm:$0xff]  }
  0x87   :  { %v6103_v15 = vld [vmem:[%s7537_s4 + $0xb8] sm:$0xff]  }
  0x89   :  { %4320 = vmatpush3.bf16.msra.mxu1 %v5581_v44  ;;  %v5031_v44 = vld [vmem:[%s7539_s1 + $0x7c] ss:$28 sps:$4 sm:$0xff]  }
  0x8a   :  { %4321 = vmatprep.subr.bf16.mxu1 %v5594_v47  ;;  %v5931_v47 = vld [vmem:[%s7537_s4 + $0x40] sm:$0xff]  }
  0x8b   :  { %1065 = vmatmul.mubr.bf16.gmra.mrb[52].mxu0 %v5003_v16  ;;  %v5072_v16 = vld [vmem:[%s7539_s1 + $0x88] ss:$28 sps:$4 sm:$0xff]  }
  0x8c   :  { %1639 = vmatmul.mubr.bf16.gmra.mrb[52].mxu1 %v5004_v17  ;;  %1072 = vmatprep.mubr.bf16.mxu0 %v5005_v18  ;;  %v6112_v17 = vld [vmem:[%s7537_s4 + $0x180] sm:$0xff]  }
  0x8d   :  { %1646 = vmatprep.mubr.bf16.mxu1 %v5007_v19  ;;  %4322 = vmatpush3.bf16.msra.mxu1 %v5599_v48  ;;  %v5034_v48 = vld [vmem:[%s7539_s1 + $0x78] ss:$28 sps:$4 sm:$0xff]   ;;  %v6119_v18 = vld [vmem:[%s7537_s4] sm:$0xff]   ;;  %v6125_v19 = vld [vmem:[%s7537_s4 + $0x48] sm:$0xff]  }
  0x8e   :  { %4323 = vmatprep.subr.bf16.mxu1 %v5618_v53  ;;  %v5033_v53 = vld [vmem:[%s7539_s1 + $0x150] ss:$28 sps:$4 sm:$0xff]  }
  0x91   :  { %4324 = vmatpush3.bf16.msra.mxu1 %v5623_v54  ;;  %v5037_v54 = vld [vmem:[%s7539_s1 + $0xb4] ss:$28 sps:$4 sm:$0xff]  }
  0x92   :  { %4325 = vmatprep.subr.bf16.mxu1 %v5644_v59  ;;  %v5040_v59 = vld [vmem:[%s7539_s1 + $0xb0] ss:$28 sps:$4 sm:$0xff]  }
  0x93   :  { %1073 = vmatmul.mubr.bf16.gmra.mrb[56].mxu0 %v5009_v20  ;;  %v5074_v20 = vld [vmem:[%s7539_s1 + $0xc0] ss:$28 sps:$4 sm:$0xff]  }
  0x94   :  { %1647 = vmatmul.mubr.bf16.gmra.mrb[56].mxu1 %v5010_v21  ;;  %1080 = vmatprep.mubr.bf16.mxu0 %v5011_v22  ;;  %v5073_v21 = vld [vmem:[%s7539_s1 + $0x128] ss:$28 sps:$4 sm:$0xff]  }
  0x95   :  { %1654 = vmatprep.mubr.bf16.mxu1 %v5013_v23  ;;  %4326 = vmatpush3.bf16.msra.mxu1 %v5650_v60  ;;  %v5039_v60 = vld [vmem:[%s7539_s1 + $0x188] ss:$28 sps:$4 sm:$0xff]   ;;  %v6144_v23 = vld [vmem:[%s7537_s4 + $0x50] sm:$0xff]  }
  0x96   :  { %4327 = vmatprep.subr.bf16.mxu1 %v5662_v62  ;;  %v5041_v62 = vld [vmem:[%s7539_s1 + $0xec] ss:$28 sps:$4 sm:$0xff]  }
  0x97   :  { %v6138_v22 = vld [vmem:[%s7537_s4 + $0x8] sm:$0xff]  }
  0x99   :  { %4328 = vmatpush3.bf16.msra.mxu1 %v5667_v63  ;;  %v5045_v63 = vld [vmem:[%s7539_s1 + $0x14] ss:$28 sps:$4 sm:$0xff]  }
  0x9a   :  { %4329 = vmatprep.subr.bf16.mxu1 %v5686_v35  ;;  %v5046_v35 = vld [vmem:[%s7539_s1 + $0xe8] ss:$28 sps:$4 sm:$0xff]  }
  0x9b   :  { %1081 = vmatmul.mubr.bf16.gmra.mrb[60].mxu0 %v5015_v24  ;;  %v5075_v24 = vld [vmem:[%s7539_s1 + $0x164] ss:$28 sps:$4 sm:$0xff]  }
  0x9c   :  { %1655 = vmatmul.mubr.bf16.gmra.mrb[60].mxu1 %v5016_v25  ;;  %1727 = vmatprep.mubr.bf16.mxu0 %v5021_v26  ;;  %v5077_v25 = vld [vmem:[%s7539_s1 + $0xf8] ss:$28 sps:$4 sm:$0xff]  }
  0x9d   :  { %1662 = vmatprep.mubr.bf16.mxu1 %v5017_v27  ;;  %4330 = vmatpush3.bf16.msra.mxu1 %v5691_v39  ;;  %v5043_v39 = vld [vmem:[%s7539_s1 + $0x10] ss:$28 sps:$4 sm:$0xff]   ;;  %v6163_v27 = vld [vmem:[%s7537_s4 + $0x58] sm:$0xff]  }
  0x9e   :  { %4331 = vmatprep.subr.bf16.mxu1 %v5698_v40  ;;  %v5047_v40 = vld [vmem:[%s7539_s1 + $0x124] ss:$28 sps:$4 sm:$0xff]   ;;  %v6157_v26 = vld [vmem:[%s7537_s4 + $0x10] sm:$0xff]  }
  0xa1   :  { %4332 = vmatpush3.bf16.msra.mxu1 %v5703_v41  ;;  %v5049_v41 = vld [vmem:[%s7539_s1 + $0x4c] ss:$28 sps:$4 sm:$0xff]  }
  0xa2   :  { %4455 = vmatprep.subr.bf16.mxu1 %v5910_v37 }
  0xa3   :  { %1728 = vmatmul.mubr.bf16.vlgmr.msra.gmra.mrb[64].mxu0 %v5019_v28  ;;  %v5079_v28 = vld [vmem:[%s7539_s1 + $0x130] ss:$28 sps:$4 sm:$0xff]  }
  0xa4   :  { %1663 = vmatmul.mubr.bf16.gmra.mrb[64].mxu1 %v5022_v29  ;;  %4816 = vmatpush3.bf16.msra.mxu0 %v5545_v36  ;;  %v5029_v36 = vld [vmem:[%s7539_s1 + $0x154] ss:$28 sps:$4 sm:$0xff]   ;;  %v5078_v29 = vld [vmem:[%s7539_s1 + $0x160] ss:$28 sps:$4 sm:$0xff]  }
  0xa5   :  { %1670 = vmatprep.mubr.bf16.mxu1 %v5023_v30  ;;  %1735 = vmatprep.mubr.bf16.mxu0 %v5025_v31  ;;  %v6176_v30 = vld [vmem:[%s7537_s4 + $0x18] sm:$0xff]   ;;  %v6182_v31 = vld [vmem:[%s7537_s4 + $0x60] sm:$0xff]  }
  0xa6   :  { %4817 = vmatprep.subr.bf16.mxu0 %v5639_v58 }
  0xa8   :  { %4818 = vmatpush3.bf16.msra.mxu0 %v5639_v58  ;;  %v5035_v58 = vld [vmem:[%s7539_s1 + $0x18c] ss:$28 sps:$4 sm:$0xff]  }
  0xa9   :  { %4391 = vmatprep.subr.bf16.mxu0 %v5931_v47 }
  0xab   :  { %1736 = vmatmul.mubr.bf16.gmra.mrb[68].mxu0 %v5028_v38  ;;  %v5080_v38 = vld [vmem:[%s7539_s1 + $0x19c] ss:$28 sps:$4 sm:$0xff]  }
  0xac   :  { %1671 = vmatmul.mubr.bf16.gmra.mrb[68].mxu1 %v5027_v43  ;;  %1743 = vmatprep.mubr.bf16.mxu0 %v5031_v44  ;;  %v5082_v43 = vld [vmem:[%s7539_s1 + $0x168] ss:$28 sps:$4 sm:$0xff]  }
  0xad   :  { %1678 = vmatprep.mubr.bf16.mxu1 %v5029_v36  ;;  %v6195_v44 = vld [vmem:[%s7537_s4 + $0x20] sm:$0xff]   ;;  %v6201_v36 = vld [vmem:[%s7537_s4 + $0x68] sm:$0xff]  }
  0xb3   :  { %1744 = vmatmul.mubr.bf16.gmra.mrb[72].mxu0 %v5034_v48  ;;  %v5084_v48 = vld [vmem:[%s7539_s1 + $0x1a0] ss:$28 sps:$4 sm:$0xff]  }
  0xb4   :  { %1679 = vmatmul.mubr.bf16.gmra.mrb[72].mxu1 %v5033_v53  ;;  %1751 = vmatprep.mubr.bf16.mxu0 %v5037_v54  ;;  %v5083_v54 = vld [vmem:[%s7539_s1 + $0x198] ss:$28 sps:$4 sm:$0xff]  }
  0xb5   :  { %1686 = vmatprep.mubr.bf16.mxu1 %v5035_v58 }
  0xbb   :  { %1752 = vmatmul.mubr.bf16.gmra.mrb[76].mxu0 %v5040_v59 }
  0xbc   :  { %1687 = vmatmul.mubr.bf16.gmra.mrb[76].mxu1 %v5039_v60  ;;  %1759 = vmatprep.mubr.bf16.mxu0 %v5041_v62 }
  0xbd   :  { %1824 = vmatprep.mubr.bf16.mxu1 %v5045_v63 }
  0xc3   :  { %1760 = vmatmul.mubr.bf16.gmra.mrb[80].mxu0 %v5046_v35  ;;  %v6214_v35 = vld [vmem:[%s7537_s4 + $0x28] sm:$0xff]  }
  0xc4   :  { %1825 = vmatmul.mubr.bf16.vlgmr.msra.gmra.mrb[80].mxu1 %v5043_v39  ;;  %1767 = vmatprep.mubr.bf16.mxu0 %v5047_v40 }
  0xc5   :  { %4456 = vmatpush3.bf16.msra.mxu1 %v5973_v46  ;;  %1832 = vmatprep.mubr.bf16.mxu1 %v5049_v41 }
  0xc6   :  { %4457 = vmatprep.subr.bf16.mxu1 %v5979_v49 }
  0xc9   :  { %4458 = vmatpush3.bf16.msra.mxu1 %v5994_v1 }
  0xca   :  { %4459 = vmatprep.subr.bf16.mxu1 %v6003_v56 }
  0xcb   :  { %1768 = vmatmul.mubr.bf16.gmra.mrb[84].mxu0 %v5051_v50  ;;  %v6220_v50 = vld [vmem:[%s7537_s4 + $0x70] sm:$0xff]  }
  0xcc   :  { %1833 = vmatmul.mubr.bf16.gmra.mrb[84].mxu1 %v5052_v51  ;;  %1775 = vmatprep.mubr.bf16.mxu0 %v5053_v52  ;;  %v5087_v51 = vld [vmem:[%s7540_s2 + $0x4] ss:$28 sps:$4 sm:$0xff]  }
  0xcd   :  { %1840 = vmatprep.mubr.bf16.mxu1 %v5055_v55  ;;  %4460 = vmatpush3.bf16.msra.mxu1 %v6009_v57 }
  0xce   :  { %4461 = vmatprep.subr.bf16.mxu1 %v6015_v61 }
  0xd1   :  { %4462 = vmatpush3.bf16.msra.mxu1 %v6033_v42 }
  0xd2   :  { %4463 = vmatprep.subr.bf16.mxu1 %v6039_v45 }
  0xd3   :  { %1776 = vmatmul.mubr.bf16.gmra.mrb[88].mxu0 %v5057_v32  ;;  %v5090_v32 = vld [vmem:[%s7540_s2 + $0xc] ss:$28 sps:$4 sm:$0xff]  }
  0xd4   :  { %1841 = vmatmul.mubr.bf16.gmra.mrb[88].mxu1 %v5058_v0  ;;  %1783 = vmatprep.mubr.bf16.mxu0 %v5059_v33 }
  0xd5   :  { %1848 = vmatprep.mubr.bf16.mxu1 %v5061_v34  ;;  %4464 = vmatpush3.bf16.msra.mxu1 %v6045_v2  ;;  %v6235_v34 = vld [vmem:[%s7537_s4 + $0x30] sm:$0xff]  }
  0xd6   :  { %4465 = vmatprep.subr.bf16.mxu1 %v6051_v3 }
  0xd9   :  { %4466 = vmatpush3.bf16.msra.mxu1 %v6069_v8 }
  0xda   :  { %4467 = vmatprep.subr.bf16.mxu1 %v6075_v9 }
  0xdb   :  { %1784 = vmatmul.mubr.bf16.gmra.mrb[92].mxu0 %v5063_v4 }
  0xdc   :  { %1849 = vmatmul.mubr.bf16.gmra.mrb[92].mxu1 %v5064_v5  ;;  %4819 = vmatprep.mubr.msk.bf16.mxu0 %vm773_vm0, %v5067_v6  ;;  %v6243_v5 = vld [vmem:[%s7537_s4 + $0x78] sm:$0xff]  }
  0xdd   :  { %1856 = vmatprep.mubr.bf16.mxu1 %v5065_v7  ;;  %4468 = vmatpush3.bf16.msra.mxu1 %v6082_v10 }
  0xde   :  { %4469 = vmatprep.subr.bf16.mxu1 %v6088_v11 }
  0xe1   :  { %4470 = vmatpush3.bf16.msra.mxu1 %v6103_v15 }
  0xe2   :  { %4835 = vmatprep.subr.bf16.mxu1 %v6112_v17 }
  0xe3   :  { %4820 = vmatmul.mubr.msk.bf16.vlgmr.msra.gmra.mrb[96].mxu0 %vm773_vm0, %v5069_v12 }
  0xe4   :  { %1857 = vmatmul.mubr.bf16.gmra.mrb[96].mxu1 %v5068_v13  ;;  %4392 = vmatpush3.bf16.msra.mxu0 %v6119_v18  ;;  %v5085_v13 = vld [vmem:[%s7540_s2] ss:$28 sps:$4 sm:$0xff]  }
  0xe5   :  { %4393 = vmatprep.subr.bf16.mxu0 %v6125_v19  ;;  %1864 = vmatprep.mubr.bf16.mxu1 %v5070_v14 }
  0xe6   :  { %4823 = vmatprep.mubr.msk.bf16.mxu0 %vm773_vm0, %v5072_v16 }
  0xe8   :  { %4394 = vmatpush3.bf16.msra.mxu0 %v6138_v22 }
  0xe9   :  { %4395 = vmatprep.subr.bf16.mxu0 %v6144_v23 }
  0xeb   :  { %4824 = vmatmul.mubr.msk.bf16.gmra.mrb[100].mxu0 %vm773_vm0, %v5074_v20 }
  0xec   :  { %1865 = vmatmul.mubr.bf16.gmra.mrb[100].mxu1 %v5073_v21  ;;  %4396 = vmatpush3.bf16.msra.mxu0 %v6157_v26  ;;  %v6252_v21 = vld [vmem:[%s7537_s4 + $0x38] sm:$0xff]  }
  0xed   :  { %4397 = vmatprep.subr.bf16.mxu0 %v6163_v27  ;;  %1872 = vmatprep.mubr.bf16.mxu1 %v5075_v24  ;;  %v5088_v24 = vld [vmem:[%s7540_s2 + $0x8] ss:$28 sps:$4 sm:$0xff]  }
  0xee   :  { %4827 = vmatprep.mubr.msk.bf16.mxu0 %vm773_vm0, %v5077_v25 }
  0xf0   :  { %4398 = vmatpush3.bf16.msra.mxu0 %v6176_v30 }
  0xf1   :  { %4399 = vmatprep.subr.bf16.mxu0 %v6182_v31 }
  0xf3   :  { %4828 = vmatmul.mubr.msk.bf16.gmra.mrb[104].mxu0 %vm773_vm0, %v5079_v28 }
  0xf4   :  { %1873 = vmatmul.mubr.bf16.gmra.mrb[104].mxu1 %v5078_v29  ;;  %4400 = vmatpush3.bf16.msra.mxu0 %v6195_v44 }
  0xf5   :  { %4401 = vmatprep.subr.bf16.mxu0 %v6201_v36  ;;  %1880 = vmatprep.mubr.bf16.mxu1 %v5080_v38  ;;  %v6261_v38 = vld [vmem:[%s7537_s4 + $0x140] sm:$0xff]  }
  0xf6   :  { %v4003_v53 = vpop.f32.mrb[0].mxu0  ;;  %4831 = vmatprep.mubr.msk.bf16.mxu0 %vm773_vm0, %v5082_v43  ;;  %v5091_v43 = vld [vmem:[%s7540_s2 + $0x3c] ss:$28 sps:$4 sm:$0xff]  }
  0xf7   :  { %v4067_v58 = vpop.f32.mrb[0].mxu1  ;;  %v4004_v59 = vpop.f32.mrb[1].mxu0 }
  0xf8   :  { %v4005_v60 = vadd.f32 %v4004_v59, %v4003_v53  ;;  %v4068_v62 = vpop.f32.mrb[1].mxu1  ;;  %v4006_v63 = vpop.f32.mrb[2].mxu0  ;;  %4402 = vmatpush3.bf16.msra.mxu0 %v6214_v35 }
  0xf9   :  { %v4069_v39 = vadd.f32 %v4068_v62, %v4067_v58  ;;  %v4070_v40 = vpop.f32.mrb[2].mxu1  ;;  %v4007_v41 = vpop.f32.mrb[3].mxu0  ;;  %4403 = vmatprep.subr.bf16.mxu0 %v6220_v50 }
  0xfa   :  { %v4008_v52 = vadd.f32 %v4007_v41, %v4006_v63  ;;  %v4071_v55 = vpop.f32.mrb[3].mxu1 }
  0xfb   :  { %v6229_v0 = vadd.f32 %v4069_v39, %v4005_v60  ;;  %v4072_v33 = vadd.f32 %v4071_v55, %v4070_v40  ;;  %4832 = vmatmul.mubr.msk.bf16.gmra.mrb[108].mxu0 %vm773_vm0, %v5084_v48  ;;  %v6275_v60 = vld [vmem:[%s7537_s4 + $0x100] sm:$0xff]   ;;  %v6284_v39 = vld [vmem:[%s7537_s4 + $0x148] sm:$0xff]  }
  0xfc   :  { %1881 = vmatmul.mubr.bf16.gmra.mrb[108].mxu1 %v5083_v54  ;;  %4404 = vmatpush3.bf16.msra.mxu0 %v6235_v34  ;;  %v5093_v54 = vld [vmem:[%s7540_s2 + $0x44] ss:$28 sps:$4 sm:$0xff]   ;;  %7580 = vst [vmem:[#allocation2_spill] sm:$0xff] %v6275_v60  ;;  %7581 = vst [vmem:[#allocation3_spill] sm:$0xff] %v6284_v39 }
  0xfd   :  { %v6238_v4 = vadd.f32 %v4072_v33, %v4008_v52  ;;  %4405 = vmatprep.subr.bf16.mxu0 %v6243_v5  ;;  %2434 = vmatprep.mubr.bf16.mxu0 %v5087_v51  ;;  %v5095_v51 = vld [vmem:[%s7540_s2 + $0x38] ss:$28 sps:$4 sm:$0xff]   ;;  %v6293_v52 = vld [vmem:[%s7537_s4 + $0x188] sm:$0xff]  }
  0xfe   :  { %v4009_v6 = vpop.f32.mrb[4].mxu0  ;;  %2531 = vmatprep.mubr.bf16.mxu1 %v5090_v32  ;;  %7582 = vst [vmem:[#allocation4_spill] sm:$0xff] %v6293_v52 }
  0xff   :  { %v4073_v7 = vpop.f32.mrb[4].mxu1  ;;  %v4010_v12 = vpop.f32.mrb[5].mxu0 }
 0x100   :  { %v4011_v14 = vadd.f32 %v4010_v12, %v4009_v6  ;;  %v4074_v16 = vpop.f32.mrb[5].mxu1  ;;  %v4012_v20 = vpop.f32.mrb[6].mxu0  ;;  %4406 = vmatpush3.bf16.msra.mxu0 %v6252_v21  ;;  %v5096_v6 = vld [vmem:[%s7540_s2 + $0x40] ss:$28 sps:$4 sm:$0xff]   ;;  %v5097_v12 = vld [vmem:[%s7540_s2 + $0x74] ss:$28 sps:$4 sm:$0xff]  }
 0x101   :  { %v4075_v25 = vadd.f32 %v4074_v16, %v4073_v7  ;;  %v4076_v28 = vpop.f32.mrb[6].mxu1  ;;  %v4013_v29 = vpop.f32.mrb[7].mxu0  ;;  %4519 = vmatprep.subr.bf16.mxu0 %v6261_v38  ;;  %v6302_v7 = vld [vmem:[%s7537_s4 + $0x108] sm:$0xff]  }
 0x102   :  { %v4014_v48 = vadd.f32 %v4013_v29, %v4012_v20  ;;  %v4077_v53 = vpop.f32.mrb[7].mxu1  ;;  %7583 = vst [vmem:[#allocation5_spill] sm:$0xff] %v6302_v7  ;;  %v5099_v20 = vld [vmem:[%s7540_s2 + $0x7c] ss:$28 sps:$4 sm:$0xff]  }
 0x103   :  { %v6270_v58 = vadd.f32 %v4075_v25, %v4011_v14  ;;  %v4078_v59 = vadd.f32 %v4077_v53, %v4076_v28  ;;  %2435 = vmatmul.mubr.bf16.vlgmr.msra.gmra.mrb[112].mxu0 %v5085_v13  ;;  %v6326_v53 = vld [vmem:[%s7537_s4 + $0x110] sm:$0xff]  }
 0x104   :  { %2532 = vmatmul.mubr.bf16.vlgmr.msra.gmra.mrb[112].mxu1 %v5088_v24  ;;  %4520 = vmatpush3.bf16.msra.mxu0 %v6275_v60  ;;  %v6314_v24 = vld [vmem:[%s7537_s4 + $0x150] sm:$0xff]   ;;  %7585 = vst [vmem:[#allocation7_spill] sm:$0xff] %v6326_v53 }
 0x105   :  { %v6278_v62 = vadd.f32 %v4078_v59, %v4014_v48  ;;  %4836 = vmatpush3.bf16.msra.mxu1 %v6112_v17  ;;  %2442 = vmatprep.mubr.bf16.mxu0 %v5091_v43  ;;  %7584 = vst [vmem:[#allocation6_spill] sm:$0xff] %v6314_v24 }
 0x106   :  { %v4015_v63 = vpop.f32.mrb[8].mxu0  ;;  %2539 = vmatprep.mubr.bf16.mxu1 %v5093_v54  ;;  %4521 = vmatprep.subr.bf16.mxu0 %v6284_v39 }
 0x107   :  { %v4079_v40 = vpop.f32.mrb[8].mxu1  ;;  %v4016_v41 = vpop.f32.mrb[9].mxu0  ;;  %4837 = vmatprep.subr.bf16.mxu1 %v6293_v52 }
 0x108   :  { %v4017_v55 = vadd.f32 %v4016_v41, %v4015_v63  ;;  %v4080_v32 = vpop.f32.mrb[9].mxu1  ;;  %v4018_v33 = vpop.f32.mrb[10].mxu0  ;;  %4522 = vmatpush3.bf16.msra.mxu0 %v6302_v7 }
 0x109   :  { %v4081_v13 = vadd.f32 %v4080_v32, %v4079_v40  ;;  %v4082_v14 = vpop.f32.mrb[10].mxu1  ;;  %v4019_v16 = vpop.f32.mrb[11].mxu0  ;;  %4523 = vmatprep.subr.bf16.mxu0 %v6314_v24  ;;  %4838 = vmatpush3.bf16.msra.mxu1 %v6293_v52  ;;  %v5101_v40 = vld [vmem:[%s7540_s2 + $0x70] ss:$28 sps:$4 sm:$0xff]   ;;  %v5102_v32 = vld [vmem:[%s7540_s2 + $0x78] ss:$28 sps:$4 sm:$0xff]  }
 0x10a   :  { %v4020_v25 = vadd.f32 %v4019_v16, %v4018_v33  ;;  %v4083_v28 = vpop.f32.mrb[11].mxu1  ;;  %4593 = vmatprep.subr.bf16.mxu1 %v5931_v47  ;;  %v6332_v47 = vld [vmem:[%s7537_s4 + $0x158] sm:$0xff]   ;;  %v5103_v33 = vld [vmem:[%s7540_s2 + $0xac] ss:$28 sps:$4 sm:$0xff]  }
 0x10b   :  { %v6319_v29 = vadd.f32 %v4081_v13, %v4017_v55  ;;  %v4084_v43 = vadd.f32 %v4083_v28, %v4082_v14  ;;  %2443 = vmatmul.mubr.bf16.gmra.mrb[116].mxu0 %v5095_v51  ;;  %7586 = vst [vmem:[#allocation8_spill] sm:$0xff] %v6332_v47  ;;  %v5105_v14 = vld [vmem:[%s7540_s2 + $0xb4] ss:$28 sps:$4 sm:$0xff]   ;;  %v6350_v16 = vld [vmem:[%s7537_s4 + $0x118] sm:$0xff]   ;;  %v6356_v28 = vld [vmem:[%s7537_s4 + $0x160] sm:$0xff]  }
 0x10c   :  { %2540 = vmatmul.mubr.bf16.gmra.mrb[116].mxu1 %v5096_v6  ;;  %2450 = vmatprep.mubr.bf16.mxu0 %v5097_v12  ;;  %7587 = vst [vmem:[#allocation9_spill] sm:$0xff] %v6350_v16  ;;  %7588 = vst [vmem:[#allocation10_spill] sm:$0xff] %v6356_v28  ;;  %v5111_v52 = vld [vmem:[%s7540_s2 + $0xec] ss:$28 sps:$4 sm:$0xff]  }
 0x10d   :  { %v6321_v48 = vadd.f32 %v4084_v43, %v4020_v25  ;;  %2547 = vmatprep.mubr.bf16.mxu1 %v5099_v20  ;;  %4524 = vmatpush3.bf16.msra.mxu0 %v6326_v53 }
 0x10e   :  { %v4021_v54 = vpop.f32.mrb[12].mxu0  ;;  %4525 = vmatprep.subr.bf16.mxu0 %v6332_v47 }
 0x10f   :  { %v4085_v59 = vpop.f32.mrb[12].mxu1  ;;  %v4022_v63 = vpop.f32.mrb[13].mxu0 }
 0x110   :  { %v4023_v41 = vadd.f32 %v4022_v63, %v4021_v54  ;;  %v4086_v51 = vpop.f32.mrb[13].mxu1  ;;  %v4024_v55 = vpop.f32.mrb[14].mxu0  ;;  %v6366_v63 = vld [vmem:[%s7537_s4 + $0x120] sm:$0xff]  }
 0x111   :  { %v4087_v6 = vadd.f32 %v4086_v51, %v4085_v59  ;;  %v4088_v12 = vpop.f32.mrb[14].mxu1  ;;  %v4025_v13 = vpop.f32.mrb[15].mxu0  ;;  %4526 = vmatpush3.bf16.msra.mxu0 %v6350_v16  ;;  %7589 = vst [vmem:[#allocation11_spill] sm:$0xff] %v6366_v63 }
 0x112   :  { %v4026_v20 = vadd.f32 %v4025_v13, %v4024_v55  ;;  %v4089_v25 = vpop.f32.mrb[15].mxu1  ;;  %4527 = vmatprep.subr.bf16.mxu0 %v6356_v28  ;;  %v5108_v13 = vld [vmem:[%s7540_s2 + $0xb0] ss:$28 sps:$4 sm:$0xff]  }
 0x113   :  { %v6359_v43 = vadd.f32 %v4087_v6, %v4023_v41  ;;  %v4090_v54 = vadd.f32 %v4089_v25, %v4088_v12  ;;  %2451 = vmatmul.mubr.bf16.gmra.mrb[120].mxu0 %v5101_v40  ;;  %v6372_v41 = vld [vmem:[%s7537_s4 + $0x168] sm:$0xff]  }
 0x114   :  { %2548 = vmatmul.mubr.bf16.gmra.mrb[120].mxu1 %v5102_v32  ;;  %2458 = vmatprep.mubr.bf16.mxu0 %v5103_v33  ;;  %7590 = vst [vmem:[#allocation12_spill] sm:$0xff] %v6372_v41  ;;  %v5107_v32 = vld [vmem:[%s7540_s2 + $0xa8] ss:$28 sps:$4 sm:$0xff]  }
 0x115   :  { %v6361_v59 = vadd.f32 %v4090_v54, %v4026_v20  ;;  %2555 = vmatprep.mubr.bf16.mxu1 %v5105_v14  ;;  %4528 = vmatpush3.bf16.msra.mxu0 %v6366_v63  ;;  %v5109_v14 = vld [vmem:[%s7540_s2 + $0xe4] ss:$28 sps:$4 sm:$0xff]   ;;  %v6396_v63 = vld [vmem:[%s7537_s4 + $0x170] sm:$0xff]  }
 0x116   :  { %v4027_v51 = vpop.f32.mrb[16].mxu0  ;;  %4529 = vmatprep.subr.bf16.mxu0 %v6372_v41  ;;  %7592 = vst [vmem:[#allocation14_spill] sm:$0xff] %v6396_v63 }
 0x117   :  { %v4091_v40 = vpop.f32.mrb[16].mxu1  ;;  %v4028_v55 = vpop.f32.mrb[17].mxu0 }
 0x118   :  { %v4029_v33 = vadd.f32 %v4028_v55, %v4027_v51  ;;  %v4092_v6 = vpop.f32.mrb[17].mxu1  ;;  %v4030_v12 = vpop.f32.mrb[18].mxu0  ;;  %v6390_v51 = vld [vmem:[%s7537_s4 + $0x128] sm:$0xff]  }
 0x119   :  { %v4093_v20 = vadd.f32 %v4092_v6, %v4091_v40  ;;  %v4094_v25 = vpop.f32.mrb[18].mxu1  ;;  %v4031_v54 = vpop.f32.mrb[19].mxu0  ;;  %7591 = vst [vmem:[#allocation13_spill] sm:$0xff] %v6390_v51  ;;  %4530 = vmatpush3.bf16.msra.mxu0 %v6390_v51 }
 0x11a   :  { %v4032_v55 = vadd.f32 %v4031_v54, %v4030_v12  ;;  %v4095_v41 = vpop.f32.mrb[19].mxu1  ;;  %4531 = vmatprep.subr.bf16.mxu0 %v6396_v63  ;;  %v6406_v12 = vld [vmem:[%s7537_s4 + $0x130] sm:$0xff]   ;;  %v5117_v63 = vld [vmem:[%s7540_s2 + $0x124] ss:$28 sps:$4 sm:$0xff]  }
 0x11b   :  { %v6399_v40 = vadd.f32 %v4093_v20, %v4029_v33  ;;  %v4096_v6 = vadd.f32 %v4095_v41, %v4094_v25  ;;  %2459 = vmatmul.mubr.bf16.gmra.mrb[124].mxu0 %v5107_v32  ;;  %7593 = vst [vmem:[#allocation15_spill] sm:$0xff] %v6406_v12  ;;  %v6412_v33 = vld [vmem:[%s7537_s4 + $0x178] sm:$0xff]   ;;  %v5114_v25 = vld [vmem:[%s7540_s2 + $0xe8] ss:$28 sps:$4 sm:$0xff]  }
 0x11c   :  { %2556 = vmatmul.mubr.bf16.gmra.mrb[124].mxu1 %v5108_v13  ;;  %2466 = vmatprep.mubr.bf16.mxu0 %v5109_v14  ;;  %7594 = vst [vmem:[#allocation16_spill] sm:$0xff] %v6412_v33 }
 0x11d   :  { %v6401_v28 = vadd.f32 %v4096_v6, %v4032_v55  ;;  %2563 = vmatprep.mubr.bf16.mxu1 %v5111_v52  ;;  %4532 = vmatpush3.bf16.msra.mxu0 %v6406_v12  ;;  %v5113_v52 = vld [vmem:[%s7540_s2 + $0xe0] ss:$28 sps:$4 sm:$0xff]  }
 0x11e   :  { %v4033_v54 = vpop.f32.mrb[20].mxu0  ;;  %4533 = vmatprep.subr.bf16.mxu0 %v6412_v33  ;;  %v5115_v55 = vld [vmem:[%s7540_s2 + $0x11c] ss:$28 sps:$4 sm:$0xff]  }
 0x11f   :  { %v4097_v41 = vpop.f32.mrb[20].mxu1  ;;  %v4034_v32 = vpop.f32.mrb[21].mxu0 }
 0x120   :  { %v4035_v13 = vadd.f32 %v4034_v32, %v4033_v54  ;;  %v4098_v14 = vpop.f32.mrb[21].mxu1  ;;  %v4036_v20 = vpop.f32.mrb[22].mxu0  ;;  %v6430_v54 = vld [vmem:[%s7537_s4 + $0x138] sm:$0xff]  }
 0x121   :  { %v4099_v6 = vadd.f32 %v4098_v14, %v4097_v41  ;;  %v4100_v12 = vpop.f32.mrb[22].mxu1  ;;  %v4037_v33 = vpop.f32.mrb[23].mxu0  ;;  %7595 = vst [vmem:[#allocation17_spill] sm:$0xff] %v6430_v54  ;;  %4534 = vmatpush3.bf16.msra.mxu0 %v6430_v54  ;;  %v5119_v54 = vld [vmem:[%s7540_s2 + $0x118] ss:$28 sps:$4 sm:$0xff]  }
 0x122   :  { %v4038_v32 = vadd.f32 %v4037_v33, %v4036_v20  ;;  %v4101_v51 = vpop.f32.mrb[23].mxu1  ;;  %4657 = vmatprep.subr.bf16.mxu0 %v5910_v37  ;;  %v5120_v37 = vld [vmem:[%s7540_s2 + $0x120] ss:$28 sps:$4 sm:$0xff]  }
 0x123   :  { %v6434_v16 = vadd.f32 %v4099_v6, %v4035_v13  ;;  %v4102_v41 = vadd.f32 %v4101_v51, %v4100_v12  ;;  %2467 = vmatmul.mubr.bf16.gmra.mrb[128].mxu0 %v5113_v52  ;;  %v5121_v51 = vld [vmem:[%s7540_s2 + $0x154] ss:$28 sps:$4 sm:$0xff]   ;;  %v5123_v13 = vld [vmem:[%s7540_s2 + $0x15c] ss:$28 sps:$4 sm:$0xff]  }
 0x124   :  { %2564 = vmatmul.mubr.bf16.gmra.mrb[128].mxu1 %v5114_v25  ;;  %2474 = vmatprep.mubr.bf16.mxu0 %v5115_v55 }
 0x125   :  { %v6436_v14 = vadd.f32 %v4102_v41, %v4038_v32  ;;  %2571 = vmatprep.mubr.bf16.mxu1 %v5117_v63 }
 0x126   :  { %v4039_v47 = vpop.f32.mrb[24].mxu0 }
 0x127   :  { %v4103_v53 = vpop.f32.mrb[24].mxu1  ;;  %v4040_v24 = vpop.f32.mrb[25].mxu0 }
 0x128   :  { %v4041_v33 = vadd.f32 %v4040_v24, %v4039_v47  ;;  %v4104_v20 = vpop.f32.mrb[25].mxu1  ;;  %v4042_v7 = vpop.f32.mrb[26].mxu0 }
 0x129   :  { %v4105_v12 = vadd.f32 %v4104_v20, %v4103_v53  ;;  %v4106_v63 = vpop.f32.mrb[26].mxu1  ;;  %v4043_v52 = vpop.f32.mrb[27].mxu0  ;;  %v5125_v20 = vld [vmem:[%s7540_s2 + $0x150] ss:$28 sps:$4 sm:$0xff]  }
 0x12a   :  { %v4044_v25 = vadd.f32 %v4043_v52, %v4042_v7  ;;  %v4107_v55 = vpop.f32.mrb[27].mxu1 }
 0x12b   :  { %v6450_v24 = vadd.f32 %v4105_v12, %v4041_v33  ;;  %v4108_v47 = vadd.f32 %v4107_v55, %v4106_v63  ;;  %2475 = vmatmul.mubr.bf16.gmra.mrb[132].mxu0 %v5119_v54  ;;  %v5126_v33 = vld [vmem:[%s7540_s2 + $0x158] ss:$28 sps:$4 sm:$0xff]   ;;  %v5127_v54 = vld [vmem:[%s7540_s2 + $0x18c] ss:$28 sps:$4 sm:$0xff]  }
 0x12c   :  { %2572 = vmatmul.mubr.bf16.gmra.mrb[132].mxu1 %v5120_v37  ;;  %2482 = vmatprep.mubr.bf16.mxu0 %v5121_v51  ;;  %v5129_v63 = vld [vmem:[%s7540_s2 + $0x194] ss:$28 sps:$4 sm:$0xff]  }
 0x12d   :  { %7596 = vst [vmem:[#allocation18_spill] sm:$0xff] %v6450_v24  ;;  %v6452_v6 = vadd.f32 %v4108_v47, %v4044_v25  ;;  %2579 = vmatprep.mubr.bf16.mxu1 %v5123_v13 }
 0x12e   :  { %v4045_v32 = vpop.f32.mrb[28].mxu0 }
 0x12f   :  { %7597 = vst [vmem:[#allocation19_spill] sm:$0xff] %v6452_v6  ;;  %v4109_v41 = vpop.f32.mrb[28].mxu1  ;;  %v4046_v53 = vpop.f32.mrb[29].mxu0 }
 0x130   :  { %v4047_v39 = vadd.f32 %v4046_v53, %v4045_v32  ;;  %v4110_v60 = vpop.f32.mrb[29].mxu1  ;;  %v4048_v7 = vpop.f32.mrb[30].mxu0 }
 0x131   :  { %v4111_v37 = vadd.f32 %v4110_v60, %v4109_v41  ;;  %v4112_v51 = vpop.f32.mrb[30].mxu1  ;;  %v4049_v12 = vpop.f32.mrb[31].mxu0  ;;  %v5131_v41 = vld [vmem:[%s7540_s2 + $0x188] ss:$28 sps:$4 sm:$0xff]  }
 0x132   :  { %v4050_v52 = vadd.f32 %v4049_v12, %v4048_v7  ;;  %v4113_v13 = vpop.f32.mrb[31].mxu1 }
 0x133   :  { %v6466_v25 = vadd.f32 %v4111_v37, %v4047_v39  ;;  %v4114_v55 = vadd.f32 %v4113_v13, %v4112_v51  ;;  %2483 = vmatmul.mubr.bf16.gmra.mrb[136].mxu0 %v5125_v20  ;;  %v5132_v39 = vld [vmem:[%s7540_s2 + $0x190] ss:$28 sps:$4 sm:$0xff]   ;;  %v5136_v37 = vld [vmem:[%s7540_s2 + $0x18] ss:$28 sps:$4 sm:$0xff]  }
 0x134   :  { %2580 = vmatmul.mubr.bf16.gmra.mrb[136].mxu1 %v5126_v33  ;;  %2490 = vmatprep.mubr.bf16.mxu0 %v5127_v54  ;;  %v5135_v20 = vld [vmem:[%s7540_s2 + $0x14] ss:$28 sps:$4 sm:$0xff]  }
 0x135   :  { %v6468_v47 = vadd.f32 %v4114_v55, %v4050_v52  ;;  %2587 = vmatprep.mubr.bf16.mxu1 %v5129_v63 }
 0x136   :  { %v4131_v32 = vpop.f32.mrb[32].mxu0 }
 0x137   :  { %7598 = vst [vmem:[#allocation20_spill] sm:$0xff] %v6468_v47  ;;  %v4801_v53 = vpop.f32.mrb[32].mxu1  ;;  %v4132_v60 = vpop.f32.mrb[33].mxu0 }
 0x138   :  { %v4133_v6 = vadd.f32 %v4132_v60, %v4131_v32  ;;  %v1123_v24 = vpop.f32.mrb[33].mxu1  ;;  %v4134_v7 = vpop.f32.mrb[34].mxu0 }
 0x139   :  { %v4802_v33 = vpop.f32.mrb[34].mxu1  ;;  %v4135_v54 = vpop.f32.mrb[35].mxu0 }
 0x13a   :  { %v1027_v51 = vadd.f32 %v4133_v6, %v6229_v0  ;;  %v4136_v12 = vadd.f32 %v4135_v54, %v4134_v7  ;;  %v1126_v63 = vpop.f32.mrb[35].mxu1  ;;  %v5133_v0 = vld [vmem:[%s7540_s2 + $0x10] ss:$28 sps:$4 sm:$0xff]  }
 0x13b   :  { %2491 = vmatmul.mubr.bf16.gmra.mrb[140].mxu0 %v5131_v41 }
 0x13c   :  { %v6483_v52 = vadd.f32 %v1123_v24, %v1027_v51  ;;  %v1030_v13 = vadd.f32 %v4136_v12, %v6238_v4  ;;  %2588 = vmatmul.mubr.bf16.gmra.mrb[140].mxu1 %v5132_v39  ;;  %2628 = vmatprep.mubr.bf16.mxu0 %v5135_v20  ;;  %v5137_v4 = vld [vmem:[%s7540_s2 + $0x50] ss:$28 sps:$4 sm:$0xff]  }
 0x13d   :  { %4839 = vmatprep.mubr.msk.bf16.mxu1 %vm773_vm0, %v5136_v37  ;;  %v5138_v20 = vld [vmem:[%s7540_s2 + $0x4c] ss:$28 sps:$4 sm:$0xff]  }
 0x13e   :  { %v6487_v55 = vadd.f32 %v1126_v63, %v1030_v13  ;;  %v4137_v32 = vpop.f32.mrb[36].mxu0 }
 0x13f   :  { %v6489_v60 = vpop.f32.mrb[36].mxu1  ;;  %v4138_v47 = vpop.f32.mrb[37].mxu0 }
 0x140   :  { %v4139_v6 = vadd.f32 %v4138_v47, %v4137_v32  ;;  %v1139_v41 = vpop.f32.mrb[37].mxu1  ;;  %v4140_v24 = vpop.f32.mrb[38].mxu0  ;;  %v5140_v47 = vld [vmem:[%s7540_s2 + $0x88] ss:$28 sps:$4 sm:$0xff]  }
 0x141   :  { %v6497_v7 = vpop.f32.mrb[38].mxu1  ;;  %v4141_v39 = vpop.f32.mrb[39].mxu0 }
 0x142   :  { %v1035_v54 = vadd.f32 %v4139_v6, %v6270_v58  ;;  %v4142_v37 = vadd.f32 %v4141_v39, %v4140_v24  ;;  %v1142_v51 = vpop.f32.mrb[39].mxu1 }
 0x143   :  { %2629 = vmatmul.mubr.bf16.vlgmr.msra.gmra.mrb[144].mxu0 %v5133_v0 }
 0x144   :  { %v6506_v12 = vadd.f32 %v4801_v53, %v1035_v54  ;;  %v1038_v63 = vadd.f32 %v4142_v37, %v6278_v62  ;;  %4840 = vmatmul.mubr.msk.bf16.vlgmr.msra.gmra.mrb[144].mxu1 %vm773_vm0, %v5137_v4  ;;  %4658 = vmatpush3.bf16.msra.mxu0 %v5973_v46  ;;  %v5141_v62 = vld [vmem:[%s7540_s2 + $0x48] ss:$28 sps:$4 sm:$0xff]  }
 0x145   :  { %4594 = vmatpush3.bf16.msra.mxu1 %v6119_v18  ;;  %2636 = vmatprep.mubr.bf16.mxu0 %v5138_v20 }
 0x146   :  { %v6512_v13 = vadd.f32 %v4802_v33, %v1038_v63  ;;  %v4143_v58 = vpop.f32.mrb[40].mxu0  ;;  %4595 = vmatprep.subr.bf16.mxu1 %v6125_v19  ;;  %4843 = vmatprep.mubr.msk.bf16.mxu1 %vm773_vm0, %v5140_v47  ;;  %v5142_v33 = vld [vmem:[%s7540_s2 + $0xc0] ss:$28 sps:$4 sm:$0xff]  }
 0x147   :  { %v6516_v32 = vpop.f32.mrb[40].mxu1  ;;  %v4144_v53 = vpop.f32.mrb[41].mxu0  ;;  %4659 = vmatprep.subr.bf16.mxu0 %v5979_v49  ;;  %v5143_v19 = vld [vmem:[%s7540_s2 + $0x84] ss:$28 sps:$4 sm:$0xff]   ;;  %v5145_v49 = vld [vmem:[%s7540_s2 + $0xf8] ss:$28 sps:$4 sm:$0xff]  }
 0x148   :  { %v4145_v46 = vadd.f32 %v4144_v53, %v4143_v58  ;;  %v6522_v0 = vpop.f32.mrb[41].mxu1  ;;  %v4146_v18 = vpop.f32.mrb[42].mxu0  ;;  %4660 = vmatpush3.bf16.msra.mxu0 %v5994_v1 }
 0x149   :  { %v6531_v6 = vpop.f32.mrb[42].mxu1  ;;  %4596 = vmatpush3.bf16.msra.mxu1 %v6138_v22  ;;  %v4147_v24 = vpop.f32.mrb[43].mxu0  ;;  %4661 = vmatprep.subr.bf16.mxu0 %v6003_v56 }
 0x14a   :  { %v1043_v4 = vadd.f32 %v4145_v46, %v6319_v29  ;;  %v4148_v39 = vadd.f32 %v4147_v24, %v4146_v18  ;;  %v6539_v20 = vpop.f32.mrb[43].mxu1  ;;  %4597 = vmatprep.subr.bf16.mxu1 %v6144_v23 }
 0x14b   :  { %2637 = vmatmul.mubr.bf16.gmra.mrb[148].mxu0 %v5141_v62 }
 0x14c   :  { %v6542_v1 = vadd.f32 %v1139_v41, %v1043_v4  ;;  %v1046_v54 = vadd.f32 %v4148_v39, %v6321_v48  ;;  %4844 = vmatmul.mubr.msk.bf16.gmra.mrb[148].mxu1 %vm773_vm0, %v5142_v33  ;;  %2644 = vmatprep.mubr.bf16.mxu0 %v5143_v19  ;;  %v5146_v48 = vld [vmem:[%s7540_s2 + $0x80] ss:$28 sps:$4 sm:$0xff]  }
 0x14d   :  { %4598 = vmatpush3.bf16.msra.mxu1 %v6157_v26  ;;  %4847 = vmatprep.mubr.msk.bf16.mxu1 %vm773_vm0, %v5145_v49 }
 0x14e   :  { %v6548_v56 = vadd.f32 %v1142_v51, %v1046_v54  ;;  %v4149_v22 = vpop.f32.mrb[44].mxu0  ;;  %4599 = vmatprep.subr.bf16.mxu1 %v6163_v27  ;;  %4662 = vmatpush3.bf16.msra.mxu0 %v6009_v57  ;;  %v5147_v51 = vld [vmem:[%s7540_s2 + $0x130] ss:$28 sps:$4 sm:$0xff]   ;;  %v5148_v57 = vld [vmem:[%s7540_s2 + $0xbc] ss:$28 sps:$4 sm:$0xff]  }
 0x14f   :  { %v6552_v23 = vpop.f32.mrb[44].mxu1  ;;  %v4150_v29 = vpop.f32.mrb[45].mxu0  ;;  %4663 = vmatprep.subr.bf16.mxu0 %v6015_v61  ;;  %v5150_v61 = vld [vmem:[%s7540_s2 + $0x168] ss:$28 sps:$4 sm:$0xff]  }
 0x150   :  { %v4151_v41 = vadd.f32 %v4150_v29, %v4149_v22  ;;  %v6558_v26 = vpop.f32.mrb[45].mxu1  ;;  %v4152_v37 = vpop.f32.mrb[46].mxu0 }
 0x151   :  { %v6566_v27 = vpop.f32.mrb[46].mxu1  ;;  %4600 = vmatpush3.bf16.msra.mxu1 %v6176_v30  ;;  %v4153_v47 = vpop.f32.mrb[47].mxu0 }
 0x152   :  { %v1051_v63 = vadd.f32 %v4151_v41, %v6359_v43  ;;  %v4154_v58 = vadd.f32 %v4153_v47, %v4152_v37  ;;  %v6573_v53 = vpop.f32.mrb[47].mxu1  ;;  %4601 = vmatprep.subr.bf16.mxu1 %v6182_v31  ;;  %4664 = vmatpush3.bf16.msra.mxu0 %v6033_v42  ;;  %v7599_v47 = vld [vmem:[#allocation2_spill] sm:$0xff] }
 0x153   :  { %2645 = vmatmul.mubr.bf16.gmra.mrb[152].mxu0 %v5146_v48  ;;  %4665 = vmatprep.subr.bf16.mxu0 %v6039_v45 }
 0x154   :  { %v6579_v62 = vadd.f32 %v6489_v60, %v1051_v63  ;;  %v1054_v30 = vadd.f32 %v4154_v58, %v6361_v59  ;;  %4848 = vmatmul.mubr.msk.bf16.gmra.mrb[152].mxu1 %vm773_vm0, %v5147_v51  ;;  %2652 = vmatprep.mubr.bf16.mxu0 %v5148_v57  ;;  %v5151_v59 = vld [vmem:[%s7540_s2 + $0xb8] ss:$28 sps:$4 sm:$0xff]  }
 0x155   :  { %4602 = vmatpush3.bf16.msra.mxu1 %v6195_v44  ;;  %4851 = vmatprep.mubr.msk.bf16.mxu1 %vm773_vm0, %v5150_v61 }
 0x156   :  { %v6586_v43 = vadd.f32 %v6497_v7, %v1054_v30  ;;  %v4155_v31 = vpop.f32.mrb[48].mxu0  ;;  %4603 = vmatprep.subr.bf16.mxu1 %v6201_v36  ;;  %4666 = vmatpush3.bf16.msra.mxu0 %v6045_v2  ;;  %v5152_v7 = vld [vmem:[%s7540_s2 + $0x1a0] ss:$28 sps:$4 sm:$0xff]   ;;  %v5153_v36 = vld [vmem:[%s7540_s2 + $0xf4] ss:$28 sps:$4 sm:$0xff]  }
 0x157   :  { %v4205_v42 = vpop.f32.mrb[48].mxu1  ;;  %v4156_v45 = vpop.f32.mrb[49].mxu0  ;;  %4667 = vmatprep.subr.bf16.mxu0 %v6051_v3  ;;  %v5157_v3 = vld [vmem:[%s7541_s3 + $0x4] ss:$28 sps:$4 sm:$0xff]   ;;  %v5164_v30 = vld [vmem:[%s7541_s3 + $0x38] ss:$28 sps:$4 sm:$0xff]  }
 0x158   :  { %v4157_v60 = vadd.f32 %v4156_v45, %v4155_v31  ;;  %v4206_v44 = vpop.f32.mrb[49].mxu1  ;;  %v4158_v46 = vpop.f32.mrb[50].mxu0 }
 0x159   :  { %v6600_v2 = vadd.f32 %v4206_v44, %v4205_v42  ;;  %v4208_v18 = vpop.f32.mrb[50].mxu1  ;;  %4604 = vmatpush3.bf16.msra.mxu1 %v6214_v35  ;;  %v4159_v33 = vpop.f32.mrb[51].mxu0  ;;  %v7602_v44 = vld [vmem:[#allocation18_spill] sm:$0xff] }
 0x15a   :  { %v1059_v19 = vadd.f32 %v4157_v60, %v6399_v40  ;;  %v4160_v24 = vadd.f32 %v4159_v33, %v4158_v46  ;;  %v4209_v49 = vpop.f32.mrb[51].mxu1  ;;  %4605 = vmatprep.subr.bf16.mxu1 %v6220_v50  ;;  %4668 = vmatpush3.bf16.msra.mxu0 %v6069_v8  ;;  %v5167_v60 = vld [vmem:[%s7541_s3 + $0x74] ss:$28 sps:$4 sm:$0xff]  }
 0x15b   :  { %v6609_v4 = vadd.f32 %v4209_v49, %v4208_v18  ;;  %2653 = vmatmul.mubr.bf16.gmra.mrb[156].mxu0 %v5151_v59  ;;  %4669 = vmatprep.subr.bf16.mxu0 %v6075_v9  ;;  %v7601_v59 = vld [vmem:[#allocation5_spill] sm:$0xff]  ;;  %v7603_v18 = vld [vmem:[#allocation6_spill] sm:$0xff]  ;;  %v7605_v49 = vld [vmem:[#allocation7_spill] sm:$0xff] }
 0x15c   :  { %v6613_v35 = vadd.f32 %v6522_v0, %v1059_v19  ;;  %v1062_v39 = vadd.f32 %v4160_v24, %v6401_v28  ;;  %4852 = vmatmul.mubr.msk.bf16.gmra.mrb[156].mxu1 %vm773_vm0, %v5152_v7  ;;  %2660 = vmatprep.mubr.bf16.mxu0 %v5153_v36  ;;  %v5158_v28 = vld [vmem:[%s7540_s2 + $0xf0] ss:$28 sps:$4 sm:$0xff]  }
 0x15d   :  { %4606 = vmatpush3.bf16.msra.mxu1 %v6235_v34  ;;  %3222 = vmatprep.mubr.bf16.mxu1 %v5157_v3  ;;  %v7604_v19 = vld [vmem:[#allocation19_spill] sm:$0xff] }
 0x15e   :  { %v6619_v50 = vadd.f32 %v6539_v20, %v1062_v39  ;;  %v4161_v8 = vpop.f32.mrb[52].mxu0  ;;  %4607 = vmatprep.subr.bf16.mxu1 %v6243_v5  ;;  %4670 = vmatpush3.bf16.msra.mxu0 %v6082_v10  ;;  %v5155_v20 = vld [vmem:[%s7541_s3] ss:$28 sps:$4 sm:$0xff]   ;;  %v5159_v5 = vld [vmem:[%s7540_s2 + $0x12c] ss:$28 sps:$4 sm:$0xff]  }
 0x15f   :  { %v4211_v9 = vpop.f32.mrb[52].mxu1  ;;  %v4162_v40 = vpop.f32.mrb[53].mxu0  ;;  %4671 = vmatprep.subr.bf16.mxu0 %v6088_v11  ;;  %v5161_v11 = vld [vmem:[%s7541_s3 + $0x3c] ss:$28 sps:$4 sm:$0xff]  }
 0x160   :  { %v4163_v0 = vadd.f32 %v4162_v40, %v4161_v8  ;;  %v4212_v54 = vpop.f32.mrb[53].mxu1  ;;  %v4164_v34 = vpop.f32.mrb[54].mxu0 }
 0x161   :  { %v6633_v10 = vadd.f32 %v4212_v54, %v4211_v9  ;;  %v4214_v22 = vpop.f32.mrb[54].mxu1  ;;  %4608 = vmatpush3.bf16.msra.mxu1 %v6252_v21  ;;  %v4165_v29 = vpop.f32.mrb[55].mxu0  ;;  %v7606_v9 = vld [vmem:[#allocation8_spill] sm:$0xff] }
 0x162   :  { %v1067_v48 = vadd.f32 %v4163_v0, %v6434_v16  ;;  %v4166_v41 = vadd.f32 %v4165_v29, %v4164_v34  ;;  %v4215_v37 = vpop.f32.mrb[55].mxu1  ;;  %4721 = vmatprep.subr.bf16.mxu1 %v6261_v38  ;;  %4672 = vmatpush3.bf16.msra.mxu0 %v6103_v15  ;;  %v7600_v15 = vld [vmem:[#allocation3_spill] sm:$0xff] }
 0x163   :  { %v6642_v51 = vadd.f32 %v4215_v37, %v4214_v22  ;;  %2661 = vmatmul.mubr.bf16.gmra.mrb[160].mxu0 %v5158_v28  ;;  %4855 = vmatprep.subr.bf16.mxu0 %v6112_v17  ;;  %v5163_v17 = vld [vmem:[%s7540_s2 + $0x128] ss:$28 sps:$4 sm:$0xff]  }
 0x164   :  { %v6646_v21 = vadd.f32 %v6516_v32, %v1067_v48  ;;  %v1070_v57 = vadd.f32 %v4166_v41, %v6436_v14  ;;  %3223 = vmatmul.mubr.bf16.vlgmr.msra.gmra.mrb[160].mxu1 %v5155_v20  ;;  %2668 = vmatprep.mubr.bf16.mxu0 %v5159_v5  ;;  %v5170_v20 = vld [vmem:[%s7541_s3 + $0x70] ss:$28 sps:$4 sm:$0xff]   ;;  %v7607_v48 = vld [vmem:[#allocation9_spill] sm:$0xff] }
 0x165   :  { %4722 = vmatpush3.bf16.msra.mxu1 %v7599_v47  ;;  %3230 = vmatprep.mubr.bf16.mxu1 %v5161_v11  ;;  %v5173_v11 = vld [vmem:[%s7541_s3 + $0xac] ss:$28 sps:$4 sm:$0xff]   ;;  %v7608_v47 = vld [vmem:[#allocation10_spill] sm:$0xff] }
 0x166   :  { %v6651_v16 = vadd.f32 %v6531_v6, %v1070_v57  ;;  %v4167_v38 = vpop.f32.mrb[56].mxu0  ;;  %4723 = vmatprep.subr.bf16.mxu1 %v7600_v15  ;;  %v5165_v6 = vld [vmem:[%s7540_s2 + $0x164] ss:$28 sps:$4 sm:$0xff]  }
 0x167   :  { %v4217_v61 = vpop.f32.mrb[56].mxu1  ;;  %v4168_v63 = vpop.f32.mrb[57].mxu0 }
 0x168   :  { %v4169_v32 = vadd.f32 %v4168_v63, %v4167_v38  ;;  %v4218_v58 = vpop.f32.mrb[57].mxu1  ;;  %v4170_v14 = vpop.f32.mrb[58].mxu0 }
 0x169   :  { %v6663_v31 = vadd.f32 %v4218_v58, %v4217_v61  ;;  %v4220_v42 = vpop.f32.mrb[58].mxu1  ;;  %v4171_v45 = vpop.f32.mrb[59].mxu0  ;;  %4724 = vmatpush3.bf16.msra.mxu1 %v7601_v59  ;;  %v7609_v61 = vld [vmem:[#allocation20_spill] sm:$0xff]  ;;  %v5176_v59 = vld [vmem:[%s7541_s3 + $0xa8] ss:$28 sps:$4 sm:$0xff]  }
 0x16a   :  { %v1075_v46 = vadd.f32 %v4169_v32, %v7602_v44  ;;  %v4172_v7 = vadd.f32 %v4171_v45, %v4170_v14  ;;  %v4221_v36 = vpop.f32.mrb[59].mxu1  ;;  %4725 = vmatprep.subr.bf16.mxu1 %v7603_v18  ;;  %v7611_v58 = vld [vmem:[#allocation12_spill] sm:$0xff] }
 0x16b   :  { %v6671_v33 = vadd.f32 %v4221_v36, %v4220_v42  ;;  %2669 = vmatmul.mubr.bf16.gmra.mrb[164].mxu0 %v5163_v17  ;;  %v7610_v17 = vld [vmem:[#allocation11_spill] sm:$0xff]  ;;  %v7612_v36 = vld [vmem:[#allocation13_spill] sm:$0xff] }
 0x16c   :  { %v6674_v3 = vadd.f32 %v6558_v26, %v1075_v46  ;;  %v1078_v24 = vadd.f32 %v4172_v7, %v7604_v19  ;;  %3231 = vmatmul.mubr.bf16.gmra.mrb[164].mxu1 %v5164_v30  ;;  %2676 = vmatprep.mubr.bf16.mxu0 %v5165_v6  ;;  %v5169_v26 = vld [vmem:[%s7540_s2 + $0x160] ss:$28 sps:$4 sm:$0xff]  }
 0x16d   :  { %3238 = vmatprep.mubr.bf16.mxu1 %v5167_v60  ;;  %4726 = vmatpush3.bf16.msra.mxu1 %v7605_v49  ;;  %v5177_v7 = vld [vmem:[%s7541_s3 + $0xe4] ss:$28 sps:$4 sm:$0xff]  }
 0x16e   :  { %v6679_v39 = vadd.f32 %v6573_v53, %v1078_v24  ;;  %v4173_v8 = vpop.f32.mrb[60].mxu0  ;;  %4727 = vmatprep.subr.bf16.mxu1 %v7606_v9  ;;  %v5171_v53 = vld [vmem:[%s7540_s2 + $0x19c] ss:$28 sps:$4 sm:$0xff]   ;;  %v7613_v49 = vld [vmem:[#allocation14_spill] sm:$0xff] }
 0x16f   :  { %v4223_v40 = vpop.f32.mrb[60].mxu1  ;;  %v4174_v28 = vpop.f32.mrb[61].mxu0 }
 0x170   :  { %v4175_v0 = vadd.f32 %v4174_v28, %v4173_v8  ;;  %v4224_v54 = vpop.f32.mrb[61].mxu1  ;;  %v4176_v34 = vpop.f32.mrb[62].mxu0 }
 0x171   :  { %v6691_v5 = vadd.f32 %v4224_v54, %v4223_v40  ;;  %v4226_v22 = vpop.f32.mrb[62].mxu1  ;;  %v4177_v29 = vpop.f32.mrb[63].mxu0  ;;  %4728 = vmatpush3.bf16.msra.mxu1 %v7607_v48  ;;  %v7614_v40 = vld [vmem:[#allocation15_spill] sm:$0xff]  ;;  %v5183_v48 = vld [vmem:[%s7541_s3 + $0x11c] ss:$28 sps:$4 sm:$0xff]  }
 0x172   :  { %v1083_v41 = vadd.f32 %v4175_v0, %v6466_v25  ;;  %v4178_v37 = vadd.f32 %v4177_v29, %v4176_v34  ;;  %v4227_v57 = vpop.f32.mrb[63].mxu1  ;;  %4729 = vmatprep.subr.bf16.mxu1 %v7608_v47  ;;  %v5179_v54 = vld [vmem:[%s7541_s3 + $0x8] ss:$28 sps:$4 sm:$0xff]  }
 0x173   :  { %v6699_v38 = vadd.f32 %v4227_v57, %v4226_v22  ;;  %2677 = vmatmul.mubr.bf16.gmra.mrb[168].mxu0 %v5169_v26  ;;  %v7615_v26 = vld [vmem:[#allocation16_spill] sm:$0xff] }
 0x174   :  { %v6702_v15 = vadd.f32 %v6552_v23, %v1083_v41  ;;  %v1086_v63 = vadd.f32 %v4178_v37, %v7609_v61  ;;  %3239 = vmatmul.mubr.bf16.gmra.mrb[168].mxu1 %v5170_v20  ;;  %2684 = vmatprep.mubr.bf16.mxu0 %v5171_v53  ;;  %v5175_v23 = vld [vmem:[%s7540_s2 + $0x198] ss:$28 sps:$4 sm:$0xff]   ;;  %v5185_v41 = vld [vmem:[%s7541_s3 + $0x44] ss:$28 sps:$4 sm:$0xff]  }
 0x175   :  { %3246 = vmatprep.mubr.bf16.mxu1 %v5173_v11  ;;  %4730 = vmatpush3.bf16.msra.mxu1 %v7610_v17  ;;  %v7616_v37 = vld [vmem:[#allocation17_spill] sm:$0xff] }
 0x176   :  { %v6707_v32 = vadd.f32 %v6566_v27, %v1086_v63  ;;  %v4269_v25 = vpop.f32.mrb[64].mxu0  ;;  %4731 = vmatprep.subr.bf16.mxu1 %v7611_v58  ;;  %v5181_v27 = vld [vmem:[%s7541_s3 + $0xc] ss:$28 sps:$4 sm:$0xff]  }
 0x177   :  { %v4229_v14 = vpop.f32.mrb[64].mxu1  ;;  %v4270_v30 = vpop.f32.mrb[65].mxu0 }
 0x178   :  { %v4230_v6 = vpop.f32.mrb[65].mxu1  ;;  %v4271_v42 = vadd.f32 %v4270_v30, %v4269_v25  ;;  %v4272_v45 = vpop.f32.mrb[66].mxu0  ;;  %v5295_v25 = vld [vmem:[%s7537_s4 + $0x180] sm:$0xff]  }
 0x179   :  { %v6719_v60 = vadd.f32 %v4230_v6, %v4229_v14  ;;  %v4232_v44 = vpop.f32.mrb[66].mxu1  ;;  %v4273_v46 = vpop.f32.mrb[67].mxu0  ;;  %4732 = vmatpush3.bf16.msra.mxu1 %v7612_v36  ;;  %v7617_v14 = vld [vmem:[#allocation4_spill] sm:$0xff] }
 0x17a   :  { %v6726_v18 = vadd.f32 %v4271_v42, %v6600_v2  ;;  %v4233_v19 = vpop.f32.mrb[67].mxu1  ;;  %v4274_v24 = vadd.f32 %v4273_v46, %v4272_v45  ;;  %4733 = vmatprep.subr.bf16.mxu1 %v7613_v49  ;;  %v5187_v45 = vld [vmem:[%s7541_s3 + $0x118] ss:$28 sps:$4 sm:$0xff]  }
 0x17b   :  { %v6729_v8 = vadd.f32 %v4233_v19, %v4232_v44  ;;  %2685 = vmatmul.mubr.bf16.gmra.mrb[172].mxu0 %v5175_v23  ;;  %v5188_v23 = vld [vmem:[%s7541_s3 + $0x40] ss:$28 sps:$4 sm:$0xff]  }
 0x17c   :  { %v6732_v9 = vadd.f32 %v4274_v24, %v6609_v4  ;;  %3247 = vmatmul.mubr.bf16.gmra.mrb[172].mxu1 %v5176_v59  ;;  %3319 = vmatprep.mubr.bf16.mxu0 %v5181_v27  ;;  %v5182_v4 = vld [vmem:[%s7541_s3 + $0xe0] ss:$28 sps:$4 sm:$0xff]  }
 0x17d   :  { %3254 = vmatprep.mubr.bf16.mxu1 %v5177_v7  ;;  %4734 = vmatpush3.bf16.msra.mxu1 %v7614_v40  ;;  %v5191_v59 = vld [vmem:[%s7541_s3 + $0x7c] ss:$28 sps:$4 sm:$0xff]   ;;  %v5189_v7 = vld [vmem:[%s7541_s3 + $0x154] ss:$28 sps:$4 sm:$0xff]  }
 0x17e   :  { %v4275_v28 = vpop.f32.mrb[68].mxu0  ;;  %4735 = vmatprep.subr.bf16.mxu1 %v7615_v26 }
 0x17f   :  { %v4235_v2 = vpop.f32.mrb[68].mxu1  ;;  %v4276_v0 = vpop.f32.mrb[69].mxu0 }
 0x180   :  { %v4236_v34 = vpop.f32.mrb[69].mxu1  ;;  %v4277_v20 = vadd.f32 %v4276_v0, %v4275_v28  ;;  %v4278_v53 = vpop.f32.mrb[70].mxu0  ;;  %v5194_v0 = vld [vmem:[%s7541_s3 + $0x78] ss:$28 sps:$4 sm:$0xff]  }
 0x181   :  { %v6742_v22 = vadd.f32 %v4236_v34, %v4235_v2  ;;  %v4238_v29 = vpop.f32.mrb[70].mxu1  ;;  %v4279_v11 = vpop.f32.mrb[71].mxu0  ;;  %4736 = vmatpush3.bf16.msra.mxu1 %v7616_v37 }
 0x182   :  { %v6752_v57 = vadd.f32 %v4277_v20, %v6633_v10  ;;  %v4239_v47 = vpop.f32.mrb[71].mxu1  ;;  %v4280_v61 = vadd.f32 %v4279_v11, %v4278_v53  ;;  %v5193_v20 = vld [vmem:[%s7541_s3 + $0x150] ss:$28 sps:$4 sm:$0xff]  }
 0x183   :  { %v6754_v63 = vadd.f32 %v4239_v47, %v4238_v29  ;;  %3320 = vmatmul.mubr.bf16.vlgmr.msra.gmra.mrb[176].mxu0 %v5179_v54  ;;  %v5195_v11 = vld [vmem:[%s7541_s3 + $0x18c] ss:$28 sps:$4 sm:$0xff]  }
 0x184   :  { %v6757_v17 = vadd.f32 %v4280_v61, %v6642_v51  ;;  %3255 = vmatmul.mubr.bf16.gmra.mrb[176].mxu1 %v5182_v4  ;;  %4856 = vmatpush3.bf16.msra.mxu0 %v5295_v25 }
 0x185   :  { %3262 = vmatprep.mubr.bf16.mxu1 %v5183_v48  ;;  %3327 = vmatprep.mubr.bf16.mxu0 %v5185_v41 }
 0x186   :  { %v4281_v58 = vpop.f32.mrb[72].mxu0  ;;  %4857 = vmatprep.subr.bf16.mxu0 %v7617_v14 }
 0x187   :  { %v4241_v10 = vpop.f32.mrb[72].mxu1  ;;  %v4282_v30 = vpop.f32.mrb[73].mxu0 }
 0x188   :  { %v4242_v6 = vpop.f32.mrb[73].mxu1  ;;  %v4283_v51 = vadd.f32 %v4282_v30, %v4281_v58  ;;  %v4284_v42 = vpop.f32.mrb[74].mxu0  ;;  %4858 = vmatpush3.bf16.msra.mxu0 %v7617_v14 }
 0x189   :  { %v6773_v27 = vadd.f32 %v4242_v6, %v4241_v10  ;;  %v4244_v44 = vpop.f32.mrb[74].mxu1  ;;  %v4285_v46 = vpop.f32.mrb[75].mxu0  ;;  %v5200_v10 = vld [vmem:[%s7541_s3 + $0xb0] ss:$28 sps:$4 sm:$0xff]   ;;  %v5199_v6 = vld [vmem:[%s7541_s3 + $0x188] ss:$28 sps:$4 sm:$0xff]  }
 0x18a   :  { %v6779_v36 = vadd.f32 %v4283_v51, %v6663_v31  ;;  %v4245_v19 = vpop.f32.mrb[75].mxu1  ;;  %v4286_v24 = vadd.f32 %v4285_v46, %v4284_v42 }
 0x18b   :  { %v6781_v49 = vadd.f32 %v4245_v19, %v4244_v44  ;;  %3328 = vmatmul.mubr.bf16.gmra.mrb[180].mxu0 %v5188_v23 }
 0x18c   :  { %v6784_v40 = vadd.f32 %v4286_v24, %v6671_v33  ;;  %3263 = vmatmul.mubr.bf16.gmra.mrb[180].mxu1 %v5187_v45  ;;  %3335 = vmatprep.mubr.bf16.mxu0 %v5191_v59  ;;  %v5197_v33 = vld [vmem:[%s7541_s3 + $0xb4] ss:$28 sps:$4 sm:$0xff]  }
 0x18d   :  { %3270 = vmatprep.mubr.bf16.mxu1 %v5189_v7  ;;  %v5205_v59 = vld [vmem:[%s7541_s3 + $0x14] ss:$28 sps:$4 sm:$0xff]  }
 0x18e   :  { %v4287_v28 = vpop.f32.mrb[76].mxu0 }
 0x18f   :  { %v4247_v26 = vpop.f32.mrb[76].mxu1  ;;  %v4288_v2 = vpop.f32.mrb[77].mxu0 }
 0x190   :  { %v4248_v31 = vpop.f32.mrb[77].mxu1  ;;  %v4289_v54 = vadd.f32 %v4288_v2, %v4287_v28  ;;  %v4290_v34 = vpop.f32.mrb[78].mxu0 }
 0x191   :  { %v6795_v53 = vadd.f32 %v4248_v31, %v4247_v26  ;;  %v4250_v4 = vpop.f32.mrb[78].mxu1  ;;  %v4291_v29 = vpop.f32.mrb[79].mxu0  ;;  %v5206_v31 = vld [vmem:[%s7541_s3 + $0xe8] ss:$28 sps:$4 sm:$0xff]  }
 0x192   :  { %v6801_v48 = vadd.f32 %v4289_v54, %v6691_v5  ;;  %v4251_v41 = vpop.f32.mrb[79].mxu1  ;;  %v4292_v37 = vadd.f32 %v4291_v29, %v4290_v34  ;;  %v5209_v29 = vld [vmem:[%s7541_s3 + $0x4c] ss:$28 sps:$4 sm:$0xff]  }
 0x193   :  { %v6803_v47 = vadd.f32 %v4251_v41, %v4250_v4  ;;  %3336 = vmatmul.mubr.bf16.gmra.mrb[184].mxu0 %v5194_v0 }
 0x194   :  { %v6806_v61 = vadd.f32 %v4292_v37, %v6699_v38  ;;  %3271 = vmatmul.mubr.bf16.gmra.mrb[184].mxu1 %v5193_v20  ;;  %3343 = vmatprep.mubr.bf16.mxu0 %v5197_v33  ;;  %v5201_v38 = vld [vmem:[%s7541_s3 + $0xec] ss:$28 sps:$4 sm:$0xff]   ;;  %v5207_v20 = vld [vmem:[%s7541_s3 + $0x124] ss:$28 sps:$4 sm:$0xff]  }
 0x195   :  { %3278 = vmatprep.mubr.bf16.mxu1 %v5195_v11 }
 0x196   :  { %v4293_v25 = vpop.f32.mrb[80].mxu0 }
 0x197   :  { %v4333_v58 = vpop.f32.mrb[80].mxu1  ;;  %v4294_v14 = vpop.f32.mrb[81].mxu0 }
 0x198   :  { %v4295_v5 = vadd.f32 %v4294_v14, %v4293_v25  ;;  %v4334_v30 = vpop.f32.mrb[81].mxu1  ;;  %v4296_v23 = vpop.f32.mrb[82].mxu0 }
 0x199   :  { %v4335_v51 = vadd.f32 %v4334_v30, %v4333_v58  ;;  %v4336_v42 = vpop.f32.mrb[82].mxu1  ;;  %v4297_v45 = vpop.f32.mrb[83].mxu0 }
 0x19a   :  { %v6821_v44 = vadd.f32 %v4295_v5, %v6719_v60  ;;  %v4298_v46 = vadd.f32 %v4297_v45, %v4296_v23  ;;  %v4337_v7 = vpop.f32.mrb[83].mxu1 }
 0x19b   :  { %v4338_v19 = vadd.f32 %v4337_v7, %v4336_v42  ;;  %3344 = vmatmul.mubr.bf16.gmra.mrb[188].mxu0 %v5200_v10  ;;  %v6824_v24 = vadd.f32 %v4335_v51, %v6726_v18 }
 0x19c   :  { %v6827_v28 = vadd.f32 %v4298_v46, %v6729_v8  ;;  %3279 = vmatmul.mubr.bf16.gmra.mrb[188].mxu1 %v5199_v6  ;;  %3351 = vmatprep.mubr.bf16.mxu0 %v5201_v38  ;;  %v5203_v8 = vld [vmem:[%s7541_s3 + $0x10] ss:$28 sps:$4 sm:$0xff]  }
 0x19d   :  { %3416 = vmatprep.mubr.bf16.mxu1 %v5205_v59  ;;  %v6830_v26 = vadd.f32 %v4338_v19, %v6732_v9  ;;  %v5215_v59 = vld [vmem:[%s7541_s3 + $0x84] ss:$28 sps:$4 sm:$0xff]  }
 0x19e   :  { %v4299_v2 = vpop.f32.mrb[84].mxu0 }
 0x19f   :  { %v4339_v0 = vpop.f32.mrb[84].mxu1  ;;  %v4300_v60 = vpop.f32.mrb[85].mxu0 }
 0x1a0   :  { %v4301_v54 = vadd.f32 %v4300_v60, %v4299_v2  ;;  %v4340_v34 = vpop.f32.mrb[85].mxu1  ;;  %v4302_v18 = vpop.f32.mrb[86].mxu0 }
 0x1a1   :  { %v4341_v9 = vadd.f32 %v4340_v34, %v4339_v0  ;;  %v4342_v33 = vpop.f32.mrb[86].mxu1  ;;  %v4303_v4 = vpop.f32.mrb[87].mxu0 }
 0x1a2   :  { %v6845_v11 = vadd.f32 %v4301_v54, %v6742_v22  ;;  %v4304_v41 = vadd.f32 %v4303_v4, %v4302_v18  ;;  %v4343_v37 = vpop.f32.mrb[87].mxu1  ;;  %v5211_v22 = vld [vmem:[%s7541_s3 + $0x120] ss:$28 sps:$4 sm:$0xff]   ;;  %v5217_v18 = vld [vmem:[%s7541_s3 + $0x158] ss:$28 sps:$4 sm:$0xff]  }
 0x1a3   :  { %v4344_v25 = vadd.f32 %v4343_v37, %v4342_v33  ;;  %3352 = vmatmul.mubr.bf16.gmra.mrb[192].mxu0 %v5206_v31  ;;  %v1835_v58 = vadd.f32 %v4341_v9, %v6752_v57  ;;  %v5212_v57 = vld [vmem:[%s7541_s3 + $0x48] ss:$28 sps:$4 sm:$0xff]   ;;  %v5219_v9 = vld [vmem:[%s7541_s3 + $0x194] ss:$28 sps:$4 sm:$0xff]  }
 0x1a4   :  { %v6849_v14 = vadd.f32 %v4304_v41, %v6754_v63  ;;  %3417 = vmatmul.mubr.bf16.vlgmr.msra.gmra.mrb[192].mxu1 %v5203_v8  ;;  %3359 = vmatprep.mubr.bf16.mxu0 %v5207_v20  ;;  %v5213_v63 = vld [vmem:[%s7541_s3 + $0x15c] ss:$28 sps:$4 sm:$0xff]  }
 0x1a5   :  { %3424 = vmatprep.mubr.bf16.mxu1 %v5209_v29  ;;  %v6852_v10 = vadd.f32 %v4344_v25, %v6757_v17  ;;  %v5221_v29 = vld [vmem:[%s7541_s3 + $0xbc] ss:$28 sps:$4 sm:$0xff]  }
 0x1a6   :  { %v4305_v5 = vpop.f32.mrb[88].mxu0 }
 0x1a7   :  { %v4345_v30 = vpop.f32.mrb[88].mxu1  ;;  %v4306_v23 = vpop.f32.mrb[89].mxu0 }
 0x1a8   :  { %v4307_v6 = vadd.f32 %v4306_v23, %v4305_v5  ;;  %v4346_v38 = vpop.f32.mrb[89].mxu1  ;;  %v4308_v51 = vpop.f32.mrb[90].mxu0 }
 0x1a9   :  { %v4347_v17 = vadd.f32 %v4346_v38, %v4345_v30  ;;  %v4348_v42 = vpop.f32.mrb[90].mxu1  ;;  %v4309_v45 = vpop.f32.mrb[91].mxu0 }
 0x1aa   :  { %v6867_v46 = vadd.f32 %v4307_v6, %v6773_v27  ;;  %v4310_v7 = vadd.f32 %v4309_v45, %v4308_v51  ;;  %v4349_v19 = vpop.f32.mrb[91].mxu1 }
 0x1ab   :  { %v4350_v2 = vadd.f32 %v4349_v19, %v4348_v42  ;;  %3360 = vmatmul.mubr.bf16.gmra.mrb[196].mxu0 %v5211_v22  ;;  %v6870_v0 = vadd.f32 %v4347_v17, %v6779_v36  ;;  %v6900_v22 = vld [vmem:[%s7542_s5] ss:$0 sm:$0xff] }
 0x1ac   :  { %v6873_v60 = vadd.f32 %v4310_v7, %v6781_v49  ;;  %3425 = vmatmul.mubr.bf16.gmra.mrb[196].mxu1 %v5212_v57  ;;  %3367 = vmatprep.mubr.bf16.mxu0 %v5213_v63  ;;  %v5218_v49 = vld [vmem:[%s7541_s3 + $0x80] ss:$28 sps:$4 sm:$0xff]   ;;  %v1194_v6 = vmul.f32 %v6900_v22, %v6506_v12  ;;  %v1192_v63 = vmul.f32 %v6900_v22, %v6483_v52  ;;  %v5227_v12 = vld [vmem:[%s7541_s3 + $0x18] ss:$28 sps:$4 sm:$0xff]  }
 0x1ad   :  { %3432 = vmatprep.mubr.bf16.mxu1 %v5215_v59  ;;  %v6876_v31 = vadd.f32 %v4350_v2, %v6784_v40  ;;  %v1195_v52 = vmul.f32 %v6900_v22, %v6512_v13 }
 0x1ae   :  { %v4311_v54 = vpop.f32.mrb[92].mxu0 }
 0x1af   :  { %v4351_v34 = vpop.f32.mrb[92].mxu1  ;;  %v4312_v27 = vpop.f32.mrb[93].mxu0 }
 0x1b0   :  { %v4313_v8 = vadd.f32 %v4312_v27, %v4311_v54  ;;  %v4352_v20 = vpop.f32.mrb[93].mxu1  ;;  %v4314_v36 = vpop.f32.mrb[94].mxu0  ;;  %v5225_v54 = vld [vmem:[%s7541_s3 + $0xf4] ss:$28 sps:$4 sm:$0xff]  }
 0x1b1   :  { %v4353_v40 = vadd.f32 %v4352_v20, %v4351_v34  ;;  %v4354_v33 = vpop.f32.mrb[94].mxu1  ;;  %v4315_v4 = vpop.f32.mrb[95].mxu0  ;;  %v1193_v34 = vmul.f32 %v6900_v22, %v6487_v55 }
 0x1b2   :  { %v6891_v41 = vadd.f32 %v4313_v8, %v6795_v53  ;;  %v4316_v37 = vadd.f32 %v4315_v4, %v4314_v36  ;;  %v4355_v25 = vpop.f32.mrb[95].mxu1 }
 0x1b3   :  { %v4356_v5 = vadd.f32 %v4355_v25, %v4354_v33  ;;  %3368 = vmatmul.mubr.bf16.gmra.mrb[200].mxu0 %v5217_v18  ;;  %v1851_v30 = vadd.f32 %v4353_v40, %v6801_v48 }
 0x1b4   :  { %v6895_v23 = vadd.f32 %v4316_v37, %v6803_v47  ;;  %3433 = vmatmul.mubr.bf16.gmra.mrb[200].mxu1 %v5218_v49  ;;  %3375 = vmatprep.mubr.bf16.mxu0 %v5219_v9  ;;  %v5223_v47 = vld [vmem:[%s7541_s3 + $0x190] ss:$28 sps:$4 sm:$0xff]   ;;  %v1198_v37 = vmul.f32 %v6900_v22, %v6579_v62  ;;  %v1196_v62 = vmul.f32 %v6900_v22, %v6542_v1 }
 0x1b5   :  { %3440 = vmatprep.mubr.bf16.mxu1 %v5221_v29  ;;  %v6903_v53 = vadd.f32 %v4356_v5, %v6806_v61  ;;  %v5224_v61 = vld [vmem:[%s7541_s3 + $0xb8] ss:$28 sps:$4 sm:$0xff]  }
 0x1b6   :  { %v4821_v38 = vpop.f32.mrb[96].mxu0 }
 0x1b7   :  { %v4357_v51 = vpop.f32.mrb[96].mxu1  ;;  %v1932_v48 = vadd.f32 %v4821_v38, %v1835_v58  ;;  %v1923_v57 = vpop.f32.mrb[97].mxu0  ;;  %v6922_v58 = vld [vmem:[%s7543_s6] ss:$0 sm:$0xff] }
 0x1b8   :  { %v4358_v17 = vpop.f32.mrb[97].mxu1  ;;  %v1924_v42 = vadd.f32 %v1923_v57, %v6824_v24  ;;  %v4822_v45 = vpop.f32.mrb[98].mxu0  ;;  %v6934_v27 = vadd.f32 %v6922_v58, %v1194_v6  ;;  %v6946_v55 = vadd.f32 %v6922_v58, %v1192_v63  ;;  %v6956_v33 = vadd.f32 %v6922_v58, %v1195_v52  ;;  %v5229_v57 = vld [vmem:[%s7541_s3 + $0x50] ss:$28 sps:$4 sm:$0xff]  }
 0x1b9   :  { %v1988_v59 = vmul.f32 %v6900_v22, %v1932_v48  ;;  %v4359_v24 = vadd.f32 %v4358_v17, %v4357_v51  ;;  %v4360_v7 = vpop.f32.mrb[98].mxu1  ;;  %v1935_v19 = vadd.f32 %v4822_v45, %v6852_v10  ;;  %v1926_v2 = vpop.f32.mrb[99].mxu0  ;;  %v6965_v29 = vadd.f32 %v6922_v58, %v1193_v34  ;;  %v5228_v45 = vld [vmem:[%s7541_s3 + $0xf0] ss:$28 sps:$4 sm:$0xff]  }
 0x1ba   :  { %v1986_v18 = vmul.f32 %v6900_v22, %v1924_v42  ;;  %v4361_v13 = vpop.f32.mrb[99].mxu1  ;;  %v1927_v8 = vadd.f32 %v1926_v2, %v6830_v26 }
 0x1bb   :  { %v6939_v20 = vadd.f32 %v6922_v58, %v1988_v59  ;;  %v1989_v10 = vmul.f32 %v6900_v22, %v1935_v19  ;;  %v4362_v36 = vadd.f32 %v4361_v13, %v4360_v7  ;;  %3376 = vmatmul.mubr.bf16.gmra.mrb[204].mxu0 %v5223_v47  ;;  %v6943_v49 = vadd.f32 %v4359_v24, %v6821_v44 }
 0x1bc   :  { %v6949_v9 = vadd.f32 %v6922_v58, %v1986_v18  ;;  %v1987_v40 = vmul.f32 %v6900_v22, %v1927_v8  ;;  %3441 = vmatmul.mubr.bf16.gmra.mrb[204].mxu1 %v5224_v61  ;;  %4859 = vmatprep.mubr.msk.bf16.mxu0 %vm773_vm0, %v5227_v12  ;;  %v1199_v61 = vmul.f32 %v6900_v22, %v6586_v43 }
 0x1bd   :  { %v6959_v44 = vadd.f32 %v6922_v58, %v1989_v10  ;;  %3448 = vmatprep.mubr.bf16.mxu1 %v5225_v54  ;;  %v6962_v4 = vadd.f32 %v4362_v36, %v6827_v28  ;;  %v1197_v7 = vmul.f32 %v6900_v22, %v6548_v56  ;;  %v7000_v19 = vadd.f32 %v6922_v58, %v1198_v37 }
 0x1be   :  { %v6972_v5 = vadd.f32 %v6922_v58, %v1987_v40  ;;  %v4825_v6 = vpop.f32.mrb[100].mxu0  ;;  %v7011_v56 = vadd.f32 %v6922_v58, %v1196_v62  ;;  %v7021_v36 = vadd.f32 %v6922_v58, %v1199_v61  ;;  %v1202_v37 = vmul.f32 %v6900_v22, %v6646_v21  ;;  %v5234_v21 = vld [vmem:[%s7541_s3 + $0xc0] ss:$28 sps:$4 sm:$0xff]  }
 0x1bf   :  { %v4363_v51 = vpop.f32.mrb[100].mxu1  ;;  %v1948_v48 = vadd.f32 %v4825_v6, %v1851_v30  ;;  %v1939_v28 = vpop.f32.mrb[101].mxu0  ;;  %v5232_v30 = vld [vmem:[%s7541_s3 + $0x88] ss:$28 sps:$4 sm:$0xff]  }
 0x1c0   :  { %v4364_v63 = vpop.f32.mrb[101].mxu1  ;;  %v1940_v17 = vadd.f32 %v1939_v28, %v6870_v0  ;;  %v4826_v42 = vpop.f32.mrb[102].mxu0  ;;  %v5230_v0 = vld [vmem:[%s7541_s3 + $0x12c] ss:$28 sps:$4 sm:$0xff]  }
 0x1c1   :  { %v1992_v1 = vmul.f32 %v6900_v22, %v1948_v48  ;;  %v4365_v12 = vadd.f32 %v4364_v63, %v4363_v51  ;;  %v4366_v52 = vpop.f32.mrb[102].mxu1  ;;  %v1951_v59 = vadd.f32 %v4826_v42, %v6903_v53  ;;  %v1942_v24 = vpop.f32.mrb[103].mxu0  ;;  %v7032_v51 = vadd.f32 %v6922_v58, %v1197_v7 }
 0x1c2   :  { %v1990_v2 = vmul.f32 %v6900_v22, %v1940_v17  ;;  %v4367_v43 = vpop.f32.mrb[103].mxu1  ;;  %v1943_v54 = vadd.f32 %v1942_v24, %v6876_v31  ;;  %v1200_v17 = vmul.f32 %v6900_v22, %v6613_v35 }
 0x1c3   :  { %v7005_v34 = vadd.f32 %v6922_v58, %v1992_v1  ;;  %v1993_v53 = vmul.f32 %v6900_v22, %v1951_v59  ;;  %v4368_v18 = vadd.f32 %v4367_v43, %v4366_v52  ;;  %4860 = vmatmul.mubr.msk.bf16.vlgmr.msra.gmra.mrb[208].mxu0 %vm773_vm0, %v5229_v57  ;;  %v1867_v13 = vadd.f32 %v4365_v12, %v6845_v11  ;;  %v5233_v1 = vld [vmem:[%s7541_s3 + $0x128] ss:$28 sps:$4 sm:$0xff]   ;;  %v5237_v12 = vld [vmem:[%s7541_s3 + $0xf8] ss:$28 sps:$4 sm:$0xff]  }
 0x1c4   :  { %v7014_v8 = vadd.f32 %v6922_v58, %v1990_v2  ;;  %v1991_v10 = vmul.f32 %v6900_v22, %v1943_v54  ;;  %3449 = vmatmul.mubr.bf16.gmra.mrb[208].mxu1 %v5228_v45  ;;  %4863 = vmatprep.mubr.msk.bf16.mxu0 %vm773_vm0, %v5232_v30  ;;  %7618 = vst [vmem:[#allocation2_spill] sm:$0xff] %v7032_v51 }
 0x1c5   :  { %v7024_v40 = vadd.f32 %v6922_v58, %v1993_v53  ;;  %v1870_v11 = vadd.f32 %v4368_v18, %v6849_v14  ;;  %3456 = vmatprep.mubr.bf16.mxu1 %v5230_v0  ;;  %v1203_v52 = vmul.f32 %v6900_v22, %v6651_v16  ;;  %v1201_v2 = vmul.f32 %v6900_v22, %v6619_v50 }
 0x1c6   :  { %v7035_v48 = vadd.f32 %v6922_v58, %v1991_v10  ;;  %v4829_v28 = vpop.f32.mrb[104].mxu0  ;;  %v7062_v43 = vadd.f32 %v6922_v58, %v1202_v37  ;;  %v7073_v50 = vadd.f32 %v6922_v58, %v1200_v17 }
 0x1c7   :  { %v4369_v62 = vpop.f32.mrb[104].mxu1  ;;  %v1964_v63 = vadd.f32 %v4829_v28, %v1867_v13  ;;  %v1955_v14 = vpop.f32.mrb[105].mxu0 }
 0x1c8   :  { %7619 = vst [vmem:[#allocation3_spill] sm:$0xff] %v7035_v48  ;;  %v4370_v45 = vpop.f32.mrb[105].mxu1  ;;  %v1956_v30 = vadd.f32 %v1955_v14, %v6943_v49  ;;  %v4830_v61 = vpop.f32.mrb[106].mxu0  ;;  %v5235_v49 = vld [vmem:[%s7541_s3 + $0x164] ss:$28 sps:$4 sm:$0xff]   ;;  %7620 = vst [vmem:[#allocation5_spill] sm:$0xff] %v7062_v43 }
 0x1c9   :  { %v1996_v35 = vmul.f32 %v6900_v22, %v1964_v63  ;;  %v4371_v59 = vadd.f32 %v4370_v45, %v4369_v62  ;;  %v4372_v24 = vpop.f32.mrb[106].mxu1  ;;  %v1967_v0 = vadd.f32 %v4830_v61, %v1870_v11  ;;  %v1958_v7 = vpop.f32.mrb[107].mxu0  ;;  %7622 = vst [vmem:[#allocation6_spill] sm:$0xff] %v7073_v50  ;;  %v7083_v62 = vadd.f32 %v6922_v58, %v1203_v52 }
 0x1ca   :  { %v1994_v54 = vmul.f32 %v6900_v22, %v1956_v30  ;;  %v4373_v53 = vpop.f32.mrb[107].mxu1  ;;  %v1959_v16 = vadd.f32 %v1958_v7, %v6962_v4  ;;  %v5242_v7 = vld [vmem:[%s7541_s3 + $0x168] ss:$28 sps:$4 sm:$0xff]  }
 0x1cb   :  { %v7067_v18 = vadd.f32 %v6922_v58, %v1996_v35  ;;  %v1997_v13 = vmul.f32 %v6900_v22, %v1967_v0  ;;  %v4374_v10 = vadd.f32 %v4373_v53, %v4372_v24  ;;  %4864 = vmatmul.mubr.msk.bf16.gmra.mrb[212].mxu0 %vm773_vm0, %v5234_v21  ;;  %v1875_v11 = vadd.f32 %v4371_v59, %v6867_v46  ;;  %v5238_v0 = vld [vmem:[%s7541_s3 + $0x160] ss:$28 sps:$4 sm:$0xff]  }
 0x1cc   :  { %v7076_v37 = vadd.f32 %v6922_v58, %v1994_v54  ;;  %v1995_v28 = vmul.f32 %v6900_v22, %v1959_v16  ;;  %3457 = vmatmul.mubr.bf16.gmra.mrb[212].mxu1 %v5233_v1  ;;  %4867 = vmatprep.mubr.msk.bf16.mxu0 %vm773_vm0, %v5237_v12  ;;  %7624 = vst [vmem:[#allocation7_spill] sm:$0xff] %v7083_v62 }
 0x1cd   :  { %7621 = vst [vmem:[#allocation18_spill] sm:$0xff] %v7067_v18  ;;  %v7086_v63 = vadd.f32 %v6922_v58, %v1997_v13  ;;  %v1878_v46 = vadd.f32 %v4374_v10, %v6873_v60  ;;  %3464 = vmatprep.mubr.bf16.mxu1 %v5235_v49  ;;  %v7092_v21 = vadd.f32 %v6922_v58, %v1201_v2  ;;  %v5239_v60 = vld [vmem:[%s7541_s3 + $0x130] ss:$28 sps:$4 sm:$0xff]  }
 0x1ce   :  { %7623 = vst [vmem:[#allocation19_spill] sm:$0xff] %v7076_v37  ;;  %v7095_v17 = vadd.f32 %v6922_v58, %v1995_v28  ;;  %v4833_v45 = vpop.f32.mrb[108].mxu0  ;;  %v1204_v12 = vmul.f32 %v6900_v22, %v6674_v3  ;;  %v5240_v3 = vld [vmem:[%s7541_s3 + $0x19c] ss:$28 sps:$4 sm:$0xff]   ;;  %v1205_v53 = vmul.f32 %v6900_v22, %v6679_v39  ;;  %v1206_v39 = vmul.f32 %v6900_v22, %v6702_v15 }
 0x1cf   :  { %7625 = vst [vmem:[#allocation8_spill] sm:$0xff] %v7086_v63  ;;  %7626 = vst [vmem:[#allocation9_spill] sm:$0xff] %v7092_v21  ;;  %v4375_v61 = vpop.f32.mrb[108].mxu1  ;;  %v1971_v1 = vpop.f32.mrb[109].mxu0 }
 0x1d0   :  { %7627 = vst [vmem:[#allocation10_spill] sm:$0xff] %v7095_v17  ;;  %v4376_v35 = vpop.f32.mrb[109].mxu1  ;;  %v1972_v59 = vadd.f32 %v1971_v1, %v1875_v11  ;;  %v4834_v24 = vpop.f32.mrb[110].mxu0 }
 0x1d1   :  { %v4377_v49 = vadd.f32 %v4376_v35, %v4375_v61  ;;  %v4378_v2 = vpop.f32.mrb[110].mxu1  ;;  %v1974_v54 = vpop.f32.mrb[111].mxu0  ;;  %v7121_v61 = vadd.f32 %v6922_v58, %v1204_v12 }
 0x1d2   :  { %v1998_v16 = vmul.f32 %v6900_v22, %v1972_v59  ;;  %v4379_v13 = vpop.f32.mrb[111].mxu1  ;;  %v1975_v10 = vadd.f32 %v1974_v54, %v1878_v46  ;;  %v7136_v59 = vadd.f32 %v6922_v58, %v1205_v53 }
 0x1d3   :  { %v1883_v11 = vadd.f32 %v4377_v49, %v6891_v41  ;;  %v4380_v28 = vadd.f32 %v4379_v13, %v4378_v2  ;;  %4868 = vmatmul.mubr.msk.bf16.gmra.mrb[216].mxu0 %vm773_vm0, %v5239_v60  ;;  %7628 = vst [vmem:[#allocation20_spill] sm:$0xff] %v7121_v61  ;;  %v1207_v60 = vmul.f32 %v6900_v22, %v6707_v32 }
 0x1d4   :  { %v7124_v1 = vadd.f32 %v6922_v58, %v1998_v16  ;;  %v1999_v35 = vmul.f32 %v6900_v22, %v1975_v10  ;;  %3465 = vmatmul.mubr.bf16.gmra.mrb[216].mxu1 %v5238_v0  ;;  %4871 = vmatprep.mubr.msk.bf16.mxu0 %vm773_vm0, %v5242_v7  ;;  %7630 = vst [vmem:[#allocation12_spill] sm:$0xff] %v7136_v59  ;;  %v5243_v16 = vld [vmem:[%s7541_s3 + $0x198] ss:$28 sps:$4 sm:$0xff]  }
 0x1d5   :  { %v1980_v46 = vadd.f32 %v4833_v45, %v1883_v11  ;;  %v1886_v41 = vadd.f32 %v4380_v28, %v6895_v23  ;;  %3472 = vmatprep.mubr.bf16.mxu1 %v5240_v3  ;;  %v5244_v23 = vld [vmem:[%s7541_s3 + $0x1a0] ss:$28 sps:$4 sm:$0xff]   ;;  %v7151_v13 = vadd.f32 %v6922_v58, %v1206_v39 }
 0x1d6   :  { %7629 = vst [vmem:[#allocation11_spill] sm:$0xff] %v7124_v1  ;;  %v7139_v0 = vadd.f32 %v6922_v58, %v1999_v35  ;;  %v4407_v7 = vpop.f32.mrb[112].mxu0 }
 0x1d7   :  { %v2000_v49 = vmul.f32 %v6900_v22, %v1980_v46  ;;  %v1983_v15 = vadd.f32 %v4834_v24, %v1886_v41  ;;  %v4471_v45 = vpop.f32.mrb[112].mxu1  ;;  %v4408_v2 = vpop.f32.mrb[113].mxu0  ;;  %7632 = vst [vmem:[#allocation14_spill] sm:$0xff] %v7151_v13  ;;  %v7158_v46 = vadd.f32 %v6922_v58, %v1207_v60 }
 0x1d8   :  { %7631 = vst [vmem:[#allocation13_spill] sm:$0xff] %v7139_v0  ;;  %v4409_v54 = vadd.f32 %v4408_v2, %v4407_v7  ;;  %v4472_v3 = vpop.f32.mrb[113].mxu1  ;;  %v4410_v53 = vpop.f32.mrb[114].mxu0 }
 0x1d9   :  { %v7154_v24 = vadd.f32 %v6922_v58, %v2000_v49  ;;  %v2001_v10 = vmul.f32 %v6900_v22, %v1983_v15  ;;  %v4473_v11 = vadd.f32 %v4472_v3, %v4471_v45  ;;  %v4474_v28 = vpop.f32.mrb[114].mxu1  ;;  %v4411_v35 = vpop.f32.mrb[115].mxu0  ;;  %7634 = vst [vmem:[#allocation16_spill] sm:$0xff] %v7158_v46 }
 0x1da   :  { %v4412_v41 = vadd.f32 %v4411_v35, %v4410_v53  ;;  %v4475_v7 = vpop.f32.mrb[115].mxu1 }
 0x1db   :  { %7633 = vst [vmem:[#allocation15_spill] sm:$0xff] %v7154_v24  ;;  %v7163_v32 = vadd.f32 %v6922_v58, %v2001_v10  ;;  %v7165_v39 = vadd.f32 %v4473_v11, %v4409_v54  ;;  %v4476_v49 = vadd.f32 %v4475_v7, %v4474_v28  ;;  %4872 = vmatmul.mubr.msk.bf16.gmra.mrb[220].mxu0 %vm773_vm0, %v5244_v23 }
 0x1dc   :  { %3473 = vmatmul.mubr.bf16.gmra.mrb[220].mxu1 %v5243_v16 }
 0x1dd   :  { %7635 = vst [vmem:[#allocation17_spill] sm:$0xff] %v7163_v32  ;;  %v7170_v15 = vadd.f32 %v4476_v49, %v4412_v41 }
 0x1de   :  { %v4413_v60 = vpop.f32.mrb[116].mxu0 }
 0x1df   :  { %v4477_v45 = vpop.f32.mrb[116].mxu1  ;;  %v4414_v3 = vpop.f32.mrb[117].mxu0 }
 0x1e0   :  { %v4415_v53 = vadd.f32 %v4414_v3, %v4413_v60  ;;  %v4478_v35 = vpop.f32.mrb[117].mxu1  ;;  %v4416_v2 = vpop.f32.mrb[118].mxu0 }
 0x1e1   :  { %v4479_v12 = vadd.f32 %v4478_v35, %v4477_v45  ;;  %v4480_v58 = vpop.f32.mrb[118].mxu1  ;;  %v4417_v10 = vpop.f32.mrb[119].mxu0 }
 0x1e2   :  { %v4418_v54 = vadd.f32 %v4417_v10, %v4416_v2  ;;  %v4481_v11 = vpop.f32.mrb[119].mxu1 }
 0x1e3   :  { %v7172_v28 = vadd.f32 %v4479_v12, %v4415_v53  ;;  %v4482_v23 = vadd.f32 %v4481_v11, %v4480_v58 }
 0x1e5   :  { %v7174_v16 = vadd.f32 %v4482_v23, %v4418_v54 }
 0x1e6   :  { %v4419_v7 = vpop.f32.mrb[120].mxu0 }
 0x1e7   :  { %v4483_v22 = vpop.f32.mrb[120].mxu1  ;;  %v4420_v41 = vpop.f32.mrb[121].mxu0 }
 0x1e8   :  { %v4421_v49 = vadd.f32 %v4420_v41, %v4419_v7  ;;  %v4484_v52 = vpop.f32.mrb[121].mxu1  ;;  %v4422_v30 = vpop.f32.mrb[122].mxu0 }
 0x1e9   :  { %v4485_v14 = vadd.f32 %v4484_v52, %v4483_v22  ;;  %v4486_v60 = vpop.f32.mrb[122].mxu1  ;;  %v4423_v3 = vpop.f32.mrb[123].mxu0 }
 0x1ea   :  { %v4424_v4 = vadd.f32 %v4423_v3, %v4422_v30  ;;  %v4487_v45 = vpop.f32.mrb[123].mxu1 }
 0x1eb   :  { %v7176_v35 = vadd.f32 %v4485_v14, %v4421_v49  ;;  %v4488_v2 = vadd.f32 %v4487_v45, %v4486_v60 }
 0x1ed   :  { %v7178_v10 = vadd.f32 %v4488_v2, %v4424_v4 }
 0x1ee   :  { %v4425_v12 = vpop.f32.mrb[124].mxu0 }
 0x1ef   :  { %v4489_v53 = vpop.f32.mrb[124].mxu1  ;;  %v4426_v58 = vpop.f32.mrb[125].mxu0 }
 0x1f0   :  { %v4427_v54 = vadd.f32 %v4426_v58, %v4425_v12  ;;  %v4490_v11 = vpop.f32.mrb[125].mxu1  ;;  %v4428_v23 = vpop.f32.mrb[126].mxu0 }
 0x1f1   :  { %v4491_v42 = vadd.f32 %v4490_v11, %v4489_v53  ;;  %v4492_v7 = vpop.f32.mrb[126].mxu1  ;;  %v4429_v41 = vpop.f32.mrb[127].mxu0 }
 0x1f2   :  { %v4430_v57 = vadd.f32 %v4429_v41, %v4428_v23  ;;  %v4493_v52 = vpop.f32.mrb[127].mxu1 }
 0x1f3   :  { %v7180_v22 = vadd.f32 %v4491_v42, %v4427_v54  ;;  %v4494_v30 = vadd.f32 %v4493_v52, %v4492_v7 }
 0x1f5   :  { %v7182_v3 = vadd.f32 %v4494_v30, %v4430_v57 }
 0x1f6   :  { %v4431_v14 = vpop.f32.mrb[128].mxu0 }
 0x1f7   :  { %v4495_v49 = vpop.f32.mrb[128].mxu1  ;;  %v4432_v4 = vpop.f32.mrb[129].mxu0 }
 0x1f8   :  { %v4433_v60 = vadd.f32 %v4432_v4, %v4431_v14  ;;  %v4496_v45 = vpop.f32.mrb[129].mxu1  ;;  %v4434_v2 = vpop.f32.mrb[130].mxu0 }
 0x1f9   :  { %v4497_v6 = vadd.f32 %v4496_v45, %v4495_v49  ;;  %v4498_v12 = vpop.f32.mrb[130].mxu1  ;;  %v4435_v58 = vpop.f32.mrb[131].mxu0 }
 0x1fa   :  { %v4436_v31 = vadd.f32 %v4435_v58, %v4434_v2  ;;  %v4499_v53 = vpop.f32.mrb[131].mxu1 }
 0x1fb   :  { %v7184_v11 = vadd.f32 %v4497_v6, %v4433_v60  ;;  %v4500_v23 = vadd.f32 %v4499_v53, %v4498_v12 }
 0x1fd   :  { %v7186_v41 = vadd.f32 %v4500_v23, %v4436_v31 }
 0x1fe   :  { %v4437_v42 = vpop.f32.mrb[132].mxu0 }
 0x1ff   :  { %v4501_v54 = vpop.f32.mrb[132].mxu1  ;;  %v4438_v57 = vpop.f32.mrb[133].mxu0 }
 0x200   :  { %v4439_v7 = vadd.f32 %v4438_v57, %v4437_v42  ;;  %v4502_v52 = vpop.f32.mrb[133].mxu1  ;;  %v4440_v30 = vpop.f32.mrb[134].mxu0 }
 0x201   :  { %v4503_v47 = vadd.f32 %v4502_v52, %v4501_v54  ;;  %v4504_v14 = vpop.f32.mrb[134].mxu1  ;;  %v4441_v4 = vpop.f32.mrb[135].mxu0 }
 0x202   :  { %v4442_v38 = vadd.f32 %v4441_v4, %v4440_v30  ;;  %v4505_v49 = vpop.f32.mrb[135].mxu1 }
 0x203   :  { %v7188_v45 = vadd.f32 %v4503_v47, %v4439_v7  ;;  %v4506_v2 = vadd.f32 %v4505_v49, %v4504_v14 }
 0x205   :  { %v7190_v58 = vadd.f32 %v4506_v2, %v4442_v38 }
 0x206   :  { %v4443_v6 = vpop.f32.mrb[136].mxu0 }
 0x207   :  { %v4507_v60 = vpop.f32.mrb[136].mxu1  ;;  %v4444_v31 = vpop.f32.mrb[137].mxu0 }
 0x208   :  { %v4445_v12 = vadd.f32 %v4444_v31, %v4443_v6  ;;  %v4508_v53 = vpop.f32.mrb[137].mxu1  ;;  %v4446_v23 = vpop.f32.mrb[138].mxu0 }
 0x209   :  { %v4509_v25 = vadd.f32 %v4508_v53, %v4507_v60  ;;  %v4510_v42 = vpop.f32.mrb[138].mxu1  ;;  %v4447_v57 = vpop.f32.mrb[139].mxu0 }
 0x20a   :  { %v4448_v26 = vadd.f32 %v4447_v57, %v4446_v23  ;;  %v4511_v54 = vpop.f32.mrb[139].mxu1 }
 0x20b   :  { %v7192_v52 = vadd.f32 %v4509_v25, %v4445_v12  ;;  %v4512_v30 = vadd.f32 %v4511_v54, %v4510_v42 }
 0x20d   :  { %v7194_v4 = vadd.f32 %v4512_v30, %v4448_v26 }
 0x20e   :  { %v4449_v47 = vpop.f32.mrb[140].mxu0 }
 0x20f   :  { %v4513_v7 = vpop.f32.mrb[140].mxu1  ;;  %v4450_v38 = vpop.f32.mrb[141].mxu0 }
 0x210   :  { %v4451_v14 = vadd.f32 %v4450_v38, %v4449_v47  ;;  %v4514_v49 = vpop.f32.mrb[141].mxu1  ;;  %v4452_v2 = vpop.f32.mrb[142].mxu0 }
 0x211   :  { %v4515_v32 = vadd.f32 %v4514_v49, %v4513_v7  ;;  %v4516_v6 = vpop.f32.mrb[142].mxu1  ;;  %v4453_v31 = vpop.f32.mrb[143].mxu0 }
 0x212   :  { %v4454_v46 = vadd.f32 %v4453_v31, %v4452_v2  ;;  %v4517_v60 = vpop.f32.mrb[143].mxu1 }
 0x213   :  { %v7196_v53 = vadd.f32 %v4515_v32, %v4451_v14  ;;  %v4518_v23 = vadd.f32 %v4517_v60, %v4516_v6 }
 0x215   :  { %v7198_v57 = vadd.f32 %v4518_v23, %v4454_v46 }
 0x216   :  { %v4535_v25 = vpop.f32.mrb[144].mxu0 }
 0x217   :  { %v4841_v12 = vpop.f32.mrb[144].mxu1  ;;  %v4536_v26 = vpop.f32.mrb[145].mxu0 }
 0x218   :  { %v4537_v42 = vadd.f32 %v4536_v26, %v4535_v25  ;;  %v2727_v54 = vpop.f32.mrb[145].mxu1  ;;  %v4538_v30 = vpop.f32.mrb[146].mxu0 }
 0x219   :  { %v4842_v24 = vpop.f32.mrb[146].mxu1  ;;  %v4539_v47 = vpop.f32.mrb[147].mxu0 }
 0x21a   :  { %v2631_v38 = vadd.f32 %v4537_v42, %v7165_v39  ;;  %v4540_v7 = vadd.f32 %v4539_v47, %v4538_v30  ;;  %v2730_v49 = vpop.f32.mrb[147].mxu1 }
 0x21c   :  { %v7201_v13 = vadd.f32 %v2727_v54, %v2631_v38  ;;  %v2634_v32 = vadd.f32 %v4540_v7, %v7170_v15 }
 0x21e   :  { %v7204_v14 = vadd.f32 %v2730_v49, %v2634_v32  ;;  %v4541_v46 = vpop.f32.mrb[148].mxu0 }
 0x21f   :  { %v4845_v2 = vpop.f32.mrb[148].mxu1  ;;  %v4542_v6 = vpop.f32.mrb[149].mxu0 }
 0x220   :  { %v4543_v31 = vadd.f32 %v4542_v6, %v4541_v46  ;;  %v2743_v60 = vpop.f32.mrb[149].mxu1  ;;  %v4544_v23 = vpop.f32.mrb[150].mxu0 }
 0x221   :  { %v4846_v25 = vpop.f32.mrb[150].mxu1  ;;  %v4545_v26 = vpop.f32.mrb[151].mxu0 }
 0x222   :  { %v2639_v0 = vadd.f32 %v4543_v31, %v7172_v28  ;;  %v4546_v59 = vadd.f32 %v4545_v26, %v4544_v23  ;;  %v2746_v39 = vpop.f32.mrb[151].mxu1 }
 0x224   :  { %v7207_v42 = vadd.f32 %v4841_v12, %v2639_v0  ;;  %v2642_v54 = vadd.f32 %v4546_v59, %v7174_v16 }
 0x226   :  { %v7210_v30 = vadd.f32 %v4842_v24, %v2642_v54  ;;  %v4547_v15 = vpop.f32.mrb[152].mxu0 }
 0x227   :  { %v4849_v47 = vpop.f32.mrb[152].mxu1  ;;  %v4548_v38 = vpop.f32.mrb[153].mxu0 }
 0x228   :  { %v4549_v7 = vadd.f32 %v4548_v38, %v4547_v15  ;;  %v2759_v49 = vpop.f32.mrb[153].mxu1  ;;  %v4550_v32 = vpop.f32.mrb[154].mxu0 }
 0x229   :  { %v4850_v46 = vpop.f32.mrb[154].mxu1  ;;  %v4551_v6 = vpop.f32.mrb[155].mxu0 }
 0x22a   :  { %v2647_v1 = vadd.f32 %v4549_v7, %v7176_v35  ;;  %v4552_v61 = vadd.f32 %v4551_v6, %v4550_v32  ;;  %v2762_v28 = vpop.f32.mrb[155].mxu1 }
 0x22c   :  { %v7213_v31 = vadd.f32 %v2743_v60, %v2647_v1  ;;  %v2650_v0 = vadd.f32 %v4552_v61, %v7178_v10 }
 0x22e   :  { %v7216_v12 = vadd.f32 %v2746_v39, %v2650_v0  ;;  %v4553_v59 = vpop.f32.mrb[156].mxu0 }
 0x22f   :  { %v7218_v24 = vpop.f32.mrb[156].mxu1  ;;  %v4554_v16 = vpop.f32.mrb[157].mxu0 }
 0x230   :  { %v4555_v23 = vadd.f32 %v4554_v16, %v4553_v59  ;;  %v2775_v26 = vpop.f32.mrb[157].mxu1  ;;  %v4556_v54 = vpop.f32.mrb[158].mxu0 }
 0x231   :  { %v7220_v15 = vpop.f32.mrb[158].mxu1  ;;  %v4557_v38 = vpop.f32.mrb[159].mxu0 }
 0x232   :  { %v2655_v35 = vadd.f32 %v4555_v23, %v7180_v22  ;;  %v4558_v7 = vadd.f32 %v4557_v38, %v4556_v54  ;;  %v2778_v32 = vpop.f32.mrb[159].mxu1 }
 0x234   :  { %v7223_v1 = vadd.f32 %v4845_v2, %v2655_v35  ;;  %v2658_v61 = vadd.f32 %v4558_v7, %v7182_v3 }
 0x236   :  { %v7226_v10 = vadd.f32 %v4846_v25, %v2658_v61  ;;  %v4559_v60 = vpop.f32.mrb[160].mxu0 }
 0x237   :  { %v4609_v39 = vpop.f32.mrb[160].mxu1  ;;  %v4560_v6 = vpop.f32.mrb[161].mxu0 }
 0x238   :  { %v4561_v0 = vadd.f32 %v4560_v6, %v4559_v60  ;;  %v4610_v59 = vpop.f32.mrb[161].mxu1  ;;  %v4562_v16 = vpop.f32.mrb[162].mxu0 }
 0x239   :  { %v7228_v17 = vadd.f32 %v4610_v59, %v4609_v39  ;;  %v4612_v21 = vpop.f32.mrb[162].mxu1  ;;  %v4563_v63 = vpop.f32.mrb[163].mxu0 }
 0x23a   :  { %v2663_v22 = vadd.f32 %v4561_v0, %v7184_v11  ;;  %v4564_v23 = vadd.f32 %v4563_v63, %v4562_v16  ;;  %v4613_v54 = vpop.f32.mrb[163].mxu1 }
 0x23b   :  { %v7231_v2 = vadd.f32 %v4613_v54, %v4612_v21 }
 0x23c   :  { %v7233_v38 = vadd.f32 %v2759_v49, %v2663_v22  ;;  %v2666_v3 = vadd.f32 %v4564_v23, %v7186_v41 }
 0x23e   :  { %v7236_v25 = vadd.f32 %v2762_v28, %v2666_v3  ;;  %v4565_v35 = vpop.f32.mrb[164].mxu0 }
 0x23f   :  { %v4615_v7 = vpop.f32.mrb[164].mxu1  ;;  %v4566_v61 = vpop.f32.mrb[165].mxu0 }
 0x240   :  { %v4567_v60 = vadd.f32 %v4566_v61, %v4565_v35  ;;  %v4616_v39 = vpop.f32.mrb[165].mxu1  ;;  %v4568_v6 = vpop.f32.mrb[166].mxu0 }
 0x241   :  { %v7238_v59 = vadd.f32 %v4616_v39, %v4615_v7  ;;  %v4618_v62 = vpop.f32.mrb[166].mxu1  ;;  %v4569_v11 = vpop.f32.mrb[167].mxu0 }
 0x242   :  { %v2671_v63 = vadd.f32 %v4567_v60, %v7188_v45  ;;  %v4570_v21 = vadd.f32 %v4569_v11, %v4568_v6  ;;  %v4619_v0 = vpop.f32.mrb[167].mxu1 }
 0x243   :  { %v7241_v49 = vadd.f32 %v4619_v0, %v4618_v62 }
 0x244   :  { %v7243_v16 = vadd.f32 %v4849_v47, %v2671_v63  ;;  %v2674_v41 = vadd.f32 %v4570_v21, %v7190_v58 }
 0x246   :  { %v7246_v28 = vadd.f32 %v4850_v46, %v2674_v41  ;;  %v4571_v22 = vpop.f32.mrb[168].mxu0 }
 0x247   :  { %v4621_v23 = vpop.f32.mrb[168].mxu1  ;;  %v4572_v54 = vpop.f32.mrb[169].mxu0 }
 0x248   :  { %v4573_v3 = vadd.f32 %v4572_v54, %v4571_v22  ;;  %v4622_v35 = vpop.f32.mrb[169].mxu1  ;;  %v4574_v7 = vpop.f32.mrb[170].mxu0 }
 0x249   :  { %v7248_v61 = vadd.f32 %v4622_v35, %v4621_v23  ;;  %v4624_v39 = vpop.f32.mrb[170].mxu1  ;;  %v4575_v45 = vpop.f32.mrb[171].mxu0 }
 0x24a   :  { %v2679_v60 = vadd.f32 %v4573_v3, %v7192_v52  ;;  %v4576_v62 = vadd.f32 %v4575_v45, %v4574_v7  ;;  %v4625_v6 = vpop.f32.mrb[171].mxu1 }
 0x24b   :  { %v4626_v47 = vadd.f32 %v4625_v6, %v4624_v39 }
 0x24c   :  { %v7251_v11 = vadd.f32 %v2775_v26, %v2679_v60  ;;  %v2682_v58 = vadd.f32 %v4576_v62, %v7194_v4 }
 0x24e   :  { %7636 = vst [vmem:[#allocation4_spill] sm:$0xff] %v7251_v11  ;;  %v7254_v46 = vadd.f32 %v2778_v32, %v2682_v58  ;;  %v4577_v63 = vpop.f32.mrb[172].mxu0 }
 0x24f   :  { %v4627_v21 = vpop.f32.mrb[172].mxu1  ;;  %v4578_v0 = vpop.f32.mrb[173].mxu0 }
 0x250   :  { %7637 = vst [vmem:[#allocation21_spill] sm:$0xff] %v7254_v46  ;;  %v4579_v41 = vadd.f32 %v4578_v0, %v4577_v63  ;;  %v4628_v22 = vpop.f32.mrb[173].mxu1  ;;  %v4580_v23 = vpop.f32.mrb[174].mxu0 }
 0x251   :  { %v4629_v54 = vadd.f32 %v4628_v22, %v4627_v21  ;;  %v4630_v35 = vpop.f32.mrb[174].mxu1  ;;  %v4581_v37 = vpop.f32.mrb[175].mxu0 }
 0x252   :  { %v2687_v52 = vadd.f32 %v4579_v41, %v7196_v53  ;;  %v4582_v3 = vadd.f32 %v4581_v37, %v4580_v23  ;;  %v4631_v7 = vpop.f32.mrb[175].mxu1 }
 0x253   :  { %v4632_v39 = vadd.f32 %v4631_v7, %v4630_v35 }
 0x254   :  { %v7258_v26 = vadd.f32 %v7218_v24, %v2687_v52  ;;  %v2690_v4 = vadd.f32 %v4582_v3, %v7198_v57 }
 0x256   :  { %7638 = vst [vmem:[#allocation22_spill] sm:$0xff] %v7258_v26  ;;  %v7262_v32 = vadd.f32 %v7220_v15, %v2690_v4  ;;  %v4673_v45 = vpop.f32.mrb[176].mxu0 }
 0x257   :  { %v4633_v60 = vpop.f32.mrb[176].mxu1  ;;  %v4674_v62 = vpop.f32.mrb[177].mxu0 }
 0x258   :  { %7639 = vst [vmem:[#allocation23_spill] sm:$0xff] %v7262_v32  ;;  %v4634_v6 = vpop.f32.mrb[177].mxu1  ;;  %v4675_v58 = vadd.f32 %v4674_v62, %v4673_v45  ;;  %v4676_v63 = vpop.f32.mrb[178].mxu0 }
 0x259   :  { %v4635_v21 = vadd.f32 %v4634_v6, %v4633_v60  ;;  %v4636_v0 = vpop.f32.mrb[178].mxu1  ;;  %v4677_v53 = vpop.f32.mrb[179].mxu0 }
 0x25a   :  { %v3322_v37 = vadd.f32 %v4675_v58, %v7228_v17  ;;  %v4637_v41 = vpop.f32.mrb[179].mxu1  ;;  %v4678_v22 = vadd.f32 %v4677_v53, %v4676_v63 }
 0x25b   :  { %v4638_v24 = vadd.f32 %v4637_v41, %v4636_v0 }
 0x25c   :  { %v3325_v23 = vadd.f32 %v4678_v22, %v7231_v2 }
 0x25e   :  { %v4679_v57 = vpop.f32.mrb[180].mxu0 }
 0x25f   :  { %v4639_v35 = vpop.f32.mrb[180].mxu1  ;;  %v4680_v15 = vpop.f32.mrb[181].mxu0 }
 0x260   :  { %v4640_v52 = vpop.f32.mrb[181].mxu1  ;;  %v4681_v3 = vadd.f32 %v4680_v15, %v4679_v57  ;;  %v4682_v7 = vpop.f32.mrb[182].mxu0 }
 0x261   :  { %v4641_v4 = vadd.f32 %v4640_v52, %v4639_v35  ;;  %v4642_v32 = vpop.f32.mrb[182].mxu1  ;;  %v4683_v45 = vpop.f32.mrb[183].mxu0 }
 0x262   :  { %v3330_v60 = vadd.f32 %v4681_v3, %v7238_v59  ;;  %v4643_v62 = vpop.f32.mrb[183].mxu1  ;;  %v4684_v6 = vadd.f32 %v4683_v45, %v4682_v7 }
 0x263   :  { %v4644_v26 = vadd.f32 %v4643_v62, %v4642_v32 }
 0x264   :  { %v3333_v17 = vadd.f32 %v4684_v6, %v7241_v49 }
 0x266   :  { %v4685_v58 = vpop.f32.mrb[184].mxu0 }
 0x267   :  { %v4645_v63 = vpop.f32.mrb[184].mxu1  ;;  %v4686_v0 = vpop.f32.mrb[185].mxu0 }
 0x268   :  { %v4646_v2 = vpop.f32.mrb[185].mxu1  ;;  %v4687_v53 = vadd.f32 %v4686_v0, %v4685_v58  ;;  %v4688_v41 = vpop.f32.mrb[186].mxu0 }
 0x269   :  { %v7268_v22 = vadd.f32 %v4646_v2, %v4645_v63  ;;  %v4648_v57 = vpop.f32.mrb[186].mxu1  ;;  %v4689_v15 = vpop.f32.mrb[187].mxu0 }
 0x26a   :  { %v7271_v35 = vadd.f32 %v4687_v53, %v7248_v61  ;;  %v4649_v52 = vpop.f32.mrb[187].mxu1  ;;  %v4690_v59 = vadd.f32 %v4689_v15, %v4688_v41 }
 0x26b   :  { %v4650_v3 = vadd.f32 %v4649_v52, %v4648_v57 }
 0x26c   :  { %v3341_v7 = vadd.f32 %v4690_v59, %v4626_v47 }
 0x26e   :  { %v4691_v32 = vpop.f32.mrb[188].mxu0 }
 0x26f   :  { %v4651_v45 = vpop.f32.mrb[188].mxu1  ;;  %v4692_v49 = vpop.f32.mrb[189].mxu0 }
 0x270   :  { %v4652_v62 = vpop.f32.mrb[189].mxu1  ;;  %v4693_v6 = vadd.f32 %v4692_v49, %v4691_v32  ;;  %v4694_v46 = vpop.f32.mrb[190].mxu0 }
 0x271   :  { %v7273_v50 = vadd.f32 %v4652_v62, %v4651_v45  ;;  %v4654_v58 = vpop.f32.mrb[190].mxu1  ;;  %v4695_v63 = vpop.f32.mrb[191].mxu0 }
 0x272   :  { %v7275_v0 = vadd.f32 %v4693_v6, %v4629_v54  ;;  %v4655_v2 = vpop.f32.mrb[191].mxu1  ;;  %v4696_v11 = vadd.f32 %v4695_v63, %v4694_v46 }
 0x273   :  { %v7277_v61 = vadd.f32 %v4655_v2, %v4654_v58 }
 0x274   :  { %v7279_v53 = vadd.f32 %v4696_v11, %v4632_v39 }
 0x276   :  { %v4697_v41 = vpop.f32.mrb[192].mxu0 }
 0x277   :  { %v4737_v47 = vpop.f32.mrb[192].mxu1  ;;  %v4698_v57 = vpop.f32.mrb[193].mxu0 }
 0x278   :  { %v4699_v15 = vadd.f32 %v4698_v57, %v4697_v41  ;;  %v4738_v52 = vpop.f32.mrb[193].mxu1  ;;  %v4700_v59 = vpop.f32.mrb[194].mxu0 }
 0x279   :  { %v4739_v32 = vadd.f32 %v4738_v52, %v4737_v47  ;;  %v4740_v49 = vpop.f32.mrb[194].mxu1  ;;  %v4701_v45 = vpop.f32.mrb[195].mxu0 }
 0x27a   :  { %v7281_v62 = vadd.f32 %v4699_v15, %v4635_v21  ;;  %v4702_v18 = vadd.f32 %v4701_v45, %v4700_v59  ;;  %v4741_v54 = vpop.f32.mrb[195].mxu1 }
 0x27b   :  { %v4742_v6 = vadd.f32 %v4741_v54, %v4740_v49  ;;  %v7283_v43 = vadd.f32 %v4739_v32, %v3322_v37 }
 0x27c   :  { %v7285_v46 = vadd.f32 %v4702_v18, %v4638_v24 }
 0x27d   :  { %v7287_v11 = vadd.f32 %v4742_v6, %v3325_v23 }
 0x27e   :  { %v4703_v39 = vpop.f32.mrb[196].mxu0 }
 0x27f   :  { %v4743_v58 = vpop.f32.mrb[196].mxu1  ;;  %v4704_v63 = vpop.f32.mrb[197].mxu0 }
 0x280   :  { %v4705_v2 = vadd.f32 %v4704_v63, %v4703_v39  ;;  %v4744_v41 = vpop.f32.mrb[197].mxu1  ;;  %v4706_v57 = vpop.f32.mrb[198].mxu0 }
 0x281   :  { %v4745_v47 = vadd.f32 %v4744_v41, %v4743_v58  ;;  %v4746_v52 = vpop.f32.mrb[198].mxu1  ;;  %v4707_v48 = vpop.f32.mrb[199].mxu0 }
 0x282   :  { %v7289_v21 = vadd.f32 %v4705_v2, %v4641_v4  ;;  %v4708_v15 = vadd.f32 %v4707_v48, %v4706_v57  ;;  %v4747_v59 = vpop.f32.mrb[199].mxu1 }
 0x283   :  { %v4748_v49 = vadd.f32 %v4747_v59, %v4746_v52  ;;  %v3427_v37 = vadd.f32 %v4745_v47, %v3330_v60 }
 0x284   :  { %v7291_v32 = vadd.f32 %v4708_v15, %v4644_v26 }
 0x285   :  { %v3430_v18 = vadd.f32 %v4748_v49, %v3333_v17 }
 0x286   :  { %v4709_v24 = vpop.f32.mrb[200].mxu0 }
 0x287   :  { %v4749_v23 = vpop.f32.mrb[200].mxu1  ;;  %v4710_v45 = vpop.f32.mrb[201].mxu0 }
 0x288   :  { %v4711_v54 = vadd.f32 %v4710_v45, %v4709_v24  ;;  %v4750_v6 = vpop.f32.mrb[201].mxu1  ;;  %v4712_v39 = vpop.f32.mrb[202].mxu0 }
 0x289   :  { %v4751_v63 = vadd.f32 %v4750_v6, %v4749_v23  ;;  %v4752_v51 = vpop.f32.mrb[202].mxu1  ;;  %v4713_v58 = vpop.f32.mrb[203].mxu0 }
 0x28a   :  { %v7294_v41 = vadd.f32 %v4711_v54, %v7268_v22  ;;  %v4714_v4 = vadd.f32 %v4713_v58, %v4712_v39  ;;  %v4753_v48 = vpop.f32.mrb[203].mxu1 }
 0x28b   :  { %v4754_v2 = vadd.f32 %v4753_v48, %v4752_v51  ;;  %v7297_v60 = vadd.f32 %v4751_v63, %v7271_v35  ;;  %v7309_v35 = vld [vmem:[%s7542_s5] ss:$0 sm:$0xff] }
 0x28c   :  { %v7299_v26 = vadd.f32 %v4714_v4, %v4650_v3  ;;  %v2790_v3 = vmul.f32 %v7309_v35, %v7201_v13  ;;  %v2791_v39 = vmul.f32 %v7309_v35, %v7204_v14  ;;  %v2792_v58 = vmul.f32 %v7309_v35, %v7207_v42  ;;  %v7327_v13 = vld [vmem:[%s7543_s6] ss:$0 sm:$0xff] }
 0x28d   :  { %v7301_v17 = vadd.f32 %v4754_v2, %v3341_v7 }
 0x28e   :  { %v4715_v57 = vpop.f32.mrb[204].mxu0 }
 0x28f   :  { %v4755_v47 = vpop.f32.mrb[204].mxu1  ;;  %v4716_v52 = vpop.f32.mrb[205].mxu0 }
 0x290   :  { %v4717_v15 = vadd.f32 %v4716_v52, %v4715_v57  ;;  %v4756_v59 = vpop.f32.mrb[205].mxu1  ;;  %v4718_v49 = vpop.f32.mrb[206].mxu0  ;;  %v2794_v57 = vmul.f32 %v7309_v35, %v7213_v31 }
 0x291   :  { %v4757_v24 = vadd.f32 %v4756_v59, %v4755_v47  ;;  %v4758_v23 = vpop.f32.mrb[206].mxu1  ;;  %v4719_v22 = vpop.f32.mrb[207].mxu0 }
 0x292   :  { %v7304_v45 = vadd.f32 %v4717_v15, %v7273_v50  ;;  %v4720_v51 = vadd.f32 %v4719_v22, %v4718_v49  ;;  %v4759_v54 = vpop.f32.mrb[207].mxu1  ;;  %v2795_v15 = vmul.f32 %v7309_v35, %v7216_v12  ;;  %v2808_v22 = vadd.f32 %v7327_v13, %v2792_v58 }
 0x293   :  { %v4760_v7 = vadd.f32 %v4759_v54, %v4758_v23  ;;  %v3443_v6 = vadd.f32 %v4757_v24, %v7275_v0  ;;  %v2806_v0 = vadd.f32 %v7327_v13, %v2790_v3  ;;  %v2810_v58 = vadd.f32 %v7327_v13, %v2794_v57 }
 0x294   :  { %v7317_v63 = vadd.f32 %v4720_v51, %v7277_v61  ;;  %v2807_v61 = vadd.f32 %v7327_v13, %v2791_v39  ;;  %v2798_v57 = vmul.f32 %v7309_v35, %v7233_v38 }
 0x295   :  { %v7320_v50 = vadd.f32 %v4760_v7, %v7279_v53  ;;  %v2793_v53 = vmul.f32 %v7309_v35, %v7210_v30  ;;  %v2796_v30 = vmul.f32 %v7309_v35, %v7223_v1 }
 0x296   :  { %v4861_v4 = vpop.f32.mrb[208].mxu0 }
 0x297   :  { %v4761_v48 = vpop.f32.mrb[208].mxu1  ;;  %v3524_v2 = vadd.f32 %v4861_v4, %v3427_v37  ;;  %v3515_v14 = vpop.f32.mrb[209].mxu0  ;;  %v2809_v39 = vadd.f32 %v7327_v13, %v2793_v53  ;;  %v2812_v53 = vadd.f32 %v7327_v13, %v2796_v30 }
 0x298   :  { %v4762_v42 = vpop.f32.mrb[209].mxu1  ;;  %v3516_v47 = vadd.f32 %v3515_v14, %v7283_v43  ;;  %v4862_v52 = vpop.f32.mrb[210].mxu0 }
 0x299   :  { %v3580_v59 = vmul.f32 %v7309_v35, %v3524_v2  ;;  %v4763_v37 = vadd.f32 %v4762_v42, %v4761_v48  ;;  %v4764_v49 = vpop.f32.mrb[210].mxu1  ;;  %v3527_v24 = vadd.f32 %v4862_v52, %v3430_v18  ;;  %v3518_v23 = vpop.f32.mrb[211].mxu0  ;;  %v7640_v52 = vmax.f32 %v6934_v27, %v6939_v20 }
 0x29a   :  { %v3578_v31 = vmul.f32 %v7309_v35, %v3516_v47  ;;  %v4765_v51 = vpop.f32.mrb[211].mxu1  ;;  %v3519_v43 = vadd.f32 %v3518_v23, %v7287_v11  ;;  %v7355_v11 = vadd.f32 %v7327_v13, %v2795_v15  ;;  %v7642_v27 = vmax.f32 %v6956_v33, %v6959_v44 }
 0x29b   :  { %v3596_v54 = vadd.f32 %v7327_v13, %v3580_v59  ;;  %v3581_v12 = vmul.f32 %v7309_v35, %v3527_v24  ;;  %v4766_v3 = vadd.f32 %v4765_v51, %v4764_v49  ;;  %v7347_v7 = vadd.f32 %v4763_v37, %v7281_v62 }
 0x29c   :  { %v3594_v18 = vadd.f32 %v7327_v13, %v3578_v31  ;;  %v3579_v1 = vmul.f32 %v7309_v35, %v3519_v43  ;;  %v2797_v62 = vmul.f32 %v7309_v35, %v7226_v10  ;;  %v2800_v10 = vmul.f32 %v7309_v35, %v7243_v16 }
 0x29d   :  { %v3612_v4 = vmax.f32 %v2808_v22, %v3596_v54  ;;  %v3597_v48 = vadd.f32 %v7327_v13, %v3581_v12  ;;  %v7358_v2 = vadd.f32 %v4766_v3, %v7285_v46 }
 0x29e   :  { %v3610_v14 = vmax.f32 %v2806_v0, %v3594_v18  ;;  %v3595_v42 = vadd.f32 %v7327_v13, %v3579_v1  ;;  %v4865_v47 = vpop.f32.mrb[212].mxu0  ;;  %v7641_v0 = vmax.f32 %v6946_v55, %v6949_v9  ;;  %v7643_v55 = vmax.f32 %v6965_v29, %v6972_v5 }
 0x29f   :  { %v3628_v15 = vmax.f32 %v7640_v52, %v3612_v4  ;;  %v3613_v59 = vmax.f32 %v2809_v39, %v3597_v48  ;;  %v4767_v37 = vpop.f32.mrb[212].mxu1  ;;  %v3540_v46 = vadd.f32 %v4865_v47, %v3443_v6  ;;  %v3531_v49 = vpop.f32.mrb[213].mxu0 }
 0x2a0   :  { %v3626_v24 = vmax.f32 %v7641_v0, %v3610_v14  ;;  %v3611_v23 = vmax.f32 %v2807_v61, %v3595_v42  ;;  %v4768_v30 = vpop.f32.mrb[213].mxu1  ;;  %v3532_v22 = vadd.f32 %v3531_v49, %v7297_v60  ;;  %v4866_v38 = vpop.f32.mrb[214].mxu0  ;;  %v2799_v14 = vmul.f32 %v7309_v35, %v7236_v25 }
 0x2a1   :  { %v3644_v31 = vmax.f32 %v3628_v15, 0.0  ;;  %v3629_v20 = vmax.f32 %v7642_v27, %v3613_v59  ;;  %v3584_v6 = vmul.f32 %v7309_v35, %v3540_v46  ;;  %v4769_v51 = vadd.f32 %v4768_v30, %v4767_v37  ;;  %v4770_v43 = vpop.f32.mrb[214].mxu1  ;;  %v3534_v54 = vpop.f32.mrb[215].mxu0 }
 0x2a2   :  { %v3642_v16 = vmax.f32 %v3626_v24, 0.0  ;;  %v3627_v9 = vmax.f32 %v7643_v55, %v3611_v23  ;;  %v3582_v61 = vmul.f32 %v7309_v35, %v3532_v22  ;;  %v3543_v60 = vadd.f32 %v4866_v38, %v7320_v50  ;;  %v4771_v12 = vpop.f32.mrb[215].mxu1 }
 0x2a3   :  { %3661 = vst.msk [vmem:[%s7544_s7 + $0x10] sm:$0xff] %vm3658_vm1, %v3644_v31  ;;  %v3645_v33 = vmax.f32 %v3629_v20, 0.0  ;;  %v3600_v44 = vadd.f32 %v7327_v13, %v3584_v6  ;;  %v4772_v3 = vadd.f32 %v4771_v12, %v4770_v43  ;;  %v3535_v18 = vadd.f32 %v3534_v54, %v7301_v17 }
 0x2a4   :  { %3659 = vst.msk [vmem:[%s7544_s7] sm:$0xff] %vm3658_vm1, %v3642_v16  ;;  %v3643_v29 = vmax.f32 %v3627_v9, 0.0  ;;  %v3598_v5 = vadd.f32 %v7327_v13, %v3582_v61  ;;  %v3585_v50 = vmul.f32 %v7309_v35, %v3543_v60  ;;  %v3459_v39 = vadd.f32 %v4769_v51, %v7289_v21 }
 0x2a5   :  { %3662 = vst.msk [vmem:[%s7544_s7 + $0x18] sm:$0xff] %vm3658_vm1, %v3645_v33  ;;  %v3616_v1 = vmax.f32 %v2812_v53, %v3600_v44  ;;  %v2813_v17 = vadd.f32 %v7327_v13, %v2797_v62  ;;  %v3583_v4 = vmul.f32 %v7309_v35, %v3535_v18  ;;  %v3462_v48 = vadd.f32 %v4772_v3, %v7291_v32 }
 0x2a6   :  { %3660 = vst.msk [vmem:[%s7544_s7 + $0x8] sm:$0xff] %vm3658_vm1, %v3643_v29  ;;  %v3614_v21 = vmax.f32 %v2810_v58, %v3598_v5  ;;  %v3601_v42 = vadd.f32 %v7327_v13, %v3585_v50  ;;  %v4869_v47 = vpop.f32.mrb[216].mxu0  ;;  %v2814_v53 = vadd.f32 %v7327_v13, %v2798_v57  ;;  %v2801_v62 = vmul.f32 %v7309_v35, %v7246_v28  ;;  %v7651_v29 = vld [vmem:[#allocation18_spill] sm:$0xff] }
 0x2a7   :  { %v7644_v32 = vmax.f32 %v7000_v19, %v7005_v34  ;;  %v3599_v25 = vadd.f32 %v7327_v13, %v3583_v4  ;;  %v4773_v15 = vpop.f32.mrb[216].mxu1  ;;  %v3556_v59 = vadd.f32 %v4869_v47, %v3459_v39  ;;  %v3547_v37 = vpop.f32.mrb[217].mxu0  ;;  %v7645_v58 = vmax.f32 %v7011_v56, %v7014_v8  ;;  %v7653_v4 = vld [vmem:[#allocation4_spill] sm:$0xff] }
 0x2a8   :  { %v3617_v49 = vmax.f32 %v2813_v17, %v3601_v42  ;;  %v2816_v0 = vadd.f32 %v7327_v13, %v2800_v10  ;;  %v4774_v57 = vpop.f32.mrb[217].mxu1  ;;  %v3548_v24 = vadd.f32 %v3547_v37, %v7347_v7  ;;  %v4870_v28 = vpop.f32.mrb[218].mxu0  ;;  %v7646_v56 = vmax.f32 %v7021_v36, %v7024_v40  ;;  %v7647_v7 = vld [vmem:[#allocation2_spill] sm:$0xff]  ;;  %v7655_v42 = vld [vmem:[#allocation19_spill] sm:$0xff] }
 0x2a9   :  { %v3632_v52 = vmax.f32 %v7644_v32, %v3616_v1  ;;  %v3630_v46 = vmax.f32 %v7645_v58, %v3614_v21  ;;  %v3615_v19 = vmax.f32 %v7355_v11, %v3599_v25  ;;  %v3588_v34 = vmul.f32 %v7309_v35, %v3556_v59  ;;  %v4776_v22 = vpop.f32.mrb[218].mxu1  ;;  %v3550_v38 = vpop.f32.mrb[219].mxu0  ;;  %v7648_v11 = vld [vmem:[#allocation3_spill] sm:$0xff]  ;;  %v7654_v21 = vld [vmem:[#allocation6_spill] sm:$0xff] }
 0x2aa   :  { %v4775_v30 = vadd.f32 %v4774_v57, %v4773_v15  ;;  %v3633_v8 = vmax.f32 %v7646_v56, %v3617_v49  ;;  %v3586_v27 = vmul.f32 %v7309_v35, %v3548_v24  ;;  %v3559_v10 = vadd.f32 %v4870_v28, %v3462_v48  ;;  %v4777_v20 = vpop.f32.mrb[219].mxu1  ;;  %v7657_v15 = vld [vmem:[#allocation21_spill] sm:$0xff]  ;;  %v7658_v57 = vld [vmem:[#allocation7_spill] sm:$0xff]  ;;  %v7659_v24 = vld [vmem:[#allocation8_spill] sm:$0xff] }
 0x2ab   :  { %v3648_v23 = vmax.f32 %v3632_v52, 0.0  ;;  %v3646_v31 = vmax.f32 %v3630_v46, 0.0  ;;  %v7649_v6 = vmax.f32 %v7647_v7, %v7648_v11  ;;  %v3604_v43 = vadd.f32 %v7327_v13, %v3588_v34 }
 0x2ac   :  { %v4778_v54 = vadd.f32 %v4777_v20, %v4776_v22  ;;  %v3551_v16 = vadd.f32 %v3550_v38, %v7358_v2  ;;  %v3649_v36 = vmax.f32 %v3633_v8, 0.0  ;;  %v3602_v40 = vadd.f32 %v7327_v13, %v3586_v27  ;;  %v7661_v22 = vld [vmem:[#allocation9_spill] sm:$0xff]  ;;  %v7662_v38 = vld [vmem:[#allocation10_spill] sm:$0xff] }
 0x2ad   :  { %3665 = vst.msk [vmem:[%s7544_s7 + $0x30] sm:$0xff] %vm3658_vm1, %v3648_v23  ;;  %v3631_v51 = vmax.f32 %v7649_v6, %v3615_v19  ;;  %3663 = vst.msk [vmem:[%s7544_s7 + $0x20] sm:$0xff] %vm3658_vm1, %v3646_v31  ;;  %v3589_v55 = vmul.f32 %v7309_v35, %v3559_v10  ;;  %v3467_v9 = vadd.f32 %v4775_v30, %v7294_v41  ;;  %v7650_v41 = vld [vmem:[#allocation5_spill] sm:$0xff]  ;;  %v7664_v6 = vld [vmem:[#allocation22_spill] sm:$0xff] }
 0x2ae   :  { %v3620_v60 = vmax.f32 %v2816_v0, %v3604_v43  ;;  %v3587_v12 = vmul.f32 %v7309_v35, %v3551_v16  ;;  %v3470_v33 = vadd.f32 %v4778_v54, %v7299_v26  ;;  %3666 = vst.msk [vmem:[%s7544_s7 + $0x38] sm:$0xff] %vm3658_vm1, %v3649_v36  ;;  %v3618_v2 = vmax.f32 %v2814_v53, %v3602_v40  ;;  %v4873_v18 = vpop.f32.mrb[220].mxu0 }
 0x2af   :  { %v3647_v61 = vmax.f32 %v3631_v51, 0.0  ;;  %v2817_v44 = vadd.f32 %v7327_v13, %v2801_v62  ;;  %v3605_v3 = vadd.f32 %v7327_v13, %v3589_v55  ;;  %v7652_v5 = vmax.f32 %v7650_v41, %v7651_v29  ;;  %v4779_v1 = vpop.f32.mrb[220].mxu1  ;;  %v3563_v17 = vpop.f32.mrb[221].mxu0  ;;  %v7665_v55 = vld [vmem:[#allocation23_spill] sm:$0xff] }
 0x2b0   :  { %v2815_v50 = vadd.f32 %v7327_v13, %v2799_v14  ;;  %v3603_v39 = vadd.f32 %v7327_v13, %v3587_v12  ;;  %v2802_v48 = vmul.f32 %v7309_v35, %v7653_v4  ;;  %v7656_v47 = vmax.f32 %v7654_v21, %v7655_v42  ;;  %v4780_v32 = vpop.f32.mrb[221].mxu1  ;;  %v4874_v25 = vpop.f32.mrb[222].mxu0  ;;  %v7667_v12 = vld [vmem:[#allocation11_spill] sm:$0xff]  ;;  %v7672_v21 = vld [vmem:[#allocation14_spill] sm:$0xff] }
 0x2b1   :  { %3664 = vst.msk [vmem:[%s7544_s7 + $0x28] sm:$0xff] %vm3658_vm1, %v3647_v61  ;;  %v3636_v26 = vmax.f32 %v7652_v5, %v3620_v60  ;;  %v3621_v62 = vmax.f32 %v2817_v44, %v3605_v3  ;;  %v3564_v52 = vadd.f32 %v3563_v17, %v3467_v9  ;;  %v2803_v59 = vmul.f32 %v7309_v35, %v7657_v15  ;;  %v4782_v46 = vpop.f32.mrb[222].mxu1  ;;  %v3566_v49 = vpop.f32.mrb[223].mxu0  ;;  %v7666_v60 = vld [vmem:[#allocation20_spill] sm:$0xff]  ;;  %v7673_v42 = vld [vmem:[#allocation15_spill] sm:$0xff] }
 0x2b2   :  { %v3634_v53 = vmax.f32 %v7656_v47, %v3618_v2  ;;  %v3619_v14 = vmax.f32 %v2815_v50, %v3603_v39  ;;  %v4781_v58 = vadd.f32 %v4780_v32, %v4779_v1  ;;  %v7660_v28 = vmax.f32 %v7658_v57, %v7659_v24  ;;  %v4783_v34 = vpop.f32.mrb[223].mxu1  ;;  %v7669_v5 = vld [vmem:[#allocation12_spill] sm:$0xff] }
 0x2b3   :  { %v3652_v37 = vmax.f32 %v3636_v26, 0.0  ;;  %v3590_v19 = vmul.f32 %v7309_v35, %v3564_v52  ;;  %v3567_v30 = vadd.f32 %v3566_v49, %v3470_v33  ;;  %v7663_v31 = vmax.f32 %v7661_v22, %v7662_v38  ;;  %v7670_v26 = vld [vmem:[#allocation13_spill] sm:$0xff]  ;;  %v7675_v32 = vld [vmem:[#allocation16_spill] sm:$0xff] }
 0x2b4   :  { %v3650_v0 = vmax.f32 %v3634_v53, 0.0  ;;  %v3637_v23 = vmax.f32 %v7660_v28, %v3621_v62  ;;  %v3475_v8 = vadd.f32 %v4781_v58, %v7304_v45  ;;  %v4784_v27 = vadd.f32 %v4783_v34, %v4782_v46  ;;  %v7676_v52 = vld [vmem:[#allocation17_spill] sm:$0xff] }
 0x2b5   :  { %3669 = vst.msk [vmem:[%s7544_s7 + $0x50] sm:$0xff] %vm3658_vm1, %v3652_v37  ;;  %v3635_v56 = vmax.f32 %v7663_v31, %v3619_v14  ;;  %v2818_v20 = vadd.f32 %v7327_v13, %v2802_v48  ;;  %v3606_v7 = vadd.f32 %v7327_v13, %v3590_v19  ;;  %v3591_v11 = vmul.f32 %v7309_v35, %v3567_v30 }
 0x2b6   :  { %3667 = vst.msk [vmem:[%s7544_s7 + $0x40] sm:$0xff] %vm3658_vm1, %v3650_v0  ;;  %v3653_v10 = vmax.f32 %v3637_v23, 0.0  ;;  %v2804_v51 = vmul.f32 %v7309_v35, %v7664_v6  ;;  %v3572_v54 = vadd.f32 %v4873_v18, %v3475_v8  ;;  %v3478_v45 = vadd.f32 %v4784_v27, %v7317_v63 }
 0x2b7   :  { %v3651_v43 = vmax.f32 %v3635_v56, 0.0  ;;  %v3622_v16 = vmax.f32 %v2818_v20, %v3606_v7  ;;  %v2819_v36 = vadd.f32 %v7327_v13, %v2803_v59  ;;  %v3607_v40 = vadd.f32 %v7327_v13, %v3591_v11 }
 0x2b8   :  { %3670 = vst.msk [vmem:[%s7544_s7 + $0x58] sm:$0xff] %vm3658_vm1, %v3653_v10  ;;  %v2805_v9 = vmul.f32 %v7309_v35, %v7665_v55  ;;  %v3592_v63 = vmul.f32 %v7309_v35, %v3572_v54  ;;  %v3575_v61 = vadd.f32 %v4874_v25, %v3478_v45  ;;  %v7668_v33 = vmax.f32 %v7666_v60, %v7667_v12 }
 0x2b9   :  { %3668 = vst.msk [vmem:[%s7544_s7 + $0x48] sm:$0xff] %vm3658_vm1, %v3651_v43  ;;  %v3623_v44 = vmax.f32 %v2819_v36, %v3607_v40  ;;  %v2820_v3 = vadd.f32 %v7327_v13, %v2804_v51  ;;  %v7671_v50 = vmax.f32 %v7669_v5, %v7670_v26  ;;  %v7674_v47 = vmax.f32 %v7672_v21, %v7673_v42 }
 0x2ba   :  { %v3638_v2 = vmax.f32 %v7668_v33, %v3622_v16  ;;  %v3608_v18 = vadd.f32 %v7327_v13, %v3592_v63  ;;  %v3593_v41 = vmul.f32 %v7309_v35, %v3575_v61  ;;  %v2821_v1 = vadd.f32 %v7327_v13, %v2805_v9 }
 0x2bb   :  { %v3639_v39 = vmax.f32 %v7671_v50, %v3623_v44 }
 0x2bc   :  { %v3654_v29 = vmax.f32 %v3638_v2, 0.0  ;;  %v3624_v17 = vmax.f32 %v2820_v3, %v3608_v18  ;;  %v3609_v4 = vadd.f32 %v7327_v13, %v3593_v41  ;;  %v7677_v13 = vmax.f32 %v7675_v32, %v7676_v52 }
 0x2bd   :  { %v3655_v48 = vmax.f32 %v3639_v39, 0.0 }
 0x2be   :  { %3671 = vst.msk [vmem:[%s7544_s7 + $0x60] sm:$0xff] %vm3658_vm1, %v3654_v29  ;;  %v3640_v35 = vmax.f32 %v7674_v47, %v3624_v17  ;;  %v3625_v53 = vmax.f32 %v2821_v1, %v3609_v4 }
 0x2bf   :  { %3672 = vst.msk [vmem:[%s7544_s7 + $0x68] sm:$0xff] %vm3658_vm1, %v3655_v48 }
 0x2c0   :  { %v3656_v62 = vmax.f32 %v3640_v35, 0.0  ;;  %v3641_v25 = vmax.f32 %v7677_v13, %v3625_v53 }
 0x2c2   :  { %3673 = vst.msk [vmem:[%s7544_s7 + $0x70] sm:$0xff] %vm3658_vm1, %v3656_v62  ;;  %v3657_v15 = vmax.f32 %v3641_v25, 0.0 }
 0x2c4   :  { %3674 = vst.msk [vmem:[%s7544_s7 + $0x78] sm:$0xff] %vm3658_vm1, %v3657_v15 }

// kernel: convnet_forward.6
= control target key start
LH: loop header
LB: loop body
LE: loop exit
PB: predicated region body
PF: predicated region fallthrough
CT: control target
= control target key end

     0   :  { %vm987_vm0 = vcmask 523264   ;;  %s6114_s4 = inlined_call_operand.vmem [shape: bf16[1600,64], index: 4, kind: input, shape index: {}]   ;;  %s6115_s0 = inlined_call_operand.vmem [shape: bf16[32,1600], index: 0, kind: input, shape index: {}]   ;;  %s6116_s1 = inlined_call_operand.vmem [shape: bf16[32,1600], index: 1, kind: input, shape index: {}]   ;;  %s6117_s2 = inlined_call_operand.vmem [shape: bf16[32,1600], index: 2, kind: input, shape index: {}]   ;;  %s6118_s3 = inlined_call_operand.vmem [shape: bf16[32,1600], index: 3, kind: input, shape index: {}]   ;;  %s6119_s5 = inlined_call_operand.vmem [shape: f32[1,64], index: 5, kind: input, shape index: {}]   ;;  %s6120_s6 = inlined_call_operand.vmem [shape: f32[1,64], index: 6, kind: input, shape index: {}]   ;;  %s6121_s7 = inlined_call_operand.vmem [shape: f32[32,64], index: 7, kind: output, shape index: {}]  }
   0x1   :  { %v4279_v0 = vld [vmem:[%s6114_s4 + $0x40] sm:$0xff]   ;;  %v4302_v4 = vld [vmem:[%s6114_s4 + $0x48] sm:$0xff]   ;;  %v4326_v8 = vld [vmem:[%s6114_s4 + $0x50] sm:$0xff]  }
   0x2   :  { %v4284_v1 = vld [vmem:[%s6114_s4 + $0xc0] sm:$0xff]   ;;  %3140 = vmatprep.subr.bf16.mxu0 %v4279_v0  ;;  %v4308_v5 = vld [vmem:[%s6114_s4 + $0xc8] sm:$0xff]   ;;  %v4332_v9 = vld [vmem:[%s6114_s4 + $0xd0] sm:$0xff]  }
   0x3   :  { %v4290_v2 = vld [vmem:[%s6114_s4] sm:$0xff]   ;;  %3168 = vmatprep.subr.bf16.mxu1 %v4284_v1  ;;  %v4314_v6 = vld [vmem:[%s6114_s4 + $0x8] sm:$0xff]   ;;  %v4338_v10 = vld [vmem:[%s6114_s4 + $0x10] sm:$0xff]  }
   0x4   :  { %v4296_v3 = vld [vmem:[%s6114_s4 + $0x80] sm:$0xff]   ;;  %3141 = vmatpush3.bf16.msra.mxu0 %v4290_v2  ;;  %v4320_v7 = vld [vmem:[%s6114_s4 + $0x88] sm:$0xff]   ;;  %v4344_v11 = vld [vmem:[%s6114_s4 + $0x90] sm:$0xff]  }
   0x5   :  { %3169 = vmatpush3.bf16.msra.mxu1 %v4296_v3  ;;  %3142 = vmatprep.subr.bf16.mxu0 %v4302_v4  ;;  %v4350_v12 = vld [vmem:[%s6114_s4 + $0x58] sm:$0xff]   ;;  %v4374_v16 = vld [vmem:[%s6114_s4 + $0x60] sm:$0xff]   ;;  %v4398_v20 = vld [vmem:[%s6114_s4 + $0x68] sm:$0xff]  }
   0x6   :  { %3170 = vmatprep.subr.bf16.mxu1 %v4308_v5  ;;  %v4356_v13 = vld [vmem:[%s6114_s4 + $0xd8] sm:$0xff]   ;;  %v4380_v17 = vld [vmem:[%s6114_s4 + $0xe0] sm:$0xff]   ;;  %v4404_v21 = vld [vmem:[%s6114_s4 + $0xe8] sm:$0xff]  }
   0x7   :  { %v4362_v14 = vld [vmem:[%s6114_s4 + $0x18] sm:$0xff]   ;;  %v4386_v18 = vld [vmem:[%s6114_s4 + $0x20] sm:$0xff]   ;;  %v4410_v22 = vld [vmem:[%s6114_s4 + $0x28] sm:$0xff]  }
   0x8   :  { %3143 = vmatpush3.bf16.msra.mxu0 %v4314_v6  ;;  %v4368_v15 = vld [vmem:[%s6114_s4 + $0x98] sm:$0xff]   ;;  %v4392_v19 = vld [vmem:[%s6114_s4 + $0xa0] sm:$0xff]   ;;  %v4416_v23 = vld [vmem:[%s6114_s4 + $0xa8] sm:$0xff]  }
   0x9   :  { %3171 = vmatpush3.bf16.msra.mxu1 %v4320_v7  ;;  %3144 = vmatprep.subr.bf16.mxu0 %v4326_v8  ;;  %v4422_v24 = vld [vmem:[%s6114_s4 + $0x70] sm:$0xff]   ;;  %v4446_v28 = vld [vmem:[%s6114_s4 + $0x78] sm:$0xff]   ;;  %v3921_v35 = vld [vmem:[%s6115_s0 + $0xc] ss:$52 sps:$4 sm:$0xff]  }
   0xa   :  { %3172 = vmatprep.subr.bf16.mxu1 %v4332_v9  ;;  %v4428_v25 = vld [vmem:[%s6114_s4 + $0xf0] sm:$0xff]   ;;  %v4452_v29 = vld [vmem:[%s6114_s4 + $0xf8] sm:$0xff]   ;;  %v4483_v36 = vld [vmem:[%s6114_s4 + $0x140] sm:$0xff]   ;;  %1075 = vmatprep.mubr.bf16.mxu1 %v3921_v35 }
   0xb   :  { %v4434_v26 = vld [vmem:[%s6114_s4 + $0x30] sm:$0xff]   ;;  %v4458_v30 = vld [vmem:[%s6114_s4 + $0x38] sm:$0xff]   ;;  %v4488_v37 = vld [vmem:[%s6114_s4 + $0x1c0] sm:$0xff]  }
   0xc   :  { %3145 = vmatpush3.bf16.msra.mxu0 %v4338_v10  ;;  %v4440_v27 = vld [vmem:[%s6114_s4 + $0xb0] sm:$0xff]   ;;  %v4464_v31 = vld [vmem:[%s6114_s4 + $0xb8] sm:$0xff]   ;;  %v4494_v38 = vld [vmem:[%s6114_s4 + $0x100] sm:$0xff]  }
   0xd   :  { %3173 = vmatpush3.bf16.msra.mxu1 %v4344_v11  ;;  %3146 = vmatprep.subr.bf16.mxu0 %v4350_v12  ;;  %v3916_v32 = vld [vmem:[%s6115_s0] ss:$52 sps:$4 sm:$0xff]   ;;  %v3918_v33 = vld [vmem:[%s6115_s0 + $0x4] ss:$52 sps:$4 sm:$0xff]   ;;  %v3919_v34 = vld [vmem:[%s6115_s0 + $0x8] ss:$52 sps:$4 sm:$0xff]  }
   0xe   :  { %3174 = vmatprep.subr.bf16.mxu1 %v4356_v13  ;;  %1026 = vmatprep.mubr.bf16.mxu0 %v3918_v33  ;;  %v4500_v39 = vld [vmem:[%s6114_s4 + $0x180] sm:$0xff]   ;;  %v4506_v40 = vld [vmem:[%s6114_s4 + $0x148] sm:$0xff]   ;;  %v4530_v44 = vld [vmem:[%s6114_s4 + $0x150] sm:$0xff]  }
   0xf   :  { %v4512_v41 = vld [vmem:[%s6114_s4 + $0x1c8] sm:$0xff]   ;;  %v4536_v45 = vld [vmem:[%s6114_s4 + $0x1d0] sm:$0xff]   ;;  %v4554_v48 = vld [vmem:[%s6114_s4 + $0x158] sm:$0xff]  }
  0x10   :  { %3147 = vmatpush3.bf16.msra.mxu0 %v4362_v14  ;;  %v4518_v42 = vld [vmem:[%s6114_s4 + $0x108] sm:$0xff]   ;;  %v4542_v46 = vld [vmem:[%s6114_s4 + $0x110] sm:$0xff]   ;;  %v4560_v49 = vld [vmem:[%s6114_s4 + $0x1d8] sm:$0xff]  }
  0x11   :  { %3175 = vmatpush3.bf16.msra.mxu1 %v4368_v15  ;;  %3148 = vmatprep.subr.bf16.mxu0 %v4374_v16  ;;  %v4524_v43 = vld [vmem:[%s6114_s4 + $0x188] sm:$0xff]   ;;  %v4548_v47 = vld [vmem:[%s6114_s4 + $0x190] sm:$0xff]   ;;  %v4566_v50 = vld [vmem:[%s6114_s4 + $0x118] sm:$0xff]  }
  0x12   :  { %3176 = vmatprep.subr.bf16.mxu1 %v4380_v17  ;;  %v4572_v51 = vld [vmem:[%s6114_s4 + $0x198] sm:$0xff]   ;;  %v4578_v52 = vld [vmem:[%s6114_s4 + $0x160] sm:$0xff]   ;;  %v4602_v56 = vld [vmem:[%s6114_s4 + $0x168] sm:$0xff]  }
  0x13   :  { %v4584_v53 = vld [vmem:[%s6114_s4 + $0x1e0] sm:$0xff]   ;;  %v4608_v57 = vld [vmem:[%s6114_s4 + $0x1e8] sm:$0xff]   ;;  %v4644_v33 = vld [vmem:[%s6114_s4 + $0x1f0] sm:$0xff]  }
  0x14   :  { %3149 = vmatpush3.bf16.msra.mxu0 %v4386_v18  ;;  %v4590_v54 = vld [vmem:[%s6114_s4 + $0x120] sm:$0xff]   ;;  %6212 = vst [vmem:[#allocation3_spill] sm:$0xff] %v4608_v57  ;;  %v3946_v59 = vld [vmem:[%s6115_s0 + $0x74] ss:$52 sps:$4 sm:$0xff]   ;;  %6214 = vst [vmem:[#allocation5_spill] sm:$0xff] %v4644_v33 }
  0x15   :  { %3177 = vmatpush3.bf16.msra.mxu1 %v4392_v19  ;;  %3150 = vmatprep.subr.bf16.mxu0 %v4398_v20  ;;  %v4596_v55 = vld [vmem:[%s6114_s4 + $0x1a0] sm:$0xff]   ;;  %v4621_v60 = vld [vmem:[%s6114_s4 + $0x128] sm:$0xff]   ;;  %v4656_v35 = vld [vmem:[%s6114_s4 + $0x1b0] sm:$0xff]  }
  0x16   :  { %3178 = vmatprep.subr.bf16.mxu1 %v4404_v21  ;;  %6211 = vst [vmem:[#allocation2_spill] sm:$0xff] %v4596_v55  ;;  %v3944_v58 = vld [vmem:[%s6115_s0 + $0x6c] ss:$52 sps:$4 sm:$0xff]   ;;  %v3950_v62 = vld [vmem:[%s6115_s0 + $0x68] ss:$52 sps:$4 sm:$0xff]   ;;  %6215 = vst [vmem:[#allocation6_spill] sm:$0xff] %v4656_v35 }
  0x17   :  { %v4626_v61 = vld [vmem:[%s6114_s4 + $0x1a8] sm:$0xff]   ;;  %v3951_v63 = vld [vmem:[%s6115_s0 + $0x70] ss:$52 sps:$4 sm:$0xff]  }
  0x18   :  { %3151 = vmatpush3.bf16.msra.mxu0 %v4410_v22  ;;  %6213 = vst [vmem:[#allocation4_spill] sm:$0xff] %v4626_v61 }
  0x19   :  { %3179 = vmatpush3.bf16.msra.mxu1 %v4416_v23  ;;  %3152 = vmatprep.subr.bf16.mxu0 %v4422_v24 }
  0x1a   :  { %3180 = vmatprep.subr.bf16.mxu1 %v4428_v25 }
  0x1c   :  { %3153 = vmatpush3.bf16.msra.mxu0 %v4434_v26 }
  0x1d   :  { %3181 = vmatpush3.bf16.msra.mxu1 %v4440_v27  ;;  %3154 = vmatprep.subr.bf16.mxu0 %v4446_v28 }
  0x1e   :  { %3182 = vmatprep.subr.bf16.mxu1 %v4452_v29 }
  0x20   :  { %3155 = vmatpush3.bf16.msra.mxu0 %v4458_v30 }
  0x21   :  { %3183 = vmatpush3.bf16.msra.mxu1 %v4464_v31  ;;  %3196 = vmatprep.subr.bf16.mxu0 %v4483_v36 }
  0x22   :  { %3224 = vmatprep.subr.bf16.mxu1 %v4488_v37 }
  0x23   :  { %1027 = vmatmul.mubr.bf16.vlgmr.msra.gmra.mrb[0].mxu0 %v3916_v32  ;;  %v4639_v32 = vld [vmem:[%s6114_s4 + $0x170] sm:$0xff]  }
  0x24   :  { %1076 = vmatmul.mubr.bf16.vlgmr.msra.gmra.mrb[0].mxu1 %v3919_v34  ;;  %3197 = vmatpush3.bf16.msra.mxu0 %v4494_v38  ;;  %v4650_v34 = vld [vmem:[%s6114_s4 + $0x130] sm:$0xff]  }
  0x25   :  { %3225 = vmatpush3.bf16.msra.mxu1 %v4500_v39  ;;  %3198 = vmatprep.subr.bf16.mxu0 %v4506_v40 }
  0x26   :  { %3226 = vmatprep.subr.bf16.mxu1 %v4512_v41  ;;  %1034 = vmatprep.mubr.bf16.mxu0 %v3944_v58  ;;  %v4662_v58 = vld [vmem:[%s6114_s4 + $0x178] sm:$0xff]  }
  0x27   :  { %1083 = vmatprep.mubr.bf16.mxu1 %v3946_v59  ;;  %v4668_v59 = vld [vmem:[%s6114_s4 + $0x1f8] sm:$0xff]  }
  0x28   :  { %3199 = vmatpush3.bf16.msra.mxu0 %v4518_v42  ;;  %6216 = vst [vmem:[#allocation7_spill] sm:$0xff] %v4668_v59 }
  0x29   :  { %3227 = vmatpush3.bf16.msra.mxu1 %v4524_v43  ;;  %3200 = vmatprep.subr.bf16.mxu0 %v4530_v44 }
  0x2a   :  { %3228 = vmatprep.subr.bf16.mxu1 %v4536_v45 }
  0x2b   :  { %1035 = vmatmul.mubr.bf16.gmra.mrb[4].mxu0 %v3950_v62  ;;  %v4674_v62 = vld [vmem:[%s6114_s4 + $0x138] sm:$0xff]  }
  0x2c   :  { %3201 = vmatpush3.bf16.msra.mxu0 %v4542_v46  ;;  %1084 = vmatmul.mubr.bf16.gmra.mrb[4].mxu1 %v3951_v63  ;;  %v4680_v63 = vld [vmem:[%s6114_s4 + $0x1b8] sm:$0xff]  }
  0x2d   :  { %3229 = vmatpush3.bf16.msra.mxu1 %v4548_v47  ;;  %3202 = vmatprep.subr.bf16.mxu0 %v4554_v48  ;;  %6217 = vst [vmem:[#allocation8_spill] sm:$0xff] %v4680_v63 }
  0x2e   :  { %3230 = vmatprep.subr.bf16.mxu1 %v4560_v49 }
  0x30   :  { %3203 = vmatpush3.bf16.msra.mxu0 %v4566_v50 }
  0x31   :  { %3231 = vmatpush3.bf16.msra.mxu1 %v4572_v51  ;;  %3204 = vmatprep.subr.bf16.mxu0 %v4578_v52 }
  0x32   :  { %3232 = vmatprep.subr.bf16.mxu1 %v4584_v53 }
  0x34   :  { %3205 = vmatpush3.bf16.msra.mxu0 %v4590_v54 }
  0x35   :  { %3233 = vmatpush3.bf16.msra.mxu1 %v4596_v55  ;;  %3206 = vmatprep.subr.bf16.mxu0 %v4602_v56  ;;  %v4710_v55 = vld [vmem:[%s6114_s4 + $0x200] sm:$0xff]  }
  0x36   :  { %3234 = vmatprep.subr.bf16.mxu1 %v4608_v57  ;;  %v4699_v57 = vld [vmem:[%s6114_s4 + $0x240] sm:$0xff]   ;;  %6219 = vst [vmem:[#allocation10_spill] sm:$0xff] %v4710_v55 }
  0x38   :  { %3207 = vmatpush3.bf16.msra.mxu0 %v4621_v60 }
  0x39   :  { %3235 = vmatpush3.bf16.msra.mxu1 %v4626_v61  ;;  %3208 = vmatprep.subr.bf16.mxu0 %v4639_v32  ;;  %v3965_v61 = vld [vmem:[%s6115_s0 + $0x1c] ss:$52 sps:$4 sm:$0xff]  }
  0x3a   :  { %3236 = vmatprep.subr.bf16.mxu1 %v4644_v33  ;;  %v3962_v33 = vld [vmem:[%s6115_s0 + $0x14] ss:$52 sps:$4 sm:$0xff]   ;;  %1173 = vmatprep.mubr.bf16.mxu1 %v3965_v61 }
  0x3b   :  { %1124 = vmatprep.mubr.bf16.mxu0 %v3962_v33  ;;  %v4716_v33 = vld [vmem:[%s6114_s4 + $0x280] sm:$0xff]   ;;  %v4722_v61 = vld [vmem:[%s6114_s4 + $0x248] sm:$0xff]  }
  0x3c   :  { %3209 = vmatpush3.bf16.msra.mxu0 %v4650_v34  ;;  %6220 = vst [vmem:[#allocation11_spill] sm:$0xff] %v4716_v33  ;;  %6221 = vst [vmem:[#allocation12_spill] sm:$0xff] %v4722_v61 }
  0x3d   :  { %3237 = vmatpush3.bf16.msra.mxu1 %v4656_v35  ;;  %3210 = vmatprep.subr.bf16.mxu0 %v4662_v58  ;;  %v3960_v35 = vld [vmem:[%s6115_s0 + $0x10] ss:$52 sps:$4 sm:$0xff]  }
  0x3e   :  { %3238 = vmatprep.subr.bf16.mxu1 %v4668_v59  ;;  %v3963_v59 = vld [vmem:[%s6115_s0 + $0x18] ss:$52 sps:$4 sm:$0xff]  }
  0x40   :  { %3211 = vmatpush3.bf16.msra.mxu0 %v4674_v62 }
  0x41   :  { %3239 = vmatpush3.bf16.msra.mxu1 %v4680_v63  ;;  %v4704_v63 = vld [vmem:[%s6114_s4 + $0x2c0] sm:$0xff]   ;;  %3252 = vmatprep.subr.bf16.mxu0 %v4699_v57 }
  0x42   :  { %6218 = vst [vmem:[#allocation9_spill] sm:$0xff] %v4704_v63  ;;  %3280 = vmatprep.subr.bf16.mxu1 %v4704_v63  ;;  %v4740_v63 = vld [vmem:[%s6114_s4 + $0x288] sm:$0xff]  }
  0x43   :  { %1125 = vmatmul.mubr.bf16.vlgmr.msra.gmra.mrb[8].mxu0 %v3960_v35  ;;  %v4728_v35 = vld [vmem:[%s6114_s4 + $0x2c8] sm:$0xff]   ;;  %6224 = vst [vmem:[#allocation15_spill] sm:$0xff] %v4740_v63 }
  0x44   :  { %1174 = vmatmul.mubr.bf16.vlgmr.msra.gmra.mrb[8].mxu1 %v3963_v59  ;;  %3253 = vmatpush3.bf16.msra.mxu0 %v4710_v55  ;;  %6222 = vst [vmem:[#allocation13_spill] sm:$0xff] %v4728_v35  ;;  %v4734_v59 = vld [vmem:[%s6114_s4 + $0x208] sm:$0xff]   ;;  %v4794_v55 = vld [vmem:[%s6114_s4 + $0x218] sm:$0xff]  }
  0x45   :  { %3281 = vmatpush3.bf16.msra.mxu1 %v4716_v33  ;;  %3254 = vmatprep.subr.bf16.mxu0 %v4722_v61  ;;  %6223 = vst [vmem:[#allocation14_spill] sm:$0xff] %v4734_v59  ;;  %v3974_v33 = vld [vmem:[%s6115_s0 + $0x7c] ss:$52 sps:$4 sm:$0xff]   ;;  %v3976_v61 = vld [vmem:[%s6115_s0 + $0x78] ss:$52 sps:$4 sm:$0xff]   ;;  %6231 = vst [vmem:[#allocation22_spill] sm:$0xff] %v4794_v55 }
  0x46   :  { %3282 = vmatprep.subr.bf16.mxu1 %v4728_v35  ;;  %1132 = vmatprep.mubr.bf16.mxu0 %v3974_v33  ;;  %v4753_v35 = vld [vmem:[%s6114_s4 + $0x250] sm:$0xff]  }
  0x47   :  { %6225 = vst [vmem:[#allocation16_spill] sm:$0xff] %v4753_v35  ;;  %v4768_v33 = vld [vmem:[%s6114_s4 + $0x210] sm:$0xff]  }
  0x48   :  { %3255 = vmatpush3.bf16.msra.mxu0 %v4734_v59  ;;  %v4758_v59 = vld [vmem:[%s6114_s4 + $0x2d0] sm:$0xff]   ;;  %6227 = vst [vmem:[#allocation18_spill] sm:$0xff] %v4768_v33 }
  0x49   :  { %3283 = vmatpush3.bf16.msra.mxu1 %v4740_v63  ;;  %6226 = vst [vmem:[#allocation17_spill] sm:$0xff] %v4758_v59  ;;  %3256 = vmatprep.subr.bf16.mxu0 %v4753_v35  ;;  %v3979_v63 = vld [vmem:[%s6115_s0 + $0x84] ss:$52 sps:$4 sm:$0xff]   ;;  %v3983_v35 = vld [vmem:[%s6115_s0 + $0x80] ss:$52 sps:$4 sm:$0xff]  }
  0x4a   :  { %3284 = vmatprep.subr.bf16.mxu1 %v4758_v59  ;;  %1181 = vmatprep.mubr.bf16.mxu1 %v3979_v63  ;;  %v4782_v59 = vld [vmem:[%s6114_s4 + $0x258] sm:$0xff]  }
  0x4b   :  { %1133 = vmatmul.mubr.bf16.gmra.mrb[12].mxu0 %v3976_v61  ;;  %v4773_v61 = vld [vmem:[%s6114_s4 + $0x290] sm:$0xff]   ;;  %6229 = vst [vmem:[#allocation20_spill] sm:$0xff] %v4782_v59  ;;  %v4788_v63 = vld [vmem:[%s6114_s4 + $0x2d8] sm:$0xff]  }
  0x4c   :  { %6228 = vst [vmem:[#allocation19_spill] sm:$0xff] %v4773_v61  ;;  %3257 = vmatpush3.bf16.msra.mxu0 %v4768_v33  ;;  %6230 = vst [vmem:[#allocation21_spill] sm:$0xff] %v4788_v63  ;;  %1182 = vmatmul.mubr.bf16.gmra.mrb[12].mxu1 %v3983_v35  ;;  %v4800_v33 = vld [vmem:[%s6114_s4 + $0x298] sm:$0xff]   ;;  %v4806_v35 = vld [vmem:[%s6114_s4 + $0x260] sm:$0xff]  }
  0x4d   :  { %3285 = vmatpush3.bf16.msra.mxu1 %v4773_v61  ;;  %3258 = vmatprep.subr.bf16.mxu0 %v4782_v59  ;;  %6232 = vst [vmem:[#allocation23_spill] sm:$0xff] %v4800_v33  ;;  %6233 = vst [vmem:[#allocation24_spill] sm:$0xff] %v4806_v35  ;;  %v4812_v61 = vld [vmem:[%s6114_s4 + $0x2e0] sm:$0xff]  }
  0x4e   :  { %3286 = vmatprep.subr.bf16.mxu1 %v4788_v63  ;;  %6234 = vst [vmem:[#allocation25_spill] sm:$0xff] %v4812_v61  ;;  %v4818_v63 = vld [vmem:[%s6114_s4 + $0x220] sm:$0xff]  }
  0x4f   :  { %6235 = vst [vmem:[#allocation26_spill] sm:$0xff] %v4818_v63  ;;  %v4009_v59 = vld [vmem:[%s6115_s0 + $0x2c] ss:$52 sps:$4 sm:$0xff]  }
  0x50   :  { %3259 = vmatpush3.bf16.msra.mxu0 %v4794_v55  ;;  %v4824_v55 = vld [vmem:[%s6114_s4 + $0x2a0] sm:$0xff]   ;;  %1271 = vmatprep.mubr.bf16.mxu1 %v4009_v59  ;;  %v4016_v59 = vld [vmem:[%s6115_s0 + $0x94] ss:$52 sps:$4 sm:$0xff]  }
  0x51   :  { %3287 = vmatpush3.bf16.msra.mxu1 %v4800_v33  ;;  %3260 = vmatprep.subr.bf16.mxu0 %v4806_v35  ;;  %6236 = vst [vmem:[#allocation27_spill] sm:$0xff] %v4824_v55  ;;  %v4830_v33 = vld [vmem:[%s6114_s4 + $0x268] sm:$0xff]  }
  0x52   :  { %3288 = vmatprep.subr.bf16.mxu1 %v4812_v61  ;;  %6237 = vst [vmem:[#allocation28_spill] sm:$0xff] %v4830_v33  ;;  %v4836_v35 = vld [vmem:[%s6114_s4 + $0x2e8] sm:$0xff]  }
  0x53   :  { %6238 = vst [vmem:[#allocation29_spill] sm:$0xff] %v4836_v35  ;;  %v4842_v61 = vld [vmem:[%s6114_s4 + $0x228] sm:$0xff]  }
  0x54   :  { %3261 = vmatpush3.bf16.msra.mxu0 %v4818_v63  ;;  %6239 = vst [vmem:[#allocation30_spill] sm:$0xff] %v4842_v61  ;;  %v4848_v63 = vld [vmem:[%s6114_s4 + $0x2a8] sm:$0xff]  }
  0x55   :  { %3289 = vmatpush3.bf16.msra.mxu1 %v4824_v55  ;;  %3262 = vmatprep.subr.bf16.mxu0 %v4830_v33  ;;  %6240 = vst [vmem:[#allocation31_spill] sm:$0xff] %v4848_v63  ;;  %v4854_v55 = vld [vmem:[%s6114_s4 + $0x270] sm:$0xff]  }
  0x56   :  { %3290 = vmatprep.subr.bf16.mxu1 %v4836_v35  ;;  %6241 = vst [vmem:[#allocation32_spill] sm:$0xff] %v4854_v55  ;;  %v4860_v33 = vld [vmem:[%s6114_s4 + $0x2f0] sm:$0xff]  }
  0x57   :  { %6242 = vst [vmem:[#allocation33_spill] sm:$0xff] %v4860_v33  ;;  %v4866_v35 = vld [vmem:[%s6114_s4 + $0x230] sm:$0xff]  }
  0x58   :  { %3263 = vmatpush3.bf16.msra.mxu0 %v4842_v61  ;;  %6243 = vst [vmem:[#allocation34_spill] sm:$0xff] %v4866_v35  ;;  %v4872_v61 = vld [vmem:[%s6114_s4 + $0x2b0] sm:$0xff]  }
  0x59   :  { %3291 = vmatpush3.bf16.msra.mxu1 %v4848_v63  ;;  %3264 = vmatprep.subr.bf16.mxu0 %v4854_v55  ;;  %6244 = vst [vmem:[#allocation35_spill] sm:$0xff] %v4872_v61  ;;  %v4878_v63 = vld [vmem:[%s6114_s4 + $0x278] sm:$0xff]  }
  0x5a   :  { %3292 = vmatprep.subr.bf16.mxu1 %v4860_v33  ;;  %6245 = vst [vmem:[#allocation36_spill] sm:$0xff] %v4878_v63  ;;  %v4884_v55 = vld [vmem:[%s6114_s4 + $0x2f8] sm:$0xff]  }
  0x5b   :  { %6246 = vst [vmem:[#allocation37_spill] sm:$0xff] %v4884_v55  ;;  %v4890_v33 = vld [vmem:[%s6114_s4 + $0x238] sm:$0xff]  }
  0x5c   :  { %3265 = vmatpush3.bf16.msra.mxu0 %v4866_v35  ;;  %6247 = vst [vmem:[#allocation38_spill] sm:$0xff] %v4890_v33  ;;  %v4896_v35 = vld [vmem:[%s6114_s4 + $0x2b8] sm:$0xff]  }
  0x5d   :  { %3293 = vmatpush3.bf16.msra.mxu1 %v4872_v61  ;;  %3266 = vmatprep.subr.bf16.mxu0 %v4878_v63  ;;  %6248 = vst [vmem:[#allocation39_spill] sm:$0xff] %v4896_v35  ;;  %v4004_v61 = vld [vmem:[%s6115_s0 + $0x20] ss:$52 sps:$4 sm:$0xff]   ;;  %v4006_v63 = vld [vmem:[%s6115_s0 + $0x24] ss:$52 sps:$4 sm:$0xff]  }
  0x5e   :  { %3294 = vmatprep.subr.bf16.mxu1 %v4884_v55  ;;  %v4007_v55 = vld [vmem:[%s6115_s0 + $0x28] ss:$52 sps:$4 sm:$0xff]   ;;  %1222 = vmatprep.mubr.bf16.mxu0 %v4006_v63  ;;  %v4012_v63 = vld [vmem:[%s6115_s0 + $0x8c] ss:$52 sps:$4 sm:$0xff]  }
  0x60   :  { %3267 = vmatpush3.bf16.msra.mxu0 %v4890_v33  ;;  %v4916_v33 = vld [vmem:[%s6114_s4 + $0x300] sm:$0xff]  }
  0x61   :  { %3295 = vmatpush3.bf16.msra.mxu1 %v4896_v35  ;;  %v4921_v35 = vld [vmem:[%s6114_s4 + $0x308] sm:$0xff]   ;;  %3836 = vmatprep.subr.bf16.mxu0 %v4916_v33 }
  0x62   :  { %3314 = vmatprep.subr.bf16.mxu1 %v4279_v0  ;;  %v4014_v0 = vld [vmem:[%s6115_s0 + $0x88] ss:$52 sps:$4 sm:$0xff]  }
  0x63   :  { %1223 = vmatmul.mubr.bf16.vlgmr.msra.gmra.mrb[16].mxu0 %v4004_v61  ;;  %v4954_v61 = vld [vmem:[%s6114_s4 + $0x318] sm:$0xff]  }
  0x64   :  { %1272 = vmatmul.mubr.bf16.vlgmr.msra.gmra.mrb[16].mxu1 %v4007_v55  ;;  %3837 = vmatpush3.bf16.msra.mxu0 %v4916_v33  ;;  %v4937_v55 = vld [vmem:[%s6114_s4 + $0x310] sm:$0xff]  }
  0x65   :  { %3315 = vmatpush3.bf16.msra.mxu1 %v4290_v2  ;;  %3838 = vmatprep.subr.bf16.mxu0 %v4921_v35  ;;  %v4018_v2 = vld [vmem:[%s6115_s0 + $0x90] ss:$52 sps:$4 sm:$0xff]  }
  0x66   :  { %3316 = vmatprep.subr.bf16.mxu1 %v4302_v4  ;;  %1230 = vmatprep.mubr.bf16.mxu0 %v4012_v63  ;;  %v4020_v4 = vld [vmem:[%s6115_s0 + $0x30] ss:$52 sps:$4 sm:$0xff]  }
  0x67   :  { %1279 = vmatprep.mubr.bf16.mxu1 %v4016_v59  ;;  %v4024_v63 = vld [vmem:[%s6116_s1 + $0x4] ss:$52 sps:$4 sm:$0xff]  }
  0x68   :  { %3839 = vmatpush3.bf16.msra.mxu0 %v4921_v35  ;;  %v4055_v59 = vld [vmem:[%s6116_s1 + $0x30] ss:$52 sps:$4 sm:$0xff]  }
  0x69   :  { %3317 = vmatpush3.bf16.msra.mxu1 %v4314_v6  ;;  %3840 = vmatprep.subr.bf16.mxu0 %v4937_v55  ;;  %v4021_v6 = vld [vmem:[%s6115_s0 + $0x98] ss:$52 sps:$4 sm:$0xff]  }
  0x6a   :  { %3318 = vmatprep.subr.bf16.mxu1 %v4326_v8  ;;  %v4027_v8 = vld [vmem:[%s6116_s1 + $0xc] ss:$52 sps:$4 sm:$0xff]  }
  0x6b   :  { %1231 = vmatmul.mubr.bf16.gmra.mrb[20].mxu0 %v4014_v0  ;;  %v6283_v0 = vld [vmem:[#allocation33_spill] sm:$0xff] }
  0x6c   :  { %3844 = vmatprep.mubr.msk.bf16.mxu0 %vm987_vm0, %v4020_v4  ;;  %1280 = vmatmul.mubr.bf16.gmra.mrb[20].mxu1 %v4018_v2  ;;  %v6284_v2 = vld [vmem:[#allocation35_spill] sm:$0xff]  ;;  %v6285_v4 = vld [vmem:[#allocation37_spill] sm:$0xff] }
  0x6d   :  { %3841 = vmatpush3.bf16.msra.mxu0 %v4937_v55  ;;  %3319 = vmatpush3.bf16.msra.mxu1 %v4338_v10  ;;  %v4034_v10 = vld [vmem:[%s6116_s1 + $0x74] ss:$52 sps:$4 sm:$0xff]  }
  0x6e   :  { %3842 = vmatprep.subr.bf16.mxu0 %v4954_v61  ;;  %3320 = vmatprep.subr.bf16.mxu1 %v4350_v12  ;;  %v4042_v12 = vld [vmem:[%s6116_s1 + $0x1c] ss:$52 sps:$4 sm:$0xff]  }
  0x6f   :  { %1553 = vmatprep.mubr.bf16.mxu1 %v4024_v63  ;;  %v4052_v63 = vld [vmem:[%s6116_s1 + $0x28] ss:$52 sps:$4 sm:$0xff]  }
  0x71   :  { %3843 = vmatpush3.bf16.msra.mxu0 %v4954_v61  ;;  %3321 = vmatpush3.bf16.msra.mxu1 %v4362_v14  ;;  %v4037_v14 = vld [vmem:[%s6116_s1 + $0x7c] ss:$52 sps:$4 sm:$0xff]  }
  0x72   :  { %3322 = vmatprep.subr.bf16.mxu1 %v4374_v16  ;;  %3342 = vmatprep.subr.bf16.mxu0 %v4284_v1  ;;  %v4022_v1 = vld [vmem:[%s6116_s1] ss:$52 sps:$4 sm:$0xff]  }
  0x73   :  { %v6250_v16 = vld [vmem:[#allocation10_spill] sm:$0xff] }
  0x74   :  { %3845 = vmatmul.mubr.msk.bf16.vlgmr.msra.gmra.mrb[24].mxu0 %vm987_vm0, %v4021_v6  ;;  %v4056_v6 = vld [vmem:[%s6116_s1 + $0x98] ss:$52 sps:$4 sm:$0xff]  }
  0x75   :  { %3323 = vmatpush3.bf16.msra.mxu1 %v4386_v18  ;;  %3343 = vmatpush3.bf16.msra.mxu0 %v4296_v3  ;;  %v4028_v3 = vld [vmem:[%s6116_s1 + $0x6c] ss:$52 sps:$4 sm:$0xff]   ;;  %v6252_v18 = vld [vmem:[#allocation12_spill] sm:$0xff] }
  0x76   :  { %3324 = vmatprep.subr.bf16.mxu1 %v4398_v20  ;;  %3344 = vmatprep.subr.bf16.mxu0 %v4308_v5  ;;  %v4030_v5 = vld [vmem:[%s6116_s1 + $0x68] ss:$52 sps:$4 sm:$0xff]   ;;  %v6253_v20 = vld [vmem:[#allocation4_spill] sm:$0xff] }
  0x77   :  { %1602 = vmatprep.mubr.bf16.mxu0 %v4027_v8  ;;  %v6286_v8 = vld [vmem:[#allocation39_spill] sm:$0xff] }
  0x79   :  { %3325 = vmatpush3.bf16.msra.mxu1 %v4410_v22  ;;  %3345 = vmatpush3.bf16.msra.mxu0 %v4320_v7  ;;  %v4033_v7 = vld [vmem:[%s6116_s1 + $0x14] ss:$52 sps:$4 sm:$0xff]   ;;  %v6255_v22 = vld [vmem:[#allocation5_spill] sm:$0xff] }
  0x7a   :  { %3326 = vmatprep.subr.bf16.mxu1 %v4422_v24  ;;  %3346 = vmatprep.subr.bf16.mxu0 %v4332_v9  ;;  %v4025_v9 = vld [vmem:[%s6116_s1 + $0x8] ss:$52 sps:$4 sm:$0xff]   ;;  %v4048_v24 = vld [vmem:[%s6116_s1 + $0x24] ss:$52 sps:$4 sm:$0xff]  }
  0x7d   :  { %3327 = vmatpush3.bf16.msra.mxu1 %v4434_v26  ;;  %3347 = vmatpush3.bf16.msra.mxu0 %v4344_v11  ;;  %v4036_v11 = vld [vmem:[%s6116_s1 + $0x70] ss:$52 sps:$4 sm:$0xff]  }
  0x7e   :  { %3328 = vmatprep.subr.bf16.mxu1 %v4446_v28  ;;  %3348 = vmatprep.subr.bf16.mxu0 %v4356_v13  ;;  %v4031_v13 = vld [vmem:[%s6116_s1 + $0x10] ss:$52 sps:$4 sm:$0xff]  }
  0x7f   :  { %v6258_v26 = vld [vmem:[#allocation18_spill] sm:$0xff]  ;;  %v6260_v28 = vld [vmem:[#allocation20_spill] sm:$0xff] }
  0x81   :  { %3329 = vmatpush3.bf16.msra.mxu1 %v4458_v30  ;;  %3349 = vmatpush3.bf16.msra.mxu0 %v4368_v15  ;;  %v6249_v15 = vld [vmem:[#allocation2_spill] sm:$0xff]  ;;  %v6261_v30 = vld [vmem:[#allocation8_spill] sm:$0xff] }
  0x82   :  { %3350 = vmatprep.subr.bf16.mxu0 %v4380_v17  ;;  %3370 = vmatprep.subr.bf16.mxu1 %v4483_v36  ;;  %v6251_v17 = vld [vmem:[#allocation3_spill] sm:$0xff]  ;;  %v6263_v36 = vld [vmem:[#allocation24_spill] sm:$0xff] }
  0x84   :  { %1554 = vmatmul.mubr.bf16.vlgmr.msra.gmra.mrb[24].mxu1 %v4022_v1  ;;  %v5140_v1 = vld [vmem:[%s6114_s4 + $0x40] sm:$0xff]  }
  0x85   :  { %3351 = vmatpush3.bf16.msra.mxu0 %v4392_v19  ;;  %3371 = vmatpush3.bf16.msra.mxu1 %v4494_v38  ;;  %v4039_v19 = vld [vmem:[%s6116_s1 + $0x78] ss:$52 sps:$4 sm:$0xff]  }
  0x86   :  { %3352 = vmatprep.subr.bf16.mxu0 %v4404_v21  ;;  %3372 = vmatprep.subr.bf16.mxu1 %v4506_v40  ;;  %v6254_v21 = vld [vmem:[#allocation14_spill] sm:$0xff]  ;;  %v6266_v40 = vld [vmem:[#allocation11_spill] sm:$0xff] }
  0x87   :  { %1561 = vmatprep.mubr.bf16.mxu1 %v4028_v3  ;;  %v4043_v38 = vld [vmem:[%s6116_s1 + $0x84] ss:$52 sps:$4 sm:$0xff]  }
  0x88   :  { %v5146_v3 = vld [vmem:[%s6114_s4 + $0xc0] sm:$0xff]  }
  0x89   :  { %3353 = vmatpush3.bf16.msra.mxu0 %v4416_v23  ;;  %3373 = vmatpush3.bf16.msra.mxu1 %v4518_v42  ;;  %v6256_v23 = vld [vmem:[#allocation16_spill] sm:$0xff]  ;;  %v6268_v42 = vld [vmem:[#allocation13_spill] sm:$0xff] }
  0x8a   :  { %3354 = vmatprep.subr.bf16.mxu0 %v4428_v25  ;;  %3374 = vmatprep.subr.bf16.mxu1 %v4530_v44  ;;  %v6257_v25 = vld [vmem:[#allocation6_spill] sm:$0xff] }
  0x8b   :  { %v6269_v44 = vld [vmem:[#allocation30_spill] sm:$0xff] }
  0x8c   :  { %1562 = vmatmul.mubr.bf16.gmra.mrb[28].mxu1 %v4030_v5  ;;  %v4057_v5 = vld [vmem:[%s6116_s1 + $0x94] ss:$52 sps:$4 sm:$0xff]  }
  0x8d   :  { %3355 = vmatpush3.bf16.msra.mxu0 %v4440_v27  ;;  %3375 = vmatpush3.bf16.msra.mxu1 %v4542_v46  ;;  %v6259_v27 = vld [vmem:[#allocation7_spill] sm:$0xff]  ;;  %v6271_v46 = vld [vmem:[#allocation32_spill] sm:$0xff] }
  0x8e   :  { %3356 = vmatprep.subr.bf16.mxu0 %v4452_v29  ;;  %3376 = vmatprep.subr.bf16.mxu1 %v4554_v48  ;;  %v4040_v29 = vld [vmem:[%s6116_s1 + $0x18] ss:$52 sps:$4 sm:$0xff]  }
  0x8f   :  { %1651 = vmatprep.mubr.bf16.mxu1 %v4033_v7  ;;  %v4054_v48 = vld [vmem:[%s6116_s1 + $0x2c] ss:$52 sps:$4 sm:$0xff]  }
  0x90   :  { %v4065_v7 = vld [vmem:[%s6117_s2 + $0xc] ss:$52 sps:$4 sm:$0xff]  }
  0x91   :  { %3357 = vmatpush3.bf16.msra.mxu0 %v4464_v31  ;;  %3377 = vmatpush3.bf16.msra.mxu1 %v4566_v50  ;;  %v6262_v31 = vld [vmem:[#allocation22_spill] sm:$0xff]  ;;  %v6274_v50 = vld [vmem:[#allocation19_spill] sm:$0xff] }
  0x92   :  { %3378 = vmatprep.subr.bf16.mxu1 %v4578_v52  ;;  %3398 = vmatprep.subr.bf16.mxu0 %v4488_v37  ;;  %v6264_v37 = vld [vmem:[#allocation9_spill] sm:$0xff] }
  0x93   :  { %v6276_v52 = vld [vmem:[#allocation21_spill] sm:$0xff] }
  0x94   :  { %1603 = vmatmul.mubr.bf16.vlgmr.msra.gmra.mrb[28].mxu0 %v4025_v9  ;;  %v5159_v9 = vld [vmem:[%s6114_s4] sm:$0xff]  }
  0x95   :  { %3379 = vmatpush3.bf16.msra.mxu1 %v4590_v54  ;;  %3399 = vmatpush3.bf16.msra.mxu0 %v4500_v39  ;;  %v6265_v39 = vld [vmem:[#allocation26_spill] sm:$0xff] }
  0x96   :  { %3380 = vmatprep.subr.bf16.mxu1 %v4602_v56  ;;  %3400 = vmatprep.subr.bf16.mxu0 %v4512_v41  ;;  %v6267_v41 = vld [vmem:[#allocation28_spill] sm:$0xff]  ;;  %v6277_v54 = vld [vmem:[#allocation38_spill] sm:$0xff]  ;;  %v6278_v56 = vld [vmem:[#allocation23_spill] sm:$0xff] }
  0x97   :  { %1610 = vmatprep.mubr.bf16.mxu0 %v4034_v10  ;;  %v5165_v10 = vld [vmem:[%s6114_s4 + $0x80] sm:$0xff]  }
  0x99   :  { %3381 = vmatpush3.bf16.msra.mxu1 %v4621_v60  ;;  %3401 = vmatpush3.bf16.msra.mxu0 %v4524_v43  ;;  %v4045_v43 = vld [vmem:[%s6116_s1 + $0x80] ss:$52 sps:$4 sm:$0xff]  }
  0x9a   :  { %3382 = vmatprep.subr.bf16.mxu1 %v4639_v32  ;;  %3402 = vmatprep.subr.bf16.mxu0 %v4536_v45  ;;  %v6270_v45 = vld [vmem:[#allocation15_spill] sm:$0xff] }
  0x9b   :  { %v4049_v60 = vld [vmem:[%s6116_s1 + $0x8c] ss:$52 sps:$4 sm:$0xff]  }
  0x9c   :  { %1611 = vmatmul.mubr.bf16.gmra.mrb[32].mxu0 %v4036_v11  ;;  %v6280_v32 = vld [vmem:[#allocation27_spill] sm:$0xff] }
  0x9d   :  { %3383 = vmatpush3.bf16.msra.mxu1 %v4650_v34  ;;  %3403 = vmatpush3.bf16.msra.mxu0 %v4548_v47  ;;  %v6272_v47 = vld [vmem:[#allocation17_spill] sm:$0xff]  ;;  %v5171_v11 = vld [vmem:[%s6114_s4 + $0x48] sm:$0xff]  }
  0x9e   :  { %3384 = vmatprep.subr.bf16.mxu1 %v4662_v58  ;;  %3404 = vmatprep.subr.bf16.mxu0 %v4560_v49  ;;  %v6273_v49 = vld [vmem:[#allocation34_spill] sm:$0xff]  ;;  %v6281_v34 = vld [vmem:[#allocation29_spill] sm:$0xff] }
  0x9f   :  { %1700 = vmatprep.mubr.bf16.mxu0 %v4042_v12  ;;  %v4051_v58 = vld [vmem:[%s6116_s1 + $0x88] ss:$52 sps:$4 sm:$0xff]  }
  0xa0   :  { %v5177_v12 = vld [vmem:[%s6114_s4 + $0xc8] sm:$0xff]  }
  0xa1   :  { %3385 = vmatpush3.bf16.msra.mxu1 %v4674_v62  ;;  %3405 = vmatpush3.bf16.msra.mxu0 %v4572_v51  ;;  %v6275_v51 = vld [vmem:[#allocation36_spill] sm:$0xff]  ;;  %v6282_v62 = vld [vmem:[#allocation31_spill] sm:$0xff] }
  0xa2   :  { %3406 = vmatprep.subr.bf16.mxu0 %v4584_v53  ;;  %3426 = vmatprep.subr.bf16.mxu1 %v4699_v57  ;;  %v4046_v53 = vld [vmem:[%s6116_s1 + $0x20] ss:$52 sps:$4 sm:$0xff]   ;;  %v6279_v57 = vld [vmem:[#allocation25_spill] sm:$0xff] }
  0xa4   :  { %1652 = vmatmul.mubr.bf16.vlgmr.msra.gmra.mrb[32].mxu1 %v4031_v13  ;;  %v4059_v13 = vld [vmem:[%s6116_s1 + $0x90] ss:$52 sps:$4 sm:$0xff]  }
  0xa5   :  { %3407 = vmatpush3.bf16.msra.mxu0 %v6249_v15  ;;  %3427 = vmatpush3.bf16.msra.mxu1 %v6250_v16  ;;  %v5192_v15 = vld [vmem:[%s6114_s4 + $0x88] sm:$0xff]   ;;  %v4062_v16 = vld [vmem:[%s6117_s2 + $0x4] ss:$52 sps:$4 sm:$0xff]  }
  0xa6   :  { %3408 = vmatprep.subr.bf16.mxu0 %v6251_v17  ;;  %3428 = vmatprep.subr.bf16.mxu1 %v6252_v18  ;;  %v5201_v17 = vld [vmem:[%s6114_s4 + $0x50] sm:$0xff]  }
  0xa7   :  { %1659 = vmatprep.mubr.bf16.mxu1 %v4037_v14  ;;  %v5186_v14 = vld [vmem:[%s6114_s4 + $0x8] sm:$0xff]   ;;  %v5207_v18 = vld [vmem:[%s6114_s4 + $0xd0] sm:$0xff]  }
  0xa9   :  { %3409 = vmatpush3.bf16.msra.mxu0 %v6253_v20  ;;  %3429 = vmatpush3.bf16.msra.mxu1 %v6254_v21  ;;  %v5219_v20 = vld [vmem:[%s6114_s4 + $0x90] sm:$0xff]   ;;  %v5225_v21 = vld [vmem:[%s6114_s4 + $0x58] sm:$0xff]  }
  0xaa   :  { %3410 = vmatprep.subr.bf16.mxu0 %v6255_v22  ;;  %3430 = vmatprep.subr.bf16.mxu1 %v6256_v23  ;;  %v5231_v22 = vld [vmem:[%s6114_s4 + $0xd8] sm:$0xff]  }
  0xab   :  { %v5237_v23 = vld [vmem:[%s6114_s4 + $0x18] sm:$0xff]  }
  0xac   :  { %1660 = vmatmul.mubr.bf16.gmra.mrb[36].mxu1 %v4039_v19  ;;  %v5213_v19 = vld [vmem:[%s6114_s4 + $0x10] sm:$0xff]  }
  0xad   :  { %3411 = vmatpush3.bf16.msra.mxu0 %v6257_v25  ;;  %3431 = vmatpush3.bf16.msra.mxu1 %v6258_v26  ;;  %v5249_v25 = vld [vmem:[%s6114_s4 + $0x60] sm:$0xff]  }
  0xae   :  { %3412 = vmatprep.subr.bf16.mxu0 %v6259_v27  ;;  %3432 = vmatprep.subr.bf16.mxu1 %v6260_v28  ;;  %v5255_v26 = vld [vmem:[%s6114_s4 + $0xe0] sm:$0xff]  }
  0xaf   :  { %1749 = vmatprep.mubr.bf16.mxu1 %v4048_v24  ;;  %v5243_v24 = vld [vmem:[%s6114_s4 + $0x98] sm:$0xff]   ;;  %v5261_v27 = vld [vmem:[%s6114_s4 + $0x20] sm:$0xff]  }
  0xb0   :  { %v5267_v28 = vld [vmem:[%s6114_s4 + $0xa0] sm:$0xff]  }
  0xb1   :  { %3413 = vmatpush3.bf16.msra.mxu0 %v6261_v30  ;;  %3433 = vmatpush3.bf16.msra.mxu1 %v6262_v31  ;;  %v5279_v30 = vld [vmem:[%s6114_s4 + $0xe8] sm:$0xff]  }
  0xb2   :  { %3434 = vmatprep.subr.bf16.mxu1 %v6263_v36  ;;  %3454 = vmatprep.subr.bf16.mxu0 %v6264_v37  ;;  %v5285_v31 = vld [vmem:[%s6114_s4 + $0x28] sm:$0xff]   ;;  %v5297_v37 = vld [vmem:[%s6114_s4 + $0x70] sm:$0xff]  }
  0xb3   :  { %v5291_v36 = vld [vmem:[%s6114_s4 + $0xa8] sm:$0xff]  }
  0xb4   :  { %1701 = vmatmul.mubr.bf16.vlgmr.msra.gmra.mrb[36].mxu0 %v4040_v29  ;;  %v5273_v29 = vld [vmem:[%s6114_s4 + $0x68] sm:$0xff]  }
  0xb5   :  { %3435 = vmatpush3.bf16.msra.mxu1 %v6265_v39  ;;  %3455 = vmatpush3.bf16.msra.mxu0 %v6266_v40 }
  0xb6   :  { %3436 = vmatprep.subr.bf16.mxu1 %v6267_v41  ;;  %3456 = vmatprep.subr.bf16.mxu0 %v6268_v42  ;;  %v5309_v42 = vld [vmem:[%s6114_s4 + $0x30] sm:$0xff]  }
  0xb7   :  { %1708 = vmatprep.mubr.bf16.mxu0 %v4043_v38  ;;  %v5303_v38 = vld [vmem:[%s6114_s4 + $0xf0] sm:$0xff]  }
  0xb8   :  { %6287 = vst [vmem:[#allocation2_spill] sm:$0xff] %v5303_v38 }
  0xb9   :  { %3437 = vmatpush3.bf16.msra.mxu1 %v6269_v44  ;;  %3457 = vmatpush3.bf16.msra.mxu0 %v6270_v45 }
  0xba   :  { %3438 = vmatprep.subr.bf16.mxu1 %v6271_v46  ;;  %3458 = vmatprep.subr.bf16.mxu0 %v6272_v47 }
  0xbc   :  { %1709 = vmatmul.mubr.bf16.gmra.mrb[40].mxu0 %v4045_v43  ;;  %v5315_v43 = vld [vmem:[%s6114_s4 + $0xb0] sm:$0xff]  }
  0xbd   :  { %3439 = vmatpush3.bf16.msra.mxu1 %v6273_v49  ;;  %3459 = vmatpush3.bf16.msra.mxu0 %v6274_v50  ;;  %6288 = vst [vmem:[#allocation10_spill] sm:$0xff] %v5315_v43  ;;  %v5327_v50 = vld [vmem:[%s6114_s4 + $0xf8] sm:$0xff]  }
  0xbe   :  { %3440 = vmatprep.subr.bf16.mxu1 %v6275_v51  ;;  %3460 = vmatprep.subr.bf16.mxu0 %v6276_v52  ;;  %6289 = vst [vmem:[#allocation3_spill] sm:$0xff] %v5327_v50 }
  0xbf   :  { %1798 = vmatprep.mubr.bf16.mxu0 %v4054_v48  ;;  %v5321_v48 = vld [vmem:[%s6114_s4 + $0x78] sm:$0xff]  }
  0xc1   :  { %3441 = vmatpush3.bf16.msra.mxu1 %v6277_v54  ;;  %3461 = vmatpush3.bf16.msra.mxu0 %v6278_v56 }
  0xc2   :  { %3462 = vmatprep.subr.bf16.mxu0 %v6279_v57  ;;  %3848 = vmatprep.subr.bf16.mxu1 %v4916_v33 }
  0xc4   :  { %1750 = vmatmul.mubr.bf16.vlgmr.msra.gmra.mrb[40].mxu1 %v4046_v53 }
  0xc5   :  { %3463 = vmatpush3.bf16.msra.mxu0 %v6280_v32  ;;  %3849 = vmatpush3.bf16.msra.mxu1 %v4916_v33  ;;  %v4060_v32 = vld [vmem:[%s6117_s2] ss:$52 sps:$4 sm:$0xff]  }
  0xc6   :  { %3464 = vmatprep.subr.bf16.mxu0 %v6281_v34  ;;  %3850 = vmatprep.subr.bf16.mxu1 %v4921_v35  ;;  %v4063_v34 = vld [vmem:[%s6117_s2 + $0x8] ss:$52 sps:$4 sm:$0xff]  }
  0xc7   :  { %1757 = vmatprep.mubr.bf16.mxu1 %v4049_v60 }
  0xc9   :  { %3465 = vmatpush3.bf16.msra.mxu0 %v6282_v62  ;;  %3851 = vmatpush3.bf16.msra.mxu1 %v4921_v35 }
  0xca   :  { %3466 = vmatprep.subr.bf16.mxu0 %v6283_v0  ;;  %3852 = vmatprep.subr.bf16.mxu1 %v4937_v55 }
  0xcc   :  { %1758 = vmatmul.mubr.bf16.gmra.mrb[44].mxu1 %v4051_v58 }
  0xcd   :  { %3467 = vmatpush3.bf16.msra.mxu0 %v6284_v2  ;;  %3853 = vmatpush3.bf16.msra.mxu1 %v4937_v55 }
  0xce   :  { %3468 = vmatprep.subr.bf16.mxu0 %v6285_v4  ;;  %3854 = vmatprep.subr.bf16.mxu1 %v4954_v61 }
  0xcf   :  { %3856 = vmatprep.mubr.msk.bf16.mxu1 %vm987_vm0, %v4055_v59  ;;  %v5341_v59 = vld [vmem:[%s6114_s4 + $0x38] sm:$0xff]  }
  0xd1   :  { %3469 = vmatpush3.bf16.msra.mxu0 %v6286_v8  ;;  %3855 = vmatpush3.bf16.msra.mxu1 %v4954_v61 }
  0xd2   :  { %3488 = vmatprep.subr.bf16.mxu0 %v5140_v1  ;;  %3516 = vmatprep.subr.bf16.mxu1 %v5146_v3 }
  0xd4   :  { %1799 = vmatmul.mubr.bf16.vlgmr.msra.gmra.mrb[44].mxu0 %v4052_v63  ;;  %3857 = vmatmul.mubr.msk.bf16.vlgmr.msra.gmra.mrb[48].mxu1 %vm987_vm0, %v4056_v6  ;;  %v5347_v63 = vld [vmem:[%s6114_s4 + $0xb8] sm:$0xff]   ;;  %v5353_v6 = vld [vmem:[%s6114_s4 + $0x140] sm:$0xff]  }
  0xd5   :  { %3489 = vmatpush3.bf16.msra.mxu0 %v5159_v9  ;;  %3517 = vmatpush3.bf16.msra.mxu1 %v5165_v10  ;;  %6290 = vst [vmem:[#allocation12_spill] sm:$0xff] %v5347_v63 }
  0xd6   :  { %3490 = vmatprep.subr.bf16.mxu0 %v5171_v11  ;;  %3518 = vmatprep.subr.bf16.mxu1 %v5177_v12 }
  0xd7   :  { %1806 = vmatprep.mubr.bf16.mxu0 %v4057_v5  ;;  %2121 = vmatprep.mubr.bf16.mxu1 %v4065_v7  ;;  %v5359_v5 = vld [vmem:[%s6114_s4 + $0x1c0] sm:$0xff]  }
  0xd8   :  { %6291 = vst [vmem:[#allocation4_spill] sm:$0xff] %v5359_v5 }
  0xd9   :  { %3491 = vmatpush3.bf16.msra.mxu0 %v5186_v14  ;;  %3519 = vmatpush3.bf16.msra.mxu1 %v5192_v15 }
  0xda   :  { %3492 = vmatprep.subr.bf16.mxu0 %v5201_v17  ;;  %3520 = vmatprep.subr.bf16.mxu1 %v5207_v18 }
  0xdc   :  { %1807 = vmatmul.mubr.bf16.gmra.mrb[48].mxu0 %v4059_v13  ;;  %v4066_v13 = vld [vmem:[%s6117_s2 + $0x6c] ss:$52 sps:$4 sm:$0xff]  }
  0xdd   :  { %3493 = vmatpush3.bf16.msra.mxu0 %v5213_v19  ;;  %3521 = vmatpush3.bf16.msra.mxu1 %v5219_v20 }
  0xde   :  { %3494 = vmatprep.subr.bf16.mxu0 %v5225_v21  ;;  %3522 = vmatprep.subr.bf16.mxu1 %v5231_v22 }
  0xdf   :  { %2072 = vmatprep.mubr.bf16.mxu0 %v4062_v16  ;;  %v4068_v16 = vld [vmem:[%s6117_s2 + $0x74] ss:$52 sps:$4 sm:$0xff]  }
  0xe1   :  { %3495 = vmatpush3.bf16.msra.mxu0 %v5237_v23  ;;  %3523 = vmatpush3.bf16.msra.mxu1 %v5243_v24 }
  0xe2   :  { %3496 = vmatprep.subr.bf16.mxu0 %v5249_v25  ;;  %3524 = vmatprep.subr.bf16.mxu1 %v5255_v26 }
  0xe5   :  { %3497 = vmatpush3.bf16.msra.mxu0 %v5261_v27  ;;  %3525 = vmatpush3.bf16.msra.mxu1 %v5267_v28 }
  0xe6   :  { %3498 = vmatprep.subr.bf16.mxu0 %v5273_v29  ;;  %3526 = vmatprep.subr.bf16.mxu1 %v5279_v30 }
  0xe9   :  { %3499 = vmatpush3.bf16.msra.mxu0 %v5285_v31  ;;  %3527 = vmatpush3.bf16.msra.mxu1 %v5291_v36 }
  0xea   :  { %3500 = vmatprep.subr.bf16.mxu0 %v5297_v37  ;;  %3528 = vmatprep.subr.bf16.mxu1 %v5303_v38 }
  0xed   :  { %3501 = vmatpush3.bf16.msra.mxu0 %v5309_v42  ;;  %3529 = vmatpush3.bf16.msra.mxu1 %v5315_v43  ;;  %v4078_v43 = vld [vmem:[%s6117_s2 + $0x7c] ss:$52 sps:$4 sm:$0xff]  }
  0xee   :  { %3502 = vmatprep.subr.bf16.mxu0 %v5321_v48  ;;  %3530 = vmatprep.subr.bf16.mxu1 %v5327_v50 }
  0xf1   :  { %3503 = vmatpush3.bf16.msra.mxu0 %v5341_v59  ;;  %3531 = vmatpush3.bf16.msra.mxu1 %v5347_v63  ;;  %v5505_v63 = vld [vmem:[%s6114_s4 + $0x128] sm:$0xff]  }
  0xf2   :  { %3544 = vmatprep.subr.bf16.mxu0 %v5353_v6  ;;  %3572 = vmatprep.subr.bf16.mxu1 %v5359_v5  ;;  %6309 = vst [vmem:[#allocation32_spill] sm:$0xff] %v5505_v63 }
  0xf4   :  { %2073 = vmatmul.mubr.bf16.vlgmr.msra.gmra.mrb[52].mxu0 %v4060_v32  ;;  %2122 = vmatmul.mubr.bf16.vlgmr.msra.gmra.mrb[52].mxu1 %v4063_v34  ;;  %v4077_v32 = vld [vmem:[%s6117_s2 + $0x1c] ss:$52 sps:$4 sm:$0xff]  }
  0xf5   :  { %2080 = vmatprep.mubr.bf16.mxu0 %v4066_v13  ;;  %2129 = vmatprep.mubr.bf16.mxu1 %v4068_v16  ;;  %v5433_v34 = vld [vmem:[%s6114_s4 + $0x110] sm:$0xff]   ;;  %v5445_v13 = vld [vmem:[%s6114_s4 + $0x158] sm:$0xff]  }
  0xf6   :  { %v3156_v39 = vpop.f32.mrb[0].mxu0  ;;  %6297 = vst [vmem:[#allocation7_spill] sm:$0xff] %v5433_v34  ;;  %6299 = vst [vmem:[#allocation8_spill] sm:$0xff] %v5445_v13  ;;  %v5451_v16 = vld [vmem:[%s6114_s4 + $0x1d8] sm:$0xff]  }
  0xf7   :  { %v3184_v40 = vpop.f32.mrb[0].mxu1  ;;  %v3157_v41 = vpop.f32.mrb[1].mxu0  ;;  %6300 = vst [vmem:[#allocation22_spill] sm:$0xff] %v5451_v16 }
  0xf8   :  { %v3158_v44 = vadd.f32 %v3157_v41, %v3156_v39  ;;  %v3185_v45 = vpop.f32.mrb[1].mxu1  ;;  %v3159_v47 = vpop.f32.mrb[2].mxu0  ;;  %v5373_v39 = vld [vmem:[%s6114_s4 + $0x100] sm:$0xff]   ;;  %v5385_v41 = vld [vmem:[%s6114_s4 + $0x148] sm:$0xff]  }
  0xf9   :  { %v3186_v52 = vadd.f32 %v3185_v45, %v3184_v40  ;;  %v3187_v53 = vpop.f32.mrb[2].mxu1  ;;  %v3160_v56 = vpop.f32.mrb[3].mxu0  ;;  %3545 = vmatpush3.bf16.msra.mxu0 %v5373_v39  ;;  %v5379_v40 = vld [vmem:[%s6114_s4 + $0x180] sm:$0xff]   ;;  %v4070_v45 = vld [vmem:[%s6117_s2 + $0x68] ss:$52 sps:$4 sm:$0xff]  }
  0xfa   :  { %v3161_v57 = vadd.f32 %v3160_v56, %v3159_v47  ;;  %v3188_v60 = vpop.f32.mrb[3].mxu1  ;;  %6292 = vst [vmem:[#allocation14_spill] sm:$0xff] %v5379_v40  ;;  %3573 = vmatpush3.bf16.msra.mxu1 %v5379_v40  ;;  %3546 = vmatprep.subr.bf16.mxu0 %v5385_v41  ;;  %v4071_v47 = vld [vmem:[%s6117_s2 + $0x70] ss:$52 sps:$4 sm:$0xff]  }
  0xfb   :  { %v5336_v58 = vadd.f32 %v3186_v52, %v3158_v44  ;;  %v3189_v62 = vadd.f32 %v3188_v60, %v3187_v53  ;;  %v5391_v44 = vld [vmem:[%s6114_s4 + $0x1c8] sm:$0xff]   ;;  %v5415_v56 = vld [vmem:[%s6114_s4 + $0x150] sm:$0xff]  }
  0xfc   :  { %6293 = vst [vmem:[#allocation5_spill] sm:$0xff] %v5391_v44  ;;  %3574 = vmatprep.subr.bf16.mxu1 %v5391_v44  ;;  %v5403_v52 = vld [vmem:[%s6114_s4 + $0x108] sm:$0xff]   ;;  %6295 = vst [vmem:[#allocation6_spill] sm:$0xff] %v5415_v56  ;;  %2081 = vmatmul.mubr.bf16.gmra.mrb[56].mxu0 %v4070_v45  ;;  %v5457_v45 = vld [vmem:[%s6114_s4 + $0x118] sm:$0xff]  }
  0xfd   :  { %v5362_v7 = vadd.f32 %v3189_v62, %v3161_v57  ;;  %3547 = vmatpush3.bf16.msra.mxu0 %v5403_v52  ;;  %v5409_v53 = vld [vmem:[%s6114_s4 + $0x188] sm:$0xff]   ;;  %v5421_v57 = vld [vmem:[%s6114_s4 + $0x1d0] sm:$0xff]   ;;  %2130 = vmatmul.mubr.bf16.gmra.mrb[56].mxu1 %v4071_v47  ;;  %6301 = vst [vmem:[#allocation24_spill] sm:$0xff] %v5457_v45  ;;  %v5463_v47 = vld [vmem:[%s6114_s4 + $0x198] sm:$0xff]  }
  0xfe   :  { %6294 = vst [vmem:[#allocation16_spill] sm:$0xff] %v5409_v53  ;;  %3575 = vmatpush3.bf16.msra.mxu1 %v5409_v53  ;;  %3548 = vmatprep.subr.bf16.mxu0 %v5415_v56  ;;  %6296 = vst [vmem:[#allocation18_spill] sm:$0xff] %v5421_v57  ;;  %v4074_v60 = vld [vmem:[%s6117_s2 + $0x14] ss:$52 sps:$4 sm:$0xff]  }
  0xff   :  { %3576 = vmatprep.subr.bf16.mxu1 %v5421_v57  ;;  %v5439_v62 = vld [vmem:[%s6114_s4 + $0x190] sm:$0xff]   ;;  %2170 = vmatprep.mubr.bf16.mxu0 %v4074_v60  ;;  %6302 = vst [vmem:[#allocation9_spill] sm:$0xff] %v5463_v47  ;;  %v5475_v60 = vld [vmem:[%s6114_s4 + $0x1e0] sm:$0xff]   ;;  %v5493_v57 = vld [vmem:[%s6114_s4 + $0x168] sm:$0xff]   ;;  %v3190_v53 = vpop.f32.mrb[4].mxu1 }
 0x100   :  { %6298 = vst [vmem:[#allocation20_spill] sm:$0xff] %v5439_v62  ;;  %2219 = vmatprep.mubr.bf16.mxu1 %v4077_v32  ;;  %6304 = vst [vmem:[#allocation11_spill] sm:$0xff] %v5475_v60  ;;  %v5481_v32 = vld [vmem:[%s6114_s4 + $0x120] sm:$0xff]  }
 0x101   :  { %3549 = vmatpush3.bf16.msra.mxu0 %v5433_v34  ;;  %6305 = vst [vmem:[#allocation28_spill] sm:$0xff] %v5481_v32  ;;  %6307 = vst [vmem:[#allocation30_spill] sm:$0xff] %v5493_v57 }
 0x102   :  { %3577 = vmatpush3.bf16.msra.mxu1 %v5439_v62  ;;  %3550 = vmatprep.subr.bf16.mxu0 %v5445_v13  ;;  %v3162_v62 = vpop.f32.mrb[4].mxu0 }
 0x103   :  { %3578 = vmatprep.subr.bf16.mxu1 %v5451_v16  ;;  %v5469_v16 = vld [vmem:[%s6114_s4 + $0x160] sm:$0xff]   ;;  %v3163_v44 = vpop.f32.mrb[5].mxu0 }
 0x104   :  { %6303 = vst [vmem:[#allocation26_spill] sm:$0xff] %v5469_v16  ;;  %v3164_v40 = vadd.f32 %v3163_v44, %v3162_v62 }
 0x105   :  { %3551 = vmatpush3.bf16.msra.mxu0 %v5457_v45 }
 0x106   :  { %3579 = vmatpush3.bf16.msra.mxu1 %v5463_v47  ;;  %3552 = vmatprep.subr.bf16.mxu0 %v5469_v16  ;;  %v5487_v47 = vld [vmem:[%s6114_s4 + $0x1a0] sm:$0xff]  }
 0x107   :  { %3580 = vmatprep.subr.bf16.mxu1 %v5475_v60  ;;  %6306 = vst [vmem:[#allocation13_spill] sm:$0xff] %v5487_v47  ;;  %v5499_v60 = vld [vmem:[%s6114_s4 + $0x1e8] sm:$0xff]  }
 0x108   :  { %6308 = vst [vmem:[#allocation15_spill] sm:$0xff] %v5499_v60 }
 0x109   :  { %3553 = vmatpush3.bf16.msra.mxu0 %v5481_v32  ;;  %v3191_v32 = vpop.f32.mrb[5].mxu1 }
 0x10a   :  { %3581 = vmatpush3.bf16.msra.mxu1 %v5487_v47  ;;  %3554 = vmatprep.subr.bf16.mxu0 %v5493_v57  ;;  %v3165_v47 = vpop.f32.mrb[6].mxu0  ;;  %v3192_v5 = vadd.f32 %v3191_v32, %v3190_v53  ;;  %v3193_v16 = vpop.f32.mrb[6].mxu1  ;;  %v5511_v57 = vld [vmem:[%s6114_s4 + $0x1a8] sm:$0xff]   ;;  %v5517_v53 = vld [vmem:[%s6114_s4 + $0x170] sm:$0xff]  }
 0x10b   :  { %3582 = vmatprep.subr.bf16.mxu1 %v5499_v60  ;;  %v3166_v45 = vpop.f32.mrb[7].mxu0  ;;  %6310 = vst [vmem:[#allocation17_spill] sm:$0xff] %v5511_v57  ;;  %v3194_v62 = vpop.f32.mrb[7].mxu1  ;;  %6311 = vst [vmem:[#allocation34_spill] sm:$0xff] %v5517_v53  ;;  %v5523_v32 = vld [vmem:[%s6114_s4 + $0x1f0] sm:$0xff]  }
 0x10c   :  { %v3167_v44 = vadd.f32 %v3166_v45, %v3165_v47  ;;  %6312 = vst [vmem:[#allocation19_spill] sm:$0xff] %v5523_v32  ;;  %v5526_v60 = vadd.f32 %v3192_v5, %v3164_v40  ;;  %v5533_v45 = vld [vmem:[%s6114_s4 + $0x130] sm:$0xff]   ;;  %v5545_v5 = vld [vmem:[%s6114_s4 + $0x178] sm:$0xff]  }
 0x10d   :  { %3555 = vmatpush3.bf16.msra.mxu0 %v5505_v63  ;;  %v3195_v63 = vadd.f32 %v3194_v62, %v3193_v16  ;;  %6313 = vst [vmem:[#allocation36_spill] sm:$0xff] %v5533_v45  ;;  %v5539_v47 = vld [vmem:[%s6114_s4 + $0x1b0] sm:$0xff]   ;;  %6315 = vst [vmem:[#allocation38_spill] sm:$0xff] %v5545_v5  ;;  %v4075_v16 = vld [vmem:[%s6117_s2 + $0x18] ss:$52 sps:$4 sm:$0xff]  }
 0x10e   :  { %3583 = vmatpush3.bf16.msra.mxu1 %v5511_v57  ;;  %3556 = vmatprep.subr.bf16.mxu0 %v5517_v53  ;;  %6314 = vst [vmem:[#allocation21_spill] sm:$0xff] %v5539_v47  ;;  %v4072_v40 = vld [vmem:[%s6117_s2 + $0x10] ss:$52 sps:$4 sm:$0xff]   ;;  %v5563_v62 = vld [vmem:[%s6114_s4 + $0x138] sm:$0xff]  }
 0x10f   :  { %3584 = vmatprep.subr.bf16.mxu1 %v5523_v32  ;;  %v5528_v57 = vadd.f32 %v3195_v63, %v3167_v44  ;;  %v5551_v63 = vld [vmem:[%s6114_s4 + $0x1f8] sm:$0xff]   ;;  %6317 = vst [vmem:[#allocation25_spill] sm:$0xff] %v5563_v62 }
 0x110   :  { %6316 = vst [vmem:[#allocation23_spill] sm:$0xff] %v5551_v63 }
 0x111   :  { %3557 = vmatpush3.bf16.msra.mxu0 %v5533_v45 }
 0x112   :  { %3585 = vmatpush3.bf16.msra.mxu1 %v5539_v47  ;;  %3558 = vmatprep.subr.bf16.mxu0 %v5545_v5  ;;  %v5575_v5 = vld [vmem:[%s6114_s4 + $0x240] sm:$0xff]  }
 0x113   :  { %3586 = vmatprep.subr.bf16.mxu1 %v5551_v63  ;;  %v5569_v63 = vld [vmem:[%s6114_s4 + $0x1b8] sm:$0xff]   ;;  %6319 = vst [vmem:[#allocation29_spill] sm:$0xff] %v5575_v5 }
 0x114   :  { %6318 = vst [vmem:[#allocation27_spill] sm:$0xff] %v5569_v63 }
 0x115   :  { %3559 = vmatpush3.bf16.msra.mxu0 %v5563_v62  ;;  %v5581_v62 = vld [vmem:[%s6114_s4 + $0x2c0] sm:$0xff]  }
 0x116   :  { %v3212_v44 = vpop.f32.mrb[8].mxu0  ;;  %3587 = vmatpush3.bf16.msra.mxu1 %v5569_v63  ;;  %3600 = vmatprep.subr.bf16.mxu0 %v5575_v5  ;;  %6320 = vst [vmem:[#allocation31_spill] sm:$0xff] %v5581_v62  ;;  %v4081_v5 = vld [vmem:[%s6117_s2 + $0x84] ss:$52 sps:$4 sm:$0xff]  }
 0x117   :  { %v3213_v47 = vpop.f32.mrb[9].mxu0  ;;  %v3240_v32 = vpop.f32.mrb[8].mxu1  ;;  %3628 = vmatprep.subr.bf16.mxu1 %v5581_v62 }
 0x118   :  { %v3214_v45 = vadd.f32 %v3213_v47, %v3212_v44  ;;  %v3215_v53 = vpop.f32.mrb[10].mxu0  ;;  %v3241_v13 = vpop.f32.mrb[9].mxu1  ;;  %2171 = vmatmul.mubr.bf16.vlgmr.msra.gmra.mrb[60].mxu0 %v4072_v40  ;;  %v5594_v47 = vld [vmem:[%s6114_s4 + $0x200] sm:$0xff]   ;;  %v4080_v40 = vld [vmem:[%s6117_s2 + $0x78] ss:$52 sps:$4 sm:$0xff]  }
 0x119   :  { %v3216_v63 = vpop.f32.mrb[11].mxu0  ;;  %v3242_v50 = vadd.f32 %v3241_v13, %v3240_v32  ;;  %v3243_v34 = vpop.f32.mrb[10].mxu1  ;;  %2220 = vmatmul.mubr.bf16.vlgmr.msra.gmra.mrb[60].mxu1 %v4075_v16  ;;  %3601 = vmatpush3.bf16.msra.mxu0 %v5594_v47  ;;  %v5600_v13 = vld [vmem:[%s6114_s4 + $0x280] sm:$0xff]   ;;  %v5629_v44 = vld [vmem:[%s6114_s4 + $0x208] sm:$0xff]  }
 0x11a   :  { %v1127_v56 = vadd.f32 %v3214_v45, %v5336_v58  ;;  %v3217_v38 = vadd.f32 %v3216_v63, %v3215_v53  ;;  %v3244_v62 = vpop.f32.mrb[11].mxu1  ;;  %6321 = vst [vmem:[#allocation33_spill] sm:$0xff] %v5600_v13  ;;  %3629 = vmatpush3.bf16.msra.mxu1 %v5600_v13  ;;  %v5606_v58 = vld [vmem:[%s6114_s4 + $0x248] sm:$0xff]   ;;  %2178 = vmatprep.mubr.bf16.mxu0 %v4078_v43  ;;  %v4083_v16 = vld [vmem:[%s6117_s2 + $0x80] ss:$52 sps:$4 sm:$0xff]   ;;  %v5691_v13 = vld [vmem:[%s6114_s4 + $0x298] sm:$0xff]  }
 0x11b   :  { %v3245_v32 = vadd.f32 %v3244_v62, %v3243_v34  ;;  %3602 = vmatprep.subr.bf16.mxu0 %v5606_v58  ;;  %v5612_v53 = vld [vmem:[%s6114_s4 + $0x2c8] sm:$0xff]   ;;  %2227 = vmatprep.mubr.bf16.mxu1 %v4081_v5  ;;  %v5641_v43 = vld [vmem:[%s6114_s4 + $0x250] sm:$0xff]   ;;  %v4086_v5 = vld [vmem:[%s6117_s2 + $0x24] ss:$52 sps:$4 sm:$0xff]   ;;  %6327 = vst [vmem:[#allocation42_spill] sm:$0xff] %v5691_v13 }
 0x11c   :  { %6322 = vst [vmem:[#allocation35_spill] sm:$0xff] %v5612_v53  ;;  %3630 = vmatprep.subr.bf16.mxu1 %v5612_v53  ;;  %v1130_v45 = vadd.f32 %v3217_v38, %v5362_v7  ;;  %v5616_v63 = vadd.f32 %v3242_v50, %v1127_v56  ;;  %v5635_v38 = vld [vmem:[%s6114_s4 + $0x288] sm:$0xff]   ;;  %v5647_v50 = vld [vmem:[%s6114_s4 + $0x2d0] sm:$0xff]  }
 0x11d   :  { %3603 = vmatpush3.bf16.msra.mxu0 %v5629_v44  ;;  %6323 = vst [vmem:[#allocation37_spill] sm:$0xff] %v5635_v38  ;;  %6324 = vst [vmem:[#allocation39_spill] sm:$0xff] %v5647_v50  ;;  %v4089_v62 = vld [vmem:[%s6117_s2 + $0x2c] ss:$52 sps:$4 sm:$0xff]  }
 0x11e   :  { %v5618_v34 = vadd.f32 %v3245_v32, %v1130_v45  ;;  %3631 = vmatpush3.bf16.msra.mxu1 %v5635_v38  ;;  %3604 = vmatprep.subr.bf16.mxu0 %v5641_v43  ;;  %v3218_v7 = vpop.f32.mrb[12].mxu0  ;;  %v5659_v38 = vld [vmem:[%s6114_s4 + $0x210] sm:$0xff]  }
 0x11f   :  { %3632 = vmatprep.subr.bf16.mxu1 %v5647_v50  ;;  %v3219_v56 = vpop.f32.mrb[13].mxu0  ;;  %v5665_v50 = vld [vmem:[%s6114_s4 + $0x290] sm:$0xff]  }
 0x120   :  { %2179 = vmatmul.mubr.bf16.gmra.mrb[64].mxu0 %v4080_v40  ;;  %v3220_v32 = vadd.f32 %v3219_v56, %v3218_v7  ;;  %v3221_v45 = vpop.f32.mrb[14].mxu0  ;;  %6325 = vst [vmem:[#allocation40_spill] sm:$0xff] %v5665_v50  ;;  %v5678_v7 = vld [vmem:[%s6114_s4 + $0x2d8] sm:$0xff]  }
 0x121   :  { %2228 = vmatmul.mubr.bf16.gmra.mrb[64].mxu1 %v4083_v16  ;;  %3605 = vmatpush3.bf16.msra.mxu0 %v5659_v38  ;;  %v3222_v53 = vpop.f32.mrb[15].mxu0  ;;  %v5672_v16 = vld [vmem:[%s6114_s4 + $0x258] sm:$0xff]   ;;  %6326 = vst [vmem:[#allocation41_spill] sm:$0xff] %v5678_v7 }
 0x122   :  { %3633 = vmatpush3.bf16.msra.mxu1 %v5665_v50  ;;  %v1135_v40 = vadd.f32 %v3220_v32, %v5526_v60  ;;  %3606 = vmatprep.subr.bf16.mxu0 %v5672_v16  ;;  %v3223_v56 = vadd.f32 %v3222_v53, %v3221_v45  ;;  %v3246_v50 = vpop.f32.mrb[12].mxu1  ;;  %v5685_v32 = vld [vmem:[%s6114_s4 + $0x218] sm:$0xff]   ;;  %v5703_v45 = vld [vmem:[%s6114_s4 + $0x2e0] sm:$0xff]  }
 0x123   :  { %3634 = vmatprep.subr.bf16.mxu1 %v5678_v7  ;;  %2268 = vmatprep.mubr.bf16.mxu0 %v4086_v5  ;;  %v3247_v53 = vpop.f32.mrb[13].mxu1 }
 0x124   :  { %2317 = vmatprep.mubr.bf16.mxu1 %v4089_v62  ;;  %v1138_v60 = vadd.f32 %v3223_v56, %v5528_v57  ;;  %v3248_v5 = vadd.f32 %v3247_v53, %v3246_v50  ;;  %v3249_v62 = vpop.f32.mrb[14].mxu1  ;;  %v5697_v57 = vld [vmem:[%s6114_s4 + $0x260] sm:$0xff]  }
 0x125   :  { %3607 = vmatpush3.bf16.msra.mxu0 %v5685_v32  ;;  %6328 = vst [vmem:[#allocation43_spill] sm:$0xff] %v5697_v57  ;;  %v3250_v56 = vpop.f32.mrb[15].mxu1  ;;  %v5711_v50 = vld [vmem:[%s6114_s4 + $0x220] sm:$0xff]  }
 0x126   :  { %3635 = vmatpush3.bf16.msra.mxu1 %v5691_v13  ;;  %3608 = vmatprep.subr.bf16.mxu0 %v5697_v57  ;;  %v5706_v7 = vadd.f32 %v3248_v5, %v1135_v40  ;;  %v3251_v13 = vadd.f32 %v3250_v56, %v3249_v62  ;;  %v5717_v53 = vld [vmem:[%s6114_s4 + $0x2a0] sm:$0xff]   ;;  %v5725_v40 = vld [vmem:[%s6114_s4 + $0x268] sm:$0xff]  }
 0x127   :  { %3636 = vmatprep.subr.bf16.mxu1 %v5703_v45  ;;  %v5731_v5 = vld [vmem:[%s6114_s4 + $0x2e8] sm:$0xff]  }
 0x128   :  { %v5720_v57 = vadd.f32 %v3251_v13, %v1138_v60  ;;  %v5737_v62 = vld [vmem:[%s6114_s4 + $0x228] sm:$0xff]   ;;  %v4084_v60 = vld [vmem:[%s6117_s2 + $0x20] ss:$52 sps:$4 sm:$0xff]  }
 0x129   :  { %3609 = vmatpush3.bf16.msra.mxu0 %v5711_v50  ;;  %v5743_v13 = vld [vmem:[%s6114_s4 + $0x2a8] sm:$0xff]  }
 0x12a   :  { %3637 = vmatpush3.bf16.msra.mxu1 %v5717_v53  ;;  %3610 = vmatprep.subr.bf16.mxu0 %v5725_v40  ;;  %6329 = vst [vmem:[#allocation44_spill] sm:$0xff] %v5743_v13  ;;  %v4087_v56 = vld [vmem:[%s6117_s2 + $0x28] ss:$52 sps:$4 sm:$0xff]  }
 0x12b   :  { %3638 = vmatprep.subr.bf16.mxu1 %v5731_v5 }
 0x12d   :  { %3611 = vmatpush3.bf16.msra.mxu0 %v5737_v62 }
 0x12e   :  { %3639 = vmatpush3.bf16.msra.mxu1 %v5743_v13  ;;  %3612 = vmatprep.subr.bf16.mxu0 %v6271_v46  ;;  %v4090_v46 = vld [vmem:[%s6117_s2 + $0x8c] ss:$52 sps:$4 sm:$0xff]   ;;  %v4096_v13 = vld [vmem:[%s6117_s2 + $0x30] ss:$52 sps:$4 sm:$0xff]  }
 0x12f   :  { %3640 = vmatprep.subr.bf16.mxu1 %v6283_v0 }
 0x131   :  { %3613 = vmatpush3.bf16.msra.mxu0 %v6273_v49  ;;  %v4093_v49 = vld [vmem:[%s6117_s2 + $0x94] ss:$52 sps:$4 sm:$0xff]  }
 0x132   :  { %3641 = vmatpush3.bf16.msra.mxu1 %v6284_v2  ;;  %3614 = vmatprep.subr.bf16.mxu0 %v6275_v51 }
 0x133   :  { %3642 = vmatprep.subr.bf16.mxu1 %v6285_v4 }
 0x135   :  { %3615 = vmatpush3.bf16.msra.mxu0 %v6277_v54 }
 0x136   :  { %3643 = vmatpush3.bf16.msra.mxu1 %v6286_v8  ;;  %3860 = vmatprep.subr.bf16.mxu0 %v4916_v33  ;;  %v3268_v51 = vpop.f32.mrb[16].mxu0 }
 0x137   :  { %3662 = vmatprep.subr.bf16.mxu1 %v5140_v1  ;;  %v3269_v54 = vpop.f32.mrb[17].mxu0  ;;  %v3296_v4 = vpop.f32.mrb[16].mxu1 }
 0x138   :  { %2269 = vmatmul.mubr.bf16.vlgmr.msra.gmra.mrb[68].mxu0 %v4084_v60  ;;  %v3270_v0 = vadd.f32 %v3269_v54, %v3268_v51  ;;  %v3271_v2 = vpop.f32.mrb[18].mxu0  ;;  %v3297_v1 = vpop.f32.mrb[17].mxu1  ;;  %v4092_v60 = vld [vmem:[%s6117_s2 + $0x88] ss:$52 sps:$4 sm:$0xff]  }
 0x139   :  { %2318 = vmatmul.mubr.bf16.vlgmr.msra.gmra.mrb[68].mxu1 %v4087_v56  ;;  %3861 = vmatpush3.bf16.msra.mxu0 %v4916_v33  ;;  %v3272_v8 = vpop.f32.mrb[19].mxu0  ;;  %v4095_v33 = vld [vmem:[%s6117_s2 + $0x90] ss:$52 sps:$4 sm:$0xff]   ;;  %v3298_v56 = vadd.f32 %v3297_v1, %v3296_v4 }
 0x13a   :  { %3663 = vmatpush3.bf16.msra.mxu1 %v5159_v9  ;;  %3862 = vmatprep.subr.bf16.mxu0 %v4921_v35  ;;  %v1225_v9 = vadd.f32 %v3270_v0, %v5616_v63 }
 0x13b   :  { %3664 = vmatprep.subr.bf16.mxu1 %v5171_v11  ;;  %2276 = vmatprep.mubr.bf16.mxu0 %v4090_v46  ;;  %v3273_v11 = vadd.f32 %v3272_v8, %v3271_v2  ;;  %v3299_v46 = vpop.f32.mrb[18].mxu1 }
 0x13c   :  { %2325 = vmatprep.mubr.bf16.mxu1 %v4093_v49  ;;  %v3300_v49 = vpop.f32.mrb[19].mxu1  ;;  %v1274_v63 = vadd.f32 %v3298_v56, %v1225_v9 }
 0x13d   :  { %3863 = vmatpush3.bf16.msra.mxu0 %v4921_v35  ;;  %v1228_v51 = vadd.f32 %v3273_v11, %v5618_v34  ;;  %v3301_v54 = vadd.f32 %v3300_v49, %v3299_v46  ;;  %v4100_v35 = vld [vmem:[%s6118_s3 + $0x4] ss:$52 sps:$4 sm:$0xff]   ;;  %v6336_v49 = vld [vmem:[#allocation12_spill] sm:$0xff] }
 0x13e   :  { %3665 = vmatpush3.bf16.msra.mxu1 %v5186_v14  ;;  %3864 = vmatprep.subr.bf16.mxu0 %v4937_v55  ;;  %v3274_v14 = vpop.f32.mrb[20].mxu0 }
 0x13f   :  { %3666 = vmatprep.subr.bf16.mxu1 %v5201_v17  ;;  %v1277_v17 = vadd.f32 %v3301_v54, %v1228_v51  ;;  %v3275_v0 = vpop.f32.mrb[21].mxu0  ;;  %v3302_v4 = vpop.f32.mrb[20].mxu1  ;;  %v6337_v51 = vld [vmem:[#allocation24_spill] sm:$0xff] }
 0x140   :  { %2277 = vmatmul.mubr.bf16.gmra.mrb[72].mxu0 %v4092_v60  ;;  %v3276_v34 = vadd.f32 %v3275_v0, %v3274_v14  ;;  %v3277_v2 = vpop.f32.mrb[22].mxu0  ;;  %v3303_v1 = vpop.f32.mrb[21].mxu1  ;;  %v6339_v14 = vld [vmem:[#allocation4_spill] sm:$0xff] }
 0x141   :  { %2326 = vmatmul.mubr.bf16.gmra.mrb[72].mxu1 %v4095_v33  ;;  %3865 = vmatpush3.bf16.msra.mxu0 %v4937_v55  ;;  %v3278_v8 = vpop.f32.mrb[23].mxu0  ;;  %v4097_v55 = vld [vmem:[%s6117_s2 + $0x98] ss:$52 sps:$4 sm:$0xff]   ;;  %v3305_v33 = vpop.f32.mrb[22].mxu1  ;;  %v4110_v0 = vld [vmem:[%s6118_s3 + $0x74] ss:$52 sps:$4 sm:$0xff]  }
 0x142   :  { %3667 = vmatpush3.bf16.msra.mxu1 %v5213_v19  ;;  %3866 = vmatprep.subr.bf16.mxu0 %v4954_v61  ;;  %v1233_v19 = vadd.f32 %v3276_v34, %v5706_v7  ;;  %v3279_v60 = vadd.f32 %v3278_v8, %v3277_v2  ;;  %v3306_v9 = vpop.f32.mrb[23].mxu1  ;;  %v4103_v7 = vld [vmem:[%s6118_s3 + $0xc] ss:$52 sps:$4 sm:$0xff]   ;;  %v6340_v2 = vld [vmem:[#allocation28_spill] sm:$0xff] }
 0x143   :  { %3668 = vmatprep.subr.bf16.mxu1 %v5225_v21  ;;  %3868 = vmatprep.mubr.msk.bf16.mxu0 %vm987_vm0, %v4096_v13  ;;  %v3304_v21 = vadd.f32 %v3303_v1, %v3302_v4  ;;  %v3307_v11 = vadd.f32 %v3306_v9, %v3305_v33  ;;  %v6341_v4 = vld [vmem:[#allocation14_spill] sm:$0xff]  ;;  %v6343_v1 = vld [vmem:[#allocation5_spill] sm:$0xff]  ;;  %v6344_v9 = vld [vmem:[#allocation32_spill] sm:$0xff] }
 0x144   :  { %2587 = vmatprep.mubr.bf16.mxu1 %v4100_v35  ;;  %v1236_v13 = vadd.f32 %v3279_v60, %v5720_v57  ;;  %v6338_v35 = vld [vmem:[#allocation26_spill] sm:$0xff] }
 0x145   :  { %3867 = vmatpush3.bf16.msra.mxu0 %v4954_v61  ;;  %v1282_v56 = vadd.f32 %v3304_v21, %v1233_v19  ;;  %v6342_v8 = vld [vmem:[#allocation30_spill] sm:$0xff] }
 0x146   :  { %3669 = vmatpush3.bf16.msra.mxu1 %v5237_v23  ;;  %3690 = vmatprep.subr.bf16.mxu0 %v5146_v3  ;;  %v1285_v61 = vadd.f32 %v3307_v11, %v1236_v13  ;;  %v4112_v60 = vld [vmem:[%s6118_s3 + $0x70] ss:$52 sps:$4 sm:$0xff]  }
 0x147   :  { %3670 = vmatprep.subr.bf16.mxu1 %v5249_v25  ;;  %v3846_v3 = vpop.f32.mrb[24].mxu0  ;;  %v6345_v13 = vld [vmem:[#allocation16_spill] sm:$0xff] }
 0x148   :  { %3869 = vmatmul.mubr.msk.bf16.vlgmr.msra.gmra.mrb[76].mxu0 %vm987_vm0, %v4097_v55  ;;  %v5812_v23 = vadd.f32 %v3846_v3, %v1282_v56  ;;  %v1322_v25 = vpop.f32.mrb[25].mxu0  ;;  %v6346_v56 = vld [vmem:[#allocation34_spill] sm:$0xff] }
 0x149   :  { %3691 = vmatpush3.bf16.msra.mxu0 %v5165_v10  ;;  %2636 = vmatprep.mubr.bf16.mxu0 %v4103_v7  ;;  %v5814_v57 = vadd.f32 %v1322_v25, %v1274_v63  ;;  %v3847_v46 = vpop.f32.mrb[26].mxu0  ;;  %v6347_v7 = vld [vmem:[#allocation18_spill] sm:$0xff]  ;;  %v4118_v25 = vld [vmem:[%s6118_s3 + $0x1c] ss:$52 sps:$4 sm:$0xff]  }
 0x14a   :  { %3671 = vmatpush3.bf16.msra.mxu1 %v5261_v27  ;;  %3692 = vmatprep.subr.bf16.mxu0 %v5177_v12  ;;  %v5818_v27 = vadd.f32 %v3847_v46, %v1285_v61  ;;  %v1325_v10 = vpop.f32.mrb[27].mxu0 }
 0x14b   :  { %3672 = vmatprep.subr.bf16.mxu1 %v5273_v29  ;;  %v5822_v12 = vadd.f32 %v1325_v10, %v1277_v17  ;;  %v6348_v10 = vld [vmem:[#allocation36_spill] sm:$0xff] }
 0x14d   :  { %3693 = vmatpush3.bf16.msra.mxu0 %v5192_v15  ;;  %v4098_v15 = vld [vmem:[%s6118_s3] ss:$52 sps:$4 sm:$0xff]  }
 0x14e   :  { %3673 = vmatpush3.bf16.msra.mxu1 %v5285_v31  ;;  %3694 = vmatprep.subr.bf16.mxu0 %v5207_v18  ;;  %v4104_v18 = vld [vmem:[%s6118_s3 + $0x6c] ss:$52 sps:$4 sm:$0xff]  }
 0x14f   :  { %3674 = vmatprep.subr.bf16.mxu1 %v5297_v37  ;;  %v6331_v31 = vld [vmem:[#allocation6_spill] sm:$0xff] }
 0x151   :  { %3695 = vmatpush3.bf16.msra.mxu0 %v5219_v20 }
 0x152   :  { %3675 = vmatpush3.bf16.msra.mxu1 %v5309_v42  ;;  %3696 = vmatprep.subr.bf16.mxu0 %v5231_v22  ;;  %v4109_v42 = vld [vmem:[%s6118_s3 + $0x14] ss:$52 sps:$4 sm:$0xff]  }
 0x153   :  { %3676 = vmatprep.subr.bf16.mxu1 %v5321_v48  ;;  %v6332_v48 = vld [vmem:[#allocation10_spill] sm:$0xff] }
 0x155   :  { %3697 = vmatpush3.bf16.msra.mxu0 %v5243_v24  ;;  %v4106_v24 = vld [vmem:[%s6118_s3 + $0x68] ss:$52 sps:$4 sm:$0xff]  }
 0x156   :  { %3677 = vmatpush3.bf16.msra.mxu1 %v5341_v59  ;;  %3698 = vmatprep.subr.bf16.mxu0 %v5255_v26  ;;  %v6333_v59 = vld [vmem:[#allocation7_spill] sm:$0xff] }
 0x157   :  { %3718 = vmatprep.subr.bf16.mxu1 %v5353_v6  ;;  %v3330_v20 = vpop.f32.mrb[24].mxu1  ;;  %v6335_v6 = vld [vmem:[#allocation8_spill] sm:$0xff] }
 0x158   :  { %v3331_v22 = vpop.f32.mrb[25].mxu1 }
 0x159   :  { %2588 = vmatmul.mubr.bf16.vlgmr.msra.gmra.mrb[76].mxu1 %v4098_v15  ;;  %3699 = vmatpush3.bf16.msra.mxu0 %v5267_v28  ;;  %v3332_v26 = vadd.f32 %v3331_v22, %v3330_v20  ;;  %v3333_v29 = vpop.f32.mrb[26].mxu1  ;;  %v6330_v28 = vld [vmem:[#allocation2_spill] sm:$0xff]  ;;  %v6349_v15 = vld [vmem:[#allocation20_spill] sm:$0xff] }
 0x15a   :  { %3719 = vmatpush3.bf16.msra.mxu1 %v5373_v39  ;;  %3700 = vmatprep.subr.bf16.mxu0 %v5279_v30  ;;  %v3334_v30 = vpop.f32.mrb[27].mxu1  ;;  %v6351_v20 = vld [vmem:[#allocation22_spill] sm:$0xff] }
 0x15b   :  { %3720 = vmatprep.subr.bf16.mxu1 %v5385_v41  ;;  %2595 = vmatprep.mubr.bf16.mxu1 %v4104_v18  ;;  %v3335_v37 = vadd.f32 %v3334_v30, %v3333_v29  ;;  %v4101_v41 = vld [vmem:[%s6118_s3 + $0x8] ss:$52 sps:$4 sm:$0xff]   ;;  %v6350_v18 = vld [vmem:[#allocation38_spill] sm:$0xff] }
 0x15c   :  { %v6352_v29 = vld [vmem:[#allocation25_spill] sm:$0xff] }
 0x15d   :  { %3701 = vmatpush3.bf16.msra.mxu0 %v5291_v36  ;;  %v6334_v36 = vld [vmem:[#allocation3_spill] sm:$0xff] }
 0x15e   :  { %3721 = vmatpush3.bf16.msra.mxu1 %v5403_v52  ;;  %3702 = vmatprep.subr.bf16.mxu0 %v6330_v28  ;;  %v6353_v28 = vld [vmem:[#allocation9_spill] sm:$0xff] }
 0x15f   :  { %3722 = vmatprep.subr.bf16.mxu1 %v6331_v31  ;;  %v3336_v39 = vpop.f32.mrb[28].mxu1 }
 0x160   :  { %v3337_v52 = vpop.f32.mrb[29].mxu1 }
 0x161   :  { %2596 = vmatmul.mubr.bf16.gmra.mrb[80].mxu1 %v4106_v24  ;;  %3703 = vmatpush3.bf16.msra.mxu0 %v6332_v48  ;;  %v3338_v54 = vadd.f32 %v3337_v52, %v3336_v39  ;;  %v3339_v63 = vpop.f32.mrb[30].mxu1  ;;  %v4107_v24 = vld [vmem:[%s6118_s3 + $0x10] ss:$52 sps:$4 sm:$0xff]   ;;  %v6356_v39 = vld [vmem:[#allocation13_spill] sm:$0xff]  ;;  %v6357_v52 = vld [vmem:[#allocation15_spill] sm:$0xff] }
 0x162   :  { %3723 = vmatpush3.bf16.msra.mxu1 %v6333_v59  ;;  %3704 = vmatprep.subr.bf16.mxu0 %v6334_v36  ;;  %v3340_v17 = vpop.f32.mrb[31].mxu1 }
 0x163   :  { %3724 = vmatprep.subr.bf16.mxu1 %v6335_v6  ;;  %2685 = vmatprep.mubr.bf16.mxu1 %v4109_v42  ;;  %v3341_v34 = vadd.f32 %v3340_v17, %v3339_v63  ;;  %v6355_v42 = vld [vmem:[#allocation29_spill] sm:$0xff] }
 0x164   :  { %v4113_v6 = vld [vmem:[%s6118_s3 + $0x7c] ss:$52 sps:$4 sm:$0xff]  }
 0x165   :  { %3705 = vmatpush3.bf16.msra.mxu0 %v6336_v49 }
 0x166   :  { %3725 = vmatpush3.bf16.msra.mxu1 %v6337_v51  ;;  %3746 = vmatprep.subr.bf16.mxu0 %v6339_v14  ;;  %v6358_v14 = vld [vmem:[#allocation17_spill] sm:$0xff] }
 0x167   :  { %3726 = vmatprep.subr.bf16.mxu1 %v6338_v35  ;;  %v3358_v55 = vpop.f32.mrb[28].mxu0 }
 0x168   :  { %2637 = vmatmul.mubr.bf16.vlgmr.msra.gmra.mrb[80].mxu0 %v4101_v41  ;;  %v3359_v19 = vpop.f32.mrb[29].mxu0 }
 0x169   :  { %3747 = vmatpush3.bf16.msra.mxu0 %v6341_v4  ;;  %2644 = vmatprep.mubr.bf16.mxu0 %v4110_v0  ;;  %v3360_v21 = vadd.f32 %v3359_v19, %v3358_v55  ;;  %v3361_v33 = vpop.f32.mrb[30].mxu0  ;;  %v6360_v4 = vld [vmem:[#allocation21_spill] sm:$0xff] }
 0x16a   :  { %3727 = vmatpush3.bf16.msra.mxu1 %v6340_v2  ;;  %3748 = vmatprep.subr.bf16.mxu0 %v6343_v1  ;;  %v3362_v11 = vpop.f32.mrb[31].mxu0 }
 0x16b   :  { %3728 = vmatprep.subr.bf16.mxu1 %v6342_v8  ;;  %v1605_v61 = vadd.f32 %v3360_v21, %v3332_v26  ;;  %v3363_v3 = vadd.f32 %v3362_v11, %v3361_v33  ;;  %v6361_v8 = vld [vmem:[#allocation23_spill] sm:$0xff] }
 0x16c   :  { %v6363_v33 = vld [vmem:[#allocation43_spill] sm:$0xff] }
 0x16d   :  { %3749 = vmatpush3.bf16.msra.mxu0 %v6345_v13  ;;  %v1608_v46 = vadd.f32 %v3363_v3, %v3335_v37  ;;  %v6354_v37 = vld [vmem:[#allocation11_spill] sm:$0xff]  ;;  %v4119_v13 = vld [vmem:[%s6118_s3 + $0x84] ss:$52 sps:$4 sm:$0xff]   ;;  %v4121_v3 = vld [vmem:[%s6118_s3 + $0x80] ss:$52 sps:$4 sm:$0xff]  }
 0x16e   :  { %3729 = vmatpush3.bf16.msra.mxu1 %v6344_v9  ;;  %3750 = vmatprep.subr.bf16.mxu0 %v6347_v7 }
 0x16f   :  { %3730 = vmatprep.subr.bf16.mxu1 %v6346_v56  ;;  %v3364_v22 = vpop.f32.mrb[32].mxu0  ;;  %v6365_v56 = vld [vmem:[#allocation33_spill] sm:$0xff] }
 0x170   :  { %2645 = vmatmul.mubr.bf16.gmra.mrb[84].mxu0 %v4112_v60  ;;  %v3365_v26 = vpop.f32.mrb[33].mxu0  ;;  %v6362_v60 = vld [vmem:[#allocation27_spill] sm:$0xff] }
 0x171   :  { %3751 = vmatpush3.bf16.msra.mxu0 %v6349_v15  ;;  %2734 = vmatprep.mubr.bf16.mxu0 %v4118_v25  ;;  %v3366_v31 = vadd.f32 %v3365_v26, %v3364_v22  ;;  %v3367_v30 = vpop.f32.mrb[34].mxu0  ;;  %v6368_v15 = vld [vmem:[#allocation39_spill] sm:$0xff]  ;;  %v6369_v26 = vld [vmem:[#allocation40_spill] sm:$0xff] }
 0x172   :  { %3731 = vmatpush3.bf16.msra.mxu1 %v6348_v10  ;;  %3752 = vmatprep.subr.bf16.mxu0 %v6351_v20  ;;  %v3368_v48 = vpop.f32.mrb[35].mxu0  ;;  %v6367_v10 = vld [vmem:[#allocation37_spill] sm:$0xff]  ;;  %v4130_v22 = vld [vmem:[%s6118_s3 + $0x2c] ss:$52 sps:$4 sm:$0xff]  }
 0x173   :  { %3732 = vmatprep.subr.bf16.mxu1 %v6350_v18  ;;  %v1613_v59 = vadd.f32 %v3366_v31, %v3338_v54  ;;  %v3369_v36 = vadd.f32 %v3368_v48, %v3367_v30  ;;  %v4115_v54 = vld [vmem:[%s6118_s3 + $0x78] ss:$52 sps:$4 sm:$0xff]  }
 0x175   :  { %3753 = vmatpush3.bf16.msra.mxu0 %v6353_v28  ;;  %v1616_v41 = vadd.f32 %v3369_v36, %v3341_v34  ;;  %v4124_v34 = vld [vmem:[%s6118_s3 + $0x24] ss:$52 sps:$4 sm:$0xff]  }
 0x176   :  { %3733 = vmatpush3.bf16.msra.mxu1 %v6352_v29  ;;  %3754 = vmatprep.subr.bf16.mxu0 %v6354_v37  ;;  %v4226_v29 = vld [vmem:[%s6114_s4 + $0x278] sm:$0xff]   ;;  %v4122_v37 = vld [vmem:[%s6118_s3 + $0x20] ss:$52 sps:$4 sm:$0xff]  }
 0x177   :  { %3774 = vmatprep.subr.bf16.mxu1 %v6355_v42  ;;  %v3386_v49 = vpop.f32.mrb[32].mxu1  ;;  %v6370_v28 = vld [vmem:[#allocation41_spill] sm:$0xff]  ;;  %v6371_v36 = vld [vmem:[#allocation42_spill] sm:$0xff] }
 0x178   :  { %v3387_v51 = vpop.f32.mrb[33].mxu1 }
 0x179   :  { %2686 = vmatmul.mubr.bf16.vlgmr.msra.gmra.mrb[84].mxu1 %v4107_v24  ;;  %3755 = vmatpush3.bf16.msra.mxu0 %v6356_v39  ;;  %v3388_v63 = vadd.f32 %v3387_v51, %v3386_v49  ;;  %v3389_v35 = vpop.f32.mrb[34].mxu1  ;;  %v4228_v39 = vld [vmem:[%s6114_s4 + $0x300] sm:$0xff]  }
 0x17a   :  { %3775 = vmatpush3.bf16.msra.mxu1 %v5594_v47  ;;  %3756 = vmatprep.subr.bf16.mxu0 %v6357_v52  ;;  %v3390_v17 = vpop.f32.mrb[35].mxu1  ;;  %v6359_v47 = vld [vmem:[#allocation19_spill] sm:$0xff] }
 0x17b   :  { %3776 = vmatprep.subr.bf16.mxu1 %v5606_v58  ;;  %2693 = vmatprep.mubr.bf16.mxu1 %v4113_v6  ;;  %v1654_v0 = vadd.f32 %v3388_v63, %v1605_v61  ;;  %v3391_v58 = vadd.f32 %v3390_v17, %v3389_v35  ;;  %v4127_v35 = vld [vmem:[%s6118_s3 + $0x88] ss:$52 sps:$4 sm:$0xff]  }
 0x17d   :  { %3757 = vmatpush3.bf16.msra.mxu0 %v6358_v14  ;;  %v1657_v2 = vadd.f32 %v3391_v58, %v1608_v46 }
 0x17e   :  { %3777 = vmatpush3.bf16.msra.mxu1 %v5629_v44  ;;  %3758 = vmatprep.subr.bf16.mxu0 %v6359_v47  ;;  %v6372_v47 = vld [vmem:[#allocation44_spill] sm:$0xff] }
 0x17f   :  { %3778 = vmatprep.subr.bf16.mxu1 %v5641_v43  ;;  %v3392_v44 = vpop.f32.mrb[36].mxu1  ;;  %v4116_v43 = vld [vmem:[%s6118_s3 + $0x18] ss:$52 sps:$4 sm:$0xff]  }
 0x180   :  { %v3393_v1 = vpop.f32.mrb[37].mxu1 }
 0x181   :  { %2694 = vmatmul.mubr.bf16.gmra.mrb[88].mxu1 %v4115_v54  ;;  %3759 = vmatpush3.bf16.msra.mxu0 %v6360_v4  ;;  %v3394_v55 = vadd.f32 %v3393_v1, %v3392_v44  ;;  %v3395_v19 = vpop.f32.mrb[38].mxu1  ;;  %v4229_v54 = vld [vmem:[%s6114_s4 + $0x308] sm:$0xff]   ;;  %v4233_v44 = vld [vmem:[%s6114_s4 + $0x2f8] sm:$0xff]  }
 0x182   :  { %3779 = vmatpush3.bf16.msra.mxu1 %v5659_v38  ;;  %3760 = vmatprep.subr.bf16.mxu0 %v6361_v8  ;;  %v3396_v21 = vpop.f32.mrb[39].mxu1  ;;  %v6364_v38 = vld [vmem:[#allocation31_spill] sm:$0xff]  ;;  %v4232_v8 = vld [vmem:[%s6114_s4 + $0x2b0] sm:$0xff]   ;;  %v4234_v1 = vld [vmem:[%s6114_s4 + $0x318] sm:$0xff]  }
 0x183   :  { %3780 = vmatprep.subr.bf16.mxu1 %v5672_v16  ;;  %2783 = vmatprep.mubr.bf16.mxu1 %v4124_v34  ;;  %v1662_v9 = vadd.f32 %v3394_v55, %v1613_v59  ;;  %v3397_v16 = vadd.f32 %v3396_v21, %v3395_v19  ;;  %v4227_v59 = vld [vmem:[%s6114_s4 + $0x238] sm:$0xff]  }
 0x184   :  { %v4128_v19 = vld [vmem:[%s6118_s3 + $0x28] ss:$52 sps:$4 sm:$0xff]  }
 0x185   :  { %3761 = vmatpush3.bf16.msra.mxu0 %v6362_v60  ;;  %v1665_v11 = vadd.f32 %v3397_v16, %v1616_v41  ;;  %v4125_v41 = vld [vmem:[%s6118_s3 + $0x8c] ss:$52 sps:$4 sm:$0xff]  }
 0x186   :  { %3781 = vmatpush3.bf16.msra.mxu1 %v5685_v32  ;;  %3802 = vmatprep.subr.bf16.mxu0 %v6364_v38  ;;  %v6366_v32 = vld [vmem:[#allocation35_spill] sm:$0xff]  ;;  %v4235_v38 = vld [vmem:[%s6114_s4 + $0x2b8] sm:$0xff]  }
 0x187   :  { %3782 = vmatprep.subr.bf16.mxu1 %v6363_v33  ;;  %v3414_v7 = vpop.f32.mrb[36].mxu0  ;;  %v4132_v60 = vld [vmem:[%s6118_s3 + $0x98] ss:$52 sps:$4 sm:$0xff]  }
 0x188   :  { %2735 = vmatmul.mubr.bf16.vlgmr.msra.gmra.mrb[88].mxu0 %v4116_v43  ;;  %v3415_v61 = vpop.f32.mrb[37].mxu0 }
 0x189   :  { %3803 = vmatpush3.bf16.msra.mxu0 %v6365_v56  ;;  %2742 = vmatprep.mubr.bf16.mxu0 %v4119_v13  ;;  %v3416_v25 = vadd.f32 %v3415_v61, %v3414_v7  ;;  %v3417_v46 = vpop.f32.mrb[38].mxu0 }
 0x18a   :  { %3783 = vmatpush3.bf16.msra.mxu1 %v5711_v50  ;;  %3804 = vmatprep.subr.bf16.mxu0 %v6366_v32  ;;  %v3418_v50 = vpop.f32.mrb[39].mxu0 }
 0x18b   :  { %3784 = vmatprep.subr.bf16.mxu1 %v5725_v40  ;;  %v4224_v40 = vld [vmem:[%s6114_s4 + $0x270] sm:$0xff]   ;;  %v1703_v18 = vadd.f32 %v3416_v25, %v1654_v0  ;;  %v3419_v20 = vadd.f32 %v3418_v50, %v3417_v46 }
 0x18c   :  { %v4231_v0 = vld [vmem:[%s6114_s4 + $0x310] sm:$0xff]  }
 0x18d   :  { %3805 = vmatpush3.bf16.msra.mxu0 %v6367_v10  ;;  %v1706_v24 = vadd.f32 %v3419_v20, %v1657_v2  ;;  %v4131_v2 = vld [vmem:[%s6118_s3 + $0x30] ss:$52 sps:$4 sm:$0xff]  }
 0x18e   :  { %3785 = vmatpush3.bf16.msra.mxu1 %v5737_v62  ;;  %3806 = vmatprep.subr.bf16.mxu0 %v6368_v15  ;;  %v4225_v62 = vld [vmem:[%s6114_s4 + $0x230] sm:$0xff]  }
 0x18f   :  { %3786 = vmatprep.subr.bf16.mxu1 %v4224_v40  ;;  %v3420_v31 = vpop.f32.mrb[40].mxu0  ;;  %v4135_v25 = vld [vmem:[%s6118_s3 + $0x90] ss:$52 sps:$4 sm:$0xff]   ;;  %v6007_v40 = vld [vmem:[%s6119_s5] ss:$0 sm:$0xff] }
 0x190   :  { %2743 = vmatmul.mubr.bf16.gmra.mrb[92].mxu0 %v4121_v3  ;;  %v3421_v30 = vpop.f32.mrb[41].mxu0 }
 0x191   :  { %3807 = vmatpush3.bf16.msra.mxu0 %v6369_v26  ;;  %2832 = vmatprep.mubr.bf16.mxu0 %v4130_v22  ;;  %v3422_v42 = vadd.f32 %v3421_v30, %v3420_v31  ;;  %v3423_v48 = vpop.f32.mrb[42].mxu0 }
 0x192   :  { %3787 = vmatpush3.bf16.msra.mxu1 %v4225_v62  ;;  %3808 = vmatprep.subr.bf16.mxu0 %v6370_v28  ;;  %v3424_v6 = vpop.f32.mrb[43].mxu0  ;;  %v1344_v28 = vmul.f32 %v6007_v40, %v5822_v12 }
 0x193   :  { %3788 = vmatprep.subr.bf16.mxu1 %v4226_v29  ;;  %v1711_v52 = vadd.f32 %v3422_v42, %v1662_v9  ;;  %v3425_v49 = vadd.f32 %v3424_v6, %v3423_v48  ;;  %v4133_v9 = vld [vmem:[%s6118_s3 + $0x94] ss:$52 sps:$4 sm:$0xff]   ;;  %v6014_v29 = vld [vmem:[%s6120_s6] ss:$0 sm:$0xff] }
 0x195   :  { %3809 = vmatpush3.bf16.msra.mxu0 %v6371_v36  ;;  %v1714_v51 = vadd.f32 %v3425_v49, %v1665_v11 }
 0x196   :  { %3789 = vmatpush3.bf16.msra.mxu1 %v4227_v59  ;;  %3810 = vmatprep.subr.bf16.mxu0 %v5703_v45 }
 0x197   :  { %3872 = vmatprep.subr.bf16.mxu1 %v4228_v39  ;;  %v3442_v45 = vpop.f32.mrb[40].mxu1 }
 0x198   :  { %v3443_v63 = vpop.f32.mrb[41].mxu1 }
 0x199   :  { %2784 = vmatmul.mubr.bf16.vlgmr.msra.gmra.mrb[92].mxu1 %v4122_v37  ;;  %3811 = vmatpush3.bf16.msra.mxu0 %v5717_v53  ;;  %v3444_v14 = vadd.f32 %v3443_v63, %v3442_v45  ;;  %v3445_v17 = vpop.f32.mrb[42].mxu1  ;;  %v1345_v45 = vmul.f32 %v6007_v40, %v5812_v23 }
 0x19a   :  { %3873 = vmatpush3.bf16.msra.mxu1 %v4228_v39  ;;  %3812 = vmatprep.subr.bf16.mxu0 %v5731_v5  ;;  %v3446_v53 = vpop.f32.mrb[43].mxu1  ;;  %v4230_v5 = vld [vmem:[%s6114_s4 + $0x2f0] sm:$0xff]   ;;  %v6027_v39 = vadd.f32 %v6014_v29, %v1344_v28 }
 0x19b   :  { %2791 = vmatprep.mubr.bf16.mxu1 %v4125_v41  ;;  %3874 = vmatprep.subr.bf16.mxu1 %v4229_v54  ;;  %v1752_v58 = vadd.f32 %v3444_v14, %v1703_v18  ;;  %v3447_v34 = vadd.f32 %v3446_v53, %v3445_v17  ;;  %v1346_v14 = vmul.f32 %v6007_v40, %v5818_v27 }
 0x19c   :  { %v6042_v53 = vadd.f32 %v6014_v29, %v1345_v45 }
 0x19d   :  { %3813 = vmatpush3.bf16.msra.mxu0 %v6372_v47  ;;  %v1755_v4 = vadd.f32 %v3447_v34, %v1706_v24  ;;  %v1343_v24 = vmul.f32 %v6007_v40, %v5814_v57  ;;  %v6049_v23 = vadd.f32 %v6014_v29, %v1346_v14 }
 0x19e   :  { %3875 = vmatpush3.bf16.msra.mxu1 %v4229_v54  ;;  %3814 = vmatprep.subr.bf16.mxu0 %v4230_v5 }
 0x19f   :  { %3876 = vmatprep.subr.bf16.mxu1 %v4231_v0  ;;  %v3448_v43 = vpop.f32.mrb[44].mxu1  ;;  %v6020_v48 = vadd.f32 %v6014_v29, %v1343_v24 }
 0x1a0   :  { %v3449_v55 = vpop.f32.mrb[45].mxu1 }
 0x1a1   :  { %2792 = vmatmul.mubr.bf16.gmra.mrb[96].mxu1 %v4127_v35  ;;  %3815 = vmatpush3.bf16.msra.mxu0 %v4232_v8  ;;  %v3450_v21 = vadd.f32 %v3449_v55, %v3448_v43  ;;  %v3451_v33 = vpop.f32.mrb[46].mxu1 }
 0x1a2   :  { %3877 = vmatpush3.bf16.msra.mxu1 %v4231_v0  ;;  %3816 = vmatprep.subr.bf16.mxu0 %v4233_v44  ;;  %v3452_v16 = vpop.f32.mrb[47].mxu1 }
 0x1a3   :  { %3878 = vmatprep.subr.bf16.mxu1 %v4234_v1  ;;  %3880 = vmatprep.mubr.msk.bf16.mxu1 %vm987_vm0, %v4131_v2  ;;  %v1760_v13 = vadd.f32 %v3450_v21, %v1711_v52  ;;  %v3453_v11 = vadd.f32 %v3452_v16, %v3451_v33 }
 0x1a5   :  { %3817 = vmatpush3.bf16.msra.mxu0 %v4235_v38  ;;  %v1763_v56 = vadd.f32 %v3453_v11, %v1714_v51 }
 0x1a6   :  { %3879 = vmatpush3.bf16.msra.mxu1 %v4234_v1 }
 0x1a7   :  { %v3470_v32 = vpop.f32.mrb[44].mxu0  ;;  %v3858_v7 = vpop.f32.mrb[48].mxu1 }
 0x1a8   :  { %2833 = vmatmul.mubr.bf16.vlgmr.msra.gmra.mrb[96].mxu0 %v4128_v19  ;;  %v3471_v61 = vpop.f32.mrb[45].mxu0  ;;  %v1849_v3 = vpop.f32.mrb[49].mxu1 }
 0x1a9   :  { %3881 = vmatmul.mubr.msk.bf16.vlgmr.msra.gmra.mrb[100].mxu1 %vm987_vm0, %v4132_v60  ;;  %2840 = vmatprep.mubr.bf16.mxu0 %v4133_v9  ;;  %v3472_v46 = vadd.f32 %v3471_v61, %v3470_v32  ;;  %v3473_v10 = vpop.f32.mrb[46].mxu0  ;;  %v3859_v50 = vpop.f32.mrb[50].mxu1 }
 0x1aa   :  { %v3474_v15 = vpop.f32.mrb[47].mxu0  ;;  %v1852_v18 = vpop.f32.mrb[51].mxu1 }
 0x1ab   :  { %v3475_v20 = vadd.f32 %v3474_v15, %v3473_v10  ;;  %v1801_v22 = vadd.f32 %v3472_v46, %v1752_v58 }
 0x1ad   :  { %v1850_v62 = vadd.f32 %v1849_v3, %v1801_v22  ;;  %v1804_v26 = vadd.f32 %v3475_v20, %v1755_v4 }
 0x1af   :  { %v1864_v31 = vmul.f32 %v6007_v40, %v1850_v62  ;;  %v1853_v30 = vadd.f32 %v1852_v18, %v1804_v26  ;;  %v3476_v37 = vpop.f32.mrb[48].mxu0 }
 0x1b0   :  { %2841 = vmatmul.mubr.bf16.gmra.mrb[100].mxu0 %v4135_v25  ;;  %v3477_v42 = vpop.f32.mrb[49].mxu0 }
 0x1b1   :  { %v6023_v57 = vadd.f32 %v6014_v29, %v1864_v31  ;;  %v1865_v59 = vmul.f32 %v6007_v40, %v1853_v30  ;;  %v3478_v36 = vadd.f32 %v3477_v42, %v3476_v37  ;;  %v3479_v6 = vpop.f32.mrb[50].mxu0 }
 0x1b2   :  { %v3480_v41 = vpop.f32.mrb[51].mxu0 }
 0x1b3   :  { %v1872_v12 = vmax.f32 %v6020_v48, %v6023_v57  ;;  %v6032_v52 = vadd.f32 %v6014_v29, %v1865_v59  ;;  %v1809_v49 = vadd.f32 %v3478_v36, %v1760_v13  ;;  %v3481_v51 = vadd.f32 %v3480_v41, %v3479_v6 }
 0x1b5   :  { %v1873_v54 = vmax.f32 %v6027_v39, %v6032_v52  ;;  %v1858_v63 = vadd.f32 %v3858_v7, %v1809_v49  ;;  %v1812_v35 = vadd.f32 %v3481_v51, %v1763_v56 }
 0x1b7   :  { %v1866_v17 = vmul.f32 %v6007_v40, %v1858_v63  ;;  %v1861_v47 = vadd.f32 %v3859_v50, %v1812_v35 }
 0x1b9   :  { %v6045_v5 = vadd.f32 %v6014_v29, %v1866_v17  ;;  %v1867_v0 = vmul.f32 %v6007_v40, %v1861_v47 }
 0x1bb   :  { %v1874_v58 = vmax.f32 %v6042_v53, %v6045_v5  ;;  %v6054_v34 = vadd.f32 %v6014_v29, %v1867_v0 }
 0x1bd   :  { %v1875_v27 = vmax.f32 %v6049_v23, %v6054_v34 }
 0x1c7   :  { %v3504_v2 = vpop.f32.mrb[52].mxu0  ;;  %v3532_v4 = vpop.f32.mrb[52].mxu1 }
 0x1c8   :  { %v3505_v8 = vpop.f32.mrb[53].mxu0  ;;  %v3533_v44 = vpop.f32.mrb[53].mxu1 }
 0x1c9   :  { %v3506_v1 = vadd.f32 %v3505_v8, %v3504_v2  ;;  %v3534_v43 = vadd.f32 %v3533_v44, %v3532_v4  ;;  %v3507_v55 = vpop.f32.mrb[54].mxu0  ;;  %v3535_v19 = vpop.f32.mrb[54].mxu1 }
 0x1ca   :  { %v3508_v60 = vpop.f32.mrb[55].mxu0  ;;  %v3536_v21 = vpop.f32.mrb[55].mxu1 }
 0x1cb   :  { %v2124_v33 = vadd.f32 %v3534_v43, %v3506_v1  ;;  %v3509_v38 = vadd.f32 %v3508_v60, %v3507_v55  ;;  %v3537_v9 = vadd.f32 %v3536_v21, %v3535_v19 }
 0x1cd   :  { %v2127_v16 = vadd.f32 %v3537_v9, %v3509_v38 }
 0x1cf   :  { %v3510_v13 = vpop.f32.mrb[56].mxu0 }
 0x1d0   :  { %v3538_v11 = vpop.f32.mrb[56].mxu1  ;;  %v3511_v56 = vpop.f32.mrb[57].mxu0 }
 0x1d1   :  { %v3539_v32 = vpop.f32.mrb[57].mxu1  ;;  %v3512_v7 = vadd.f32 %v3511_v56, %v3510_v13  ;;  %v3513_v3 = vpop.f32.mrb[58].mxu0 }
 0x1d2   :  { %v3540_v61 = vadd.f32 %v3539_v32, %v3538_v11  ;;  %v3541_v25 = vpop.f32.mrb[58].mxu1  ;;  %v3514_v46 = vpop.f32.mrb[59].mxu0 }
 0x1d3   :  { %v3542_v10 = vpop.f32.mrb[59].mxu1  ;;  %v3515_v15 = vadd.f32 %v3514_v46, %v3513_v3 }
 0x1d4   :  { %v2132_v50 = vadd.f32 %v3540_v61, %v3512_v7  ;;  %v3543_v18 = vadd.f32 %v3542_v10, %v3541_v25 }
 0x1d6   :  { %v2135_v20 = vadd.f32 %v3543_v18, %v3515_v15 }
 0x1eb   :  { %v3560_v22 = vpop.f32.mrb[60].mxu0 }
 0x1ec   :  { %v3588_v24 = vpop.f32.mrb[60].mxu1  ;;  %v3561_v62 = vpop.f32.mrb[61].mxu0 }
 0x1ed   :  { %v3589_v26 = vpop.f32.mrb[61].mxu1  ;;  %v3562_v28 = vadd.f32 %v3561_v62, %v3560_v22  ;;  %v3563_v31 = vpop.f32.mrb[62].mxu0 }
 0x1ee   :  { %v3590_v30 = vadd.f32 %v3589_v26, %v3588_v24  ;;  %v3591_v37 = vpop.f32.mrb[62].mxu1  ;;  %v3564_v42 = vpop.f32.mrb[63].mxu0 }
 0x1ef   :  { %v3592_v59 = vpop.f32.mrb[63].mxu1  ;;  %v2173_v36 = vadd.f32 %v3562_v28, %v2124_v33  ;;  %v3565_v6 = vadd.f32 %v3564_v42, %v3563_v31 }
 0x1f0   :  { %v3593_v41 = vadd.f32 %v3592_v59, %v3591_v37 }
 0x1f1   :  { %v2176_v49 = vadd.f32 %v3565_v6, %v2127_v16  ;;  %v2222_v51 = vadd.f32 %v3590_v30, %v2173_v36 }
 0x1f3   :  { %v2225_v45 = vadd.f32 %v3593_v41, %v2176_v49  ;;  %v3566_v63 = vpop.f32.mrb[64].mxu0 }
 0x1f4   :  { %v3594_v35 = vpop.f32.mrb[64].mxu1  ;;  %v3567_v14 = vpop.f32.mrb[65].mxu0 }
 0x1f5   :  { %v3595_v17 = vpop.f32.mrb[65].mxu1  ;;  %v3568_v47 = vadd.f32 %v3567_v14, %v3566_v63  ;;  %v3569_v0 = vpop.f32.mrb[66].mxu0 }
 0x1f6   :  { %v3596_v2 = vadd.f32 %v3595_v17, %v3594_v35  ;;  %v3597_v4 = vpop.f32.mrb[66].mxu1  ;;  %v3570_v8 = vpop.f32.mrb[67].mxu0 }
 0x1f7   :  { %v3598_v44 = vpop.f32.mrb[67].mxu1  ;;  %v2181_v1 = vadd.f32 %v3568_v47, %v2132_v50  ;;  %v3571_v43 = vadd.f32 %v3570_v8, %v3569_v0 }
 0x1f8   :  { %v3599_v55 = vadd.f32 %v3598_v44, %v3597_v4 }
 0x1f9   :  { %v2184_v19 = vadd.f32 %v3571_v43, %v2135_v20  ;;  %v2230_v60 = vadd.f32 %v3596_v2, %v2181_v1 }
 0x1fb   :  { %v2233_v21 = vadd.f32 %v3599_v55, %v2184_v19 }
 0x20b   :  { %v3616_v33 = vpop.f32.mrb[68].mxu0 }
 0x20c   :  { %v3644_v38 = vpop.f32.mrb[68].mxu1  ;;  %v3617_v9 = vpop.f32.mrb[69].mxu0 }
 0x20d   :  { %v3645_v16 = vpop.f32.mrb[69].mxu1  ;;  %v3618_v13 = vadd.f32 %v3617_v9, %v3616_v33  ;;  %v3619_v11 = vpop.f32.mrb[70].mxu0 }
 0x20e   :  { %v3646_v56 = vadd.f32 %v3645_v16, %v3644_v38  ;;  %v3647_v32 = vpop.f32.mrb[70].mxu1  ;;  %v3620_v7 = vpop.f32.mrb[71].mxu0 }
 0x20f   :  { %v3648_v61 = vpop.f32.mrb[71].mxu1  ;;  %v2271_v3 = vadd.f32 %v3618_v13, %v2222_v51  ;;  %v3621_v25 = vadd.f32 %v3620_v7, %v3619_v11 }
 0x210   :  { %v3649_v46 = vadd.f32 %v3648_v61, %v3647_v32 }
 0x211   :  { %v2274_v10 = vadd.f32 %v3621_v25, %v2225_v45  ;;  %v2320_v50 = vadd.f32 %v3646_v56, %v2271_v3 }
 0x213   :  { %v3622_v15 = vpop.f32.mrb[72].mxu0  ;;  %v2323_v20 = vadd.f32 %v3649_v46, %v2274_v10 }
 0x214   :  { %v3650_v18 = vpop.f32.mrb[72].mxu1  ;;  %v3623_v22 = vpop.f32.mrb[73].mxu0 }
 0x215   :  { %v3651_v24 = vpop.f32.mrb[73].mxu1  ;;  %v3624_v62 = vadd.f32 %v3623_v22, %v3622_v15  ;;  %v3625_v26 = vpop.f32.mrb[74].mxu0 }
 0x216   :  { %v3652_v28 = vadd.f32 %v3651_v24, %v3650_v18  ;;  %v3653_v31 = vpop.f32.mrb[74].mxu1  ;;  %v3626_v30 = vpop.f32.mrb[75].mxu0 }
 0x217   :  { %v3654_v37 = vpop.f32.mrb[75].mxu1  ;;  %v2279_v42 = vadd.f32 %v3624_v62, %v2230_v60  ;;  %v3627_v59 = vadd.f32 %v3626_v30, %v3625_v26 }
 0x218   :  { %v3655_v36 = vadd.f32 %v3654_v37, %v3653_v31 }
 0x219   :  { %v2282_v6 = vadd.f32 %v3627_v59, %v2233_v21  ;;  %v2328_v41 = vadd.f32 %v3652_v28, %v2279_v42 }
 0x21b   :  { %v3870_v49 = vpop.f32.mrb[76].mxu0  ;;  %v2331_v51 = vadd.f32 %v3655_v36, %v2282_v6 }
 0x21c   :  { %v6058_v45 = vadd.f32 %v3870_v49, %v2328_v41  ;;  %v2368_v63 = vpop.f32.mrb[77].mxu0 }
 0x21d   :  { %v6060_v35 = vadd.f32 %v2368_v63, %v2320_v50  ;;  %v3871_v14 = vpop.f32.mrb[78].mxu0 }
 0x21e   :  { %v6062_v17 = vadd.f32 %v3871_v14, %v2331_v51  ;;  %v2371_v47 = vpop.f32.mrb[79].mxu0 }
 0x21f   :  { %v6064_v0 = vadd.f32 %v2371_v47, %v2323_v20 }
 0x22c   :  { %v3678_v2 = vpop.f32.mrb[76].mxu1 }
 0x22d   :  { %v3679_v4 = vpop.f32.mrb[77].mxu1 }
 0x22e   :  { %v3680_v8 = vadd.f32 %v3679_v4, %v3678_v2  ;;  %v3681_v44 = vpop.f32.mrb[78].mxu1 }
 0x22f   :  { %v3682_v1 = vpop.f32.mrb[79].mxu1 }
 0x230   :  { %v3683_v43 = vadd.f32 %v3682_v1, %v3681_v44 }
 0x234   :  { %v3684_v55 = vpop.f32.mrb[80].mxu1 }
 0x235   :  { %v3685_v19 = vpop.f32.mrb[81].mxu1 }
 0x236   :  { %v3686_v60 = vadd.f32 %v3685_v19, %v3684_v55  ;;  %v3687_v21 = vpop.f32.mrb[82].mxu1 }
 0x237   :  { %v3688_v33 = vpop.f32.mrb[83].mxu1 }
 0x238   :  { %v3689_v38 = vadd.f32 %v3688_v33, %v3687_v21 }
 0x23b   :  { %v3706_v9 = vpop.f32.mrb[80].mxu0 }
 0x23c   :  { %v3707_v16 = vpop.f32.mrb[81].mxu0 }
 0x23d   :  { %v3708_v13 = vadd.f32 %v3707_v16, %v3706_v9  ;;  %v3709_v11 = vpop.f32.mrb[82].mxu0 }
 0x23e   :  { %v3710_v56 = vpop.f32.mrb[83].mxu0 }
 0x23f   :  { %v2639_v32 = vadd.f32 %v3708_v13, %v3680_v8  ;;  %v3711_v7 = vadd.f32 %v3710_v56, %v3709_v11 }
 0x241   :  { %v2642_v61 = vadd.f32 %v3711_v7, %v3683_v43 }
 0x243   :  { %v3712_v3 = vpop.f32.mrb[84].mxu0 }
 0x244   :  { %v3713_v25 = vpop.f32.mrb[85].mxu0 }
 0x245   :  { %v3714_v46 = vadd.f32 %v3713_v25, %v3712_v3  ;;  %v3715_v10 = vpop.f32.mrb[86].mxu0 }
 0x246   :  { %v3716_v50 = vpop.f32.mrb[87].mxu0 }
 0x247   :  { %v2647_v15 = vadd.f32 %v3714_v46, %v3686_v60  ;;  %v3717_v18 = vadd.f32 %v3716_v50, %v3715_v10 }
 0x249   :  { %v2650_v20 = vadd.f32 %v3717_v18, %v3689_v38 }
 0x24c   :  { %v3734_v22 = vpop.f32.mrb[84].mxu1 }
 0x24d   :  { %v3735_v24 = vpop.f32.mrb[85].mxu1 }
 0x24e   :  { %v3736_v62 = vadd.f32 %v3735_v24, %v3734_v22  ;;  %v3737_v26 = vpop.f32.mrb[86].mxu1 }
 0x24f   :  { %v3738_v28 = vpop.f32.mrb[87].mxu1 }
 0x250   :  { %v2688_v31 = vadd.f32 %v3736_v62, %v2639_v32  ;;  %v3739_v30 = vadd.f32 %v3738_v28, %v3737_v26 }
 0x252   :  { %v2691_v37 = vadd.f32 %v3739_v30, %v2642_v61 }
 0x254   :  { %v3740_v42 = vpop.f32.mrb[88].mxu1 }
 0x255   :  { %v3741_v59 = vpop.f32.mrb[89].mxu1 }
 0x256   :  { %v3742_v36 = vadd.f32 %v3741_v59, %v3740_v42  ;;  %v3743_v6 = vpop.f32.mrb[90].mxu1 }
 0x257   :  { %v3744_v41 = vpop.f32.mrb[91].mxu1 }
 0x258   :  { %v2696_v49 = vadd.f32 %v3742_v36, %v2647_v15  ;;  %v3745_v51 = vadd.f32 %v3744_v41, %v3743_v6 }
 0x25a   :  { %v2699_v63 = vadd.f32 %v3745_v51, %v2650_v20 }
 0x25b   :  { %v3762_v14 = vpop.f32.mrb[88].mxu0 }
 0x25c   :  { %v3763_v47 = vpop.f32.mrb[89].mxu0 }
 0x25d   :  { %v3764_v2 = vadd.f32 %v3763_v47, %v3762_v14  ;;  %v3765_v4 = vpop.f32.mrb[90].mxu0  ;;  %v2384_v14 = vmul.f32 %v6007_v40, %v6064_v0 }
 0x25e   :  { %v3766_v8 = vpop.f32.mrb[91].mxu0 }
 0x25f   :  { %v2737_v44 = vadd.f32 %v3764_v2, %v2688_v31  ;;  %v3767_v1 = vadd.f32 %v3766_v8, %v3765_v4 }
 0x261   :  { %v2740_v43 = vadd.f32 %v3767_v1, %v2691_v37 }
 0x263   :  { %v3768_v55 = vpop.f32.mrb[92].mxu0 }
 0x264   :  { %v3769_v19 = vpop.f32.mrb[93].mxu0 }
 0x265   :  { %v3770_v60 = vadd.f32 %v3769_v19, %v3768_v55  ;;  %v3771_v21 = vpop.f32.mrb[94].mxu0 }
 0x266   :  { %v3772_v33 = vpop.f32.mrb[95].mxu0 }
 0x267   :  { %v2745_v38 = vadd.f32 %v3770_v60, %v2696_v49  ;;  %v3773_v9 = vadd.f32 %v3772_v33, %v3771_v21  ;;  %v2383_v49 = vmul.f32 %v6007_v40, %v6060_v35  ;;  %v2388_v35 = vadd.f32 %v6014_v29, %v2384_v14 }
 0x269   :  { %v2748_v16 = vadd.f32 %v3773_v9, %v2699_v63  ;;  %v2385_v9 = vmul.f32 %v6007_v40, %v6058_v45 }
 0x26b   :  { %v2389_v45 = vadd.f32 %v6014_v29, %v2385_v9 }
 0x26c   :  { %v3790_v13 = vpop.f32.mrb[92].mxu1 }
 0x26d   :  { %v3791_v11 = vpop.f32.mrb[93].mxu1 }
 0x26e   :  { %v3792_v56 = vadd.f32 %v3791_v11, %v3790_v13  ;;  %v3793_v32 = vpop.f32.mrb[94].mxu1 }
 0x26f   :  { %v3794_v7 = vpop.f32.mrb[95].mxu1 }
 0x270   :  { %v2786_v61 = vadd.f32 %v3792_v56, %v2737_v44  ;;  %v3795_v3 = vadd.f32 %v3794_v7, %v3793_v32  ;;  %v2387_v44 = vadd.f32 %v6014_v29, %v2383_v49  ;;  %v2386_v32 = vmul.f32 %v6007_v40, %v6062_v17 }
 0x272   :  { %v2789_v25 = vadd.f32 %v3795_v3, %v2740_v43  ;;  %v2390_v17 = vadd.f32 %v6014_v29, %v2386_v32 }
 0x274   :  { %v3796_v46 = vpop.f32.mrb[96].mxu1 }
 0x275   :  { %v3797_v10 = vpop.f32.mrb[97].mxu1 }
 0x276   :  { %v3798_v50 = vadd.f32 %v3797_v10, %v3796_v46  ;;  %v3799_v15 = vpop.f32.mrb[98].mxu1 }
 0x277   :  { %v3800_v18 = vpop.f32.mrb[99].mxu1 }
 0x278   :  { %v2794_v20 = vadd.f32 %v3798_v50, %v2745_v38  ;;  %v3801_v22 = vadd.f32 %v3800_v18, %v3799_v15 }
 0x27a   :  { %v2797_v24 = vadd.f32 %v3801_v22, %v2748_v16 }
 0x27b   :  { %v3818_v62 = vpop.f32.mrb[96].mxu0 }
 0x27c   :  { %v3882_v26 = vpop.f32.mrb[100].mxu1  ;;  %v3819_v28 = vpop.f32.mrb[97].mxu0 }
 0x27d   :  { %v2883_v31 = vpop.f32.mrb[101].mxu1  ;;  %v3820_v30 = vadd.f32 %v3819_v28, %v3818_v62  ;;  %v3821_v37 = vpop.f32.mrb[98].mxu0 }
 0x27e   :  { %v3883_v42 = vpop.f32.mrb[102].mxu1  ;;  %v3822_v59 = vpop.f32.mrb[99].mxu0 }
 0x27f   :  { %v2886_v36 = vpop.f32.mrb[103].mxu1  ;;  %v3823_v6 = vadd.f32 %v3822_v59, %v3821_v37  ;;  %v2835_v41 = vadd.f32 %v3820_v30, %v2786_v61 }
 0x281   :  { %v2884_v51 = vadd.f32 %v2883_v31, %v2835_v41  ;;  %v2838_v63 = vadd.f32 %v3823_v6, %v2789_v25 }
 0x283   :  { %v2898_v47 = vmul.f32 %v6007_v40, %v2884_v51  ;;  %v2887_v2 = vadd.f32 %v2886_v36, %v2838_v63  ;;  %v3824_v4 = vpop.f32.mrb[100].mxu0 }
 0x284   :  { %v3825_v8 = vpop.f32.mrb[101].mxu0 }
 0x285   :  { %v2902_v1 = vadd.f32 %v6014_v29, %v2898_v47  ;;  %v2899_v43 = vmul.f32 %v6007_v40, %v2887_v2  ;;  %v3826_v55 = vadd.f32 %v3825_v8, %v3824_v4  ;;  %v3827_v19 = vpop.f32.mrb[102].mxu0 }
 0x286   :  { %v3828_v60 = vpop.f32.mrb[103].mxu0 }
 0x287   :  { %v2906_v21 = vmax.f32 %v2387_v44, %v2902_v1  ;;  %v2903_v33 = vadd.f32 %v6014_v29, %v2899_v43  ;;  %v2843_v0 = vadd.f32 %v3826_v55, %v2794_v20  ;;  %v3829_v38 = vadd.f32 %v3828_v60, %v3827_v19 }
 0x289   :  { %v2910_v16 = vmax.f32 %v1872_v12, %v2906_v21  ;;  %v2907_v13 = vmax.f32 %v2388_v35, %v2903_v33  ;;  %v2892_v11 = vadd.f32 %v3882_v26, %v2843_v0  ;;  %v2846_v56 = vadd.f32 %v3829_v38, %v2797_v24 }
 0x28b   :  { %v2914_v7 = vmax.f32 %v2910_v16, 0.0  ;;  %v2911_v61 = vmax.f32 %v1873_v54, %v2907_v13  ;;  %v2900_v3 = vmul.f32 %v6007_v40, %v2892_v11  ;;  %v2895_v25 = vadd.f32 %v3883_v42, %v2846_v56 }
 0x28d   :  { %2918 = vst.msk [vmem:[%s6121_s7] sm:$0xff] %vm987_vm0, %v2914_v7  ;;  %v2915_v48 = vmax.f32 %v2911_v61, 0.0  ;;  %v2904_v57 = vadd.f32 %v6014_v29, %v2900_v3  ;;  %v2901_v12 = vmul.f32 %v6007_v40, %v2895_v25 }
 0x28f   :  { %2919 = vst.msk [vmem:[%s6121_s7 + $0x8] sm:$0xff] %vm987_vm0, %v2915_v48  ;;  %v2908_v39 = vmax.f32 %v2389_v45, %v2904_v57  ;;  %v2905_v52 = vadd.f32 %v6014_v29, %v2901_v12 }
 0x291   :  { %v2912_v54 = vmax.f32 %v1874_v58, %v2908_v39  ;;  %v2909_v46 = vmax.f32 %v2390_v17, %v2905_v52 }
 0x293   :  { %v2916_v10 = vmax.f32 %v2912_v54, 0.0  ;;  %v2913_v40 = vmax.f32 %v1875_v27, %v2909_v46 }
 0x295   :  { %2920 = vst.msk [vmem:[%s6121_s7 + $0x10] sm:$0xff] %vm987_vm0, %v2916_v10  ;;  %v2917_v50 = vmax.f32 %v2913_v40, 0.0 }
 0x297   :  { %2921 = vst.msk [vmem:[%s6121_s7 + $0x18] sm:$0xff] %vm987_vm0, %v2917_v50 }

// kernel: convnet_forward.7
= control target key start
LH: loop header
LB: loop body
LE: loop exit
PB: predicated region body
PF: predicated region fallthrough
CT: control target
= control target key end

     0   :  { %v537_v32 = vlaneseq  ;;  %v5348_v33 = vmov 1966171168   ;;  %s7249_s0 = inlined_call_operand.vmem [shape: bf16[2,1024], index: 0, kind: input, shape index: {}]   ;;  %s7250_s1 = inlined_call_operand.vmem [shape: bf16[1024,1000], index: 1, kind: input, shape index: {}]   ;;  %s7251_s2 = inlined_call_operand.vmem [shape: f32[1,1000], index: 2, kind: input, shape index: {}]   ;;  %s7252_s3 = inlined_call_operand.vmem [shape: bf16[1000,4], index: 3, kind: input, shape index: {}]   ;;  %s7253_s4 = inlined_call_operand.vmem [shape: f32[1,4], index: 4, kind: input, shape index: {}]   ;;  %s7254_s5 = inlined_call_operand.hbm [shape: f32[2,4], index: 5, kind: output, shape index: {}]  }
   0x1   :  { %v23_v0 = vld [vmem:[%s7250_s1] sm:$0xff]  ;;  %v24_v2 = vld [vmem:[%s7250_s1 + $0x8] sm:$0xff]  ;;  %v580_v34 = vunpack.c.l.s4 %v5348_v33 }
   0x2   :  { %v27_v1 = vld [vmem:[%s7250_s1 + $0x20] sm:$0xff]  ;;  %v28_v4 = vld [vmem:[%s7250_s1 + $0x28] sm:$0xff]  ;;  %v5447_v43 = vshrl.u32 %v537_v32, 7 }
   0x3   :  { %v4559_v3 = vcombine.high %v23_v0, %v27_v1  ;;  %v4558_v5 = vcombine.low %v23_v0, %v27_v1  ;;  %v31_v6 = vld [vmem:[%s7250_s1 + $0x40] sm:$0xff]  ;;  %v4561_v8 = vcombine.high %v24_v2, %v28_v4  ;;  %v4560_v9 = vcombine.low %v24_v2, %v28_v4  ;;  %v32_v11 = vld [vmem:[%s7250_s1 + $0x48] sm:$0xff] }
   0x4   :  { %v35_v7 = vld [vmem:[%s7250_s1 + $0x60] sm:$0xff]  ;;  %v36_v12 = vld [vmem:[%s7250_s1 + $0x68] sm:$0xff]  ;;  %v581_v44 = vunpack.c.0.s8 %v580_v34 }
   0x5   :  { %v4567_v10 = vcombine.high %v31_v6, %v35_v7  ;;  %v39_v13 = vld [vmem:[%s7250_s1 + $0x80] sm:$0xff]  ;;  %3195 = vmatprep.subr.bf16.mxu0 %v4559_v3  ;;  %v4569_v14 = vcombine.high %v32_v11, %v36_v12  ;;  %v40_v16 = vld [vmem:[%s7250_s1 + $0x88] sm:$0xff]  ;;  %3359 = vmatprep.subr.bf16.mxu1 %v4561_v8  ;;  %v4566_v18 = vcombine.low %v31_v6, %v35_v7 }
   0x6   :  { %v43_v15 = vld [vmem:[%s7250_s1 + $0xa0] sm:$0xff]  ;;  %v44_v17 = vld [vmem:[%s7250_s1 + $0xa8] sm:$0xff]  ;;  %3196 = vmatpush1.bf16.msra.mxu0 %v4558_v5  ;;  %3360 = vmatpush1.bf16.msra.mxu1 %v4560_v9  ;;  %v4568_v19 = vcombine.low %v32_v11, %v36_v12  ;;  %v5462_v53 = vsub.s32 %v581_v44, %v5447_v43 }
   0x7   :  { %3197 = vmatprep.subr.bf16.mxu0 %v4567_v10  ;;  %v4575_v20 = vcombine.high %v39_v13, %v43_v15  ;;  %3361 = vmatprep.subr.bf16.mxu1 %v4569_v14  ;;  %v4577_v21 = vcombine.high %v40_v16, %v44_v17  ;;  %v47_v22 = vld [vmem:[%s7250_s1 + $0xc0] sm:$0xff]  ;;  %v48_v24 = vld [vmem:[%s7250_s1 + $0xc8] sm:$0xff]  ;;  %v4574_v26 = vcombine.low %v39_v13, %v43_v15 }
   0x8   :  { %v51_v23 = vld [vmem:[%s7250_s1 + $0xe0] sm:$0xff]  ;;  %v52_v25 = vld [vmem:[%s7250_s1 + $0xe8] sm:$0xff]  ;;  %v4576_v27 = vcombine.low %v40_v16, %v44_v17 }
   0x9   :  { %v4583_v28 = vcombine.high %v47_v22, %v51_v23  ;;  %v4585_v29 = vcombine.high %v48_v24, %v52_v25  ;;  %v55_v30 = vld [vmem:[%s7250_s1 + $0x100] sm:$0xff]  ;;  %v56_v35 = vld [vmem:[%s7250_s1 + $0x108] sm:$0xff]  ;;  %v4582_v37 = vcombine.low %v47_v22, %v51_v23  ;;  %v4584_v38 = vcombine.low %v48_v24, %v52_v25 }
   0xa   :  { %3198 = vmatpush1.bf16.msra.mxu0 %v4566_v18  ;;  %3362 = vmatpush1.bf16.msra.mxu1 %v4568_v19  ;;  %v59_v31 = vld [vmem:[%s7250_s1 + $0x120] sm:$0xff]  ;;  %v60_v36 = vld [vmem:[%s7250_s1 + $0x128] sm:$0xff] }
   0xb   :  { %3199 = vmatprep.subr.bf16.mxu0 %v4575_v20  ;;  %3363 = vmatprep.subr.bf16.mxu1 %v4577_v21  ;;  %v4591_v39 = vcombine.high %v55_v30, %v59_v31  ;;  %v4593_v40 = vcombine.high %v56_v35, %v60_v36  ;;  %v63_v41 = vld [vmem:[%s7250_s1 + $0x140] sm:$0xff]  ;;  %v64_v45 = vld [vmem:[%s7250_s1 + $0x148] sm:$0xff]  ;;  %v4590_v47 = vcombine.low %v55_v30, %v59_v31 }
   0xc   :  { %v67_v42 = vld [vmem:[%s7250_s1 + $0x160] sm:$0xff]  ;;  %v68_v46 = vld [vmem:[%s7250_s1 + $0x168] sm:$0xff]  ;;  %v4592_v48 = vcombine.low %v56_v35, %v60_v36 }
   0xd   :  { %v4599_v49 = vcombine.high %v63_v41, %v67_v42  ;;  %v4601_v50 = vcombine.high %v64_v45, %v68_v46  ;;  %v71_v51 = vld [vmem:[%s7250_s1 + $0x180] sm:$0xff]  ;;  %v72_v54 = vld [vmem:[%s7250_s1 + $0x188] sm:$0xff]  ;;  %v4598_v56 = vcombine.low %v63_v41, %v67_v42  ;;  %v4600_v57 = vcombine.low %v64_v45, %v68_v46 }
   0xe   :  { %3200 = vmatpush1.bf16.msra.mxu0 %v4574_v26  ;;  %3364 = vmatpush1.bf16.msra.mxu1 %v4576_v27  ;;  %v75_v52 = vld [vmem:[%s7250_s1 + $0x1a0] sm:$0xff]  ;;  %v76_v55 = vld [vmem:[%s7250_s1 + $0x1a8] sm:$0xff] }
   0xf   :  { %3201 = vmatprep.subr.bf16.mxu0 %v4583_v28  ;;  %3365 = vmatprep.subr.bf16.mxu1 %v4585_v29  ;;  %v4607_v58 = vcombine.high %v71_v51, %v75_v52  ;;  %v5473_v59 = vld [vmem:[%s7249_s0] sm:$0xff]  ;;  %v4609_v60 = vcombine.high %v72_v54, %v76_v55  ;;  %v80_v0 = vld [vmem:[%s7250_s1 + $0x1c8] sm:$0xff]  ;;  %v4606_v2 = vcombine.low %v71_v51, %v75_v52 }
  0x10   :  { %v79_v61 = vld [vmem:[%s7250_s1 + $0x1c0] sm:$0xff]  ;;  %v5483_v63 = vrot.slane %v5473_v59, %v5462_v53  ;;  %v84_v1 = vld [vmem:[%s7250_s1 + $0x1e8] sm:$0xff]  ;;  %v4608_v4 = vcombine.low %v72_v54, %v76_v55 }
  0x11   :  { %v83_v62 = vld [vmem:[%s7250_s1 + $0x1e0] sm:$0xff]  ;;  %v4617_v6 = vcombine.high %v80_v0, %v84_v1  ;;  %v88_v10 = vld [vmem:[%s7250_s1 + $0x208] sm:$0xff]  ;;  %v4616_v13 = vcombine.low %v80_v0, %v84_v1 }
  0x12   :  { %3202 = vmatpush1.bf16.msra.mxu0 %v4582_v37  ;;  %3366 = vmatpush1.bf16.msra.mxu1 %v4584_v38  ;;  %v593_v3 = vcombine.high %v5483_v63, %v5483_v63  ;;  %v4615_v5 = vcombine.high %v79_v61, %v83_v62  ;;  %v87_v7 = vld [vmem:[%s7250_s1 + $0x200] sm:$0xff]  ;;  %v92_v11 = vld [vmem:[%s7250_s1 + $0x228] sm:$0xff]  ;;  %v4614_v12 = vcombine.low %v79_v61, %v83_v62 }
  0x13   :  { %3203 = vmatprep.subr.bf16.mxu0 %v4591_v39  ;;  %3367 = vmatprep.subr.bf16.mxu1 %v4593_v40  ;;  %v91_v8 = vld [vmem:[%s7250_s1 + $0x220] sm:$0xff]  ;;  %v4625_v15 = vcombine.high %v88_v10, %v92_v11  ;;  %v96_v18 = vld [vmem:[%s7250_s1 + $0x248] sm:$0xff]  ;;  %v4624_v21 = vcombine.low %v88_v10, %v92_v11 }
  0x14   :  { %v5500_v9 = vrot.slane %v593_v3, %v5462_v53  ;;  %v4623_v14 = vcombine.high %v87_v7, %v91_v8  ;;  %v95_v16 = vld [vmem:[%s7250_s1 + $0x240] sm:$0xff]  ;;  %v100_v19 = vld [vmem:[%s7250_s1 + $0x268] sm:$0xff]  ;;  %v4622_v20 = vcombine.low %v87_v7, %v91_v8 }
  0x15   :  { %v99_v17 = vld [vmem:[%s7250_s1 + $0x260] sm:$0xff]  ;;  %v4633_v23 = vcombine.high %v96_v18, %v100_v19  ;;  %v104_v26 = vld [vmem:[%s7250_s1 + $0x288] sm:$0xff]  ;;  %v4632_v29 = vcombine.low %v96_v18, %v100_v19  ;;  %v578_v18 = vcombine.high %v5473_v59, %v5473_v59 }
  0x16   :  { %3204 = vmatpush1.bf16.msra.mxu0 %v4590_v47  ;;  %3368 = vmatpush1.bf16.msra.mxu1 %v4592_v48  ;;  %v4631_v22 = vcombine.high %v95_v16, %v99_v17  ;;  %v103_v24 = vld [vmem:[%s7250_s1 + $0x280] sm:$0xff]  ;;  %v108_v27 = vld [vmem:[%s7250_s1 + $0x2a8] sm:$0xff]  ;;  %v4630_v28 = vcombine.low %v95_v16, %v99_v17 }
  0x17   :  { %3205 = vmatprep.subr.bf16.mxu0 %v4599_v49  ;;  %3369 = vmatprep.subr.bf16.mxu1 %v4601_v50  ;;  %v107_v25 = vld [vmem:[%s7250_s1 + $0x2a0] sm:$0xff]  ;;  %v4641_v31 = vcombine.high %v104_v26, %v108_v27  ;;  %v112_v34 = vld [vmem:[%s7250_s1 + $0x2c8] sm:$0xff]  ;;  %v4640_v37 = vcombine.low %v104_v26, %v108_v27 }
  0x18   :  { %3227 = vmatprep.mubr.bf16.mxu0 %v5500_v9  ;;  %3391 = vmatprep.mubr.bf16.mxu1 %v5500_v9  ;;  %v4639_v30 = vcombine.high %v103_v24, %v107_v25  ;;  %v111_v32 = vld [vmem:[%s7250_s1 + $0x2c0] sm:$0xff]  ;;  %v116_v35 = vld [vmem:[%s7250_s1 + $0x2e8] sm:$0xff]  ;;  %v4638_v36 = vcombine.low %v103_v24, %v107_v25  ;;  %v592_v24 = vrot.slane %v578_v18, %v5462_v53 }
  0x19   :  { %v115_v33 = vld [vmem:[%s7250_s1 + $0x2e0] sm:$0xff]  ;;  %v4649_v39 = vcombine.high %v112_v34, %v116_v35  ;;  %v120_v42 = vld [vmem:[%s7250_s1 + $0x308] sm:$0xff]  ;;  %v4648_v46 = vcombine.low %v112_v34, %v116_v35  ;;  %v5617_v25 = vrot.slane %v5483_v63, %v5462_v53  ;;  %v5639_v35 = vcombine.high %v5500_v9, %v5500_v9 }
  0x1a   :  { %3206 = vmatpush1.bf16.msra.mxu0 %v4598_v56  ;;  %3370 = vmatpush1.bf16.msra.mxu1 %v4600_v57  ;;  %v4647_v38 = vcombine.high %v111_v32, %v115_v33  ;;  %v119_v40 = vld [vmem:[%s7250_s1 + $0x300] sm:$0xff]  ;;  %v124_v44 = vld [vmem:[%s7250_s1 + $0x328] sm:$0xff]  ;;  %v4646_v45 = vcombine.low %v111_v32, %v115_v33 }
  0x1b   :  { %3207 = vmatprep.subr.bf16.mxu0 %v4607_v58  ;;  %3371 = vmatprep.subr.bf16.mxu1 %v4609_v60  ;;  %v123_v41 = vld [vmem:[%s7250_s1 + $0x320] sm:$0xff]  ;;  %v4657_v48 = vcombine.high %v120_v42, %v124_v44  ;;  %v128_v51 = vld [vmem:[%s7250_s1 + $0x348] sm:$0xff]  ;;  %v4656_v55 = vcombine.low %v120_v42, %v124_v44 }
  0x1c   :  { %v4655_v47 = vcombine.high %v119_v40, %v123_v41  ;;  %v127_v49 = vld [vmem:[%s7250_s1 + $0x340] sm:$0xff]  ;;  %v132_v52 = vld [vmem:[%s7250_s1 + $0x368] sm:$0xff]  ;;  %v4654_v54 = vcombine.low %v119_v40, %v123_v41 }
  0x1d   :  { %v131_v50 = vld [vmem:[%s7250_s1 + $0x360] sm:$0xff]  ;;  %v4665_v57 = vcombine.high %v128_v51, %v132_v52  ;;  %v136_v61 = vld [vmem:[%s7250_s1 + $0x388] sm:$0xff]  ;;  %v4664_v1 = vcombine.low %v128_v51, %v132_v52 }
  0x1e   :  { %3208 = vmatpush1.bf16.msra.mxu0 %v4606_v2  ;;  %3372 = vmatpush1.bf16.msra.mxu1 %v4608_v4  ;;  %v4663_v56 = vcombine.high %v127_v49, %v131_v50  ;;  %v135_v58 = vld [vmem:[%s7250_s1 + $0x380] sm:$0xff]  ;;  %v140_v62 = vld [vmem:[%s7250_s1 + $0x3a8] sm:$0xff]  ;;  %v4662_v0 = vcombine.low %v127_v49, %v131_v50 }
  0x1f   :  { %3209 = vmatprep.subr.bf16.mxu0 %v4615_v5  ;;  %3373 = vmatprep.subr.bf16.mxu1 %v4617_v6  ;;  %v139_v60 = vld [vmem:[%s7250_s1 + $0x3a0] sm:$0xff]  ;;  %v4673_v3 = vcombine.high %v136_v61, %v140_v62  ;;  %v144_v6 = vld [vmem:[%s7250_s1 + $0x3c8] sm:$0xff]  ;;  %v4672_v10 = vcombine.low %v136_v61, %v140_v62 }
  0x20   :  { %v4671_v2 = vcombine.high %v135_v58, %v139_v60  ;;  %v143_v4 = vld [vmem:[%s7250_s1 + $0x3c0] sm:$0xff]  ;;  %v148_v7 = vld [vmem:[%s7250_s1 + $0x3e8] sm:$0xff]  ;;  %v4670_v8 = vcombine.low %v135_v58, %v139_v60 }
  0x21   :  { %v147_v5 = vld [vmem:[%s7250_s1 + $0x3e0] sm:$0xff]  ;;  %v156_v16 = vld [vmem:[%s7250_s1 + $0x428] sm:$0xff]  ;;  %v4680_v19 = vcombine.low %v144_v6, %v148_v7 }
  0x22   :  { %3210 = vmatpush1.bf16.msra.mxu0 %v4614_v12  ;;  %3374 = vmatpush1.bf16.msra.mxu1 %v4616_v13  ;;  %v4679_v11 = vcombine.high %v143_v4, %v147_v5  ;;  %v4681_v12 = vcombine.high %v144_v6, %v148_v7  ;;  %v151_v13 = vld [vmem:[%s7250_s1 + $0x400] sm:$0xff]  ;;  %v4678_v17 = vcombine.low %v143_v4, %v147_v5  ;;  %v160_v59 = vld [vmem:[%s7250_s1 + $0x448] sm:$0xff] }
  0x23   :  { %3211 = vmatprep.subr.bf16.mxu0 %v4623_v14  ;;  %3375 = vmatprep.subr.bf16.mxu1 %v4625_v15  ;;  %v155_v14 = vld [vmem:[%s7250_s1 + $0x420] sm:$0xff]  ;;  %v152_v15 = vld [vmem:[%s7250_s1 + $0x408] sm:$0xff] }
  0x24   :  { %v164_v26 = vld [vmem:[%s7250_s1 + $0x468] sm:$0xff]  ;;  %v4686_v27 = vcombine.low %v151_v13, %v155_v14  ;;  %v167_v63 = vld [vmem:[%s7250_s1 + $0x480] sm:$0xff] }
  0x25   :  { %v168_v32 = vld [vmem:[%s7250_s1 + $0x488] sm:$0xff]  ;;  %v4697_v33 = vcombine.high %v160_v59, %v164_v26  ;;  %v175_v41 = vld [vmem:[%s7250_s1 + $0x4c0] sm:$0xff] }
  0x26   :  { %3212 = vmatpush1.bf16.msra.mxu0 %v4622_v20  ;;  %3376 = vmatpush1.bf16.msra.mxu1 %v4624_v21  ;;  %v4687_v20 = vcombine.high %v151_v13, %v155_v14  ;;  %v4689_v21 = vcombine.high %v152_v15, %v156_v16  ;;  %v172_v34 = vld [vmem:[%s7250_s1 + $0x4a8] sm:$0xff]  ;;  %v179_v42 = vld [vmem:[%s7250_s1 + $0x4e0] sm:$0xff] }
  0x27   :  { %3213 = vmatprep.subr.bf16.mxu0 %v4631_v22  ;;  %3377 = vmatprep.subr.bf16.mxu1 %v4633_v23  ;;  %v159_v22 = vld [vmem:[%s7250_s1 + $0x440] sm:$0xff]  ;;  %v4705_v44 = vcombine.high %v168_v32, %v172_v34  ;;  %v184_v51 = vld [vmem:[%s7250_s1 + $0x508] sm:$0xff] }
  0x28   :  { %v163_v23 = vld [vmem:[%s7250_s1 + $0x460] sm:$0xff]  ;;  %v192_v61 = vld [vmem:[%s7250_s1 + $0x548] sm:$0xff] }
  0x29   :  { %v183_v49 = vld [vmem:[%s7250_s1 + $0x500] sm:$0xff]  ;;  %v200_v6 = vld [vmem:[%s7250_s1 + $0x588] sm:$0xff] }
  0x2a   :  { %3214 = vmatpush1.bf16.msra.mxu0 %v4630_v28  ;;  %3378 = vmatpush1.bf16.msra.mxu1 %v4632_v29  ;;  %v594_v28 = vcombine.high %v592_v24, %v592_v24  ;;  %v4688_v29 = vcombine.low %v152_v15, %v156_v16  ;;  %v187_v50 = vld [vmem:[%s7250_s1 + $0x520] sm:$0xff]  ;;  %v208_v15 = vld [vmem:[%s7250_s1 + $0x5c8] sm:$0xff] }
  0x2b   :  { %3215 = vmatprep.subr.bf16.mxu0 %v4639_v30  ;;  %3379 = vmatprep.subr.bf16.mxu1 %v4641_v31  ;;  %v4695_v30 = vcombine.high %v159_v22, %v163_v23  ;;  %v171_v31 = vld [vmem:[%s7250_s1 + $0x4a0] sm:$0xff] }
  0x2c   :  { %v4703_v40 = vcombine.high %v167_v63, %v171_v31  ;;  %v191_v58 = vld [vmem:[%s7250_s1 + $0x540] sm:$0xff] }
  0x2d   :  { %v195_v60 = vld [vmem:[%s7250_s1 + $0x560] sm:$0xff] }
  0x2e   :  { %3216 = vmatpush1.bf16.msra.mxu0 %v4638_v36  ;;  %3380 = vmatpush1.bf16.msra.mxu1 %v4640_v37  ;;  %v5642_v36 = vrot.slane %v594_v28, %v5462_v53  ;;  %v5645_v37 = vrot.slane %v592_v24, %v5462_v53  ;;  %v176_v53 = vld [vmem:[%s7250_s1 + $0x4c8] sm:$0xff]  ;;  %v199_v4 = vld [vmem:[%s7250_s1 + $0x580] sm:$0xff] }
  0x2f   :  { %3217 = vmatprep.subr.bf16.mxu0 %v4647_v38  ;;  %3381 = vmatprep.subr.bf16.mxu1 %v4649_v39  ;;  %v4694_v38 = vcombine.low %v159_v22, %v163_v23  ;;  %v4696_v39 = vcombine.low %v160_v59, %v164_v26  ;;  %v203_v5 = vld [vmem:[%s7250_s1 + $0x5a0] sm:$0xff]  ;;  %v216_v23 = vld [vmem:[%s7250_s1 + $0x608] sm:$0xff] }
  0x30   :  { %v207_v13 = vld [vmem:[%s7250_s1 + $0x5c0] sm:$0xff]  ;;  %v4734_v18 = vcombine.low %v199_v4, %v203_v5  ;;  %v220_v59 = vld [vmem:[%s7250_s1 + $0x628] sm:$0xff] }
  0x31   :  { %v211_v14 = vld [vmem:[%s7250_s1 + $0x5e0] sm:$0xff] }
  0x32   :  { %3218 = vmatpush1.bf16.msra.mxu0 %v4646_v45  ;;  %3382 = vmatpush1.bf16.msra.mxu1 %v4648_v46  ;;  %v180_v45 = vld [vmem:[%s7250_s1 + $0x4e8] sm:$0xff]  ;;  %v4702_v46 = vcombine.low %v167_v63, %v171_v31  ;;  %v219_v22 = vld [vmem:[%s7250_s1 + $0x620] sm:$0xff]  ;;  %v4742_v26 = vcombine.low %v207_v13, %v211_v14  ;;  %v4753_v31 = vcombine.high %v216_v23, %v220_v59 }
  0x33   :  { %3219 = vmatprep.subr.bf16.mxu0 %v4655_v47  ;;  %3383 = vmatprep.subr.bf16.mxu1 %v4657_v48  ;;  %v4704_v47 = vcombine.low %v168_v32, %v172_v34  ;;  %v4711_v48 = vcombine.high %v175_v41, %v179_v42  ;;  %v4713_v52 = vcombine.high %v176_v53, %v180_v45  ;;  %v224_v63 = vld [vmem:[%s7250_s1 + $0x648] sm:$0xff] }
  0x34   :  { %v228_v32 = vld [vmem:[%s7250_s1 + $0x668] sm:$0xff]  ;;  %v4752_v34 = vcombine.low %v216_v23, %v220_v59 }
  0x35   :  { %v276_v23 = vld [vmem:[%s7250_s1 + $0x7e8] sm:$0xff] }
  0x36   :  { %3220 = vmatpush1.bf16.msra.mxu0 %v4654_v54  ;;  %3384 = vmatpush1.bf16.msra.mxu1 %v4656_v55  ;;  %v188_v54 = vld [vmem:[%s7250_s1 + $0x528] sm:$0xff]  ;;  %v4710_v55 = vcombine.low %v175_v41, %v179_v42  ;;  %v4761_v42 = vcombine.high %v224_v63, %v228_v32 }
  0x37   :  { %3221 = vmatprep.subr.bf16.mxu0 %v4663_v56  ;;  %3385 = vmatprep.subr.bf16.mxu1 %v4665_v57  ;;  %v4712_v56 = vcombine.low %v176_v53, %v180_v45  ;;  %v4719_v57 = vcombine.high %v183_v49, %v187_v50  ;;  %v4721_v62 = vcombine.high %v184_v51, %v188_v54  ;;  %v232_v41 = vld [vmem:[%s7250_s1 + $0x688] sm:$0xff] }
  0x38   :  { %v236_v53 = vld [vmem:[%s7250_s1 + $0x6a8] sm:$0xff]  ;;  %v4760_v45 = vcombine.low %v224_v63, %v228_v32 }
  0x39   :  { %v284_v63 = vld [vmem:[%s7250_s1 + $0x828] sm:$0xff] }
  0x3a   :  { %3222 = vmatpush1.bf16.msra.mxu0 %v4662_v0  ;;  %3386 = vmatpush1.bf16.msra.mxu1 %v4664_v1  ;;  %v196_v0 = vld [vmem:[%s7250_s1 + $0x568] sm:$0xff]  ;;  %v4718_v1 = vcombine.low %v183_v49, %v187_v50  ;;  %v4769_v50 = vcombine.high %v232_v41, %v236_v53 }
  0x3b   :  { %3223 = vmatprep.subr.bf16.mxu0 %v4671_v2  ;;  %3387 = vmatprep.subr.bf16.mxu1 %v4673_v3  ;;  %v4720_v2 = vcombine.low %v184_v51, %v188_v54  ;;  %v4727_v3 = vcombine.high %v191_v58, %v195_v60  ;;  %v4729_v7 = vcombine.high %v192_v61, %v196_v0  ;;  %v240_v49 = vld [vmem:[%s7250_s1 + $0x6c8] sm:$0xff] }
  0x3c   :  { %v244_v51 = vld [vmem:[%s7250_s1 + $0x6e8] sm:$0xff]  ;;  %v4768_v54 = vcombine.low %v232_v41, %v236_v53  ;;  %v5830_v41 = vcombine.high %v5617_v25, %v5617_v25 }
  0x3e   :  { %3224 = vmatpush1.bf16.msra.mxu0 %v4670_v8  ;;  %3388 = vmatpush1.bf16.msra.mxu1 %v4672_v10  ;;  %v204_v8 = vld [vmem:[%s7250_s1 + $0x5a8] sm:$0xff]  ;;  %v4726_v10 = vcombine.low %v191_v58, %v195_v60  ;;  %v4777_v60 = vcombine.high %v240_v49, %v244_v51 }
  0x3f   :  { %3225 = vmatprep.subr.bf16.mxu0 %v4679_v11  ;;  %3389 = vmatprep.subr.bf16.mxu1 %v4681_v12  ;;  %v4728_v11 = vcombine.low %v192_v61, %v196_v0  ;;  %v4735_v12 = vcombine.high %v199_v4, %v203_v5  ;;  %v4737_v16 = vcombine.high %v200_v6, %v204_v8  ;;  %v248_v58 = vld [vmem:[%s7250_s1 + $0x708] sm:$0xff] }
  0x40   :  { %v252_v61 = vld [vmem:[%s7250_s1 + $0x728] sm:$0xff]  ;;  %v4776_v0 = vcombine.low %v240_v49, %v244_v51 }
  0x41   :  { %v256_v4 = vld [vmem:[%s7250_s1 + $0x748] sm:$0xff]  ;;  %v4785_v5 = vcombine.high %v248_v58, %v252_v61 }
  0x42   :  { %3226 = vmatpush1.bf16.msra.mxu0 %v4678_v17  ;;  %3390 = vmatpush1.bf16.msra.mxu1 %v4680_v19  ;;  %v212_v17 = vld [vmem:[%s7250_s1 + $0x5e8] sm:$0xff]  ;;  %v4736_v19 = vcombine.low %v200_v6, %v204_v8  ;;  %v4784_v8 = vcombine.low %v248_v58, %v252_v61 }
  0x43   :  { %3236 = vmatprep.subr.bf16.mxu0 %v4687_v20  ;;  %3400 = vmatprep.subr.bf16.mxu1 %v4689_v21  ;;  %v4743_v20 = vcombine.high %v207_v13, %v211_v14  ;;  %v215_v21 = vld [vmem:[%s7250_s1 + $0x600] sm:$0xff]  ;;  %v4745_v24 = vcombine.high %v208_v15, %v212_v17  ;;  %v260_v6 = vld [vmem:[%s7250_s1 + $0x768] sm:$0xff] }
  0x44   :  { %v4751_v28 = vcombine.high %v215_v21, %v219_v22  ;;  %v264_v13 = vld [vmem:[%s7250_s1 + $0x788] sm:$0xff]  ;;  %v4793_v14 = vcombine.high %v256_v4, %v260_v6 }
  0x45   :  { %3228 = vmatmul.mubr.bf16.vlgmr.msra.gmra.mrb[0].mxu0 %v5617_v25  ;;  %3392 = vmatmul.mubr.bf16.vlgmr.msra.gmra.mrb[0].mxu1 %v5617_v25 }
  0x46   :  { %3237 = vmatpush1.bf16.msra.mxu0 %v4686_v27  ;;  %3401 = vmatpush1.bf16.msra.mxu1 %v4688_v29  ;;  %v4744_v27 = vcombine.low %v208_v15, %v212_v17  ;;  %v223_v29 = vld [vmem:[%s7250_s1 + $0x640] sm:$0xff]  ;;  %v268_v15 = vld [vmem:[%s7250_s1 + $0x7a8] sm:$0xff]  ;;  %v4792_v17 = vcombine.low %v256_v4, %v260_v6 }
  0x47   :  { %3238 = vmatprep.subr.bf16.mxu0 %v4695_v30  ;;  %3402 = vmatprep.subr.bf16.mxu1 %v4697_v33  ;;  %v227_v30 = vld [vmem:[%s7250_s1 + $0x660] sm:$0xff]  ;;  %v4750_v33 = vcombine.low %v215_v21, %v219_v22  ;;  %v272_v21 = vld [vmem:[%s7250_s1 + $0x7c8] sm:$0xff]  ;;  %v4801_v22 = vcombine.high %v264_v13, %v268_v15  ;;  %v4800_v59 = vcombine.low %v264_v13, %v268_v15 }
  0x48   :  { %3268 = vmatprep.mubr.bf16.mxu0 %v5639_v35  ;;  %3432 = vmatprep.mubr.bf16.mxu1 %v5639_v35  ;;  %v4808_v32 = vcombine.low %v272_v21, %v276_v23 }
  0x4a   :  { %3239 = vmatpush1.bf16.msra.mxu0 %v4694_v38  ;;  %3403 = vmatpush1.bf16.msra.mxu1 %v4696_v39  ;;  %v4759_v38 = vcombine.high %v223_v29, %v227_v30  ;;  %v231_v39 = vld [vmem:[%s7250_s1 + $0x680] sm:$0xff] }
  0x4b   :  { %3240 = vmatprep.subr.bf16.mxu0 %v4703_v40  ;;  %3404 = vmatprep.subr.bf16.mxu1 %v4705_v44  ;;  %v235_v40 = vld [vmem:[%s7250_s1 + $0x6a0] sm:$0xff]  ;;  %v4758_v44 = vcombine.low %v223_v29, %v227_v30  ;;  %v280_v29 = vld [vmem:[%s7250_s1 + $0x808] sm:$0xff]  ;;  %v4809_v30 = vcombine.high %v272_v21, %v276_v23 }
  0x4e   :  { %3241 = vmatpush1.bf16.msra.mxu0 %v4702_v46  ;;  %3405 = vmatpush1.bf16.msra.mxu1 %v4704_v47  ;;  %v4767_v46 = vcombine.high %v231_v39, %v235_v40  ;;  %v239_v47 = vld [vmem:[%s7250_s1 + $0x6c0] sm:$0xff] }
  0x4f   :  { %3242 = vmatprep.subr.bf16.mxu0 %v4711_v48  ;;  %3406 = vmatprep.subr.bf16.mxu1 %v4713_v52  ;;  %v243_v48 = vld [vmem:[%s7250_s1 + $0x6e0] sm:$0xff]  ;;  %v4766_v52 = vcombine.low %v231_v39, %v235_v40  ;;  %v4817_v39 = vcombine.high %v280_v29, %v284_v63  ;;  %v288_v40 = vld [vmem:[%s7250_s1 + $0x848] sm:$0xff] }
  0x52   :  { %3243 = vmatpush1.bf16.msra.mxu0 %v4710_v55  ;;  %3407 = vmatpush1.bf16.msra.mxu1 %v4712_v56  ;;  %v4775_v55 = vcombine.high %v239_v47, %v243_v48  ;;  %v247_v56 = vld [vmem:[%s7250_s1 + $0x700] sm:$0xff] }
  0x53   :  { %3244 = vmatprep.subr.bf16.mxu0 %v4719_v57  ;;  %3408 = vmatprep.subr.bf16.mxu1 %v4721_v62  ;;  %v251_v57 = vld [vmem:[%s7250_s1 + $0x720] sm:$0xff]  ;;  %v4774_v62 = vcombine.low %v239_v47, %v243_v48 }
  0x56   :  { %3245 = vmatpush1.bf16.msra.mxu0 %v4718_v1  ;;  %3409 = vmatpush1.bf16.msra.mxu1 %v4720_v2  ;;  %v4783_v1 = vcombine.high %v247_v56, %v251_v57  ;;  %v255_v2 = vld [vmem:[%s7250_s1 + $0x740] sm:$0xff] }
  0x57   :  { %3246 = vmatprep.subr.bf16.mxu0 %v4727_v3  ;;  %3410 = vmatprep.subr.bf16.mxu1 %v4729_v7  ;;  %v259_v3 = vld [vmem:[%s7250_s1 + $0x760] sm:$0xff]  ;;  %v4782_v7 = vcombine.low %v247_v56, %v251_v57 }
  0x5a   :  { %3247 = vmatpush1.bf16.msra.mxu0 %v4726_v10  ;;  %3411 = vmatpush1.bf16.msra.mxu1 %v4728_v11  ;;  %v4791_v10 = vcombine.high %v255_v2, %v259_v3  ;;  %v263_v11 = vld [vmem:[%s7250_s1 + $0x780] sm:$0xff] }
  0x5b   :  { %3248 = vmatprep.subr.bf16.mxu0 %v4735_v12  ;;  %3412 = vmatprep.subr.bf16.mxu1 %v4737_v16  ;;  %v267_v12 = vld [vmem:[%s7250_s1 + $0x7a0] sm:$0xff]  ;;  %v4790_v16 = vcombine.low %v255_v2, %v259_v3 }
  0x5e   :  { %3249 = vmatpush1.bf16.msra.mxu0 %v4734_v18  ;;  %3413 = vmatpush1.bf16.msra.mxu1 %v4736_v19  ;;  %v4799_v18 = vcombine.high %v263_v11, %v267_v12  ;;  %v271_v19 = vld [vmem:[%s7250_s1 + $0x7c0] sm:$0xff] }
  0x5f   :  { %3250 = vmatprep.subr.bf16.mxu0 %v4743_v20  ;;  %3414 = vmatprep.subr.bf16.mxu1 %v4745_v24  ;;  %v275_v20 = vld [vmem:[%s7250_s1 + $0x7e0] sm:$0xff]  ;;  %v4798_v24 = vcombine.low %v263_v11, %v267_v12 }
  0x62   :  { %3251 = vmatpush1.bf16.msra.mxu0 %v4742_v26  ;;  %3415 = vmatpush1.bf16.msra.mxu1 %v4744_v27  ;;  %v4807_v26 = vcombine.high %v271_v19, %v275_v20  ;;  %v279_v27 = vld [vmem:[%s7250_s1 + $0x800] sm:$0xff] }
  0x63   :  { %3252 = vmatprep.subr.bf16.mxu0 %v4751_v28  ;;  %3416 = vmatprep.subr.bf16.mxu1 %v4753_v31  ;;  %v283_v28 = vld [vmem:[%s7250_s1 + $0x820] sm:$0xff]  ;;  %v4806_v31 = vcombine.low %v271_v19, %v275_v20 }
  0x66   :  { %3253 = vmatpush1.bf16.msra.mxu0 %v4750_v33  ;;  %3417 = vmatpush1.bf16.msra.mxu1 %v4752_v34  ;;  %v4815_v33 = vcombine.high %v279_v27, %v283_v28  ;;  %v287_v34 = vld [vmem:[%s7250_s1 + $0x840] sm:$0xff] }
  0x67   :  { %3254 = vmatprep.subr.bf16.mxu0 %v4759_v38  ;;  %3418 = vmatprep.subr.bf16.mxu1 %v4761_v42  ;;  %v291_v38 = vld [vmem:[%s7250_s1 + $0x860] sm:$0xff]  ;;  %v292_v42 = vld [vmem:[%s7250_s1 + $0x868] sm:$0xff] }
  0x6a   :  { %3255 = vmatpush1.bf16.msra.mxu0 %v4758_v44  ;;  %3419 = vmatpush1.bf16.msra.mxu1 %v4760_v45 }
  0x6b   :  { %3256 = vmatprep.subr.bf16.mxu0 %v4767_v46  ;;  %3420 = vmatprep.subr.bf16.mxu1 %v4769_v50 }
  0x6e   :  { %3257 = vmatpush1.bf16.msra.mxu0 %v4766_v52  ;;  %3421 = vmatpush1.bf16.msra.mxu1 %v4768_v54 }
  0x6f   :  { %3258 = vmatprep.subr.bf16.mxu0 %v4775_v55  ;;  %3422 = vmatprep.subr.bf16.mxu1 %v4777_v60 }
  0x72   :  { %3259 = vmatpush1.bf16.msra.mxu0 %v4774_v62  ;;  %3423 = vmatpush1.bf16.msra.mxu1 %v4776_v0 }
  0x73   :  { %3260 = vmatprep.subr.bf16.mxu0 %v4783_v1  ;;  %3424 = vmatprep.subr.bf16.mxu1 %v4785_v5 }
  0x76   :  { %3261 = vmatpush1.bf16.msra.mxu0 %v4782_v7  ;;  %3425 = vmatpush1.bf16.msra.mxu1 %v4784_v8 }
  0x77   :  { %3262 = vmatprep.subr.bf16.mxu0 %v4791_v10  ;;  %3426 = vmatprep.subr.bf16.mxu1 %v4793_v14 }
  0x7a   :  { %3263 = vmatpush1.bf16.msra.mxu0 %v4790_v16  ;;  %3427 = vmatpush1.bf16.msra.mxu1 %v4792_v17 }
  0x7b   :  { %3264 = vmatprep.subr.bf16.mxu0 %v4799_v18  ;;  %3428 = vmatprep.subr.bf16.mxu1 %v4801_v22 }
  0x7e   :  { %3265 = vmatpush1.bf16.msra.mxu0 %v4798_v24  ;;  %3429 = vmatpush1.bf16.msra.mxu1 %v4800_v59 }
  0x7f   :  { %3266 = vmatprep.subr.bf16.mxu0 %v4807_v26  ;;  %3430 = vmatprep.subr.bf16.mxu1 %v4809_v30 }
  0x80   :  { %10 = vsyncpa [#allocation3], 0  ;;  %v4814_v53 = vcombine.low %v279_v27, %v283_v28  ;;  %v4816_v44 = vcombine.low %v280_v29, %v284_v63  ;;  %v4823_v45 = vcombine.high %v287_v34, %v291_v38  ;;  %v4825_v46 = vcombine.high %v288_v40, %v292_v42  ;;  %v295_v47 = vld [vmem:[%s7250_s1 + $0x880] sm:$0xff]  ;;  %v296_v49 = vld [vmem:[%s7250_s1 + $0x888] sm:$0xff]  ;;  %s5350_s21 = smov [#allocation2]  }
  0x81   :  { %v299_v48 = vld [vmem:[%s7250_s1 + $0x8a0] sm:$0xff]  ;;  %v300_v50 = vld [vmem:[%s7250_s1 + $0x8a8] sm:$0xff]  ;;  %v4822_v51 = vcombine.low %v287_v34, %v291_v38  ;;  %v4824_v52 = vcombine.low %v288_v40, %v292_v42  ;;  %vm4378_vm0 = vcmask 1043456   ;;  %vm4374_vm1 = vcmask 850944  }
  0x82   :  { %3267 = vmatpush1.bf16.msra.mxu0 %v4806_v31  ;;  %3431 = vmatpush1.bf16.msra.mxu1 %v4808_v32  ;;  %v4831_v54 = vcombine.high %v295_v47, %v299_v48  ;;  %v4833_v55 = vcombine.high %v296_v49, %v300_v50  ;;  %v303_v56 = vld [vmem:[%s7250_s1 + $0x8c0] sm:$0xff]  ;;  %v304_v58 = vld [vmem:[%s7250_s1 + $0x8c8] sm:$0xff]  ;;  %v4830_v61 = vcombine.low %v295_v47, %v299_v48  ;;  %vm4542_vm2 = vcmask 25600  }
  0x83   :  { %3277 = vmatprep.subr.bf16.mxu0 %v4815_v33  ;;  %3441 = vmatprep.subr.bf16.mxu1 %v4817_v39  ;;  %v307_v57 = vld [vmem:[%s7250_s1 + $0x8e0] sm:$0xff]  ;;  %v308_v60 = vld [vmem:[%s7250_s1 + $0x8e8] sm:$0xff]  ;;  %v4832_v62 = vcombine.low %v296_v49, %v300_v50 }
  0x84   :  { %v4839_v0 = vcombine.high %v303_v56, %v307_v57  ;;  %v4841_v1 = vcombine.high %v304_v58, %v308_v60  ;;  %v311_v2 = vld [vmem:[%s7250_s1 + $0x900] sm:$0xff]  ;;  %v312_v4 = vld [vmem:[%s7250_s1 + $0x908] sm:$0xff]  ;;  %v4838_v6 = vcombine.low %v303_v56, %v307_v57  ;;  %v4840_v7 = vcombine.low %v304_v58, %v308_v60 }
  0x85   :  { %3269 = vmatmul.mubr.bf16.vlgmr.msra.gmra.mrb[0].mxu0 %v5830_v41  ;;  %3433 = vmatmul.mubr.bf16.vlgmr.msra.gmra.mrb[0].mxu1 %v5830_v41  ;;  %v315_v3 = vld [vmem:[%s7250_s1 + $0x920] sm:$0xff]  ;;  %v316_v5 = vld [vmem:[%s7250_s1 + $0x928] sm:$0xff] }
  0x86   :  { %3278 = vmatpush1.bf16.msra.mxu0 %v4814_v53  ;;  %3442 = vmatpush1.bf16.msra.mxu1 %v4816_v44  ;;  %v4847_v8 = vcombine.high %v311_v2, %v315_v3  ;;  %v4849_v10 = vcombine.high %v312_v4, %v316_v5  ;;  %v319_v11 = vld [vmem:[%s7250_s1 + $0x940] sm:$0xff]  ;;  %v320_v13 = vld [vmem:[%s7250_s1 + $0x948] sm:$0xff]  ;;  %v4846_v15 = vcombine.low %v311_v2, %v315_v3 }
  0x87   :  { %3279 = vmatprep.subr.bf16.mxu0 %v4823_v45  ;;  %3443 = vmatprep.subr.bf16.mxu1 %v4825_v46  ;;  %v323_v12 = vld [vmem:[%s7250_s1 + $0x960] sm:$0xff]  ;;  %v324_v14 = vld [vmem:[%s7250_s1 + $0x968] sm:$0xff]  ;;  %v4848_v16 = vcombine.low %v312_v4, %v316_v5 }
  0x88   :  { %3309 = vmatprep.mubr.bf16.mxu0 %v5642_v36  ;;  %3473 = vmatprep.mubr.bf16.mxu1 %v5642_v36  ;;  %v4855_v17 = vcombine.high %v319_v11, %v323_v12  ;;  %v4857_v18 = vcombine.high %v320_v13, %v324_v14  ;;  %v327_v19 = vld [vmem:[%s7250_s1 + $0x980] sm:$0xff]  ;;  %v328_v21 = vld [vmem:[%s7250_s1 + $0x988] sm:$0xff]  ;;  %v4854_v23 = vcombine.low %v319_v11, %v323_v12 }
  0x89   :  { %v331_v20 = vld [vmem:[%s7250_s1 + $0x9a0] sm:$0xff]  ;;  %v332_v22 = vld [vmem:[%s7250_s1 + $0x9a8] sm:$0xff]  ;;  %v4856_v24 = vcombine.low %v320_v13, %v324_v14 }
  0x8a   :  { %3280 = vmatpush1.bf16.msra.mxu0 %v4822_v51  ;;  %3444 = vmatpush1.bf16.msra.mxu1 %v4824_v52  ;;  %v4863_v59 = vcombine.high %v327_v19, %v331_v20  ;;  %v4865_v26 = vcombine.high %v328_v21, %v332_v22  ;;  %v335_v27 = vld [vmem:[%s7250_s1 + $0x9c0] sm:$0xff]  ;;  %v336_v29 = vld [vmem:[%s7250_s1 + $0x9c8] sm:$0xff]  ;;  %v4862_v63 = vcombine.low %v327_v19, %v331_v20 }
  0x8b   :  { %3281 = vmatprep.subr.bf16.mxu0 %v4831_v54  ;;  %3445 = vmatprep.subr.bf16.mxu1 %v4833_v55  ;;  %v339_v28 = vld [vmem:[%s7250_s1 + $0x9e0] sm:$0xff]  ;;  %v340_v30 = vld [vmem:[%s7250_s1 + $0x9e8] sm:$0xff]  ;;  %v4864_v31 = vcombine.low %v328_v21, %v332_v22 }
  0x8c   :  { %v4871_v32 = vcombine.high %v335_v27, %v339_v28  ;;  %v4873_v33 = vcombine.high %v336_v29, %v340_v30  ;;  %v343_v34 = vld [vmem:[%s7250_s1 + $0xa00] sm:$0xff]  ;;  %v344_v39 = vld [vmem:[%s7250_s1 + $0xa08] sm:$0xff]  ;;  %v4870_v42 = vcombine.low %v335_v27, %v339_v28  ;;  %v4872_v53 = vcombine.low %v336_v29, %v340_v30 }
  0x8d   :  { %v347_v38 = vld [vmem:[%s7250_s1 + $0xa20] sm:$0xff]  ;;  %v348_v40 = vld [vmem:[%s7250_s1 + $0xa28] sm:$0xff] }
  0x8e   :  { %3282 = vmatpush1.bf16.msra.mxu0 %v4830_v61  ;;  %3446 = vmatpush1.bf16.msra.mxu1 %v4832_v62  ;;  %v4879_v44 = vcombine.high %v343_v34, %v347_v38  ;;  %v4881_v45 = vcombine.high %v344_v39, %v348_v40  ;;  %v351_v46 = vld [vmem:[%s7250_s1 + $0xa40] sm:$0xff]  ;;  %v352_v48 = vld [vmem:[%s7250_s1 + $0xa48] sm:$0xff]  ;;  %v4878_v50 = vcombine.low %v343_v34, %v347_v38 }
  0x8f   :  { %3283 = vmatprep.subr.bf16.mxu0 %v4839_v0  ;;  %3447 = vmatprep.subr.bf16.mxu1 %v4841_v1  ;;  %v355_v47 = vld [vmem:[%s7250_s1 + $0xa60] sm:$0xff]  ;;  %v356_v49 = vld [vmem:[%s7250_s1 + $0xa68] sm:$0xff]  ;;  %v4880_v51 = vcombine.low %v344_v39, %v348_v40 }
  0x90   :  { %v4887_v52 = vcombine.high %v351_v46, %v355_v47  ;;  %v4889_v54 = vcombine.high %v352_v48, %v356_v49  ;;  %v359_v55 = vld [vmem:[%s7250_s1 + $0xa80] sm:$0xff]  ;;  %v360_v57 = vld [vmem:[%s7250_s1 + $0xa88] sm:$0xff]  ;;  %v4886_v60 = vcombine.low %v351_v46, %v355_v47  ;;  %v4888_v61 = vcombine.low %v352_v48, %v356_v49 }
  0x91   :  { %v363_v56 = vld [vmem:[%s7250_s1 + $0xaa0] sm:$0xff]  ;;  %v364_v58 = vld [vmem:[%s7250_s1 + $0xaa8] sm:$0xff] }
  0x92   :  { %3284 = vmatpush1.bf16.msra.mxu0 %v4838_v6  ;;  %3448 = vmatpush1.bf16.msra.mxu1 %v4840_v7  ;;  %v4895_v62 = vcombine.high %v359_v55, %v363_v56  ;;  %v4897_v0 = vcombine.high %v360_v57, %v364_v58  ;;  %v367_v1 = vld [vmem:[%s7250_s1 + $0xac0] sm:$0xff]  ;;  %v368_v3 = vld [vmem:[%s7250_s1 + $0xac8] sm:$0xff]  ;;  %v4894_v5 = vcombine.low %v359_v55, %v363_v56 }
  0x93   :  { %3285 = vmatprep.subr.bf16.mxu0 %v4847_v8  ;;  %3449 = vmatprep.subr.bf16.mxu1 %v4849_v10  ;;  %v371_v2 = vld [vmem:[%s7250_s1 + $0xae0] sm:$0xff]  ;;  %v372_v4 = vld [vmem:[%s7250_s1 + $0xae8] sm:$0xff]  ;;  %v4896_v6 = vcombine.low %v360_v57, %v364_v58 }
  0x94   :  { %v4903_v7 = vcombine.high %v367_v1, %v371_v2  ;;  %v4905_v8 = vcombine.high %v368_v3, %v372_v4  ;;  %v375_v10 = vld [vmem:[%s7250_s1 + $0xb00] sm:$0xff]  ;;  %v376_v12 = vld [vmem:[%s7250_s1 + $0xb08] sm:$0xff]  ;;  %v4902_v14 = vcombine.low %v367_v1, %v371_v2  ;;  %v6039_v2 = vcombine.high %v5642_v36, %v5642_v36 }
  0x95   :  { %v379_v11 = vld [vmem:[%s7250_s1 + $0xb20] sm:$0xff]  ;;  %v380_v13 = vld [vmem:[%s7250_s1 + $0xb28] sm:$0xff] }
  0x96   :  { %3286 = vmatpush1.bf16.msra.mxu0 %v4846_v15  ;;  %3450 = vmatpush1.bf16.msra.mxu1 %v4848_v16  ;;  %v4904_v15 = vcombine.low %v368_v3, %v372_v4  ;;  %v4911_v16 = vcombine.high %v375_v10, %v379_v11  ;;  %v387_v19 = vld [vmem:[%s7250_s1 + $0xb60] sm:$0xff]  ;;  %v384_v20 = vld [vmem:[%s7250_s1 + $0xb48] sm:$0xff]  ;;  %v4910_v22 = vcombine.low %v375_v10, %v379_v11 }
  0x97   :  { %3287 = vmatprep.subr.bf16.mxu0 %v4855_v17  ;;  %3451 = vmatprep.subr.bf16.mxu1 %v4857_v18  ;;  %v4913_v17 = vcombine.high %v376_v12, %v380_v13  ;;  %v383_v18 = vld [vmem:[%s7250_s1 + $0xb40] sm:$0xff]  ;;  %v388_v21 = vld [vmem:[%s7250_s1 + $0xb68] sm:$0xff] }
  0x98   :  { %v395_v27 = vld [vmem:[%s7250_s1 + $0xba0] sm:$0xff]  ;;  %v392_v28 = vld [vmem:[%s7250_s1 + $0xb88] sm:$0xff]  ;;  %v4918_v30 = vcombine.low %v383_v18, %v387_v19 }
  0x99   :  { %v396_v29 = vld [vmem:[%s7250_s1 + $0xba8] sm:$0xff]  ;;  %v403_v34 = vld [vmem:[%s7250_s1 + $0xbe0] sm:$0xff] }
  0x9a   :  { %3288 = vmatpush1.bf16.msra.mxu0 %v4854_v23  ;;  %3452 = vmatpush1.bf16.msra.mxu1 %v4856_v24  ;;  %v4912_v23 = vcombine.low %v376_v12, %v380_v13  ;;  %v4919_v24 = vcombine.high %v383_v18, %v387_v19  ;;  %v400_v38 = vld [vmem:[%s7250_s1 + $0xbc8] sm:$0xff]  ;;  %v411_v46 = vld [vmem:[%s7250_s1 + $0xc20] sm:$0xff] }
  0x9b   :  { %3289 = vmatprep.subr.bf16.mxu0 %v4863_v59  ;;  %3453 = vmatprep.subr.bf16.mxu1 %v4865_v26  ;;  %v4921_v59 = vcombine.high %v384_v20, %v388_v21  ;;  %v391_v26 = vld [vmem:[%s7250_s1 + $0xb80] sm:$0xff]  ;;  %v404_v39 = vld [vmem:[%s7250_s1 + $0xbe8] sm:$0xff] }
  0x9c   :  { %v4926_v40 = vcombine.low %v391_v26, %v395_v27  ;;  %v408_v47 = vld [vmem:[%s7250_s1 + $0xc08] sm:$0xff]  ;;  %v419_v55 = vld [vmem:[%s7250_s1 + $0xc60] sm:$0xff] }
  0x9d   :  { %v412_v48 = vld [vmem:[%s7250_s1 + $0xc28] sm:$0xff]  ;;  %v427_v1 = vld [vmem:[%s7250_s1 + $0xca0] sm:$0xff] }
  0x9e   :  { %3290 = vmatpush1.bf16.msra.mxu0 %v4862_v63  ;;  %3454 = vmatpush1.bf16.msra.mxu1 %v4864_v31  ;;  %v4920_v63 = vcombine.low %v384_v20, %v388_v21  ;;  %v4927_v31 = vcombine.high %v391_v26, %v395_v27  ;;  %v416_v56 = vld [vmem:[%s7250_s1 + $0xc48] sm:$0xff]  ;;  %v431_v10 = vld [vmem:[%s7250_s1 + $0xcc0] sm:$0xff] }
  0x9f   :  { %3291 = vmatprep.subr.bf16.mxu0 %v4871_v32  ;;  %3455 = vmatprep.subr.bf16.mxu1 %v4873_v33  ;;  %v4929_v32 = vcombine.high %v392_v28, %v396_v29  ;;  %v399_v33 = vld [vmem:[%s7250_s1 + $0xbc0] sm:$0xff]  ;;  %v420_v57 = vld [vmem:[%s7250_s1 + $0xc68] sm:$0xff] }
  0xa0   :  { %v4934_v49 = vcombine.low %v399_v33, %v403_v34  ;;  %v424_v3 = vld [vmem:[%s7250_s1 + $0xc88] sm:$0xff]  ;;  %v435_v11 = vld [vmem:[%s7250_s1 + $0xce0] sm:$0xff] }
  0xa1   :  { %v428_v4 = vld [vmem:[%s7250_s1 + $0xca8] sm:$0xff]  ;;  %v439_v18 = vld [vmem:[%s7250_s1 + $0xd00] sm:$0xff] }
  0xa2   :  { %3292 = vmatpush1.bf16.msra.mxu0 %v4870_v42  ;;  %3456 = vmatpush1.bf16.msra.mxu1 %v4872_v53  ;;  %v4928_v42 = vcombine.low %v392_v28, %v396_v29  ;;  %v4935_v53 = vcombine.high %v399_v33, %v403_v34  ;;  %v432_v12 = vld [vmem:[%s7250_s1 + $0xcc8] sm:$0xff]  ;;  %v443_v19 = vld [vmem:[%s7250_s1 + $0xd20] sm:$0xff] }
  0xa3   :  { %3293 = vmatprep.subr.bf16.mxu0 %v4879_v44  ;;  %3457 = vmatprep.subr.bf16.mxu1 %v4881_v45  ;;  %v4937_v44 = vcombine.high %v400_v38, %v404_v39  ;;  %v407_v45 = vld [vmem:[%s7250_s1 + $0xc00] sm:$0xff]  ;;  %v436_v13 = vld [vmem:[%s7250_s1 + $0xce8] sm:$0xff] }
  0xa4   :  { %v4942_v58 = vcombine.low %v407_v45, %v411_v46  ;;  %v440_v20 = vld [vmem:[%s7250_s1 + $0xd08] sm:$0xff]  ;;  %v447_v26 = vld [vmem:[%s7250_s1 + $0xd40] sm:$0xff] }
  0xa5   :  { %v444_v21 = vld [vmem:[%s7250_s1 + $0xd28] sm:$0xff]  ;;  %v451_v27 = vld [vmem:[%s7250_s1 + $0xd60] sm:$0xff] }
  0xa6   :  { %3294 = vmatpush1.bf16.msra.mxu0 %v4878_v50  ;;  %3458 = vmatpush1.bf16.msra.mxu1 %v4880_v51  ;;  %v4936_v50 = vcombine.low %v400_v38, %v404_v39  ;;  %v4943_v51 = vcombine.high %v407_v45, %v411_v46  ;;  %v448_v28 = vld [vmem:[%s7250_s1 + $0xd48] sm:$0xff]  ;;  %v455_v33 = vld [vmem:[%s7250_s1 + $0xd80] sm:$0xff] }
  0xa7   :  { %3295 = vmatprep.subr.bf16.mxu0 %v4887_v52  ;;  %3459 = vmatprep.subr.bf16.mxu1 %v4889_v54  ;;  %v4945_v52 = vcombine.high %v408_v47, %v412_v48  ;;  %v415_v54 = vld [vmem:[%s7250_s1 + $0xc40] sm:$0xff]  ;;  %v452_v29 = vld [vmem:[%s7250_s1 + $0xd68] sm:$0xff] }
  0xa8   :  { %v459_v34 = vld [vmem:[%s7250_s1 + $0xda0] sm:$0xff]  ;;  %v456_v38 = vld [vmem:[%s7250_s1 + $0xd88] sm:$0xff] }
  0xa9   :  { %v460_v39 = vld [vmem:[%s7250_s1 + $0xda8] sm:$0xff]  ;;  %v463_v45 = vld [vmem:[%s7250_s1 + $0xdc0] sm:$0xff] }
  0xaa   :  { %3296 = vmatpush1.bf16.msra.mxu0 %v4886_v60  ;;  %3460 = vmatpush1.bf16.msra.mxu1 %v4888_v61  ;;  %v4944_v60 = vcombine.low %v408_v47, %v412_v48  ;;  %v4951_v61 = vcombine.high %v415_v54, %v419_v55  ;;  %v467_v46 = vld [vmem:[%s7250_s1 + $0xde0] sm:$0xff]  ;;  %v464_v47 = vld [vmem:[%s7250_s1 + $0xdc8] sm:$0xff] }
  0xab   :  { %3297 = vmatprep.subr.bf16.mxu0 %v4895_v62  ;;  %3461 = vmatprep.subr.bf16.mxu1 %v4897_v0  ;;  %v4953_v62 = vcombine.high %v416_v56, %v420_v57  ;;  %v423_v0 = vld [vmem:[%s7250_s1 + $0xc80] sm:$0xff]  ;;  %v468_v48 = vld [vmem:[%s7250_s1 + $0xde8] sm:$0xff] }
  0xae   :  { %3298 = vmatpush1.bf16.msra.mxu0 %v4894_v5  ;;  %3462 = vmatpush1.bf16.msra.mxu1 %v4896_v6  ;;  %v4950_v5 = vcombine.low %v415_v54, %v419_v55  ;;  %v4952_v6 = vcombine.low %v416_v56, %v420_v57  ;;  %v471_v54 = vld [vmem:[%s7250_s1 + $0xe00] sm:$0xff]  ;;  %v472_v56 = vld [vmem:[%s7250_s1 + $0xe08] sm:$0xff] }
  0xaf   :  { %3299 = vmatprep.subr.bf16.mxu0 %v4903_v7  ;;  %3463 = vmatprep.subr.bf16.mxu1 %v4905_v8  ;;  %v4959_v7 = vcombine.high %v423_v0, %v427_v1  ;;  %v4961_v8 = vcombine.high %v424_v3, %v428_v4  ;;  %v475_v55 = vld [vmem:[%s7250_s1 + $0xe20] sm:$0xff]  ;;  %v476_v57 = vld [vmem:[%s7250_s1 + $0xe28] sm:$0xff] }
  0xb2   :  { %3300 = vmatpush1.bf16.msra.mxu0 %v4902_v14  ;;  %3464 = vmatpush1.bf16.msra.mxu1 %v4904_v15  ;;  %v4958_v14 = vcombine.low %v423_v0, %v427_v1  ;;  %v4960_v15 = vcombine.low %v424_v3, %v428_v4  ;;  %v479_v0 = vld [vmem:[%s7250_s1 + $0xe40] sm:$0xff]  ;;  %v480_v3 = vld [vmem:[%s7250_s1 + $0xe48] sm:$0xff] }
  0xb3   :  { %3301 = vmatprep.subr.bf16.mxu0 %v4911_v16  ;;  %3465 = vmatprep.subr.bf16.mxu1 %v4913_v17  ;;  %v4967_v16 = vcombine.high %v431_v10, %v435_v11  ;;  %v4969_v17 = vcombine.high %v432_v12, %v436_v13  ;;  %v483_v1 = vld [vmem:[%s7250_s1 + $0xe60] sm:$0xff]  ;;  %v484_v4 = vld [vmem:[%s7250_s1 + $0xe68] sm:$0xff] }
  0xb6   :  { %3302 = vmatpush1.bf16.msra.mxu0 %v4910_v22  ;;  %3466 = vmatpush1.bf16.msra.mxu1 %v4912_v23  ;;  %v4966_v22 = vcombine.low %v431_v10, %v435_v11  ;;  %v4968_v23 = vcombine.low %v432_v12, %v436_v13  ;;  %v487_v10 = vld [vmem:[%s7250_s1 + $0xe80] sm:$0xff]  ;;  %v488_v12 = vld [vmem:[%s7250_s1 + $0xe88] sm:$0xff] }
  0xb7   :  { %3303 = vmatprep.subr.bf16.mxu0 %v4919_v24  ;;  %3467 = vmatprep.subr.bf16.mxu1 %v4921_v59  ;;  %v4975_v24 = vcombine.high %v439_v18, %v443_v19  ;;  %v4977_v59 = vcombine.high %v440_v20, %v444_v21  ;;  %v491_v11 = vld [vmem:[%s7250_s1 + $0xea0] sm:$0xff]  ;;  %v492_v13 = vld [vmem:[%s7250_s1 + $0xea8] sm:$0xff] }
  0xba   :  { %3304 = vmatpush1.bf16.msra.mxu0 %v4918_v30  ;;  %3468 = vmatpush1.bf16.msra.mxu1 %v4920_v63  ;;  %v4974_v30 = vcombine.low %v439_v18, %v443_v19  ;;  %v4976_v63 = vcombine.low %v440_v20, %v444_v21  ;;  %v495_v18 = vld [vmem:[%s7250_s1 + $0xec0] sm:$0xff]  ;;  %v496_v20 = vld [vmem:[%s7250_s1 + $0xec8] sm:$0xff] }
  0xbb   :  { %3305 = vmatprep.subr.bf16.mxu0 %v4927_v31  ;;  %3469 = vmatprep.subr.bf16.mxu1 %v4929_v32  ;;  %v4983_v31 = vcombine.high %v447_v26, %v451_v27  ;;  %v4985_v32 = vcombine.high %v448_v28, %v452_v29  ;;  %v499_v19 = vld [vmem:[%s7250_s1 + $0xee0] sm:$0xff]  ;;  %v500_v21 = vld [vmem:[%s7250_s1 + $0xee8] sm:$0xff] }
  0xbe   :  { %3306 = vmatpush1.bf16.msra.mxu0 %v4926_v40  ;;  %3470 = vmatpush1.bf16.msra.mxu1 %v4928_v42  ;;  %v4982_v40 = vcombine.low %v447_v26, %v451_v27  ;;  %v4984_v42 = vcombine.low %v448_v28, %v452_v29  ;;  %v503_v26 = vld [vmem:[%s7250_s1 + $0xf00] sm:$0xff]  ;;  %v504_v28 = vld [vmem:[%s7250_s1 + $0xf08] sm:$0xff] }
  0xbf   :  { %3307 = vmatprep.subr.bf16.mxu0 %v4935_v53  ;;  %3471 = vmatprep.subr.bf16.mxu1 %v4937_v44  ;;  %v4991_v53 = vcombine.high %v455_v33, %v459_v34  ;;  %v4993_v44 = vcombine.high %v456_v38, %v460_v39  ;;  %v507_v27 = vld [vmem:[%s7250_s1 + $0xf20] sm:$0xff]  ;;  %v508_v29 = vld [vmem:[%s7250_s1 + $0xf28] sm:$0xff] }
  0xc2   :  { %3308 = vmatpush1.bf16.msra.mxu0 %v4934_v49  ;;  %3472 = vmatpush1.bf16.msra.mxu1 %v4936_v50  ;;  %v4990_v49 = vcombine.low %v455_v33, %v459_v34  ;;  %v4992_v50 = vcombine.low %v456_v38, %v460_v39  ;;  %v511_v33 = vld [vmem:[%s7250_s1 + $0xf40] sm:$0xff]  ;;  %v512_v38 = vld [vmem:[%s7250_s1 + $0xf48] sm:$0xff] }
  0xc3   :  { %3318 = vmatprep.subr.bf16.mxu0 %v4943_v51  ;;  %3482 = vmatprep.subr.bf16.mxu1 %v4945_v52  ;;  %v4999_v51 = vcombine.high %v463_v45, %v467_v46  ;;  %v5001_v52 = vcombine.high %v464_v47, %v468_v48  ;;  %v515_v34 = vld [vmem:[%s7250_s1 + $0xf60] sm:$0xff]  ;;  %v516_v39 = vld [vmem:[%s7250_s1 + $0xf68] sm:$0xff] }
  0xc5   :  { %3310 = vmatmul.mubr.bf16.vlgmr.msra.gmra.mrb[0].mxu0 %v5645_v37  ;;  %3474 = vmatmul.mubr.bf16.vlgmr.msra.gmra.mrb[0].mxu1 %v5645_v37 }
  0xc6   :  { %3319 = vmatpush1.bf16.msra.mxu0 %v4942_v58  ;;  %3483 = vmatpush1.bf16.msra.mxu1 %v4944_v60  ;;  %v4998_v58 = vcombine.low %v463_v45, %v467_v46  ;;  %v5000_v60 = vcombine.low %v464_v47, %v468_v48  ;;  %v519_v45 = vld [vmem:[%s7250_s1 + $0xf80] sm:$0xff]  ;;  %v520_v47 = vld [vmem:[%s7250_s1 + $0xf88] sm:$0xff] }
  0xc7   :  { %3320 = vmatprep.subr.bf16.mxu0 %v4951_v61  ;;  %3484 = vmatprep.subr.bf16.mxu1 %v4953_v62  ;;  %v5007_v61 = vcombine.high %v471_v54, %v475_v55  ;;  %v5009_v62 = vcombine.high %v472_v56, %v476_v57  ;;  %v523_v46 = vld [vmem:[%s7250_s1 + $0xfa0] sm:$0xff]  ;;  %v524_v48 = vld [vmem:[%s7250_s1 + $0xfa8] sm:$0xff] }
  0xc8   :  { %3350 = vmatprep.mubr.bf16.mxu0 %v6039_v2  ;;  %3514 = vmatprep.mubr.bf16.mxu1 %v6039_v2 }
  0xca   :  { %3321 = vmatpush1.bf16.msra.mxu0 %v4950_v5  ;;  %3485 = vmatpush1.bf16.msra.mxu1 %v4952_v6  ;;  %v5006_v5 = vcombine.low %v471_v54, %v475_v55  ;;  %v5008_v6 = vcombine.low %v472_v56, %v476_v57  ;;  %v527_v54 = vld [vmem:[%s7250_s1 + $0xfc0] sm:$0xff]  ;;  %v528_v56 = vld [vmem:[%s7250_s1 + $0xfc8] sm:$0xff] }
  0xcb   :  { %3322 = vmatprep.subr.bf16.mxu0 %v4959_v7  ;;  %3486 = vmatprep.subr.bf16.mxu1 %v4961_v8  ;;  %v5015_v7 = vcombine.high %v479_v0, %v483_v1  ;;  %v5017_v8 = vcombine.high %v480_v3, %v484_v4  ;;  %v531_v55 = vld [vmem:[%s7250_s1 + $0xfe0] sm:$0xff]  ;;  %v532_v57 = vld [vmem:[%s7250_s1 + $0xfe8] sm:$0xff] }
  0xce   :  { %3323 = vmatpush1.bf16.msra.mxu0 %v4958_v14  ;;  %3487 = vmatpush1.bf16.msra.mxu1 %v4960_v15  ;;  %v5014_v14 = vcombine.low %v479_v0, %v483_v1  ;;  %v5016_v15 = vcombine.low %v480_v3, %v484_v4  ;;  %v25_v0 = vld [vmem:[%s7250_s1 + $0x10] sm:$0xff]  ;;  %v26_v3 = vld [vmem:[%s7250_s1 + $0x18] sm:$0xff] }
  0xcf   :  { %3324 = vmatprep.subr.bf16.mxu0 %v4967_v16  ;;  %3488 = vmatprep.subr.bf16.mxu1 %v4969_v17  ;;  %v5023_v16 = vcombine.high %v487_v10, %v491_v11  ;;  %v5025_v17 = vcombine.high %v488_v12, %v492_v13  ;;  %v29_v1 = vld [vmem:[%s7250_s1 + $0x30] sm:$0xff]  ;;  %v30_v4 = vld [vmem:[%s7250_s1 + $0x38] sm:$0xff] }
  0xd2   :  { %3325 = vmatpush1.bf16.msra.mxu0 %v4966_v22  ;;  %3489 = vmatpush1.bf16.msra.mxu1 %v4968_v23  ;;  %v5022_v22 = vcombine.low %v487_v10, %v491_v11  ;;  %v5024_v23 = vcombine.low %v488_v12, %v492_v13  ;;  %v33_v10 = vld [vmem:[%s7250_s1 + $0x50] sm:$0xff]  ;;  %v6227_v12 = vcombine.high %v5645_v37, %v5645_v37  ;;  %v34_v13 = vld [vmem:[%s7250_s1 + $0x58] sm:$0xff] }
  0xd3   :  { %3326 = vmatprep.subr.bf16.mxu0 %v4975_v24  ;;  %3490 = vmatprep.subr.bf16.mxu1 %v4977_v59  ;;  %v5031_v24 = vcombine.high %v495_v18, %v499_v19  ;;  %v5033_v59 = vcombine.high %v496_v20, %v500_v21  ;;  %v37_v11 = vld [vmem:[%s7250_s1 + $0x70] sm:$0xff] }
  0xd6   :  { %3327 = vmatpush1.bf16.msra.mxu0 %v4974_v30  ;;  %3491 = vmatpush1.bf16.msra.mxu1 %v4976_v63  ;;  %v5030_v30 = vcombine.low %v495_v18, %v499_v19  ;;  %v5032_v63 = vcombine.low %v496_v20, %v500_v21  ;;  %v41_v19 = vld [vmem:[%s7250_s1 + $0x90] sm:$0xff]  ;;  %v42_v21 = vld [vmem:[%s7250_s1 + $0x98] sm:$0xff] }
  0xd7   :  { %3328 = vmatprep.subr.bf16.mxu0 %v4983_v31  ;;  %3492 = vmatprep.subr.bf16.mxu1 %v4985_v32  ;;  %v5039_v31 = vcombine.high %v503_v26, %v507_v27  ;;  %v5041_v32 = vcombine.high %v504_v28, %v508_v29  ;;  %v45_v20 = vld [vmem:[%s7250_s1 + $0xb0] sm:$0xff] }
  0xda   :  { %3329 = vmatpush1.bf16.msra.mxu0 %v4982_v40  ;;  %3493 = vmatpush1.bf16.msra.mxu1 %v4984_v42  ;;  %v5038_v40 = vcombine.low %v503_v26, %v507_v27  ;;  %v5040_v42 = vcombine.low %v504_v28, %v508_v29  ;;  %v49_v27 = vld [vmem:[%s7250_s1 + $0xd0] sm:$0xff]  ;;  %v50_v29 = vld [vmem:[%s7250_s1 + $0xd8] sm:$0xff] }
  0xdb   :  { %3330 = vmatprep.subr.bf16.mxu0 %v4991_v53  ;;  %3494 = vmatprep.subr.bf16.mxu1 %v4993_v44  ;;  %v5047_v53 = vcombine.high %v511_v33, %v515_v34  ;;  %v5049_v44 = vcombine.high %v512_v38, %v516_v39  ;;  %v53_v28 = vld [vmem:[%s7250_s1 + $0xf0] sm:$0xff] }
  0xde   :  { %3331 = vmatpush1.bf16.msra.mxu0 %v4990_v49  ;;  %3495 = vmatpush1.bf16.msra.mxu1 %v4992_v50  ;;  %v5046_v49 = vcombine.low %v511_v33, %v515_v34  ;;  %v5048_v50 = vcombine.low %v512_v38, %v516_v39  ;;  %v57_v34 = vld [vmem:[%s7250_s1 + $0x110] sm:$0xff]  ;;  %v62_v39 = vld [vmem:[%s7250_s1 + $0x138] sm:$0xff] }
  0xdf   :  { %3332 = vmatprep.subr.bf16.mxu0 %v4999_v51  ;;  %3496 = vmatprep.subr.bf16.mxu1 %v5001_v52  ;;  %v5055_v51 = vcombine.high %v519_v45, %v523_v46  ;;  %v5057_v52 = vcombine.high %v520_v47, %v524_v48  ;;  %v61_v38 = vld [vmem:[%s7250_s1 + $0x130] sm:$0xff] }
  0xe2   :  { %3333 = vmatpush1.bf16.msra.mxu0 %v4998_v58  ;;  %3497 = vmatpush1.bf16.msra.mxu1 %v5000_v60  ;;  %v5054_v58 = vcombine.low %v519_v45, %v523_v46  ;;  %v5056_v60 = vcombine.low %v520_v47, %v524_v48  ;;  %v65_v45 = vld [vmem:[%s7250_s1 + $0x150] sm:$0xff]  ;;  %v66_v47 = vld [vmem:[%s7250_s1 + $0x158] sm:$0xff] }
  0xe3   :  { %3334 = vmatprep.subr.bf16.mxu0 %v5007_v61  ;;  %3498 = vmatprep.subr.bf16.mxu1 %v5009_v62  ;;  %v5063_v61 = vcombine.high %v527_v54, %v531_v55  ;;  %v5065_v62 = vcombine.high %v528_v56, %v532_v57  ;;  %v69_v46 = vld [vmem:[%s7250_s1 + $0x170] sm:$0xff]  ;;  %v70_v48 = vld [vmem:[%s7250_s1 + $0x178] sm:$0xff] }
  0xe6   :  { %3335 = vmatpush1.bf16.msra.mxu0 %v5006_v5  ;;  %3499 = vmatpush1.bf16.msra.mxu1 %v5008_v6  ;;  %v5062_v5 = vcombine.low %v527_v54, %v531_v55  ;;  %v5064_v6 = vcombine.low %v528_v56, %v532_v57  ;;  %v73_v54 = vld [vmem:[%s7250_s1 + $0x190] sm:$0xff]  ;;  %v74_v56 = vld [vmem:[%s7250_s1 + $0x198] sm:$0xff] }
  0xe7   :  { %3336 = vmatprep.subr.bf16.mxu0 %v5015_v7  ;;  %3500 = vmatprep.subr.bf16.mxu1 %v5017_v8  ;;  %v4563_v7 = vcombine.high %v25_v0, %v29_v1  ;;  %v4565_v8 = vcombine.high %v26_v3, %v30_v4  ;;  %v77_v55 = vld [vmem:[%s7250_s1 + $0x1b0] sm:$0xff]  ;;  %v78_v57 = vld [vmem:[%s7250_s1 + $0x1b8] sm:$0xff] }
  0xea   :  { %3337 = vmatpush1.bf16.msra.mxu0 %v5014_v14  ;;  %3501 = vmatpush1.bf16.msra.mxu1 %v5016_v15  ;;  %v38_v14 = vld [vmem:[%s7250_s1 + $0x78] sm:$0xff]  ;;  %v4562_v15 = vcombine.low %v25_v0, %v29_v1  ;;  %v81_v0 = vld [vmem:[%s7250_s1 + $0x1d0] sm:$0xff] }
  0xeb   :  { %3338 = vmatprep.subr.bf16.mxu0 %v5023_v16  ;;  %3502 = vmatprep.subr.bf16.mxu1 %v5025_v17  ;;  %v4564_v16 = vcombine.low %v26_v3, %v30_v4  ;;  %v4571_v17 = vcombine.high %v33_v10, %v37_v11  ;;  %v4573_v18 = vcombine.high %v34_v13, %v38_v14  ;;  %v85_v1 = vld [vmem:[%s7250_s1 + $0x1f0] sm:$0xff]  ;;  %v82_v3 = vld [vmem:[%s7250_s1 + $0x1d8] sm:$0xff] }
  0xec   :  { %v86_v4 = vld [vmem:[%s7250_s1 + $0x1f8] sm:$0xff] }
  0xee   :  { %3339 = vmatpush1.bf16.msra.mxu0 %v5022_v22  ;;  %3503 = vmatpush1.bf16.msra.mxu1 %v5024_v23  ;;  %v46_v22 = vld [vmem:[%s7250_s1 + $0xb8] sm:$0xff]  ;;  %v4570_v23 = vcombine.low %v33_v10, %v37_v11  ;;  %v89_v10 = vld [vmem:[%s7250_s1 + $0x210] sm:$0xff] }
  0xef   :  { %3340 = vmatprep.subr.bf16.mxu0 %v5031_v24  ;;  %3504 = vmatprep.subr.bf16.mxu1 %v5033_v59  ;;  %v4572_v24 = vcombine.low %v34_v13, %v38_v14  ;;  %v4579_v59 = vcombine.high %v41_v19, %v45_v20  ;;  %v4581_v26 = vcombine.high %v42_v21, %v46_v22  ;;  %v93_v11 = vld [vmem:[%s7250_s1 + $0x230] sm:$0xff]  ;;  %v90_v13 = vld [vmem:[%s7250_s1 + $0x218] sm:$0xff] }
  0xf0   :  { %v94_v14 = vld [vmem:[%s7250_s1 + $0x238] sm:$0xff] }
  0xf2   :  { %3341 = vmatpush1.bf16.msra.mxu0 %v5030_v30  ;;  %3505 = vmatpush1.bf16.msra.mxu1 %v5032_v63  ;;  %v54_v30 = vld [vmem:[%s7250_s1 + $0xf8] sm:$0xff]  ;;  %v4578_v63 = vcombine.low %v41_v19, %v45_v20  ;;  %v97_v19 = vld [vmem:[%s7250_s1 + $0x250] sm:$0xff] }
  0xf3   :  { %3342 = vmatprep.subr.bf16.mxu0 %v5039_v31  ;;  %3506 = vmatprep.subr.bf16.mxu1 %v5041_v32  ;;  %v4580_v31 = vcombine.low %v42_v21, %v46_v22  ;;  %v4587_v32 = vcombine.high %v49_v27, %v53_v28  ;;  %v4589_v33 = vcombine.high %v50_v29, %v54_v30  ;;  %v101_v20 = vld [vmem:[%s7250_s1 + $0x270] sm:$0xff]  ;;  %v98_v21 = vld [vmem:[%s7250_s1 + $0x258] sm:$0xff] }
  0xf4   :  { %v102_v22 = vld [vmem:[%s7250_s1 + $0x278] sm:$0xff] }
  0xf6   :  { %3343 = vmatpush1.bf16.msra.mxu0 %v5038_v40  ;;  %3507 = vmatpush1.bf16.msra.mxu1 %v5040_v42  ;;  %v4586_v40 = vcombine.low %v49_v27, %v53_v28  ;;  %v4588_v42 = vcombine.low %v50_v29, %v54_v30  ;;  %v105_v27 = vld [vmem:[%s7250_s1 + $0x290] sm:$0xff]  ;;  %v106_v29 = vld [vmem:[%s7250_s1 + $0x298] sm:$0xff] }
  0xf7   :  { %3344 = vmatprep.subr.bf16.mxu0 %v5047_v53  ;;  %3508 = vmatprep.subr.bf16.mxu1 %v5049_v44  ;;  %v4595_v53 = vcombine.high %v57_v34, %v61_v38  ;;  %v109_v28 = vld [vmem:[%s7250_s1 + $0x2b0] sm:$0xff]  ;;  %v110_v30 = vld [vmem:[%s7250_s1 + $0x2b8] sm:$0xff] }
  0xfa   :  { %3345 = vmatpush1.bf16.msra.mxu0 %v5046_v49  ;;  %3509 = vmatpush1.bf16.msra.mxu1 %v5048_v50  ;;  %v4594_v49 = vcombine.low %v57_v34, %v61_v38  ;;  %v113_v34 = vld [vmem:[%s7250_s1 + $0x2d0] sm:$0xff] }
  0xfb   :  { %3346 = vmatprep.subr.bf16.mxu0 %v5055_v51  ;;  %3510 = vmatprep.subr.bf16.mxu1 %v5057_v52  ;;  %v4603_v51 = vcombine.high %v65_v45, %v69_v46  ;;  %v4605_v52 = vcombine.high %v66_v47, %v70_v48  ;;  %v117_v38 = vld [vmem:[%s7250_s1 + $0x2f0] sm:$0xff] }
  0xfe   :  { %3347 = vmatpush1.bf16.msra.mxu0 %v5054_v58  ;;  %3511 = vmatpush1.bf16.msra.mxu1 %v5056_v60  ;;  %v4602_v58 = vcombine.low %v65_v45, %v69_v46  ;;  %v4604_v60 = vcombine.low %v66_v47, %v70_v48  ;;  %v121_v45 = vld [vmem:[%s7250_s1 + $0x310] sm:$0xff]  ;;  %v122_v47 = vld [vmem:[%s7250_s1 + $0x318] sm:$0xff] }
  0xff   :  { %3348 = vmatprep.subr.bf16.mxu0 %v5063_v61  ;;  %3512 = vmatprep.subr.bf16.mxu1 %v5065_v62  ;;  %v4611_v61 = vcombine.high %v73_v54, %v77_v55  ;;  %v4613_v62 = vcombine.high %v74_v56, %v78_v57  ;;  %v125_v46 = vld [vmem:[%s7250_s1 + $0x330] sm:$0xff]  ;;  %v126_v48 = vld [vmem:[%s7250_s1 + $0x338] sm:$0xff] }
 0x102   :  { %3349 = vmatpush1.bf16.msra.mxu0 %v5062_v5  ;;  %3513 = vmatpush1.bf16.msra.mxu1 %v5064_v6  ;;  %v4610_v5 = vcombine.low %v73_v54, %v77_v55  ;;  %v4612_v6 = vcombine.low %v74_v56, %v78_v57  ;;  %v129_v54 = vld [vmem:[%s7250_s1 + $0x350] sm:$0xff]  ;;  %v130_v56 = vld [vmem:[%s7250_s1 + $0x358] sm:$0xff] }
 0x103   :  { %3523 = vmatprep.subr.bf16.mxu0 %v4563_v7  ;;  %3687 = vmatprep.subr.bf16.mxu1 %v4565_v8  ;;  %v4619_v7 = vcombine.high %v81_v0, %v85_v1  ;;  %v4621_v8 = vcombine.high %v82_v3, %v86_v4  ;;  %v133_v55 = vld [vmem:[%s7250_s1 + $0x370] sm:$0xff]  ;;  %v134_v57 = vld [vmem:[%s7250_s1 + $0x378] sm:$0xff] }
 0x105   :  { %3351 = vmatmul.mubr.bf16.vlgmr.msra.gmra.mrb[0].mxu0 %v6227_v12  ;;  %3515 = vmatmul.mubr.bf16.vlgmr.msra.gmra.mrb[0].mxu1 %v6227_v12 }
 0x106   :  { %3524 = vmatpush1.bf16.msra.mxu0 %v4562_v15  ;;  %3688 = vmatpush1.bf16.msra.mxu1 %v4564_v16  ;;  %v4618_v15 = vcombine.low %v81_v0, %v85_v1  ;;  %v4620_v16 = vcombine.low %v82_v3, %v86_v4  ;;  %v137_v0 = vld [vmem:[%s7250_s1 + $0x390] sm:$0xff]  ;;  %v138_v3 = vld [vmem:[%s7250_s1 + $0x398] sm:$0xff] }
 0x107   :  { %3525 = vmatprep.subr.bf16.mxu0 %v4571_v17  ;;  %3689 = vmatprep.subr.bf16.mxu1 %v4573_v18  ;;  %v4627_v17 = vcombine.high %v89_v10, %v93_v11  ;;  %v4629_v18 = vcombine.high %v90_v13, %v94_v14  ;;  %v141_v1 = vld [vmem:[%s7250_s1 + $0x3b0] sm:$0xff]  ;;  %v142_v4 = vld [vmem:[%s7250_s1 + $0x3b8] sm:$0xff] }
 0x108   :  { %3555 = vmatprep.mubr.bf16.mxu0 %v5500_v9  ;;  %3719 = vmatprep.mubr.bf16.mxu1 %v5500_v9  ;;  %v58_v9 = vld [vmem:[%s7250_s1 + $0x118] sm:$0xff] }
 0x109   :  { %v4597_v44 = vcombine.high %v58_v9, %v62_v39  ;;  %v4596_v50 = vcombine.low %v58_v9, %v62_v39  ;;  %v114_v9 = vld [vmem:[%s7250_s1 + $0x2d8] sm:$0xff] }
 0x10a   :  { %3526 = vmatpush1.bf16.msra.mxu0 %v4570_v23  ;;  %3690 = vmatpush1.bf16.msra.mxu1 %v4572_v24  ;;  %v4626_v23 = vcombine.low %v89_v10, %v93_v11  ;;  %v4628_v24 = vcombine.low %v90_v13, %v94_v14  ;;  %v118_v39 = vld [vmem:[%s7250_s1 + $0x2f8] sm:$0xff]  ;;  %v145_v10 = vld [vmem:[%s7250_s1 + $0x3d0] sm:$0xff] }
 0x10b   :  { %3527 = vmatprep.subr.bf16.mxu0 %v4579_v59  ;;  %3691 = vmatprep.subr.bf16.mxu1 %v4581_v26  ;;  %v4635_v59 = vcombine.high %v97_v19, %v101_v20  ;;  %v4637_v26 = vcombine.high %v98_v21, %v102_v22  ;;  %v149_v11 = vld [vmem:[%s7250_s1 + $0x3f0] sm:$0xff]  ;;  %v146_v13 = vld [vmem:[%s7250_s1 + $0x3d8] sm:$0xff] }
 0x10c   :  { %v150_v14 = vld [vmem:[%s7250_s1 + $0x3f8] sm:$0xff] }
 0x10e   :  { %3528 = vmatpush1.bf16.msra.mxu0 %v4578_v63  ;;  %3692 = vmatpush1.bf16.msra.mxu1 %v4580_v31  ;;  %v4634_v63 = vcombine.low %v97_v19, %v101_v20  ;;  %v4636_v31 = vcombine.low %v98_v21, %v102_v22  ;;  %v153_v19 = vld [vmem:[%s7250_s1 + $0x410] sm:$0xff]  ;;  %v154_v21 = vld [vmem:[%s7250_s1 + $0x418] sm:$0xff] }
 0x10f   :  { %3529 = vmatprep.subr.bf16.mxu0 %v4587_v32  ;;  %3693 = vmatprep.subr.bf16.mxu1 %v4589_v33  ;;  %v4643_v32 = vcombine.high %v105_v27, %v109_v28  ;;  %v4645_v33 = vcombine.high %v106_v29, %v110_v30  ;;  %v157_v20 = vld [vmem:[%s7250_s1 + $0x430] sm:$0xff]  ;;  %v158_v22 = vld [vmem:[%s7250_s1 + $0x438] sm:$0xff] }
 0x112   :  { %3530 = vmatpush1.bf16.msra.mxu0 %v4586_v40  ;;  %3694 = vmatpush1.bf16.msra.mxu1 %v4588_v42  ;;  %v4642_v40 = vcombine.low %v105_v27, %v109_v28  ;;  %v4644_v42 = vcombine.low %v106_v29, %v110_v30  ;;  %v161_v27 = vld [vmem:[%s7250_s1 + $0x450] sm:$0xff]  ;;  %v162_v29 = vld [vmem:[%s7250_s1 + $0x458] sm:$0xff] }
 0x113   :  { %3531 = vmatprep.subr.bf16.mxu0 %v4595_v53  ;;  %3695 = vmatprep.subr.bf16.mxu1 %v4597_v44  ;;  %v4651_v53 = vcombine.high %v113_v34, %v117_v38  ;;  %v4653_v44 = vcombine.high %v114_v9, %v118_v39  ;;  %v165_v28 = vld [vmem:[%s7250_s1 + $0x470] sm:$0xff]  ;;  %v166_v30 = vld [vmem:[%s7250_s1 + $0x478] sm:$0xff] }
 0x116   :  { %3532 = vmatpush1.bf16.msra.mxu0 %v4594_v49  ;;  %3696 = vmatpush1.bf16.msra.mxu1 %v4596_v50  ;;  %v4650_v49 = vcombine.low %v113_v34, %v117_v38  ;;  %v4652_v50 = vcombine.low %v114_v9, %v118_v39  ;;  %v169_v34 = vld [vmem:[%s7250_s1 + $0x490] sm:$0xff]  ;;  %v170_v9 = vld [vmem:[%s7250_s1 + $0x498] sm:$0xff] }
 0x117   :  { %3533 = vmatprep.subr.bf16.mxu0 %v4603_v51  ;;  %3697 = vmatprep.subr.bf16.mxu1 %v4605_v52  ;;  %v4659_v51 = vcombine.high %v121_v45, %v125_v46  ;;  %v4661_v52 = vcombine.high %v122_v47, %v126_v48  ;;  %v173_v38 = vld [vmem:[%s7250_s1 + $0x4b0] sm:$0xff]  ;;  %v174_v39 = vld [vmem:[%s7250_s1 + $0x4b8] sm:$0xff] }
 0x11a   :  { %3534 = vmatpush1.bf16.msra.mxu0 %v4602_v58  ;;  %3698 = vmatpush1.bf16.msra.mxu1 %v4604_v60  ;;  %v4658_v58 = vcombine.low %v121_v45, %v125_v46  ;;  %v4660_v60 = vcombine.low %v122_v47, %v126_v48  ;;  %v177_v45 = vld [vmem:[%s7250_s1 + $0x4d0] sm:$0xff]  ;;  %v182_v47 = vld [vmem:[%s7250_s1 + $0x4f8] sm:$0xff]  ;;  %v4706_v48 = vcombine.low %v169_v34, %v173_v38 }
 0x11b   :  { %3535 = vmatprep.subr.bf16.mxu0 %v4611_v61  ;;  %3699 = vmatprep.subr.bf16.mxu1 %v4613_v62  ;;  %v4667_v61 = vcombine.high %v129_v54, %v133_v55  ;;  %v4669_v62 = vcombine.high %v130_v56, %v134_v57  ;;  %v181_v46 = vld [vmem:[%s7250_s1 + $0x4f0] sm:$0xff] }
 0x11e   :  { %3536 = vmatpush1.bf16.msra.mxu0 %v4610_v5  ;;  %3700 = vmatpush1.bf16.msra.mxu1 %v4612_v6  ;;  %v4666_v5 = vcombine.low %v129_v54, %v133_v55  ;;  %v4668_v6 = vcombine.low %v130_v56, %v134_v57  ;;  %v189_v54 = vld [vmem:[%s7250_s1 + $0x530] sm:$0xff]  ;;  %v190_v55 = vld [vmem:[%s7250_s1 + $0x538] sm:$0xff]  ;;  %v4714_v56 = vcombine.low %v177_v45, %v181_v46 }
 0x11f   :  { %3537 = vmatprep.subr.bf16.mxu0 %v4619_v7  ;;  %3701 = vmatprep.subr.bf16.mxu1 %v4621_v8  ;;  %v4675_v7 = vcombine.high %v137_v0, %v141_v1  ;;  %v4677_v8 = vcombine.high %v138_v3, %v142_v4 }
 0x122   :  { %3538 = vmatpush1.bf16.msra.mxu0 %v4618_v15  ;;  %3702 = vmatpush1.bf16.msra.mxu1 %v4620_v16  ;;  %v4674_v15 = vcombine.low %v137_v0, %v141_v1  ;;  %v4676_v16 = vcombine.low %v138_v3, %v142_v4  ;;  %v194_v0 = vld [vmem:[%s7250_s1 + $0x558] sm:$0xff] }
 0x123   :  { %3539 = vmatprep.subr.bf16.mxu0 %v4627_v17  ;;  %3703 = vmatprep.subr.bf16.mxu1 %v4629_v18  ;;  %v4683_v17 = vcombine.high %v145_v10, %v149_v11  ;;  %v4685_v18 = vcombine.high %v146_v13, %v150_v14  ;;  %v198_v1 = vld [vmem:[%s7250_s1 + $0x578] sm:$0xff] }
 0x126   :  { %3540 = vmatpush1.bf16.msra.mxu0 %v4626_v23  ;;  %3704 = vmatpush1.bf16.msra.mxu1 %v4628_v24  ;;  %v4682_v23 = vcombine.low %v145_v10, %v149_v11  ;;  %v4684_v24 = vcombine.low %v146_v13, %v150_v14  ;;  %v202_v10 = vld [vmem:[%s7250_s1 + $0x598] sm:$0xff]  ;;  %v4732_v14 = vcombine.low %v194_v0, %v198_v1 }
 0x127   :  { %3541 = vmatprep.subr.bf16.mxu0 %v4635_v59  ;;  %3705 = vmatprep.subr.bf16.mxu1 %v4637_v26  ;;  %v4691_v59 = vcombine.high %v153_v19, %v157_v20  ;;  %v4693_v26 = vcombine.high %v154_v21, %v158_v22  ;;  %v206_v11 = vld [vmem:[%s7250_s1 + $0x5b8] sm:$0xff] }
 0x12a   :  { %3542 = vmatpush1.bf16.msra.mxu0 %v4634_v63  ;;  %3706 = vmatpush1.bf16.msra.mxu1 %v4636_v31  ;;  %v4690_v63 = vcombine.low %v153_v19, %v157_v20  ;;  %v4692_v31 = vcombine.low %v154_v21, %v158_v22  ;;  %v210_v19 = vld [vmem:[%s7250_s1 + $0x5d8] sm:$0xff]  ;;  %v4740_v22 = vcombine.low %v202_v10, %v206_v11 }
 0x12b   :  { %3543 = vmatprep.subr.bf16.mxu0 %v4643_v32  ;;  %3707 = vmatprep.subr.bf16.mxu1 %v4645_v33  ;;  %v4699_v32 = vcombine.high %v161_v27, %v165_v28  ;;  %v4701_v33 = vcombine.high %v162_v29, %v166_v30  ;;  %v214_v20 = vld [vmem:[%s7250_s1 + $0x5f8] sm:$0xff] }
 0x12e   :  { %3544 = vmatpush1.bf16.msra.mxu0 %v4642_v40  ;;  %3708 = vmatpush1.bf16.msra.mxu1 %v4644_v42  ;;  %v4698_v40 = vcombine.low %v161_v27, %v165_v28  ;;  %v4700_v42 = vcombine.low %v162_v29, %v166_v30  ;;  %v218_v27 = vld [vmem:[%s7250_s1 + $0x618] sm:$0xff]  ;;  %v4748_v30 = vcombine.low %v210_v19, %v214_v20 }
 0x12f   :  { %3545 = vmatprep.subr.bf16.mxu0 %v4651_v53  ;;  %3709 = vmatprep.subr.bf16.mxu1 %v4653_v44  ;;  %v4707_v53 = vcombine.high %v169_v34, %v173_v38  ;;  %v4709_v44 = vcombine.high %v170_v9, %v174_v39  ;;  %v222_v28 = vld [vmem:[%s7250_s1 + $0x638] sm:$0xff] }
 0x130   :  { %v226_v34 = vld [vmem:[%s7250_s1 + $0x658] sm:$0xff] }
 0x131   :  { %v230_v38 = vld [vmem:[%s7250_s1 + $0x678] sm:$0xff] }
 0x132   :  { %3546 = vmatpush1.bf16.msra.mxu0 %v4650_v49  ;;  %3710 = vmatpush1.bf16.msra.mxu1 %v4652_v50  ;;  %v4708_v49 = vcombine.low %v170_v9, %v174_v39  ;;  %v4715_v50 = vcombine.high %v177_v45, %v181_v46  ;;  %v4756_v39 = vcombine.low %v218_v27, %v222_v28  ;;  %v234_v45 = vld [vmem:[%s7250_s1 + $0x698] sm:$0xff] }
 0x133   :  { %3547 = vmatprep.subr.bf16.mxu0 %v4659_v51  ;;  %3711 = vmatprep.subr.bf16.mxu1 %v4661_v52  ;;  %v185_v52 = vld [vmem:[%s7250_s1 + $0x510] sm:$0xff]  ;;  %v238_v46 = vld [vmem:[%s7250_s1 + $0x6b8] sm:$0xff] }
 0x134   :  { %v4722_v3 = vcombine.low %v185_v52, %v189_v54 }
 0x136   :  { %3548 = vmatpush1.bf16.msra.mxu0 %v4658_v58  ;;  %3712 = vmatpush1.bf16.msra.mxu1 %v4660_v60  ;;  %v4723_v58 = vcombine.high %v185_v52, %v189_v54  ;;  %v242_v52 = vld [vmem:[%s7250_s1 + $0x6d8] sm:$0xff] }
 0x137   :  { %3549 = vmatprep.subr.bf16.mxu0 %v4667_v61  ;;  %3713 = vmatprep.subr.bf16.mxu1 %v4669_v62  ;;  %v193_v61 = vld [vmem:[%s7250_s1 + $0x550] sm:$0xff]  ;;  %v246_v54 = vld [vmem:[%s7250_s1 + $0x6f8] sm:$0xff] }
 0x138   :  { %v197_v62 = vld [vmem:[%s7250_s1 + $0x570] sm:$0xff] }
 0x139   :  { %v4730_v13 = vcombine.low %v193_v61, %v197_v62 }
 0x13a   :  { %3550 = vmatpush1.bf16.msra.mxu0 %v4666_v5  ;;  %3714 = vmatpush1.bf16.msra.mxu1 %v4668_v6  ;;  %v4731_v5 = vcombine.high %v193_v61, %v197_v62  ;;  %v4733_v6 = vcombine.high %v194_v0, %v198_v1  ;;  %v250_v61 = vld [vmem:[%s7250_s1 + $0x718] sm:$0xff]  ;;  %v4780_v1 = vcombine.low %v242_v52, %v246_v54 }
 0x13b   :  { %3551 = vmatprep.subr.bf16.mxu0 %v4675_v7  ;;  %3715 = vmatprep.subr.bf16.mxu1 %v4677_v8  ;;  %v201_v7 = vld [vmem:[%s7250_s1 + $0x590] sm:$0xff]  ;;  %v254_v62 = vld [vmem:[%s7250_s1 + $0x738] sm:$0xff] }
 0x13c   :  { %v205_v8 = vld [vmem:[%s7250_s1 + $0x5b0] sm:$0xff] }
 0x13d   :  { %v4738_v21 = vcombine.low %v201_v7, %v205_v8 }
 0x13e   :  { %3552 = vmatpush1.bf16.msra.mxu0 %v4674_v15  ;;  %3716 = vmatpush1.bf16.msra.mxu1 %v4676_v16  ;;  %v4739_v15 = vcombine.high %v201_v7, %v205_v8  ;;  %v4741_v16 = vcombine.high %v202_v10, %v206_v11  ;;  %v258_v7 = vld [vmem:[%s7250_s1 + $0x758] sm:$0xff]  ;;  %v4788_v11 = vcombine.low %v250_v61, %v254_v62 }
 0x13f   :  { %3553 = vmatprep.subr.bf16.mxu0 %v4683_v17  ;;  %3717 = vmatprep.subr.bf16.mxu1 %v4685_v18  ;;  %v209_v17 = vld [vmem:[%s7250_s1 + $0x5d0] sm:$0xff]  ;;  %v262_v8 = vld [vmem:[%s7250_s1 + $0x778] sm:$0xff] }
 0x140   :  { %v213_v18 = vld [vmem:[%s7250_s1 + $0x5f0] sm:$0xff] }
 0x141   :  { %v4746_v29 = vcombine.low %v209_v17, %v213_v18 }
 0x142   :  { %3554 = vmatpush1.bf16.msra.mxu0 %v4682_v23  ;;  %3718 = vmatpush1.bf16.msra.mxu1 %v4684_v24  ;;  %v4747_v23 = vcombine.high %v209_v17, %v213_v18  ;;  %v4749_v24 = vcombine.high %v210_v19, %v214_v20  ;;  %v266_v17 = vld [vmem:[%s7250_s1 + $0x798] sm:$0xff]  ;;  %v4796_v20 = vcombine.low %v258_v7, %v262_v8 }
 0x143   :  { %3564 = vmatprep.subr.bf16.mxu0 %v4691_v59  ;;  %3728 = vmatprep.subr.bf16.mxu1 %v4693_v26  ;;  %v217_v59 = vld [vmem:[%s7250_s1 + $0x610] sm:$0xff]  ;;  %v270_v18 = vld [vmem:[%s7250_s1 + $0x7b8] sm:$0xff] }
 0x144   :  { %v221_v26 = vld [vmem:[%s7250_s1 + $0x630] sm:$0xff] }
 0x145   :  { %3556 = vmatmul.mubr.bf16.vlgmr.msra.gmra.mrb[4].mxu0 %v5617_v25  ;;  %3720 = vmatmul.mubr.bf16.vlgmr.msra.gmra.mrb[4].mxu1 %v5617_v25  ;;  %v178_v25 = vld [vmem:[%s7250_s1 + $0x4d8] sm:$0xff]  ;;  %v4754_v9 = vcombine.low %v217_v59, %v221_v26 }
 0x146   :  { %3565 = vmatpush1.bf16.msra.mxu0 %v4690_v63  ;;  %3729 = vmatpush1.bf16.msra.mxu1 %v4692_v31  ;;  %v4717_v51 = vcombine.high %v178_v25, %v182_v47  ;;  %v4716_v57 = vcombine.low %v178_v25, %v182_v47  ;;  %v4755_v63 = vcombine.high %v217_v59, %v221_v26  ;;  %v274_v59 = vld [vmem:[%s7250_s1 + $0x7d8] sm:$0xff] }
 0x147   :  { %3566 = vmatprep.subr.bf16.mxu0 %v4699_v32  ;;  %3730 = vmatprep.subr.bf16.mxu1 %v4701_v33  ;;  %v4757_v31 = vcombine.high %v218_v27, %v222_v28  ;;  %v225_v32 = vld [vmem:[%s7250_s1 + $0x650] sm:$0xff]  ;;  %v4764_v47 = vcombine.low %v226_v34, %v230_v38  ;;  %v278_v26 = vld [vmem:[%s7250_s1 + $0x7f8] sm:$0xff]  ;;  %v4804_v28 = vcombine.low %v266_v17, %v270_v18 }
 0x148   :  { %3596 = vmatprep.mubr.bf16.mxu0 %v5639_v35  ;;  %3760 = vmatprep.mubr.bf16.mxu1 %v5639_v35  ;;  %v186_v35 = vld [vmem:[%s7250_s1 + $0x518] sm:$0xff]  ;;  %v229_v33 = vld [vmem:[%s7250_s1 + $0x670] sm:$0xff] }
 0x149   :  { %v4725_v60 = vcombine.high %v186_v35, %v190_v55  ;;  %v4724_v4 = vcombine.low %v186_v35, %v190_v55  ;;  %v4762_v25 = vcombine.low %v225_v32, %v229_v33  ;;  %v4772_v55 = vcombine.low %v234_v45, %v238_v46 }
 0x14a   :  { %3567 = vmatpush1.bf16.msra.mxu0 %v4698_v40  ;;  %3731 = vmatpush1.bf16.msra.mxu1 %v4700_v42  ;;  %v4763_v40 = vcombine.high %v225_v32, %v229_v33  ;;  %v4765_v42 = vcombine.high %v226_v34, %v230_v38  ;;  %v282_v32 = vld [vmem:[%s7250_s1 + $0x818] sm:$0xff]  ;;  %v4812_v38 = vcombine.low %v274_v59, %v278_v26 }
 0x14b   :  { %3568 = vmatprep.subr.bf16.mxu0 %v4707_v53  ;;  %3732 = vmatprep.subr.bf16.mxu1 %v4709_v44  ;;  %v233_v53 = vld [vmem:[%s7250_s1 + $0x690] sm:$0xff]  ;;  %v286_v33 = vld [vmem:[%s7250_s1 + $0x838] sm:$0xff] }
 0x14c   :  { %v237_v44 = vld [vmem:[%s7250_s1 + $0x6b0] sm:$0xff] }
 0x14d   :  { %v4770_v35 = vcombine.low %v233_v53, %v237_v44 }
 0x14e   :  { %3569 = vmatpush1.bf16.msra.mxu0 %v4706_v48  ;;  %3733 = vmatpush1.bf16.msra.mxu1 %v4708_v49  ;;  %v4771_v48 = vcombine.high %v233_v53, %v237_v44  ;;  %v4773_v49 = vcombine.high %v234_v45, %v238_v46  ;;  %v290_v53 = vld [vmem:[%s7250_s1 + $0x858] sm:$0xff]  ;;  %v4820_v46 = vcombine.low %v282_v32, %v286_v33 }
 0x14f   :  { %3570 = vmatprep.subr.bf16.mxu0 %v4715_v50  ;;  %3734 = vmatprep.subr.bf16.mxu1 %v4717_v51  ;;  %v241_v50 = vld [vmem:[%s7250_s1 + $0x6d0] sm:$0xff]  ;;  %v294_v44 = vld [vmem:[%s7250_s1 + $0x878] sm:$0xff] }
 0x150   :  { %v245_v51 = vld [vmem:[%s7250_s1 + $0x6f0] sm:$0xff] }
 0x151   :  { %v4778_v0 = vcombine.low %v241_v50, %v245_v51 }
 0x152   :  { %3571 = vmatpush1.bf16.msra.mxu0 %v4714_v56  ;;  %3735 = vmatpush1.bf16.msra.mxu1 %v4716_v57  ;;  %v4779_v56 = vcombine.high %v241_v50, %v245_v51  ;;  %v4781_v57 = vcombine.high %v242_v52, %v246_v54  ;;  %v298_v50 = vld [vmem:[%s7250_s1 + $0x898] sm:$0xff]  ;;  %v4828_v54 = vcombine.low %v290_v53, %v294_v44 }
 0x153   :  { %3572 = vmatprep.subr.bf16.mxu0 %v4723_v58  ;;  %3736 = vmatprep.subr.bf16.mxu1 %v4725_v60  ;;  %v249_v58 = vld [vmem:[%s7250_s1 + $0x710] sm:$0xff]  ;;  %v302_v51 = vld [vmem:[%s7250_s1 + $0x8b8] sm:$0xff] }
 0x154   :  { %v253_v60 = vld [vmem:[%s7250_s1 + $0x730] sm:$0xff] }
 0x155   :  { %v4786_v10 = vcombine.low %v249_v58, %v253_v60 }
 0x156   :  { %3573 = vmatpush1.bf16.msra.mxu0 %v4722_v3  ;;  %3737 = vmatpush1.bf16.msra.mxu1 %v4724_v4  ;;  %v4787_v3 = vcombine.high %v249_v58, %v253_v60  ;;  %v4789_v4 = vcombine.high %v250_v61, %v254_v62  ;;  %v310_v58 = vld [vmem:[%s7250_s1 + $0x8f8] sm:$0xff]  ;;  %v4836_v61 = vcombine.low %v298_v50, %v302_v51 }
 0x157   :  { %3574 = vmatprep.subr.bf16.mxu0 %v4731_v5  ;;  %3738 = vmatprep.subr.bf16.mxu1 %v4733_v6  ;;  %v257_v5 = vld [vmem:[%s7250_s1 + $0x750] sm:$0xff] }
 0x158   :  { %v261_v6 = vld [vmem:[%s7250_s1 + $0x770] sm:$0xff] }
 0x159   :  { %v4794_v19 = vcombine.low %v257_v5, %v261_v6 }
 0x15a   :  { %3575 = vmatpush1.bf16.msra.mxu0 %v4730_v13  ;;  %3739 = vmatpush1.bf16.msra.mxu1 %v4732_v14  ;;  %v4795_v13 = vcombine.high %v257_v5, %v261_v6  ;;  %v4797_v14 = vcombine.high %v258_v7, %v262_v8 }
 0x15b   :  { %3576 = vmatprep.subr.bf16.mxu0 %v4739_v15  ;;  %3740 = vmatprep.subr.bf16.mxu1 %v4741_v16  ;;  %v265_v15 = vld [vmem:[%s7250_s1 + $0x790] sm:$0xff] }
 0x15c   :  { %v269_v16 = vld [vmem:[%s7250_s1 + $0x7b0] sm:$0xff] }
 0x15d   :  { %v4802_v27 = vcombine.low %v265_v15, %v269_v16 }
 0x15e   :  { %3577 = vmatpush1.bf16.msra.mxu0 %v4738_v21  ;;  %3741 = vmatpush1.bf16.msra.mxu1 %v4740_v22  ;;  %v4803_v21 = vcombine.high %v265_v15, %v269_v16  ;;  %v4805_v22 = vcombine.high %v266_v17, %v270_v18 }
 0x15f   :  { %3578 = vmatprep.subr.bf16.mxu0 %v4747_v23  ;;  %3742 = vmatprep.subr.bf16.mxu1 %v4749_v24  ;;  %v273_v23 = vld [vmem:[%s7250_s1 + $0x7d0] sm:$0xff] }
 0x160   :  { %v277_v24 = vld [vmem:[%s7250_s1 + $0x7f0] sm:$0xff] }
 0x161   :  { %v4810_v34 = vcombine.low %v273_v23, %v277_v24 }
 0x162   :  { %3579 = vmatpush1.bf16.msra.mxu0 %v4746_v29  ;;  %3743 = vmatpush1.bf16.msra.mxu1 %v4748_v30  ;;  %v4811_v29 = vcombine.high %v273_v23, %v277_v24  ;;  %v4813_v30 = vcombine.high %v274_v59, %v278_v26 }
 0x163   :  { %3580 = vmatprep.subr.bf16.mxu0 %v4755_v63  ;;  %3744 = vmatprep.subr.bf16.mxu1 %v4757_v31  ;;  %v281_v63 = vld [vmem:[%s7250_s1 + $0x810] sm:$0xff] }
 0x164   :  { %v285_v31 = vld [vmem:[%s7250_s1 + $0x830] sm:$0xff] }
 0x165   :  { %v4818_v45 = vcombine.low %v281_v63, %v285_v31 }
 0x166   :  { %3581 = vmatpush1.bf16.msra.mxu0 %v4754_v9  ;;  %3745 = vmatpush1.bf16.msra.mxu1 %v4756_v39  ;;  %v4819_v9 = vcombine.high %v281_v63, %v285_v31  ;;  %v4821_v39 = vcombine.high %v282_v32, %v286_v33 }
 0x167   :  { %3582 = vmatprep.subr.bf16.mxu0 %v4763_v40  ;;  %3746 = vmatprep.subr.bf16.mxu1 %v4765_v42  ;;  %v289_v40 = vld [vmem:[%s7250_s1 + $0x850] sm:$0xff] }
 0x168   :  { %v293_v42 = vld [vmem:[%s7250_s1 + $0x870] sm:$0xff] }
 0x169   :  { %v4826_v52 = vcombine.low %v289_v40, %v293_v42 }
 0x16a   :  { %3583 = vmatpush1.bf16.msra.mxu0 %v4762_v25  ;;  %3747 = vmatpush1.bf16.msra.mxu1 %v4764_v47  ;;  %v4827_v25 = vcombine.high %v289_v40, %v293_v42  ;;  %v4829_v47 = vcombine.high %v290_v53, %v294_v44 }
 0x16b   :  { %3584 = vmatprep.subr.bf16.mxu0 %v4771_v48  ;;  %3748 = vmatprep.subr.bf16.mxu1 %v4773_v49  ;;  %v297_v48 = vld [vmem:[%s7250_s1 + $0x890] sm:$0xff] }
 0x16c   :  { %v301_v49 = vld [vmem:[%s7250_s1 + $0x8b0] sm:$0xff] }
 0x16d   :  { %v4834_v60 = vcombine.low %v297_v48, %v301_v49 }
 0x16e   :  { %3585 = vmatpush1.bf16.msra.mxu0 %v4770_v35  ;;  %3749 = vmatpush1.bf16.msra.mxu1 %v4772_v55  ;;  %v4835_v35 = vcombine.high %v297_v48, %v301_v49  ;;  %v4837_v55 = vcombine.high %v298_v50, %v302_v51 }
 0x16f   :  { %3586 = vmatprep.subr.bf16.mxu0 %v4779_v56  ;;  %3750 = vmatprep.subr.bf16.mxu1 %v4781_v57  ;;  %v305_v56 = vld [vmem:[%s7250_s1 + $0x8d0] sm:$0xff] }
 0x170   :  { %v309_v57 = vld [vmem:[%s7250_s1 + $0x8f0] sm:$0xff] }
 0x171   :  { %v4843_v62 = vcombine.high %v305_v56, %v309_v57  ;;  %v4842_v5 = vcombine.low %v305_v56, %v309_v57 }
 0x172   :  { %3587 = vmatpush1.bf16.msra.mxu0 %v4778_v0  ;;  %3751 = vmatpush1.bf16.msra.mxu1 %v4780_v1  ;;  %v313_v1 = vld [vmem:[%s7250_s1 + $0x910] sm:$0xff] }
 0x173   :  { %3588 = vmatprep.subr.bf16.mxu0 %v4787_v3  ;;  %3752 = vmatprep.subr.bf16.mxu1 %v4789_v4  ;;  %v317_v3 = vld [vmem:[%s7250_s1 + $0x930] sm:$0xff]  ;;  %v318_v4 = vld [vmem:[%s7250_s1 + $0x938] sm:$0xff] }
 0x174   :  { %v4851_v7 = vcombine.high %v313_v1, %v317_v3  ;;  %v4850_v15 = vcombine.low %v313_v1, %v317_v3 }
 0x176   :  { %3589 = vmatpush1.bf16.msra.mxu0 %v4786_v10  ;;  %3753 = vmatpush1.bf16.msra.mxu1 %v4788_v11  ;;  %v321_v10 = vld [vmem:[%s7250_s1 + $0x950] sm:$0xff] }
 0x177   :  { %3590 = vmatprep.subr.bf16.mxu0 %v4795_v13  ;;  %3754 = vmatprep.subr.bf16.mxu1 %v4797_v14  ;;  %v325_v11 = vld [vmem:[%s7250_s1 + $0x970] sm:$0xff]  ;;  %v322_v13 = vld [vmem:[%s7250_s1 + $0x958] sm:$0xff] }
 0x178   :  { %v326_v14 = vld [vmem:[%s7250_s1 + $0x978] sm:$0xff]  ;;  %v4859_v17 = vcombine.high %v321_v10, %v325_v11  ;;  %v4858_v23 = vcombine.low %v321_v10, %v325_v11 }
 0x179   :  { %v4861_v18 = vcombine.high %v322_v13, %v326_v14  ;;  %v4860_v24 = vcombine.low %v322_v13, %v326_v14 }
 0x17a   :  { %3591 = vmatpush1.bf16.msra.mxu0 %v4794_v19  ;;  %3755 = vmatpush1.bf16.msra.mxu1 %v4796_v20  ;;  %v329_v19 = vld [vmem:[%s7250_s1 + $0x990] sm:$0xff] }
 0x17b   :  { %3592 = vmatprep.subr.bf16.mxu0 %v4803_v21  ;;  %3756 = vmatprep.subr.bf16.mxu1 %v4805_v22  ;;  %v333_v20 = vld [vmem:[%s7250_s1 + $0x9b0] sm:$0xff]  ;;  %v330_v21 = vld [vmem:[%s7250_s1 + $0x998] sm:$0xff] }
 0x17c   :  { %v334_v22 = vld [vmem:[%s7250_s1 + $0x9b8] sm:$0xff]  ;;  %v4867_v59 = vcombine.high %v329_v19, %v333_v20  ;;  %v4866_v63 = vcombine.low %v329_v19, %v333_v20 }
 0x17d   :  { %v4869_v26 = vcombine.high %v330_v21, %v334_v22  ;;  %v4868_v31 = vcombine.low %v330_v21, %v334_v22 }
 0x17e   :  { %3593 = vmatpush1.bf16.msra.mxu0 %v4802_v27  ;;  %3757 = vmatpush1.bf16.msra.mxu1 %v4804_v28  ;;  %v337_v27 = vld [vmem:[%s7250_s1 + $0x9d0] sm:$0xff] }
 0x17f   :  { %3594 = vmatprep.subr.bf16.mxu0 %v4811_v29  ;;  %3758 = vmatprep.subr.bf16.mxu1 %v4813_v30  ;;  %v341_v28 = vld [vmem:[%s7250_s1 + $0x9f0] sm:$0xff]  ;;  %v338_v29 = vld [vmem:[%s7250_s1 + $0x9d8] sm:$0xff] }
 0x180   :  { %v342_v30 = vld [vmem:[%s7250_s1 + $0x9f8] sm:$0xff]  ;;  %v4875_v32 = vcombine.high %v337_v27, %v341_v28  ;;  %v4874_v40 = vcombine.low %v337_v27, %v341_v28 }
 0x181   :  { %v4877_v33 = vcombine.high %v338_v29, %v342_v30  ;;  %v4876_v42 = vcombine.low %v338_v29, %v342_v30 }
 0x182   :  { %3595 = vmatpush1.bf16.msra.mxu0 %v4810_v34  ;;  %3759 = vmatpush1.bf16.msra.mxu1 %v4812_v38  ;;  %v345_v34 = vld [vmem:[%s7250_s1 + $0xa10] sm:$0xff] }
 0x183   :  { %3605 = vmatprep.subr.bf16.mxu0 %v4819_v9  ;;  %3769 = vmatprep.subr.bf16.mxu1 %v4821_v39  ;;  %v349_v38 = vld [vmem:[%s7250_s1 + $0xa30] sm:$0xff]  ;;  %v346_v9 = vld [vmem:[%s7250_s1 + $0xa18] sm:$0xff] }
 0x184   :  { %v350_v39 = vld [vmem:[%s7250_s1 + $0xa38] sm:$0xff]  ;;  %v4883_v53 = vcombine.high %v345_v34, %v349_v38  ;;  %v4882_v48 = vcombine.low %v345_v34, %v349_v38 }
 0x185   :  { %3597 = vmatmul.mubr.bf16.vlgmr.msra.gmra.mrb[4].mxu0 %v5830_v41  ;;  %3761 = vmatmul.mubr.bf16.vlgmr.msra.gmra.mrb[4].mxu1 %v5830_v41  ;;  %v306_v41 = vld [vmem:[%s7250_s1 + $0x8d8] sm:$0xff]  ;;  %v4885_v44 = vcombine.high %v346_v9, %v350_v39  ;;  %v4884_v49 = vcombine.low %v346_v9, %v350_v39 }
 0x186   :  { %3606 = vmatpush1.bf16.msra.mxu0 %v4818_v45  ;;  %3770 = vmatpush1.bf16.msra.mxu1 %v4820_v46  ;;  %v4845_v0 = vcombine.high %v306_v41, %v310_v58  ;;  %v4844_v6 = vcombine.low %v306_v41, %v310_v58  ;;  %v353_v45 = vld [vmem:[%s7250_s1 + $0xa50] sm:$0xff] }
 0x187   :  { %3607 = vmatprep.subr.bf16.mxu0 %v4827_v25  ;;  %3771 = vmatprep.subr.bf16.mxu1 %v4829_v47  ;;  %v357_v46 = vld [vmem:[%s7250_s1 + $0xa70] sm:$0xff]  ;;  %v354_v25 = vld [vmem:[%s7250_s1 + $0xa58] sm:$0xff] }
 0x188   :  { %3637 = vmatprep.mubr.bf16.mxu0 %v5642_v36  ;;  %3801 = vmatprep.mubr.bf16.mxu1 %v5642_v36  ;;  %v314_v36 = vld [vmem:[%s7250_s1 + $0x918] sm:$0xff]  ;;  %v4891_v50 = vcombine.high %v353_v45, %v357_v46  ;;  %v4890_v56 = vcombine.low %v353_v45, %v357_v46 }
 0x189   :  { %v4853_v8 = vcombine.high %v314_v36, %v318_v4  ;;  %v4852_v16 = vcombine.low %v314_v36, %v318_v4  ;;  %v358_v47 = vld [vmem:[%s7250_s1 + $0xa78] sm:$0xff] }
 0x18a   :  { %3608 = vmatpush1.bf16.msra.mxu0 %v4826_v52  ;;  %3772 = vmatpush1.bf16.msra.mxu1 %v4828_v54  ;;  %v4893_v51 = vcombine.high %v354_v25, %v358_v47  ;;  %v361_v52 = vld [vmem:[%s7250_s1 + $0xa90] sm:$0xff]  ;;  %v4892_v57 = vcombine.low %v354_v25, %v358_v47 }
 0x18b   :  { %3609 = vmatprep.subr.bf16.mxu0 %v4835_v35  ;;  %3773 = vmatprep.subr.bf16.mxu1 %v4837_v55  ;;  %v365_v54 = vld [vmem:[%s7250_s1 + $0xab0] sm:$0xff]  ;;  %v362_v35 = vld [vmem:[%s7250_s1 + $0xa98] sm:$0xff] }
 0x18c   :  { %v366_v55 = vld [vmem:[%s7250_s1 + $0xab8] sm:$0xff]  ;;  %v4899_v41 = vcombine.high %v361_v52, %v365_v54  ;;  %v4898_v1 = vcombine.low %v361_v52, %v365_v54 }
 0x18d   :  { %v4901_v58 = vcombine.high %v362_v35, %v366_v55  ;;  %v4900_v3 = vcombine.low %v362_v35, %v366_v55 }
 0x18e   :  { %3610 = vmatpush1.bf16.msra.mxu0 %v4834_v60  ;;  %3774 = vmatpush1.bf16.msra.mxu1 %v4836_v61  ;;  %v369_v60 = vld [vmem:[%s7250_s1 + $0xad0] sm:$0xff] }
 0x18f   :  { %3611 = vmatprep.subr.bf16.mxu0 %v4843_v62  ;;  %3775 = vmatprep.subr.bf16.mxu1 %v4845_v0  ;;  %v373_v61 = vld [vmem:[%s7250_s1 + $0xaf0] sm:$0xff]  ;;  %v370_v62 = vld [vmem:[%s7250_s1 + $0xad8] sm:$0xff] }
 0x190   :  { %v374_v0 = vld [vmem:[%s7250_s1 + $0xaf8] sm:$0xff]  ;;  %v4907_v36 = vcombine.high %v369_v60, %v373_v61  ;;  %v4906_v10 = vcombine.low %v369_v60, %v373_v61 }
 0x191   :  { %v4909_v4 = vcombine.high %v370_v62, %v374_v0  ;;  %v4908_v11 = vcombine.low %v370_v62, %v374_v0 }
 0x192   :  { %3612 = vmatpush1.bf16.msra.mxu0 %v4842_v5  ;;  %3776 = vmatpush1.bf16.msra.mxu1 %v4844_v6  ;;  %v377_v5 = vld [vmem:[%s7250_s1 + $0xb10] sm:$0xff] }
 0x193   :  { %3613 = vmatprep.subr.bf16.mxu0 %v4851_v7  ;;  %3777 = vmatprep.subr.bf16.mxu1 %v4853_v8  ;;  %v381_v6 = vld [vmem:[%s7250_s1 + $0xb30] sm:$0xff]  ;;  %v378_v7 = vld [vmem:[%s7250_s1 + $0xb18] sm:$0xff] }
 0x194   :  { %v382_v8 = vld [vmem:[%s7250_s1 + $0xb38] sm:$0xff]  ;;  %v4915_v13 = vcombine.high %v377_v5, %v381_v6  ;;  %v4914_v19 = vcombine.low %v377_v5, %v381_v6 }
 0x195   :  { %v4917_v14 = vcombine.high %v378_v7, %v382_v8  ;;  %v4916_v20 = vcombine.low %v378_v7, %v382_v8  ;;  %v441_v8 = vld [vmem:[%s7250_s1 + $0xd10] sm:$0xff] }
 0x196   :  { %3614 = vmatpush1.bf16.msra.mxu0 %v4850_v15  ;;  %3778 = vmatpush1.bf16.msra.mxu1 %v4852_v16  ;;  %v385_v15 = vld [vmem:[%s7250_s1 + $0xb50] sm:$0xff] }
 0x197   :  { %3615 = vmatprep.subr.bf16.mxu0 %v4859_v17  ;;  %3779 = vmatprep.subr.bf16.mxu1 %v4861_v18  ;;  %v389_v16 = vld [vmem:[%s7250_s1 + $0xb70] sm:$0xff]  ;;  %v386_v17 = vld [vmem:[%s7250_s1 + $0xb58] sm:$0xff] }
 0x198   :  { %v390_v18 = vld [vmem:[%s7250_s1 + $0xb78] sm:$0xff]  ;;  %v4923_v21 = vcombine.high %v385_v15, %v389_v16  ;;  %v4922_v27 = vcombine.low %v385_v15, %v389_v16 }
 0x199   :  { %v4925_v22 = vcombine.high %v386_v17, %v390_v18  ;;  %v4924_v28 = vcombine.low %v386_v17, %v390_v18  ;;  %v449_v17 = vld [vmem:[%s7250_s1 + $0xd50] sm:$0xff] }
 0x19a   :  { %3616 = vmatpush1.bf16.msra.mxu0 %v4858_v23  ;;  %3780 = vmatpush1.bf16.msra.mxu1 %v4860_v24  ;;  %v393_v23 = vld [vmem:[%s7250_s1 + $0xb90] sm:$0xff] }
 0x19b   :  { %3617 = vmatprep.subr.bf16.mxu0 %v4867_v59  ;;  %3781 = vmatprep.subr.bf16.mxu1 %v4869_v26  ;;  %v397_v24 = vld [vmem:[%s7250_s1 + $0xbb0] sm:$0xff]  ;;  %v394_v59 = vld [vmem:[%s7250_s1 + $0xb98] sm:$0xff] }
 0x19c   :  { %v398_v26 = vld [vmem:[%s7250_s1 + $0xbb8] sm:$0xff]  ;;  %v4931_v29 = vcombine.high %v393_v23, %v397_v24  ;;  %v4930_v34 = vcombine.low %v393_v23, %v397_v24  ;;  %v453_v18 = vld [vmem:[%s7250_s1 + $0xd70] sm:$0xff] }
 0x19d   :  { %v4933_v30 = vcombine.high %v394_v59, %v398_v26  ;;  %v4932_v38 = vcombine.low %v394_v59, %v398_v26  ;;  %v4987_v23 = vcombine.high %v449_v17, %v453_v18  ;;  %v457_v59 = vld [vmem:[%s7250_s1 + $0xd90] sm:$0xff] }
 0x19e   :  { %3618 = vmatpush1.bf16.msra.mxu0 %v4866_v63  ;;  %3782 = vmatpush1.bf16.msra.mxu1 %v4868_v31  ;;  %v401_v63 = vld [vmem:[%s7250_s1 + $0xbd0] sm:$0xff] }
 0x19f   :  { %3619 = vmatprep.subr.bf16.mxu0 %v4875_v32  ;;  %3783 = vmatprep.subr.bf16.mxu1 %v4877_v33  ;;  %v405_v31 = vld [vmem:[%s7250_s1 + $0xbf0] sm:$0xff]  ;;  %v402_v32 = vld [vmem:[%s7250_s1 + $0xbd8] sm:$0xff] }
 0x1a0   :  { %v406_v33 = vld [vmem:[%s7250_s1 + $0xbf8] sm:$0xff]  ;;  %v4939_v9 = vcombine.high %v401_v63, %v405_v31  ;;  %v4938_v45 = vcombine.low %v401_v63, %v405_v31  ;;  %v461_v26 = vld [vmem:[%s7250_s1 + $0xdb0] sm:$0xff] }
 0x1a1   :  { %v4941_v39 = vcombine.high %v402_v32, %v406_v33  ;;  %v4940_v46 = vcombine.low %v402_v32, %v406_v33  ;;  %v4995_v63 = vcombine.high %v457_v59, %v461_v26  ;;  %v465_v33 = vld [vmem:[%s7250_s1 + $0xdd0] sm:$0xff] }
 0x1a2   :  { %3620 = vmatpush1.bf16.msra.mxu0 %v4874_v40  ;;  %3784 = vmatpush1.bf16.msra.mxu1 %v4876_v42  ;;  %v409_v40 = vld [vmem:[%s7250_s1 + $0xc10] sm:$0xff] }
 0x1a3   :  { %3621 = vmatprep.subr.bf16.mxu0 %v4883_v53  ;;  %3785 = vmatprep.subr.bf16.mxu1 %v4885_v44  ;;  %v413_v42 = vld [vmem:[%s7250_s1 + $0xc30] sm:$0xff]  ;;  %v410_v53 = vld [vmem:[%s7250_s1 + $0xc18] sm:$0xff] }
 0x1a4   :  { %v414_v44 = vld [vmem:[%s7250_s1 + $0xc38] sm:$0xff]  ;;  %v4947_v25 = vcombine.high %v409_v40, %v413_v42  ;;  %v4946_v52 = vcombine.low %v409_v40, %v413_v42 }
 0x1a5   :  { %v4949_v47 = vcombine.high %v410_v53, %v414_v44  ;;  %v4948_v54 = vcombine.low %v410_v53, %v414_v44  ;;  %v470_v40 = vld [vmem:[%s7250_s1 + $0xdf8] sm:$0xff]  ;;  %v4994_v44 = vcombine.low %v457_v59, %v461_v26 }
 0x1a6   :  { %3622 = vmatpush1.bf16.msra.mxu0 %v4882_v48  ;;  %3786 = vmatpush1.bf16.msra.mxu1 %v4884_v49  ;;  %v417_v48 = vld [vmem:[%s7250_s1 + $0xc50] sm:$0xff] }
 0x1a7   :  { %3623 = vmatprep.subr.bf16.mxu0 %v4891_v50  ;;  %3787 = vmatprep.subr.bf16.mxu1 %v4893_v51  ;;  %v421_v49 = vld [vmem:[%s7250_s1 + $0xc70] sm:$0xff]  ;;  %v418_v50 = vld [vmem:[%s7250_s1 + $0xc58] sm:$0xff] }
 0x1a8   :  { %v422_v51 = vld [vmem:[%s7250_s1 + $0xc78] sm:$0xff]  ;;  %v4955_v35 = vcombine.high %v417_v48, %v421_v49  ;;  %v4954_v60 = vcombine.low %v417_v48, %v421_v49 }
 0x1a9   :  { %v4957_v55 = vcombine.high %v418_v50, %v422_v51  ;;  %v4956_v61 = vcombine.low %v418_v50, %v422_v51  ;;  %v473_v50 = vld [vmem:[%s7250_s1 + $0xe10] sm:$0xff] }
 0x1aa   :  { %3624 = vmatpush1.bf16.msra.mxu0 %v4890_v56  ;;  %3788 = vmatpush1.bf16.msra.mxu1 %v4892_v57  ;;  %v425_v56 = vld [vmem:[%s7250_s1 + $0xc90] sm:$0xff] }
 0x1ab   :  { %3625 = vmatprep.subr.bf16.mxu0 %v4899_v41  ;;  %3789 = vmatprep.subr.bf16.mxu1 %v4901_v58  ;;  %v429_v57 = vld [vmem:[%s7250_s1 + $0xcb0] sm:$0xff]  ;;  %v426_v41 = vld [vmem:[%s7250_s1 + $0xc98] sm:$0xff] }
 0x1ac   :  { %v430_v58 = vld [vmem:[%s7250_s1 + $0xcb8] sm:$0xff]  ;;  %v4963_v62 = vcombine.high %v425_v56, %v429_v57  ;;  %v477_v51 = vld [vmem:[%s7250_s1 + $0xe30] sm:$0xff] }
 0x1ad   :  { %v4965_v0 = vcombine.high %v426_v41, %v430_v58  ;;  %v4964_v5 = vcombine.low %v426_v41, %v430_v58  ;;  %v481_v41 = vld [vmem:[%s7250_s1 + $0xe50] sm:$0xff] }
 0x1ae   :  { %3626 = vmatpush1.bf16.msra.mxu0 %v4898_v1  ;;  %3790 = vmatpush1.bf16.msra.mxu1 %v4900_v3  ;;  %v433_v1 = vld [vmem:[%s7250_s1 + $0xcd0] sm:$0xff] }
 0x1af   :  { %3627 = vmatprep.subr.bf16.mxu0 %v4907_v36  ;;  %3791 = vmatprep.subr.bf16.mxu1 %v4909_v4  ;;  %v437_v3 = vld [vmem:[%s7250_s1 + $0xcf0] sm:$0xff]  ;;  %v438_v36 = vld [vmem:[%s7250_s1 + $0xcf8] sm:$0xff]  ;;  %v4962_v4 = vcombine.low %v425_v56, %v429_v57  ;;  %v5011_v56 = vcombine.high %v473_v50, %v477_v51 }
 0x1b0   :  { %v4971_v6 = vcombine.high %v433_v1, %v437_v3  ;;  %v485_v58 = vld [vmem:[%s7250_s1 + $0xe70] sm:$0xff] }
 0x1b2   :  { %3628 = vmatpush1.bf16.msra.mxu0 %v4906_v10  ;;  %3792 = vmatpush1.bf16.msra.mxu1 %v4908_v11  ;;  %v445_v10 = vld [vmem:[%s7250_s1 + $0xd30] sm:$0xff]  ;;  %v446_v11 = vld [vmem:[%s7250_s1 + $0xd38] sm:$0xff] }
 0x1b3   :  { %3629 = vmatprep.subr.bf16.mxu0 %v4915_v13  ;;  %3793 = vmatprep.subr.bf16.mxu1 %v4917_v14  ;;  %v4970_v13 = vcombine.low %v433_v1, %v437_v3  ;;  %v4979_v15 = vcombine.high %v441_v8, %v445_v10  ;;  %v5019_v1 = vcombine.high %v481_v41, %v485_v58 }
 0x1b6   :  { %3630 = vmatpush1.bf16.msra.mxu0 %v4914_v19  ;;  %3794 = vmatpush1.bf16.msra.mxu1 %v4916_v20  ;;  %v450_v19 = vld [vmem:[%s7250_s1 + $0xd58] sm:$0xff] }
 0x1b7   :  { %3631 = vmatprep.subr.bf16.mxu0 %v4923_v21  ;;  %3795 = vmatprep.subr.bf16.mxu1 %v4925_v22  ;;  %v454_v20 = vld [vmem:[%s7250_s1 + $0xd78] sm:$0xff]  ;;  %v4978_v21 = vcombine.low %v441_v8, %v445_v10 }
 0x1b8   :  { %v4989_v24 = vcombine.high %v450_v19, %v454_v20 }
 0x1ba   :  { %3632 = vmatpush1.bf16.msra.mxu0 %v4922_v27  ;;  %3796 = vmatpush1.bf16.msra.mxu1 %v4924_v28  ;;  %v458_v27 = vld [vmem:[%s7250_s1 + $0xd98] sm:$0xff] }
 0x1bb   :  { %3633 = vmatprep.subr.bf16.mxu0 %v4931_v29  ;;  %3797 = vmatprep.subr.bf16.mxu1 %v4933_v30  ;;  %v462_v28 = vld [vmem:[%s7250_s1 + $0xdb8] sm:$0xff]  ;;  %v4986_v29 = vcombine.low %v449_v17, %v453_v18  ;;  %v4988_v30 = vcombine.low %v450_v19, %v454_v20  ;;  %v505_v19 = vld [vmem:[%s7250_s1 + $0xf10] sm:$0xff] }
 0x1bc   :  { %v4997_v32 = vcombine.high %v458_v27, %v462_v28  ;;  %v509_v20 = vld [vmem:[%s7250_s1 + $0xf30] sm:$0xff] }
 0x1bd   :  { %v5043_v59 = vcombine.high %v505_v19, %v509_v20 }
 0x1be   :  { %3634 = vmatpush1.bf16.msra.mxu0 %v4930_v34  ;;  %3798 = vmatpush1.bf16.msra.mxu1 %v4932_v38  ;;  %v469_v34 = vld [vmem:[%s7250_s1 + $0xdf0] sm:$0xff] }
 0x1bf   :  { %3635 = vmatprep.subr.bf16.mxu0 %v4939_v9  ;;  %3799 = vmatprep.subr.bf16.mxu1 %v4941_v39  ;;  %v466_v39 = vld [vmem:[%s7250_s1 + $0xdd8] sm:$0xff] }
 0x1c0   :  { %v5005_v49 = vcombine.high %v466_v39, %v470_v40 }
 0x1c2   :  { %3636 = vmatpush1.bf16.msra.mxu0 %v4938_v45  ;;  %3800 = vmatpush1.bf16.msra.mxu1 %v4940_v46 }
 0x1c3   :  { %3646 = vmatprep.subr.bf16.mxu0 %v4947_v25  ;;  %3810 = vmatprep.subr.bf16.mxu1 %v4949_v47  ;;  %v4996_v25 = vcombine.low %v458_v27, %v462_v28  ;;  %v5003_v47 = vcombine.high %v465_v33, %v469_v34  ;;  %v513_v27 = vld [vmem:[%s7250_s1 + $0xf50] sm:$0xff] }
 0x1c4   :  { %v517_v28 = vld [vmem:[%s7250_s1 + $0xf70] sm:$0xff] }
 0x1c5   :  { %3638 = vmatmul.mubr.bf16.vlgmr.msra.gmra.mrb[4].mxu0 %v5645_v37  ;;  %3802 = vmatmul.mubr.bf16.vlgmr.msra.gmra.mrb[4].mxu1 %v5645_v37  ;;  %v434_v37 = vld [vmem:[%s7250_s1 + $0xcd8] sm:$0xff] }
 0x1c6   :  { %3647 = vmatpush1.bf16.msra.mxu0 %v4946_v52  ;;  %3811 = vmatpush1.bf16.msra.mxu1 %v4948_v54  ;;  %v4973_v7 = vcombine.high %v434_v37, %v438_v36  ;;  %v4972_v14 = vcombine.low %v434_v37, %v438_v36  ;;  %v474_v52 = vld [vmem:[%s7250_s1 + $0xe18] sm:$0xff]  ;;  %v489_v37 = vld [vmem:[%s7250_s1 + $0xe90] sm:$0xff] }
 0x1c7   :  { %3648 = vmatprep.subr.bf16.mxu0 %v4955_v35  ;;  %3812 = vmatprep.subr.bf16.mxu1 %v4957_v55  ;;  %v478_v54 = vld [vmem:[%s7250_s1 + $0xe38] sm:$0xff]  ;;  %v5002_v35 = vcombine.low %v465_v33, %v469_v34  ;;  %v5004_v55 = vcombine.low %v466_v39, %v470_v40  ;;  %v493_v36 = vld [vmem:[%s7250_s1 + $0xeb0] sm:$0xff]  ;;  %v5051_v33 = vcombine.high %v513_v27, %v517_v28 }
 0x1c8   :  { %3678 = vmatprep.mubr.bf16.mxu0 %v6039_v2  ;;  %3842 = vmatprep.mubr.bf16.mxu1 %v6039_v2  ;;  %v442_v2 = vld [vmem:[%s7250_s1 + $0xd18] sm:$0xff]  ;;  %v5013_v57 = vcombine.high %v474_v52, %v478_v54  ;;  %v5027_v8 = vcombine.high %v489_v37, %v493_v36  ;;  %v521_v39 = vld [vmem:[%s7250_s1 + $0xf90] sm:$0xff] }
 0x1c9   :  { %v4981_v16 = vcombine.high %v442_v2, %v446_v11  ;;  %v4980_v22 = vcombine.low %v442_v2, %v446_v11  ;;  %v497_v2 = vld [vmem:[%s7250_s1 + $0xed0] sm:$0xff] }
 0x1ca   :  { %3649 = vmatpush1.bf16.msra.mxu0 %v4954_v60  ;;  %3813 = vmatpush1.bf16.msra.mxu1 %v4956_v61  ;;  %v482_v60 = vld [vmem:[%s7250_s1 + $0xe58] sm:$0xff]  ;;  %v501_v11 = vld [vmem:[%s7250_s1 + $0xef0] sm:$0xff] }
 0x1cb   :  { %3650 = vmatprep.subr.bf16.mxu0 %v4963_v62  ;;  %3814 = vmatprep.subr.bf16.mxu1 %v4965_v0  ;;  %v486_v61 = vld [vmem:[%s7250_s1 + $0xe78] sm:$0xff]  ;;  %v5010_v62 = vcombine.low %v473_v50, %v477_v51  ;;  %v5012_v0 = vcombine.low %v474_v52, %v478_v54  ;;  %v5035_v17 = vcombine.high %v497_v2, %v501_v11  ;;  %v525_v40 = vld [vmem:[%s7250_s1 + $0xfb0] sm:$0xff] }
 0x1cc   :  { %v5021_v3 = vcombine.high %v482_v60, %v486_v61  ;;  %v529_v51 = vld [vmem:[%s7250_s1 + $0xfd0] sm:$0xff] }
 0x1cd   :  { %v533_v52 = vld [vmem:[%s7250_s1 + $0xff0] sm:$0xff] }
 0x1ce   :  { %3651 = vmatpush1.bf16.msra.mxu0 %v4962_v4  ;;  %3815 = vmatpush1.bf16.msra.mxu1 %v4964_v5  ;;  %v490_v4 = vld [vmem:[%s7250_s1 + $0xe98] sm:$0xff] }
 0x1cf   :  { %3652 = vmatprep.subr.bf16.mxu0 %v4971_v6  ;;  %3816 = vmatprep.subr.bf16.mxu1 %v4973_v7  ;;  %v494_v5 = vld [vmem:[%s7250_s1 + $0xeb8] sm:$0xff]  ;;  %v5018_v6 = vcombine.low %v481_v41, %v485_v58  ;;  %v5020_v7 = vcombine.low %v482_v60, %v486_v61  ;;  %v5067_v58 = vcombine.high %v529_v51, %v533_v52 }
 0x1d0   :  { %v5029_v10 = vcombine.high %v490_v4, %v494_v5 }
 0x1d2   :  { %3653 = vmatpush1.bf16.msra.mxu0 %v4970_v13  ;;  %3817 = vmatpush1.bf16.msra.mxu1 %v4972_v14  ;;  %v498_v13 = vld [vmem:[%s7250_s1 + $0xed8] sm:$0xff] }
 0x1d3   :  { %3654 = vmatprep.subr.bf16.mxu0 %v4979_v15  ;;  %3818 = vmatprep.subr.bf16.mxu1 %v4981_v16  ;;  %v502_v14 = vld [vmem:[%s7250_s1 + $0xef8] sm:$0xff]  ;;  %v5026_v15 = vcombine.low %v489_v37, %v493_v36  ;;  %v5028_v16 = vcombine.low %v490_v4, %v494_v5  ;;  %v5262_v37 = vld [vmem:[%s7252_s3 + $0xc0] sm:$0xff]   ;;  %v5265_v5 = vld [vmem:[%s7252_s3 + $0x48] sm:$0xff]  }
 0x1d4   :  { %v5037_v18 = vcombine.high %v498_v13, %v502_v14 }
 0x1d6   :  { %3655 = vmatpush1.bf16.msra.mxu0 %v4978_v21  ;;  %3819 = vmatpush1.bf16.msra.mxu1 %v4980_v22  ;;  %v506_v21 = vld [vmem:[%s7250_s1 + $0xf18] sm:$0xff] }
 0x1d7   :  { %3656 = vmatprep.subr.bf16.mxu0 %v4987_v23  ;;  %3820 = vmatprep.subr.bf16.mxu1 %v4989_v24  ;;  %v510_v22 = vld [vmem:[%s7250_s1 + $0xf38] sm:$0xff]  ;;  %v5034_v23 = vcombine.low %v497_v2, %v501_v11  ;;  %v5036_v24 = vcombine.low %v498_v13, %v502_v14  ;;  %v5268_v2 = vld [vmem:[%s7252_s3 + $0x88] sm:$0xff]   ;;  %v5269_v11 = vld [vmem:[%s7252_s3 + $0x50] sm:$0xff]  }
 0x1d8   :  { %v6887_v31 = vpop.f32.mrb[0].mxu0  ;;  %v6895_v38 = vpop.f32.mrb[0].mxu1  ;;  %v5045_v26 = vcombine.high %v506_v21, %v510_v22  ;;  %v5271_v13 = vld [vmem:[%s7252_s3 + $0x10] sm:$0xff]  }
 0x1d9   :  { %v6897_v9 = vpop.f32.mrb[1].mxu0  ;;  %v6905_v42 = vpop.f32.mrb[1].mxu1  ;;  %v5272_v14 = vld [vmem:[%s7252_s3 + $0x90] sm:$0xff]  }
 0x1da   :  { %v3356_v53 = vpop.f32.mrb[2].mxu0  ;;  %3657 = vmatpush1.bf16.msra.mxu0 %v4986_v29  ;;  %v3520_v45 = vpop.f32.mrb[2].mxu1  ;;  %3821 = vmatpush1.bf16.msra.mxu1 %v4988_v30  ;;  %v514_v29 = vld [vmem:[%s7250_s1 + $0xf58] sm:$0xff] }
 0x1db   :  { %v3357_v46 = vpop.f32.mrb[3].mxu0  ;;  %3658 = vmatprep.subr.bf16.mxu0 %v4995_v63  ;;  %v3521_v48 = vpop.f32.mrb[3].mxu1  ;;  %3822 = vmatprep.subr.bf16.mxu1 %v4997_v32  ;;  %v518_v30 = vld [vmem:[%s7250_s1 + $0xf78] sm:$0xff]  ;;  %v5042_v63 = vcombine.low %v505_v19, %v509_v20  ;;  %v5044_v32 = vcombine.low %v506_v21, %v510_v22  ;;  %v543_v53 = vsub.s32 1, %v5447_v43  ;;  %v5277_v19 = vld [vmem:[%s7252_s3 + $0x60] sm:$0xff]   ;;  %v539_v22 = vsub.s32 0, %v5447_v43 }
 0x1dc   :  { %v5053_v34 = vcombine.high %v514_v29, %v518_v30  ;;  %v526_v45 = vld [vmem:[%s7250_s1 + $0xfb8] sm:$0xff]  ;;  %v6995_v46 = vld [vmem:[%s7251_s2] sm:$0xff]  ;;  %v5052_v48 = vcombine.low %v514_v29, %v518_v30  ;;  %v5284_v29 = vld [vmem:[%s7252_s3 + $0xa8] sm:$0xff]  }
 0x1dd   :  { %v544_v54 = vrot.slane %v6995_v46, %v543_v53  ;;  %v5278_v20 = vld [vmem:[%s7252_s3 + $0xe0] sm:$0xff]   ;;  %v5285_v30 = vld [vmem:[%s7252_s3 + $0x70] sm:$0xff]  }
 0x1de   :  { %3659 = vmatpush1.bf16.msra.mxu0 %v4994_v44  ;;  %3823 = vmatpush1.bf16.msra.mxu1 %v4996_v25  ;;  %v522_v44 = vld [vmem:[%s7250_s1 + $0xf98] sm:$0xff]  ;;  %v551_v25 = vsub.s32 3, %v5447_v43  ;;  %v5279_v21 = vld [vmem:[%s7252_s3 + $0x20] sm:$0xff]  }
 0x1df   :  { %3660 = vmatprep.subr.bf16.mxu0 %v5003_v47  ;;  %3824 = vmatprep.subr.bf16.mxu1 %v5005_v49  ;;  %v5050_v47 = vcombine.low %v513_v27, %v517_v28  ;;  %v5059_v49 = vcombine.high %v521_v39, %v525_v40  ;;  %v5061_v50 = vcombine.high %v522_v44, %v526_v45  ;;  %v5283_v27 = vld [vmem:[%s7252_s3 + $0x28] sm:$0xff]  }
 0x1e0   :  { %v5060_v41 = vcombine.low %v522_v44, %v526_v45  ;;  %v5202_v61 = vadd.f32 %v6897_v9, %v544_v54  ;;  %v5263_v9 = vld [vmem:[%s7252_s3] sm:$0xff]   ;;  %v540_v28 = vrot.slane %v6995_v46, %v539_v22  ;;  %v5290_v44 = vld [vmem:[%s7252_s3 + $0xf8] sm:$0xff]   ;;  %v5349_v54 = vmov 0  }
 0x1e2   :  { %3661 = vmatpush1.bf16.msra.mxu0 %v5002_v35  ;;  %3825 = vmatpush1.bf16.msra.mxu1 %v5004_v55  ;;  %v530_v35 = vld [vmem:[%s7250_s1 + $0xfd8] sm:$0xff]  ;;  %v3852_v36 = vmax.f32 %v5202_v61, 0.0 }
 0x1e3   :  { %3662 = vmatprep.subr.bf16.mxu0 %v5011_v56  ;;  %3826 = vmatprep.subr.bf16.mxu1 %v5013_v57  ;;  %v534_v55 = vld [vmem:[%s7250_s1 + $0xff8] sm:$0xff]  ;;  %v552_v56 = vrot.slane %v6995_v46, %v551_v25  ;;  %v5058_v57 = vcombine.low %v521_v39, %v525_v40  ;;  %v5288_v39 = vld [vmem:[%s7252_s3 + $0xb0] sm:$0xff]  }
 0x1e4   :  { %v5069_v60 = vcombine.high %v530_v35, %v534_v55  ;;  %v5289_v40 = vld [vmem:[%s7252_s3 + $0x78] sm:$0xff]  }
 0x1e5   :  { %v5292_v25 = vld [vmem:[%s7252_s3 + $0xb8] sm:$0xff]  }
 0x1e6   :  { %3663 = vmatpush1.bf16.msra.mxu0 %v5010_v62  ;;  %3827 = vmatpush1.bf16.msra.mxu1 %v5012_v0  ;;  %v5204_v62 = vadd.f32 %v6905_v42, %v552_v56  ;;  %v5066_v0 = vcombine.low %v529_v51, %v533_v52  ;;  %v5264_v42 = vld [vmem:[%s7252_s3 + $0x80] sm:$0xff]   ;;  %v5303_v51 = vld [vmem:[%s7252_s3 + $0x148] sm:$0xff]   ;;  %v5306_v56 = vld [vmem:[%s7252_s3 + $0x150] sm:$0xff]  }
 0x1e7   :  { %3664 = vmatprep.subr.bf16.mxu0 %v5019_v1  ;;  %3828 = vmatprep.subr.bf16.mxu1 %v5021_v3  ;;  %v5068_v1 = vcombine.low %v530_v35, %v534_v55  ;;  %v5261_v3 = vld [vmem:[%s7252_s3 + $0x40] sm:$0xff]   ;;  %v5304_v35 = vld [vmem:[%s7252_s3 + $0x108] sm:$0xff]   ;;  %v5296_v61 = vld [vmem:[%s7252_s3 + $0x198] sm:$0xff]  }
 0x1e8   :  { %v3854_v4 = vmax.f32 %v5204_v62, 0.0  ;;  %v5294_v55 = vld [vmem:[%s7252_s3 + $0x188] sm:$0xff]   ;;  %v5312_v62 = vld [vmem:[%s7252_s3 + $0x160] sm:$0xff]  }
 0x1ea   :  { %3665 = vmatpush1.bf16.msra.mxu0 %v5018_v6  ;;  %3829 = vmatpush1.bf16.msra.mxu1 %v5020_v7  ;;  %v3860_v6 = vpack.c.bf16 %v3852_v36, %v3852_v36  ;;  %v5266_v7 = vld [vmem:[%s7252_s3 + $0xc8] sm:$0xff]  }
 0x1eb   :  { %3666 = vmatprep.subr.bf16.mxu0 %v5027_v8  ;;  %3830 = vmatprep.subr.bf16.mxu1 %v5029_v10  ;;  %v3862_v8 = vpack.c.bf16 %v3854_v4, %v3854_v4  ;;  %v5267_v10 = vld [vmem:[%s7252_s3 + $0x8] sm:$0xff]   ;;  %v5299_v4 = vld [vmem:[%s7252_s3 + $0x1b0] sm:$0xff]  }
 0x1ec   :  { %v5298_v36 = vld [vmem:[%s7252_s3 + $0x1a8] sm:$0xff]  }
 0x1ee   :  { %3667 = vmatpush1.bf16.msra.mxu0 %v5026_v15  ;;  %3831 = vmatpush1.bf16.msra.mxu1 %v5028_v16  ;;  %v5273_v15 = vld [vmem:[%s7252_s3 + $0x58] sm:$0xff]  }
 0x1ef   :  { %3668 = vmatprep.subr.bf16.mxu0 %v5035_v17  ;;  %3832 = vmatprep.subr.bf16.mxu1 %v5037_v18  ;;  %v5274_v16 = vld [vmem:[%s7252_s3 + $0xd8] sm:$0xff]  }
 0x1f0   :  { %v5275_v17 = vld [vmem:[%s7252_s3 + $0x18] sm:$0xff]  }
 0x1f1   :  { %v5276_v18 = vld [vmem:[%s7252_s3 + $0x98] sm:$0xff]  }
 0x1f2   :  { %3669 = vmatpush1.bf16.msra.mxu0 %v5034_v23  ;;  %3833 = vmatpush1.bf16.msra.mxu1 %v5036_v24  ;;  %v5280_v23 = vld [vmem:[%s7252_s3 + $0xa0] sm:$0xff]   ;;  %v5281_v24 = vld [vmem:[%s7252_s3 + $0x68] sm:$0xff]  }
 0x1f3   :  { %3670 = vmatprep.subr.bf16.mxu0 %v5043_v59  ;;  %3834 = vmatprep.subr.bf16.mxu1 %v5045_v26  ;;  %v547_v59 = vsub.s32 2, %v5447_v43  ;;  %v5282_v26 = vld [vmem:[%s7252_s3 + $0xe8] sm:$0xff]  }
 0x1f6   :  { %3671 = vmatpush1.bf16.msra.mxu0 %v5042_v63  ;;  %3835 = vmatpush1.bf16.msra.mxu1 %v5044_v32  ;;  %v548_v63 = vrot.slane %v6995_v46, %v547_v59  ;;  %v5286_v32 = vld [vmem:[%s7252_s3 + $0xf0] sm:$0xff]  }
 0x1f7   :  { %3672 = vmatprep.subr.bf16.mxu0 %v5051_v33  ;;  %3836 = vmatprep.subr.bf16.mxu1 %v5053_v34  ;;  %v5287_v33 = vld [vmem:[%s7252_s3 + $0x30] sm:$0xff]   ;;  %v5201_v34 = vadd.f32 %v6887_v31, %v540_v28  ;;  %v5291_v31 = vld [vmem:[%s7252_s3 + $0x38] sm:$0xff]  }
 0x1f8   :  { %v5203_v53 = vadd.f32 %v6895_v38, %v548_v63  ;;  %v5300_v38 = vld [vmem:[%s7252_s3 + $0x140] sm:$0xff]  }
 0x1f9   :  { %v3851_v45 = vmax.f32 %v5201_v34, 0.0 }
 0x1fa   :  { %3673 = vmatpush1.bf16.msra.mxu0 %v5050_v47  ;;  %3837 = vmatpush1.bf16.msra.mxu1 %v5052_v48  ;;  %v3853_v47 = vmax.f32 %v5203_v53, 0.0  ;;  %v5301_v48 = vld [vmem:[%s7252_s3 + $0x100] sm:$0xff]  }
 0x1fb   :  { %3674 = vmatprep.subr.bf16.mxu0 %v5059_v49  ;;  %3838 = vmatprep.subr.bf16.mxu1 %v5061_v50  ;;  %v3859_v49 = vpack.c.bf16 %v3851_v45, %v3851_v45  ;;  %v5293_v50 = vld [vmem:[%s7252_s3 + $0x180] sm:$0xff]  }
 0x1fc   :  { %v3861_v52 = vpack.c.bf16 %v3853_v47, %v3853_v47 }
 0x1fe   :  { %3675 = vmatpush1.bf16.msra.mxu0 %v5058_v57  ;;  %3839 = vmatpush1.bf16.msra.mxu1 %v5060_v41  ;;  %v5307_v57 = vld [vmem:[%s7252_s3 + $0x110] sm:$0xff]  }
 0x1ff   :  { %3676 = vmatprep.subr.bf16.mxu0 %v5067_v58  ;;  %3840 = vmatprep.subr.bf16.mxu1 %v5069_v60  ;;  %v5295_v41 = vld [vmem:[%s7252_s3 + $0x190] sm:$0xff]   ;;  %v5309_v58 = vld [vmem:[%s7252_s3 + $0x158] sm:$0xff]  }
 0x200   :  { %v5310_v60 = vld [vmem:[%s7252_s3 + $0x118] sm:$0xff]  }
 0x202   :  { %3677 = vmatpush1.bf16.msra.mxu0 %v5066_v0  ;;  %3841 = vmatpush1.bf16.msra.mxu1 %v5068_v1  ;;  %v5313_v0 = vld [vmem:[%s7252_s3 + $0x120] sm:$0xff]  }
 0x203   :  { %5135 = vmatprep.subr.bf16.mxu0 %v5261_v3  ;;  %5157 = vmatprep.subr.bf16.mxu1 %v5262_v37  ;;  %v5297_v1 = vld [vmem:[%s7252_s3 + $0x1a0] sm:$0xff]   ;;  %v5315_v3 = vld [vmem:[%s7252_s3 + $0x168] sm:$0xff]  }
 0x204   :  { %v5316_v37 = vld [vmem:[%s7252_s3 + $0x128] sm:$0xff]  }
 0x205   :  { %3679 = vmatmul.mubr.bf16.vlgmr.msra.gmra.mrb[4].mxu0 %v6227_v12  ;;  %3843 = vmatmul.mubr.bf16.vlgmr.msra.gmra.mrb[4].mxu1 %v6227_v12  ;;  %v5270_v12 = vld [vmem:[%s7252_s3 + $0xd0] sm:$0xff]  }
 0x206   :  { %5136 = vmatpush3.bf16.msra.mxu0 %v5263_v9  ;;  %4414 = vmatprep.mubr.bf16.mxu0 %v3860_v6  ;;  %v5302_v9 = vld [vmem:[%s7252_s3 + $0x1b8] sm:$0xff]   ;;  %v5311_v6 = vld [vmem:[%s7252_s3 + $0x1d0] sm:$0xff]  }
 0x207   :  { %5158 = vmatpush3.bf16.msra.mxu1 %v5264_v42  ;;  %4454 = vmatprep.mubr.bf16.mxu1 %v3862_v8  ;;  %v5305_v42 = vld [vmem:[%s7252_s3 + $0x1c0] sm:$0xff]  }
 0x208   :  { %5137 = vmatprep.subr.bf16.mxu0 %v5265_v5  ;;  %5159 = vmatprep.subr.bf16.mxu1 %v5266_v7  ;;  %v5308_v5 = vld [vmem:[%s7252_s3 + $0x1c8] sm:$0xff]   ;;  %v5314_v7 = vld [vmem:[%s7252_s3 + $0x1d8] sm:$0xff]   ;;  %v5317_v8 = vld [vmem:[%s7252_s3 + $0x1e0] sm:$0xff]  }
 0x20a   :  { %5138 = vmatpush3.bf16.msra.mxu0 %v5267_v10  ;;  %v5318_v10 = vld [vmem:[%s7252_s3 + $0x170] sm:$0xff]  }
 0x20b   :  { %5160 = vmatpush3.bf16.msra.mxu1 %v5268_v2  ;;  %5139 = vmatprep.subr.bf16.mxu0 %v5269_v11  ;;  %v5319_v2 = vld [vmem:[%s7252_s3 + $0x130] sm:$0xff]   ;;  %v5320_v11 = vld [vmem:[%s7252_s3 + $0x1e8] sm:$0xff]  }
 0x20c   :  { %5161 = vmatprep.subr.bf16.mxu1 %v5270_v12  ;;  %v5321_v12 = vld [vmem:[%s7252_s3 + $0x178] sm:$0xff]  }
 0x20e   :  { %5140 = vmatpush3.bf16.msra.mxu0 %v5271_v13  ;;  %v5323_v13 = vld [vmem:[%s7252_s3 + $0x1f0] ss:$0 sps:$4 sm:$0xff]  }
 0x20f   :  { %5162 = vmatpush3.bf16.msra.mxu1 %v5272_v14  ;;  %5141 = vmatprep.subr.bf16.mxu0 %v5273_v15  ;;  %v5322_v14 = vld [vmem:[%s7252_s3 + $0x138] sm:$0xff]   ;;  %v4380_v15 = vsel %vm4378_vm0, %v5323_v13, 0 }
 0x210   :  { %5163 = vmatprep.subr.bf16.mxu1 %v5274_v16  ;;  %v555_v16 = vsub.s32 4, %v5447_v43 }
 0x212   :  { %5142 = vmatpush3.bf16.msra.mxu0 %v5275_v17  ;;  %v563_v17 = vsub.s32 6, %v5447_v43 }
 0x213   :  { %5164 = vmatpush3.bf16.msra.mxu1 %v5276_v18  ;;  %5143 = vmatprep.subr.bf16.mxu0 %v5277_v19  ;;  %v559_v18 = vsub.s32 5, %v5447_v43  ;;  %v567_v19 = vsub.s32 7, %v5447_v43 }
 0x214   :  { %5165 = vmatprep.subr.bf16.mxu1 %v5278_v20  ;;  %v556_v20 = vrot.slane %v6995_v46, %v555_v16 }
 0x215   :  { %v560_v22 = vrot.slane %v6995_v46, %v559_v18 }
 0x216   :  { %5144 = vmatpush3.bf16.msra.mxu0 %v5279_v21  ;;  %v564_v21 = vrot.slane %v6995_v46, %v563_v17 }
 0x217   :  { %5166 = vmatpush3.bf16.msra.mxu1 %v5280_v23  ;;  %5145 = vmatprep.subr.bf16.mxu0 %v5281_v24  ;;  %v568_v23 = vrot.slane %v6995_v46, %v567_v19 }
 0x218   :  { %5167 = vmatprep.subr.bf16.mxu1 %v5282_v26 }
 0x21a   :  { %5146 = vmatpush3.bf16.msra.mxu0 %v5283_v27 }
 0x21b   :  { %5168 = vmatpush3.bf16.msra.mxu1 %v5284_v29  ;;  %5147 = vmatprep.subr.bf16.mxu0 %v5285_v30 }
 0x21c   :  { %5169 = vmatprep.subr.bf16.mxu1 %v5286_v32 }
 0x21e   :  { %5148 = vmatpush3.bf16.msra.mxu0 %v5287_v33 }
 0x21f   :  { %5170 = vmatpush3.bf16.msra.mxu1 %v5288_v39  ;;  %5149 = vmatprep.subr.bf16.mxu0 %v5289_v40 }
 0x220   :  { %5171 = vmatprep.subr.bf16.mxu1 %v5290_v44 }
 0x222   :  { %5150 = vmatpush3.bf16.msra.mxu0 %v5291_v31 }
 0x223   :  { %5172 = vmatpush3.bf16.msra.mxu1 %v5292_v25  ;;  %5179 = vmatprep.subr.bf16.mxu0 %v5300_v38 }
 0x224   :  { %4502 = vmatprep.subr.bf16.mxu1 %v5349_v54 }
 0x225   :  { %4415 = vmatmul.mubr.bf16.vlgmr.msra.gmra.mrb[8].mxu0 %v3859_v49 }
 0x226   :  { %4455 = vmatmul.mubr.bf16.vlgmr.msra.gmra.mrb[8].mxu1 %v3861_v52  ;;  %5180 = vmatpush3.bf16.msra.mxu0 %v5301_v48  ;;  %v5070_v48 = vld [vmem:[%s7253_s4] ss:$0 sm:$0xff]  ;;  %s4550_s4 = sshll.u32 %s5350_s21, 4  ;;  %s4551_s4 = int_to_ptr.vmem [resolvable:$true] %s4550_s4 }
 0x227   :  { %4503 = vmatpush1.bf16.msra.mxu1 %v5293_v50  ;;  %5181 = vmatprep.subr.bf16.mxu0 %v5303_v51  ;;  %s5324_s22 = scalar_lea.vmem %s4551_s4, 32  ;;  %p5329_p1 = scmp.lt.s32.totalorder %s4551_s4, %s4551_s4 }
 0x228   :  { %4504 = vmatprep.subr.bf16.mxu1 %v5349_v54  ;;  %p5325_p0 = scmp.ne.s32.totalorder %s4551_s4, %s5324_s22  ;;  %p5330_p2 = scmp.lt.s32.totalorder %s5324_s22, %s5324_s22 }
 0x22a   :  { %5182 = vmatpush3.bf16.msra.mxu0 %v5304_v35  ;;  %p5331_p3 = por %p5330_p2, %p5329_p1 }
 0x22b   :  { %4505 = vmatpush1.bf16.msra.mxu1 %v5294_v55  ;;  %5183 = vmatprep.subr.bf16.mxu0 %v5306_v56 }
 0x22c   :  { %4506 = vmatprep.subr.bf16.mxu1 %v5349_v54  ;;  %p5332_p4 = pnand %p5331_p3, %p5325_p0 }
 0x22e   :  { %5184 = vmatpush3.bf16.msra.mxu0 %v5307_v57 }
 0x22f   :  { %4507 = vmatpush1.bf16.msra.mxu1 %v5295_v41  ;;  %5185 = vmatprep.subr.bf16.mxu0 %v5309_v58 }
 0x230   :  { %4508 = vmatprep.subr.bf16.mxu1 %v5349_v54 }
 0x232   :  { %5186 = vmatpush3.bf16.msra.mxu0 %v5310_v60 }
 0x233   :  { %4509 = vmatpush1.bf16.msra.mxu1 %v5296_v61  ;;  %5187 = vmatprep.subr.bf16.mxu0 %v5312_v62 }
 0x234   :  { %4510 = vmatprep.subr.bf16.mxu1 %v5349_v54 }
 0x236   :  { %5188 = vmatpush3.bf16.msra.mxu0 %v5313_v0 }
 0x237   :  { %4511 = vmatpush1.bf16.msra.mxu1 %v5297_v1  ;;  %5189 = vmatprep.subr.bf16.mxu0 %v5315_v3 }
 0x238   :  { %4512 = vmatprep.subr.bf16.mxu1 %v5349_v54 }
 0x23a   :  { %5190 = vmatpush3.bf16.msra.mxu0 %v5316_v37 }
 0x23b   :  { %4513 = vmatpush1.bf16.msra.mxu1 %v5298_v36  ;;  %5191 = vmatprep.subr.bf16.mxu0 %v5318_v10 }
 0x23c   :  { %4514 = vmatprep.subr.bf16.mxu1 %v5349_v54 }
 0x23e   :  { %5192 = vmatpush3.bf16.msra.mxu0 %v5319_v2 }
 0x23f   :  { %4515 = vmatpush1.bf16.msra.mxu1 %v5299_v4  ;;  %5193 = vmatprep.subr.bf16.mxu0 %v5321_v12 }
 0x240   :  { %4516 = vmatprep.subr.bf16.mxu1 %v5349_v54 }
 0x242   :  { %5194 = vmatpush3.bf16.msra.mxu0 %v5322_v14 }
 0x243   :  { %4517 = vmatpush1.bf16.msra.mxu1 %v5302_v9 }
 0x244   :  { %4518 = vmatprep.subr.bf16.mxu1 %v5349_v54 }
 0x247   :  { %4519 = vmatpush1.bf16.msra.mxu1 %v5305_v42 }
 0x248   :  { %4520 = vmatprep.subr.bf16.mxu1 %v5349_v54 }
 0x24b   :  { %4521 = vmatpush1.bf16.msra.mxu1 %v5308_v5 }
 0x24c   :  { %4522 = vmatprep.subr.bf16.mxu1 %v5349_v54 }
 0x24f   :  { %4523 = vmatpush1.bf16.msra.mxu1 %v5311_v6 }
 0x250   :  { %4524 = vmatprep.subr.bf16.mxu1 %v5349_v54 }
 0x253   :  { %4525 = vmatpush1.bf16.msra.mxu1 %v5314_v7 }
 0x254   :  { %4526 = vmatprep.subr.bf16.mxu1 %v5349_v54 }
 0x257   :  { %4527 = vmatpush1.bf16.msra.mxu1 %v5317_v8 }
 0x258   :  { %4528 = vmatprep.subr.bf16.mxu1 %v5349_v54 }
 0x25b   :  { %4529 = vmatpush1.bf16.msra.mxu1 %v5320_v11 }
 0x25c   :  { %4530 = vmatprep.subr.bf16.mxu1 %v5349_v54 }
 0x25f   :  { %4531 = vmatpush1.bf16.msra.mxu1 %v4380_v15 }
 0x2d8   :  { %v3680_v24 = vpop.f32.mrb[4].mxu0  ;;  %v3844_v26 = vpop.f32.mrb[4].mxu1 }
 0x2d9   :  { %v5205_v59 = vadd.f32 %v3680_v24, %v556_v20  ;;  %v3682_v27 = vpop.f32.mrb[5].mxu0  ;;  %v5207_v28 = vadd.f32 %v3844_v26, %v564_v21  ;;  %v3846_v30 = vpop.f32.mrb[5].mxu1 }
 0x2da   :  { %v5206_v29 = vadd.f32 %v3682_v27, %v560_v22  ;;  %v3684_v63 = vpop.f32.mrb[6].mxu0  ;;  %v5208_v33 = vadd.f32 %v3846_v30, %v568_v23  ;;  %v3848_v34 = vpop.f32.mrb[6].mxu1 }
 0x2db   :  { %v3855_v32 = vmax.f32 %v5205_v59, 0.0  ;;  %v3685_v43 = vpop.f32.mrb[7].mxu0  ;;  %v3857_v39 = vmax.f32 %v5207_v28, 0.0  ;;  %v3849_v53 = vpop.f32.mrb[7].mxu1 }
 0x2dc   :  { %v3856_v40 = vmax.f32 %v5206_v29, 0.0  ;;  %v3858_v44 = vmax.f32 %v5208_v33, 0.0 }
 0x2dd   :  { %v3863_v45 = vpack.c.bf16 %v3855_v32, %v3855_v32  ;;  %v3865_v25 = vpack.c.bf16 %v3857_v39, %v3857_v39 }
 0x2de   :  { %v3864_v31 = vpack.c.bf16 %v3856_v40, %v3856_v40  ;;  %v3866_v46 = vpack.c.bf16 %v3858_v44, %v3858_v44 }
 0x2e0   :  { %4494 = vmatprep.mubr.bf16.mxu0 %v3864_v31  ;;  %5134 = vmatprep.mubr.msk.bf16.mxu1 %vm4374_vm1, %v3866_v46 }
 0x2e1   :  { %4495 = vmatmul.mubr.bf16.vlgmr.msra.gmra.mrb[12].mxu0 %v3863_v45  ;;  %4535 = vmatmul.mubr.bf16.vlgmr.msra.gmra.mrb[12].mxu1 %v3865_v25 }
 0x2f8   :  { %v5151_v38 = vpop.f32.mrb[8].mxu0 }
 0x2f9   :  { %v5173_v47 = vpop.f32.mrb[8].mxu1  ;;  %v5152_v49 = vpop.f32.mrb[9].mxu0 }
 0x2fa   :  { %v5153_v50 = vadd.f32 %v5152_v49, %v5151_v38  ;;  %v5174_v51 = vpop.f32.mrb[9].mxu1  ;;  %v5154_v52 = vpop.f32.mrb[10].mxu0 }
 0x2fb   :  { %v5175_v54 = vadd.f32 %v5174_v51, %v5173_v47  ;;  %v5176_v35 = vpop.f32.mrb[10].mxu1  ;;  %v5155_v55 = vpop.f32.mrb[11].mxu0 }
 0x2fc   :  { %v4417_v56 = vadd.f32 %v5153_v50, %v5070_v48  ;;  %v5177_v57 = vpop.f32.mrb[11].mxu1 }
 0x2fe   :  { %v4457_v41 = vadd.f32 %v5175_v54, %v4417_v56 }
 0x3b4   :  { %v5195_v58 = vpop.f32.mrb[12].mxu0  ;;  %v4536_v60 = vpop.f32.mrb[12].mxu1 }
 0x3b5   :  { %v5196_v61 = vpop.f32.mrb[13].mxu0  ;;  %v4538_v0 = vpop.f32.mrb[13].mxu1 }
 0x3b6   :  { %v5197_v62 = vadd.f32 %v5196_v61, %v5195_v58  ;;  %v5198_v1 = vpop.f32.mrb[14].mxu0  ;;  %v4539_v3 = vpop.f32.mrb[14].mxu1 }
 0x3b7   :  { %v5199_v37 = vpop.f32.mrb[15].mxu0  ;;  %v4540_v4 = vpop.f32.mrb[15].mxu1 }
 0x3b8   :  { %v4497_v36 = vadd.f32 %v5197_v62, %v4457_v41 }
 0x3ba   :  { %v4537_v9 = vadd.f32 %v4536_v60, %v4497_v36 }
 0x3bc   :  { %4543 = vst.msk [vmem:[#allocation2] sm:$0x3] %vm4542_vm2, %v4537_v9 }
 0x3bd   :  { %5335 = shalt.err (!%p5332_p4)
}
 0x3be   :  { %s5336_s25 = scalar_lea.hbm %s7254_s5, 32 }
 0x3bf   :  { %p5337_p5 = scmp.ne.s32.totalorder %s7254_s5, %s5336_s25  ;;  %p5340_p6 = scmp.lt.u32.totalorder %s5336_s25, %s7254_s5 }
 0x3c1   :  { %p5342_p7 = pnand %p5340_p6, %p5337_p5 }
 0x3c3   :  { %5345 = shalt.err (!%p5342_p7)
}
 0x3c4   :  { %4553 = dma.vmem_to_hbm [thread:$0]  %s4551_s4, 32, %s7254_s5, [#allocation3]  }
 0x3c5   :  { %5346 = dma.done.wait [#allocation3], 32  }
 0x3c6   :  { %5347 = vsyncadd [#allocation3], 4294967264 }
 0x3c7   :  { %4557 = vsyncpa [#allocation3], 1 }

</bundles_post_ra>
